<compile_context>
chip_gen: v6e
topology: v6e:2x2x1
jax: 0.10.0
libtpu: 0.0.40
codegen_flags: <defaults>
</compile_context>

<pallas_src>
import functools
import numpy as np

import jax
import jax.numpy as jnp
from jax.experimental import pallas as pl
from jax.experimental.pallas import tpu as pltpu


_LANES = 128            # padded channel width (lane-dense layout)
_SENTINEL = -(2 ** 20)  # "no source row" marker for padded gather rows


def _round_up(x, m):
    return (x + m - 1) // m * m


# ----------------------------------------------------------------------------
# Fused BasicBlock2 kernel
# ----------------------------------------------------------------------------
def _make_block_kernel(*, W, M0, Mo, Md, eps):
    CP = _LANES

    def kernel(x_ref, w1d_ref, w2_ref, tout_ref, tres_ref, td_ref,
               g1_ref, be1_ref, gd_ref, bed_ref, g2_ref, be2_ref, alpha_ref,
               out_ref, h_scr):
        f32 = jnp.float32
        alpha = alpha_ref[...]                     # (1, 1) PReLU slope

        def prelu(v):
            return jnp.where(v > 0.0, v, v * alpha)

        def bn(v, count, g, b):
            # one-pass training-mode batch-norm (biased variance).  Padding
            # rows of `v` are exactly zero, so dividing the raw sums by the
            # real `count` gives exact statistics.
            s = jnp.sum(v, axis=0, keepdims=True)
            q = jnp.sum(v * v, axis=0, keepdims=True)
            mu = s * (1.0 / count)
            var = q * (1.0 / count) - mu * mu
            return (v - mu) * jax.lax.rsqrt(var + eps) * g + b

        # ---- merged 1x1 convs: conv1 -> cols [0,CP), downsample -> [CP,2CP) ----
        y0 = jnp.dot(x_ref[...], w1d_ref[...], preferred_element_type=f32)
        h_pre = y0[:, :CP]
        d_pre = y0[:, CP:]

        # ---- bn1 + activation; keep h resident in VMEM scratch ----
        h_scr[...] = prelu(bn(h_pre, M0, g1_ref[...], be1_ref[...]))

        # ---- downsample branch: strided row subset via one-hot matmul, bn ----
        M0P = d_pre.shape[0]
        MdP = td_ref.shape[0]
        cols_full = jax.lax.broadcasted_iota(jnp.int32, (MdP, M0P), 1)
        oh_d = (td_ref[...] == cols_full).astype(f32)          # (MdP, M0P)
        d_sub = jnp.dot(oh_d, d_pre, preferred_element_type=f32)
        res_sub = bn(d_sub, Md, gd_ref[...], bed_ref[...])

        # ---- conv2 (3x3, stride s, pad 0): 9 one-hot patch gathers + matmuls ----
        MoP = tout_ref.shape[0]
        cols2 = jax.lax.broadcasted_iota(jnp.int32, (MoP, M0P), 1)
        tout = tout_ref[...]                                    # (MoP, 1)
        acc = jnp.zeros((MoP, CP), f32)
        for kh in range(3):
            for kw in range(3):
                off = kh * W + kw
                oh_k = ((tout + off) == cols2).astype(f32)      # (MoP, M0P)
                patch = jnp.dot(oh_k, h_scr[...], preferred_element_type=f32)
                acc = acc + jnp.dot(patch, w2_ref[kh * 3 + kw],
                                    preferred_element_type=f32)

        y2 = bn(acc, Mo, g2_ref[...], be2_ref[...])

        # ---- nearest-neighbor interp of residual (gather) + add + activation ----
        cols_d = jax.lax.broadcasted_iota(jnp.int32, (MoP, MdP), 1)
        oh_r = (tres_ref[...] == cols_d).astype(f32)            # (MoP, MdP)
        res = jnp.dot(oh_r, res_sub, preferred_element_type=f32)

        out_ref[...] = prelu(y2 + res)

    return kernel


# ----------------------------------------------------------------------------
# Python wrapper: layout prep (NCHW -> padded GEMM layout) + single pallas_call
# ----------------------------------------------------------------------------
@functools.partial(jax.jit, static_argnames=("stride", "eps"))
def basic_block2_forward(x_nchw, params, stride=2, eps=1e-5):
    N, Cin, H, W = x_nchw.shape
    P = params["w1"].shape[0]
    s = stride
    CP = _LANES

    Ho = (H - 3) // s + 1               # conv2: k=3, stride=s, pad=0
    Wo = (W - 3) // s + 1
    Hd = (H - 1) // s + 1               # downsample 1x1, stride=s
    Wd = (W - 1) // s + 1
    M0, Mo, Md = N * H * W, N * Ho * Wo, N * Hd * Wd
    M0P, MoP, MdP = _round_up(M0, 8), _round_up(Mo, 8), _round_up(Md, 8)

    f32 = jnp.float32

    # ---- lane-dense padded operands ----
    x_nhwc = jnp.transpose(x_nchw, (0, 2, 3, 1)).astype(f32)
    x2d = jnp.zeros((M0P, CP), f32).at[:M0, :Cin].set(x_nhwc.reshape(M0, Cin))

    w1 = params["w1"].reshape(P, Cin).astype(f32)
    wd = params["wd"].reshape(P, Cin).astype(f32)
    w1d = (jnp.zeros((CP, 2 * CP), f32)
           .at[:Cin, :P].set(w1.T)
           .at[:Cin, CP:CP + P].set(wd.T))

    w2_t = jnp.transpose(params["w2"].astype(f32), (2, 3, 1, 0)).reshape(9, P, P)
    w2p = jnp.zeros((9, CP, CP), f32).at[:, :P, :P].set(w2_t)

    def pad_vec(v):
        return jnp.zeros((1, CP), f32).at[0, :P].set(v.astype(f32))

    g1, be1 = pad_vec(params["g1"]), pad_vec(params["be1"])
    gd, bed = pad_vec(params["gd"]), pad_vec(params["bed"])
    g2, be2 = pad_vec(params["g2"]), pad_vec(params["be2"])
    alpha = params["alpha"].astype(f32).reshape(1, 1)
    # NOTE: conv biases b1/b2 feed straight into training-mode BN, whose mean
    # subtraction cancels them exactly, so they are intentionally not used.

    # ---- static gather-index tables (trace-time numpy constants) ----
    nn_, hh, ww = np.meshgrid(np.arange(N), np.arange(Ho), np.arange(Wo),
                              indexing="ij")
    base = (nn_ * H + s * hh) * W + s * ww          # conv2 window top-left pixel
    tout = np.full((MoP, 1), _SENTINEL, np.int32)
    tout[:Mo, 0] = base.reshape(-1)

    idx_h = (np.arange(Ho) * Hd) // Ho              # torch 'nearest' interp rule
    idx_w = (np.arange(Wo) * Wd) // Wo
    rrow = (nn_ * Hd + idx_h[hh]) * Wd + idx_w[ww]
    tres = np.full((MoP, 1), _SENTINEL, np.int32)
    tres[:Mo, 0] = rrow.reshape(-1)

    nd, di, dj = np.meshgrid(np.arange(N), np.arange(Hd), np.arange(Wd),
                             indexing="ij")
    drow = (nd * H + s * di) * W + s * dj           # strided 1x1-conv samples
    td = np.full((MdP, 1), _SENTINEL, np.int32)
    td[:Md, 0] = drow.reshape(-1)

    kernel = _make_block_kernel(W=W, M0=M0, Mo=Mo, Md=Md, eps=float(eps))

    flops = 2 * (M0P * CP * 2 * CP
                 + MdP * M0P * CP
                 + 9 * (MoP * M0P * CP + MoP * CP * CP)
                 + MoP * MdP * CP)
    bytes_accessed = 4 * (M0P * CP + CP * 2 * CP + 9 * CP * CP
                          + 7 * CP + 2 * MoP + MdP + MoP * CP)

    vmem = pl.BlockSpec(memory_space=pltpu.MemorySpace.VMEM)
    out2d = pl.pallas_call(
        kernel,
        out_shape=jax.ShapeDtypeStruct((MoP, CP), f32),
        in_specs=[vmem] * 13,
        out_specs=vmem,
        scratch_shapes=[pltpu.VMEM((M0P, CP), f32)],
        cost_estimate=pl.CostEstimate(flops=flops, transcendentals=3 * CP,
                                      bytes_accessed=bytes_accessed),
    )(x2d, w1d, w2p, jnp.asarray(tout), jnp.asarray(tres), jnp.asarray(td),
      g1, be1, gd, bed, g2, be2, alpha)

    out = out2d[:Mo, :P].reshape(N, Ho, Wo, P)
    return jnp.transpose(out, (0, 3, 1, 2))         # NHWC -> NCHW


# ----------------------------------------------------------------------------
# Parameter init (deterministic, mirrors the module's parameter set)
# ----------------------------------------------------------------------------
def init_params(key, inplanes, planes):
    ks = jax.random.split(key, 11)
    p = {}
    p["w1"] = jax.random.normal(ks[0], (planes, inplanes, 1, 1), jnp.float32) * 0.2
    p["b1"] = jax.random.normal(ks[1], (planes,), jnp.float32) * 0.05
    p["g1"] = 1.0 + 0.1 * jax.random.normal(ks[2], (planes,), jnp.float32)
    p["be1"] = 0.1 * jax.random.normal(ks[3], (planes,), jnp.float32)
    p["w2"] = jax.random.normal(ks[4], (planes, planes, 3, 3), jnp.float32) * 0.1
    p["b2"] = jax.random.normal(ks[5], (planes,), jnp.float32) * 0.05
    p["g2"] = 1.0 + 0.1 * jax.random.normal(ks[6], (planes,), jnp.float32)
    p["be2"] = 0.1 * jax.random.normal(ks[7], (planes,), jnp.float32)
    p["wd"] = jax.random.normal(ks[8], (planes, inplanes, 1, 1), jnp.float32) * 0.2
    p["gd"] = 1.0 + 0.1 * jax.random.normal(ks[9], (planes,), jnp.float32)
    p["bed"] = 0.1 * jax.random.normal(ks[10], (planes,), jnp.float32)
    p["alpha"] = jnp.full((1,), 0.25, jnp.float32)   # nn.PReLU default slope
    return p


# ----------------------------------------------------------------------------
# Pure-JAX reference of BasicBlock2 (for correctness checking only)
# ----------------------------------------------------------------------------
def reference_block(x_nchw, params, stride=2, eps=1e-5):
    prec = jax.lax.Precision.HIGHEST
    x = jnp.transpose(x_nchw, (0, 2, 3, 1)).astype(jnp.float32)
    N, H, W, Cin = x.shape
    P = params["w1"].shape[0]
    s = stride
    alpha = params["alpha"].reshape(())

    def prelu(v):
        return jnp.where(v > 0.0, v, alpha * v)

    def bn(v, g, b):
        mu = jnp.mean(v, axis=(0, 1, 2), keepdims=True)
        var = jnp.mean((v - mu) ** 2, axis=(0, 1, 2), keepdims=True)
        return (v - mu) * jax.lax.rsqrt(var + eps) * g + b

    w1 = params["w1"].reshape(P, Cin)
    h = jnp.einsum("nhwc,pc->nhwp", x, w1, precision=prec) + params["b1"]
    h = prelu(bn(h, params["g1"], params["be1"]))

    xd = x[:, ::s, ::s, :]
    wd = params["wd"].reshape(P, Cin)
    res = bn(jnp.einsum("nhwc,pc->nhwp", xd, wd, precision=prec),
             params["gd"], params["bed"])

    Ho = (H - 3) // s + 1
    Wo = (W - 3) // s + 1
    acc = jnp.zeros((N, Ho, Wo, P), jnp.float32)
    for kh in range(3):
        for kw in range(3):
            win = jax.lax.slice(
                h, (0, kh, kw, 0),
                (N, kh + s * (Ho - 1) + 1, kw + s * (Wo - 1) + 1, P),
                (1, s, s, 1))
            acc = acc + jnp.einsum("nhwp,pq->nhwq", win,
                                   params["w2"][:, :, kh, kw].T, precision=prec)
    y2 = bn(acc + params["b2"], params["g2"], params["be2"])

    Hd, Wd = res.shape[1], res.shape[2]
    idx_h = (np.arange(Ho) * Hd) // Ho
    idx_w = (np.arange(Wo) * Wd) // Wo
    res_i = res[:, idx_h, :, :][:, :, idx_w, :]
    out = prelu(y2 + res_i)
    return jnp.transpose(out, (0, 3, 1, 2))


# ----------------------------------------------------------------------------
if __name__ == "__main__":
    key = jax.random.PRNGKey(0)
    kx, kp = jax.random.split(key)

    N, Cin, H, W = 2, 4, 16, 16
    planes, stride = 8, 2

    x = jax.random.normal(kx, (N, Cin, H, W), jnp.float32)
    params = init_params(kp, Cin, planes)

    y = jax.block_until_ready(basic_block2_forward(x, params, stride=stride))

    Ho = (H - 3) // stride + 1
    Wo = (W - 3) // stride + 1
    assert y.shape == (N, planes, Ho, Wo), y.shape
    assert bool(jnp.all(jnp.isfinite(y)))

    y_ref = jax.block_until_ready(reference_block(x, params, stride=stride))
    err = float(jnp.max(jnp.abs(y - y_ref)))
    assert err < 5e-2, f"max abs err vs pure-JAX reference: {err}"

    print("KERNEL_OK")
</pallas_src>

<mosaic_0001>
module attributes {stable_mosaic.version = 11 : i64} {
  func.func @kernel(%arg0: memref<512x128xf32, #tpu.memory_space<vmem>>, %arg1: memref<128x256xf32, #tpu.memory_space<vmem>>, %arg2: memref<9x128x128xf32, #tpu.memory_space<vmem>>, %arg3: memref<104x1xi32, #tpu.memory_space<vmem>>, %arg4: memref<104x1xi32, #tpu.memory_space<vmem>>, %arg5: memref<128x1xi32, #tpu.memory_space<vmem>>, %arg6: memref<1x128xf32, #tpu.memory_space<vmem>>, %arg7: memref<1x128xf32, #tpu.memory_space<vmem>>, %arg8: memref<1x128xf32, #tpu.memory_space<vmem>>, %arg9: memref<1x128xf32, #tpu.memory_space<vmem>>, %arg10: memref<1x128xf32, #tpu.memory_space<vmem>>, %arg11: memref<1x128xf32, #tpu.memory_space<vmem>>, %arg12: memref<1x1xf32, #tpu.memory_space<vmem>>, %arg13: memref<104x128xf32, #tpu.memory_space<vmem>>, %arg14: memref<512x128xf32, #tpu.memory_space<vmem>>) attributes {dimension_semantics = [], scalar_prefetch = 0 : i64, scratch_operands = 1 : i64, tpu.core_type = #tpu.core_type<tc>} {
    %c0 = arith.constant 0 : index
    %c0_0 = arith.constant 0 : index
    %0 = vector.load %arg12[%c0, %c0_0] : memref<1x1xf32, #tpu.memory_space<vmem>>, vector<1x1xf32>
    %c0_1 = arith.constant 0 : index
    %c0_2 = arith.constant 0 : index
    %1 = vector.load %arg0[%c0_1, %c0_2] : memref<512x128xf32, #tpu.memory_space<vmem>>, vector<512x128xf32>
    %c0_3 = arith.constant 0 : index
    %c0_4 = arith.constant 0 : index
    %2 = vector.load %arg1[%c0_3, %c0_4] : memref<128x256xf32, #tpu.memory_space<vmem>>, vector<128x256xf32>
    %cst = arith.constant dense<0.000000e+00> : vector<512x256xf32>
    %3 = tpu.matmul %1, %2, %cst {dimension_numbers = #tpu.dot_dimension_numbers<[1], [0], [0], [1], [0, 0, 1, 1], [], []>} : vector<512x128xf32>, vector<128x256xf32>, vector<512x256xf32> -> vector<512x256xf32>
    %4 = vector.extract_strided_slice %3 {offsets = [0, 0], sizes = [512, 128], strides = [1, 1]} : vector<512x256xf32> to vector<512x128xf32>
    %5 = vector.extract_strided_slice %3 {offsets = [0, 128], sizes = [512, 128], strides = [1, 1]} : vector<512x256xf32> to vector<512x128xf32>
    %c0_5 = arith.constant 0 : index
    %c0_6 = arith.constant 0 : index
    %6 = vector.load %arg6[%c0_5, %c0_6] : memref<1x128xf32, #tpu.memory_space<vmem>>, vector<1x128xf32>
    %c0_7 = arith.constant 0 : index
    %c0_8 = arith.constant 0 : index
    %7 = vector.load %arg7[%c0_7, %c0_8] : memref<1x128xf32, #tpu.memory_space<vmem>>, vector<1x128xf32>
    %cst_9 = arith.constant dense<0.000000e+00> : vector<128xf32>
    %8 = vector.multi_reduction <add>, %4, %cst_9 [0] : vector<512x128xf32> to vector<128xf32>
    %9 = vector.shape_cast %8 : vector<128xf32> to vector<1x128xf32>
    %10 = arith.mulf %4, %4 : vector<512x128xf32>
    %cst_10 = arith.constant dense<0.000000e+00> : vector<128xf32>
    %11 = vector.multi_reduction <add>, %10, %cst_10 [0] : vector<512x128xf32> to vector<128xf32>
    %12 = vector.shape_cast %11 : vector<128xf32> to vector<1x128xf32>
    %cst_11 = arith.constant 0.001953125 : f32
    %13 = vector.broadcast %cst_11 : f32 to vector<1x128xf32>
    %14 = arith.mulf %9, %13 : vector<1x128xf32>
    %cst_12 = arith.constant 0.001953125 : f32
    %15 = vector.broadcast %cst_12 : f32 to vector<1x128xf32>
    %16 = arith.mulf %12, %15 : vector<1x128xf32>
    %17 = arith.mulf %14, %14 : vector<1x128xf32>
    %18 = arith.subf %16, %17 : vector<1x128xf32>
    %19 = vector.broadcast %14 : vector<1x128xf32> to vector<512x128xf32>
    %20 = arith.subf %4, %19 : vector<512x128xf32>
    %cst_13 = arith.constant 9.99999974E-6 : f32
    %21 = vector.broadcast %cst_13 : f32 to vector<1x128xf32>
    %22 = arith.addf %18, %21 : vector<1x128xf32>
    %23 = math.rsqrt %22 : vector<1x128xf32>
    %24 = vector.broadcast %23 : vector<1x128xf32> to vector<512x128xf32>
    %25 = arith.mulf %20, %24 : vector<512x128xf32>
    %26 = vector.broadcast %6 : vector<1x128xf32> to vector<512x128xf32>
    %27 = arith.mulf %25, %26 : vector<512x128xf32>
    %28 = vector.broadcast %7 : vector<1x128xf32> to vector<512x128xf32>
    %29 = arith.addf %27, %28 : vector<512x128xf32>
    %cst_14 = arith.constant 0.000000e+00 : f32
    %30 = vector.broadcast %cst_14 : f32 to vector<512x128xf32>
    %31 = arith.cmpf ogt, %29, %30 : vector<512x128xf32>
    %32 = vector.broadcast %0 : vector<1x1xf32> to vector<512x128xf32>
    %33 = arith.mulf %29, %32 : vector<512x128xf32>
    %34 = arith.select %31, %29, %33 : vector<512x128xi1>, vector<512x128xf32>
    %c0_15 = arith.constant 0 : index
    %c0_16 = arith.constant 0 : index
    %35 = vector.load %arg14[%c0_15, %c0_16] : memref<512x128xf32, #tpu.memory_space<vmem>>, vector<512x128xf32>
    tpu.vector_store %arg14[%c0_15, %c0_16], %34 {strides = array<i32>} : memref<512x128xf32, #tpu.memory_space<vmem>>, vector<512x128xf32>,
    %36 = tpu.iota {dimensions = array<i32: 1>} : vector<128x512xi32>
    %c0_17 = arith.constant 0 : index
    %c0_18 = arith.constant 0 : index
    %37 = vector.load %arg5[%c0_17, %c0_18] : memref<128x1xi32, #tpu.memory_space<vmem>>, vector<128x1xi32>
    %38 = vector.broadcast %37 : vector<128x1xi32> to vector<128x512xi32>
    %39 = arith.cmpi eq, %38, %36 : vector<128x512xi32>
    %40 = arith.extui %39 : vector<128x512xi1> to vector<128x512xi32>
    %41 = arith.sitofp %40 : vector<128x512xi32> to vector<128x512xf32>
    %cst_19 = arith.constant dense<0.000000e+00> : vector<128x128xf32>
    %42 = tpu.matmul %41, %5, %cst_19 {dimension_numbers = #tpu.dot_dimension_numbers<[1], [0], [0], [1], [0, 0, 1, 1], [], []>} : vector<128x512xf32>, vector<512x128xf32>, vector<128x128xf32> -> vector<128x128xf32>
    %c0_20 = arith.constant 0 : index
    %c0_21 = arith.constant 0 : index
    %43 = vector.load %arg8[%c0_20, %c0_21] : memref<1x128xf32, #tpu.memory_space<vmem>>, vector<1x128xf32>
    %c0_22 = arith.constant 0 : index
    %c0_23 = arith.constant 0 : index
    %44 = vector.load %arg9[%c0_22, %c0_23] : memref<1x128xf32, #tpu.memory_space<vmem>>, vector<1x128xf32>
    %cst_24 = arith.constant dense<0.000000e+00> : vector<128xf32>
    %45 = vector.multi_reduction <add>, %42, %cst_24 [0] : vector<128x128xf32> to vector<128xf32>
    %46 = vector.shape_cast %45 : vector<128xf32> to vector<1x128xf32>
    %47 = arith.mulf %42, %42 : vector<128x128xf32>
    %cst_25 = arith.constant dense<0.000000e+00> : vector<128xf32>
    %48 = vector.multi_reduction <add>, %47, %cst_25 [0] : vector<128x128xf32> to vector<128xf32>
    %49 = vector.shape_cast %48 : vector<128xf32> to vector<1x128xf32>
    %cst_26 = arith.constant 7.812500e-03 : f32
    %50 = vector.broadcast %cst_26 : f32 to vector<1x128xf32>
    %51 = arith.mulf %46, %50 : vector<1x128xf32>
    %cst_27 = arith.constant 7.812500e-03 : f32
    %52 = vector.broadcast %cst_27 : f32 to vector<1x128xf32>
    %53 = arith.mulf %49, %52 : vector<1x128xf32>
    %54 = arith.mulf %51, %51 : vector<1x128xf32>
    %55 = arith.subf %53, %54 : vector<1x128xf32>
    %56 = vector.broadcast %51 : vector<1x128xf32> to vector<128x128xf32>
    %57 = arith.subf %42, %56 : vector<128x128xf32>
    %cst_28 = arith.constant 9.99999974E-6 : f32
    %58 = vector.broadcast %cst_28 : f32 to vector<1x128xf32>
    %59 = arith.addf %55, %58 : vector<1x128xf32>
    %60 = math.rsqrt %59 : vector<1x128xf32>
    %61 = vector.broadcast %60 : vector<1x128xf32> to vector<128x128xf32>
    %62 = arith.mulf %57, %61 : vector<128x128xf32>
    %63 = vector.broadcast %43 : vector<1x128xf32> to vector<128x128xf32>
    %64 = arith.mulf %62, %63 : vector<128x128xf32>
    %65 = vector.broadcast %44 : vector<1x128xf32> to vector<128x128xf32>
    %66 = arith.addf %64, %65 : vector<128x128xf32>
    %67 = tpu.iota {dimensions = array<i32: 1>} : vector<104x512xi32>
    %c0_29 = arith.constant 0 : index
    %c0_30 = arith.constant 0 : index
    %68 = vector.load %arg3[%c0_29, %c0_30] : memref<104x1xi32, #tpu.memory_space<vmem>>, vector<104x1xi32>
    %cst_31 = arith.constant 0.000000e+00 : f32
    %69 = vector.broadcast %cst_31 : f32 to vector<104x128xf32>
    %c0_i32 = arith.constant 0 : i32
    %70 = vector.broadcast %c0_i32 : i32 to vector<104x1xi32>
    %71 = arith.addi %68, %70 : vector<104x1xi32>
    %72 = vector.broadcast %71 : vector<104x1xi32> to vector<104x512xi32>
    %73 = arith.cmpi eq, %72, %67 : vector<104x512xi32>
    %74 = arith.extui %73 : vector<104x512xi1> to vector<104x512xi32>
    %75 = arith.sitofp %74 : vector<104x512xi32> to vector<104x512xf32>
    %c0_32 = arith.constant 0 : index
    %c0_33 = arith.constant 0 : index
    %76 = vector.load %arg14[%c0_32, %c0_33] : memref<512x128xf32, #tpu.memory_space<vmem>>, vector<512x128xf32>
    %cst_34 = arith.constant dense<0.000000e+00> : vector<104x128xf32>
    %77 = tpu.matmul %75, %76, %cst_34 {dimension_numbers = #tpu.dot_dimension_numbers<[1], [0], [0], [1], [0, 0, 1, 1], [], []>} : vector<104x512xf32>, vector<512x128xf32>, vector<104x128xf32> -> vector<104x128xf32>
    %c0_35 = arith.constant 0 : index
    %c0_36 = arith.constant 0 : index
    %c0_37 = arith.constant 0 : index
    %78 = vector.load %arg2[%c0_35, %c0_36, %c0_37] : memref<9x128x128xf32, #tpu.memory_space<vmem>>, vector<1x128x128xf32>
    %79 = vector.shape_cast %78 : vector<1x128x128xf32> to vector<128x128xf32>
    %cst_38 = arith.constant dense<0.000000e+00> : vector<104x128xf32>
    %80 = tpu.matmul %77, %79, %cst_38 {dimension_numbers = #tpu.dot_dimension_numbers<[1], [0], [0], [1], [0, 0, 1, 1], [], []>} : vector<104x128xf32>, vector<128x128xf32>, vector<104x128xf32> -> vector<104x128xf32>
    %81 = arith.addf %69, %80 : vector<104x128xf32>
    %c1_i32 = arith.constant 1 : i32
    %82 = vector.broadcast %c1_i32 : i32 to vector<104x1xi32>
    %83 = arith.addi %68, %82 : vector<104x1xi32>
    %84 = vector.broadcast %83 : vector<104x1xi32> to vector<104x512xi32>
    %85 = arith.cmpi eq, %84, %67 : vector<104x512xi32>
    %86 = arith.extui %85 : vector<104x512xi1> to vector<104x512xi32>
    %87 = arith.sitofp %86 : vector<104x512xi32> to vector<104x512xf32>
    %c0_39 = arith.constant 0 : index
    %c0_40 = arith.constant 0 : index
    %88 = vector.load %arg14[%c0_39, %c0_40] : memref<512x128xf32, #tpu.memory_space<vmem>>, vector<512x128xf32>
    %cst_41 = arith.constant dense<0.000000e+00> : vector<104x128xf32>
    %89 = tpu.matmul %87, %88, %cst_41 {dimension_numbers = #tpu.dot_dimension_numbers<[1], [0], [0], [1], [0, 0, 1, 1], [], []>} : vector<104x512xf32>, vector<512x128xf32>, vector<104x128xf32> -> vector<104x128xf32>
    %c1 = arith.constant 1 : index
    %c0_42 = arith.constant 0 : index
    %c0_43 = arith.constant 0 : index
    %90 = vector.load %arg2[%c1, %c0_42, %c0_43] : memref<9x128x128xf32, #tpu.memory_space<vmem>>, vector<1x128x128xf32>
    %91 = vector.shape_cast %90 : vector<1x128x128xf32> to vector<128x128xf32>
    %cst_44 = arith.constant dense<0.000000e+00> : vector<104x128xf32>
    %92 = tpu.matmul %89, %91, %cst_44 {dimension_numbers = #tpu.dot_dimension_numbers<[1], [0], [0], [1], [0, 0, 1, 1], [], []>} : vector<104x128xf32>, vector<128x128xf32>, vector<104x128xf32> -> vector<104x128xf32>
    %93 = arith.addf %81, %92 : vector<104x128xf32>
    %c2_i32 = arith.constant 2 : i32
    %94 = vector.broadcast %c2_i32 : i32 to vector<104x1xi32>
    %95 = arith.addi %68, %94 : vector<104x1xi32>
    %96 = vector.broadcast %95 : vector<104x1xi32> to vector<104x512xi32>
    %97 = arith.cmpi eq, %96, %67 : vector<104x512xi32>
    %98 = arith.extui %97 : vector<104x512xi1> to vector<104x512xi32>
    %99 = arith.sitofp %98 : vector<104x512xi32> to vector<104x512xf32>
    %c0_45 = arith.constant 0 : index
    %c0_46 = arith.constant 0 : index
    %100 = vector.load %arg14[%c0_45, %c0_46] : memref<512x128xf32, #tpu.memory_space<vmem>>, vector<512x128xf32>
    %cst_47 = arith.constant dense<0.000000e+00> : vector<104x128xf32>
    %101 = tpu.matmul %99, %100, %cst_47 {dimension_numbers = #tpu.dot_dimension_numbers<[1], [0], [0], [1], [0, 0, 1, 1], [], []>} : vector<104x512xf32>, vector<512x128xf32>, vector<104x128xf32> -> vector<104x128xf32>
    %c2 = arith.constant 2 : index
    %c0_48 = arith.constant 0 : index
    %c0_49 = arith.constant 0 : index
    %102 = vector.load %arg2[%c2, %c0_48, %c0_49] : memref<9x128x128xf32, #tpu.memory_space<vmem>>, vector<1x128x128xf32>
    %103 = vector.shape_cast %102 : vector<1x128x128xf32> to vector<128x128xf32>
    %cst_50 = arith.constant dense<0.000000e+00> : vector<104x128xf32>
    %104 = tpu.matmul %101, %103, %cst_50 {dimension_numbers = #tpu.dot_dimension_numbers<[1], [0], [0], [1], [0, 0, 1, 1], [], []>} : vector<104x128xf32>, vector<128x128xf32>, vector<104x128xf32> -> vector<104x128xf32>
    %105 = arith.addf %93, %104 : vector<104x128xf32>
    %c16_i32 = arith.constant 16 : i32
    %106 = vector.broadcast %c16_i32 : i32 to vector<104x1xi32>
    %107 = arith.addi %68, %106 : vector<104x1xi32>
    %108 = vector.broadcast %107 : vector<104x1xi32> to vector<104x512xi32>
    %109 = arith.cmpi eq, %108, %67 : vector<104x512xi32>
    %110 = arith.extui %109 : vector<104x512xi1> to vector<104x512xi32>
    %111 = arith.sitofp %110 : vector<104x512xi32> to vector<104x512xf32>
    %c0_51 = arith.constant 0 : index
    %c0_52 = arith.constant 0 : index
    %112 = vector.load %arg14[%c0_51, %c0_52] : memref<512x128xf32, #tpu.memory_space<vmem>>, vector<512x128xf32>
    %cst_53 = arith.constant dense<0.000000e+00> : vector<104x128xf32>
    %113 = tpu.matmul %111, %112, %cst_53 {dimension_numbers = #tpu.dot_dimension_numbers<[1], [0], [0], [1], [0, 0, 1, 1], [], []>} : vector<104x512xf32>, vector<512x128xf32>, vector<104x128xf32> -> vector<104x128xf32>
    %c3 = arith.constant 3 : index
    %c0_54 = arith.constant 0 : index
    %c0_55 = arith.constant 0 : index
    %114 = vector.load %arg2[%c3, %c0_54, %c0_55] : memref<9x128x128xf32, #tpu.memory_space<vmem>>, vector<1x128x128xf32>
    %115 = vector.shape_cast %114 : vector<1x128x128xf32> to vector<128x128xf32>
    %cst_56 = arith.constant dense<0.000000e+00> : vector<104x128xf32>
    %116 = tpu.matmul %113, %115, %cst_56 {dimension_numbers = #tpu.dot_dimension_numbers<[1], [0], [0], [1], [0, 0, 1, 1], [], []>} : vector<104x128xf32>, vector<128x128xf32>, vector<104x128xf32> -> vector<104x128xf32>
    %117 = arith.addf %105, %116 : vector<104x128xf32>
    %c17_i32 = arith.constant 17 : i32
    %118 = vector.broadcast %c17_i32 : i32 to vector<104x1xi32>
    %119 = arith.addi %68, %118 : vector<104x1xi32>
    %120 = vector.broadcast %119 : vector<104x1xi32> to vector<104x512xi32>
    %121 = arith.cmpi eq, %120, %67 : vector<104x512xi32>
    %122 = arith.extui %121 : vector<104x512xi1> to vector<104x512xi32>
    %123 = arith.sitofp %122 : vector<104x512xi32> to vector<104x512xf32>
    %c0_57 = arith.constant 0 : index
    %c0_58 = arith.constant 0 : index
    %124 = vector.load %arg14[%c0_57, %c0_58] : memref<512x128xf32, #tpu.memory_space<vmem>>, vector<512x128xf32>
    %cst_59 = arith.constant dense<0.000000e+00> : vector<104x128xf32>
    %125 = tpu.matmul %123, %124, %cst_59 {dimension_numbers = #tpu.dot_dimension_numbers<[1], [0], [0], [1], [0, 0, 1, 1], [], []>} : vector<104x512xf32>, vector<512x128xf32>, vector<104x128xf32> -> vector<104x128xf32>
    %c4 = arith.constant 4 : index
    %c0_60 = arith.constant 0 : index
    %c0_61 = arith.constant 0 : index
    %126 = vector.load %arg2[%c4, %c0_60, %c0_61] : memref<9x128x128xf32, #tpu.memory_space<vmem>>, vector<1x128x128xf32>
    %127 = vector.shape_cast %126 : vector<1x128x128xf32> to vector<128x128xf32>
    %cst_62 = arith.constant dense<0.000000e+00> : vector<104x128xf32>
    %128 = tpu.matmul %125, %127, %cst_62 {dimension_numbers = #tpu.dot_dimension_numbers<[1], [0], [0], [1], [0, 0, 1, 1], [], []>} : vector<104x128xf32>, vector<128x128xf32>, vector<104x128xf32> -> vector<104x128xf32>
    %129 = arith.addf %117, %128 : vector<104x128xf32>
    %c18_i32 = arith.constant 18 : i32
    %130 = vector.broadcast %c18_i32 : i32 to vector<104x1xi32>
    %131 = arith.addi %68, %130 : vector<104x1xi32>
    %132 = vector.broadcast %131 : vector<104x1xi32> to vector<104x512xi32>
    %133 = arith.cmpi eq, %132, %67 : vector<104x512xi32>
    %134 = arith.extui %133 : vector<104x512xi1> to vector<104x512xi32>
    %135 = arith.sitofp %134 : vector<104x512xi32> to vector<104x512xf32>
    %c0_63 = arith.constant 0 : index
    %c0_64 = arith.constant 0 : index
    %136 = vector.load %arg14[%c0_63, %c0_64] : memref<512x128xf32, #tpu.memory_space<vmem>>, vector<512x128xf32>
    %cst_65 = arith.constant dense<0.000000e+00> : vector<104x128xf32>
    %137 = tpu.matmul %135, %136, %cst_65 {dimension_numbers = #tpu.dot_dimension_numbers<[1], [0], [0], [1], [0, 0, 1, 1], [], []>} : vector<104x512xf32>, vector<512x128xf32>, vector<104x128xf32> -> vector<104x128xf32>
    %c5 = arith.constant 5 : index
    %c0_66 = arith.constant 0 : index
    %c0_67 = arith.constant 0 : index
    %138 = vector.load %arg2[%c5, %c0_66, %c0_67] : memref<9x128x128xf32, #tpu.memory_space<vmem>>, vector<1x128x128xf32>
    %139 = vector.shape_cast %138 : vector<1x128x128xf32> to vector<128x128xf32>
    %cst_68 = arith.constant dense<0.000000e+00> : vector<104x128xf32>
    %140 = tpu.matmul %137, %139, %cst_68 {dimension_numbers = #tpu.dot_dimension_numbers<[1], [0], [0], [1], [0, 0, 1, 1], [], []>} : vector<104x128xf32>, vector<128x128xf32>, vector<104x128xf32> -> vector<104x128xf32>
    %141 = arith.addf %129, %140 : vector<104x128xf32>
    %c32_i32 = arith.constant 32 : i32
    %142 = vector.broadcast %c32_i32 : i32 to vector<104x1xi32>
    %143 = arith.addi %68, %142 : vector<104x1xi32>
    %144 = vector.broadcast %143 : vector<104x1xi32> to vector<104x512xi32>
    %145 = arith.cmpi eq, %144, %67 : vector<104x512xi32>
    %146 = arith.extui %145 : vector<104x512xi1> to vector<104x512xi32>
    %147 = arith.sitofp %146 : vector<104x512xi32> to vector<104x512xf32>
    %c0_69 = arith.constant 0 : index
    %c0_70 = arith.constant 0 : index
    %148 = vector.load %arg14[%c0_69, %c0_70] : memref<512x128xf32, #tpu.memory_space<vmem>>, vector<512x128xf32>
    %cst_71 = arith.constant dense<0.000000e+00> : vector<104x128xf32>
    %149 = tpu.matmul %147, %148, %cst_71 {dimension_numbers = #tpu.dot_dimension_numbers<[1], [0], [0], [1], [0, 0, 1, 1], [], []>} : vector<104x512xf32>, vector<512x128xf32>, vector<104x128xf32> -> vector<104x128xf32>
    %c6 = arith.constant 6 : index
    %c0_72 = arith.constant 0 : index
    %c0_73 = arith.constant 0 : index
    %150 = vector.load %arg2[%c6, %c0_72, %c0_73] : memref<9x128x128xf32, #tpu.memory_space<vmem>>, vector<1x128x128xf32>
    %151 = vector.shape_cast %150 : vector<1x128x128xf32> to vector<128x128xf32>
    %cst_74 = arith.constant dense<0.000000e+00> : vector<104x128xf32>
    %152 = tpu.matmul %149, %151, %cst_74 {dimension_numbers = #tpu.dot_dimension_numbers<[1], [0], [0], [1], [0, 0, 1, 1], [], []>} : vector<104x128xf32>, vector<128x128xf32>, vector<104x128xf32> -> vector<104x128xf32>
    %153 = arith.addf %141, %152 : vector<104x128xf32>
    %c33_i32 = arith.constant 33 : i32
    %154 = vector.broadcast %c33_i32 : i32 to vector<104x1xi32>
    %155 = arith.addi %68, %154 : vector<104x1xi32>
    %156 = vector.broadcast %155 : vector<104x1xi32> to vector<104x512xi32>
    %157 = arith.cmpi eq, %156, %67 : vector<104x512xi32>
    %158 = arith.extui %157 : vector<104x512xi1> to vector<104x512xi32>
    %159 = arith.sitofp %158 : vector<104x512xi32> to vector<104x512xf32>
    %c0_75 = arith.constant 0 : index
    %c0_76 = arith.constant 0 : index
    %160 = vector.load %arg14[%c0_75, %c0_76] : memref<512x128xf32, #tpu.memory_space<vmem>>, vector<512x128xf32>
    %cst_77 = arith.constant dense<0.000000e+00> : vector<104x128xf32>
    %161 = tpu.matmul %159, %160, %cst_77 {dimension_numbers = #tpu.dot_dimension_numbers<[1], [0], [0], [1], [0, 0, 1, 1], [], []>} : vector<104x512xf32>, vector<512x128xf32>, vector<104x128xf32> -> vector<104x128xf32>
    %c7 = arith.constant 7 : index
    %c0_78 = arith.constant 0 : index
    %c0_79 = arith.constant 0 : index
    %162 = vector.load %arg2[%c7, %c0_78, %c0_79] : memref<9x128x128xf32, #tpu.memory_space<vmem>>, vector<1x128x128xf32>
    %163 = vector.shape_cast %162 : vector<1x128x128xf32> to vector<128x128xf32>
    %cst_80 = arith.constant dense<0.000000e+00> : vector<104x128xf32>
    %164 = tpu.matmul %161, %163, %cst_80 {dimension_numbers = #tpu.dot_dimension_numbers<[1], [0], [0], [1], [0, 0, 1, 1], [], []>} : vector<104x128xf32>, vector<128x128xf32>, vector<104x128xf32> -> vector<104x128xf32>
    %165 = arith.addf %153, %164 : vector<104x128xf32>
    %c34_i32 = arith.constant 34 : i32
    %166 = vector.broadcast %c34_i32 : i32 to vector<104x1xi32>
    %167 = arith.addi %68, %166 : vector<104x1xi32>
    %168 = vector.broadcast %167 : vector<104x1xi32> to vector<104x512xi32>
    %169 = arith.cmpi eq, %168, %67 : vector<104x512xi32>
    %170 = arith.extui %169 : vector<104x512xi1> to vector<104x512xi32>
    %171 = arith.sitofp %170 : vector<104x512xi32> to vector<104x512xf32>
    %c0_81 = arith.constant 0 : index
    %c0_82 = arith.constant 0 : index
    %172 = vector.load %arg14[%c0_81, %c0_82] : memref<512x128xf32, #tpu.memory_space<vmem>>, vector<512x128xf32>
    %cst_83 = arith.constant dense<0.000000e+00> : vector<104x128xf32>
    %173 = tpu.matmul %171, %172, %cst_83 {dimension_numbers = #tpu.dot_dimension_numbers<[1], [0], [0], [1], [0, 0, 1, 1], [], []>} : vector<104x512xf32>, vector<512x128xf32>, vector<104x128xf32> -> vector<104x128xf32>
    %c8 = arith.constant 8 : index
    %c0_84 = arith.constant 0 : index
    %c0_85 = arith.constant 0 : index
    %174 = vector.load %arg2[%c8, %c0_84, %c0_85] : memref<9x128x128xf32, #tpu.memory_space<vmem>>, vector<1x128x128xf32>
    %175 = vector.shape_cast %174 : vector<1x128x128xf32> to vector<128x128xf32>
    %cst_86 = arith.constant dense<0.000000e+00> : vector<104x128xf32>
    %176 = tpu.matmul %173, %175, %cst_86 {dimension_numbers = #tpu.dot_dimension_numbers<[1], [0], [0], [1], [0, 0, 1, 1], [], []>} : vector<104x128xf32>, vector<128x128xf32>, vector<104x128xf32> -> vector<104x128xf32>
    %177 = arith.addf %165, %176 : vector<104x128xf32>
    %c0_87 = arith.constant 0 : index
    %c0_88 = arith.constant 0 : index
    %178 = vector.load %arg10[%c0_87, %c0_88] : memref<1x128xf32, #tpu.memory_space<vmem>>, vector<1x128xf32>
    %c0_89 = arith.constant 0 : index
    %c0_90 = arith.constant 0 : index
    %179 = vector.load %arg11[%c0_89, %c0_90] : memref<1x128xf32, #tpu.memory_space<vmem>>, vector<1x128xf32>
    %cst_91 = arith.constant dense<0.000000e+00> : vector<128xf32>
    %180 = vector.multi_reduction <add>, %177, %cst_91 [0] : vector<104x128xf32> to vector<128xf32>
    %181 = vector.shape_cast %180 : vector<128xf32> to vector<1x128xf32>
    %182 = arith.mulf %177, %177 : vector<104x128xf32>
    %cst_92 = arith.constant dense<0.000000e+00> : vector<128xf32>
    %183 = vector.multi_reduction <add>, %182, %cst_92 [0] : vector<104x128xf32> to vector<128xf32>
    %184 = vector.shape_cast %183 : vector<128xf32> to vector<1x128xf32>
    %cst_93 = arith.constant 0.0102040814 : f32
    %185 = vector.broadcast %cst_93 : f32 to vector<1x128xf32>
    %186 = arith.mulf %181, %185 : vector<1x128xf32>
    %cst_94 = arith.constant 0.0102040814 : f32
    %187 = vector.broadcast %cst_94 : f32 to vector<1x128xf32>
    %188 = arith.mulf %184, %187 : vector<1x128xf32>
    %189 = arith.mulf %186, %186 : vector<1x128xf32>
    %190 = arith.subf %188, %189 : vector<1x128xf32>
    %191 = vector.broadcast %186 : vector<1x128xf32> to vector<104x128xf32>
    %192 = arith.subf %177, %191 : vector<104x128xf32>
    %cst_95 = arith.constant 9.99999974E-6 : f32
    %193 = vector.broadcast %cst_95 : f32 to vector<1x128xf32>
    %194 = arith.addf %190, %193 : vector<1x128xf32>
    %195 = math.rsqrt %194 : vector<1x128xf32>
    %196 = vector.broadcast %195 : vector<1x128xf32> to vector<104x128xf32>
    %197 = arith.mulf %192, %196 : vector<104x128xf32>
    %198 = vector.broadcast %178 : vector<1x128xf32> to vector<104x128xf32>
    %199 = arith.mulf %197, %198 : vector<104x128xf32>
    %200 = vector.broadcast %179 : vector<1x128xf32> to vector<104x128xf32>
    %201 = arith.addf %199, %200 : vector<104x128xf32>
    %202 = tpu.iota {dimensions = array<i32: 1>} : vector<104x128xi32>
    %c0_96 = arith.constant 0 : index
    %c0_97 = arith.constant 0 : index
    %203 = vector.load %arg4[%c0_96, %c0_97] : memref<104x1xi32, #tpu.memory_space<vmem>>, vector<104x1xi32>
    %204 = vector.broadcast %203 : vector<104x1xi32> to vector<104x128xi32>
    %205 = arith.cmpi eq, %204, %202 : vector<104x128xi32>
    %206 = arith.extui %205 : vector<104x128xi1> to vector<104x128xi32>
    %207 = arith.sitofp %206 : vector<104x128xi32> to vector<104x128xf32>
    %cst_98 = arith.constant dense<0.000000e+00> : vector<104x128xf32>
    %208 = tpu.matmul %207, %66, %cst_98 {dimension_numbers = #tpu.dot_dimension_numbers<[1], [0], [0], [1], [0, 0, 1, 1], [], []>} : vector<104x128xf32>, vector<128x128xf32>, vector<104x128xf32> -> vector<104x128xf32>
    %209 = arith.addf %201, %208 : vector<104x128xf32>
    %cst_99 = arith.constant 0.000000e+00 : f32
    %210 = vector.broadcast %cst_99 : f32 to vector<104x128xf32>
    %211 = arith.cmpf ogt, %209, %210 : vector<104x128xf32>
    %212 = vector.broadcast %0 : vector<1x1xf32> to vector<104x128xf32>
    %213 = arith.mulf %209, %212 : vector<104x128xf32>
    %214 = arith.select %211, %209, %213 : vector<104x128xi1>, vector<104x128xf32>
    %c0_100 = arith.constant 0 : index
    %c0_101 = arith.constant 0 : index
    %215 = vector.load %arg13[%c0_100, %c0_101] : memref<104x128xf32, #tpu.memory_space<vmem>>, vector<104x128xf32>
    tpu.vector_store %arg13[%c0_100, %c0_101], %214 {strides = array<i32>} : memref<104x128xf32, #tpu.memory_space<vmem>>, vector<104x128xf32>,
    return
  }
}

</mosaic_0001>

<bundles_post_ra>
// kernel: basic_block2_forward.1
= control target key start
LH: loop header
LB: loop body
LE: loop exit
PB: predicated region body
PF: predicated region fallthrough
CT: control target
= control target key end

     0   :  { %v19240_v3 = vmov 0.0   ;;  %v11836_v4 = vmov 0   ;;  %s19223_s1 = inlined_call_operand.vmem [shape: f32[128,256], index: 1, kind: input, shape index: {}]   ;;  %s19224_s12 = inlined_call_operand.<no memory space> [shape: f32[1,1], index: 12, kind: input, shape index: {}]   ;;  %s19225_s5 = inlined_call_operand.vmem [shape: s32[128,1], index: 5, kind: input, shape index: {}]   ;;  %s19226_s0 = inlined_call_operand.vmem [shape: f32[512,128], index: 0, kind: input, shape index: {}]   ;;  %s19227_s3 = inlined_call_operand.vmem [shape: s32[104,1], index: 3, kind: input, shape index: {}]   ;;  %s19228_s4 = inlined_call_operand.vmem [shape: s32[104,1], index: 4, kind: input, shape index: {}]   ;;  %s19229_s6 = inlined_call_operand.vmem [shape: f32[1,128], index: 6, kind: input, shape index: {}]   ;;  %s19230_s7 = inlined_call_operand.vmem [shape: f32[1,128], index: 7, kind: input, shape index: {}]   ;;  %s19231_s2 = inlined_call_operand.vmem [shape: f32[9,128,128], index: 2, kind: input, shape index: {}]   ;;  %s19232_s8 = inlined_call_operand.vmem [shape: f32[1,128], index: 8, kind: input, shape index: {}]   ;;  %s19233_s9 = inlined_call_operand.vmem [shape: f32[1,128], index: 9, kind: input, shape index: {}]   ;;  %s19234_s10 = inlined_call_operand.vmem [shape: f32[1,128], index: 10, kind: input, shape index: {}]   ;;  %s19235_s11 = inlined_call_operand.vmem [shape: f32[1,128], index: 11, kind: input, shape index: {}]   ;;  %s19236_s13 = inlined_call_operand.vmem [shape: f32[104,128], index: 13, kind: output, shape index: {}]  }
   0x1   :  { %v142_v0 = vld [vmem:[%s19223_s1 + $0xf8] sm:$0xff]  ;;  %v141_v1 = vld [vmem:[%s19223_s1 + $0xf0] sm:$0xff]  ;;  %v140_v2 = vld [vmem:[%s19223_s1 + $0xe8] sm:$0xff]  ;;  %207 = vmatprep.mubr.f32.mxu0 %v19240_v3  ;;  %11827 = vset.pattern.permute.xlu0 %v11836_v4  ;;  %v18_v5 = vstv %s19224_s12 }
   0x2   :  { %143 = vmatprep.subr.mxu0 %v142_v0  ;;  %v139_v6 = vld [vmem:[%s19223_s1 + $0xe0] sm:$0xff]  ;;  %19 = vst [vmem:[#allocation3] sm:$0x1] %v18_v5  ;;  %11828 = vset.pattern.permute.xlu1 %v11836_v4  ;;  %v138_v7 = vld [vmem:[%s19223_s1 + $0xd8] sm:$0xff]  ;;  %v137_v8 = vld [vmem:[%s19223_s1 + $0xd0] sm:$0xff] }
   0x3   :  { %144 = vmatpush1.msra.mxu0 %v141_v1  ;;  %v136_v9 = vld [vmem:[%s19223_s1 + $0xc8] sm:$0xff]  ;;  %v135_v10 = vld [vmem:[%s19223_s1 + $0xc0] sm:$0xff]  ;;  %v134_v11 = vld [vmem:[%s19223_s1 + $0xb8] sm:$0xff] }
   0x4   :  { %145 = vmatprep.subr.mxu0 %v140_v2  ;;  %v133_v12 = vld [vmem:[%s19223_s1 + $0xb0] sm:$0xff]  ;;  %v132_v13 = vld [vmem:[%s19223_s1 + $0xa8] sm:$0xff]  ;;  %v131_v14 = vld [vmem:[%s19223_s1 + $0xa0] sm:$0xff] }
   0x5   :  { %146 = vmatpush1.msra.mxu0 %v139_v6  ;;  %v130_v15 = vld [vmem:[%s19223_s1 + $0x98] sm:$0xff]  ;;  %v129_v16 = vld [vmem:[%s19223_s1 + $0x90] sm:$0xff]  ;;  %v128_v17 = vld [vmem:[%s19223_s1 + $0x88] sm:$0xff] }
   0x6   :  { %147 = vmatprep.subr.mxu0 %v138_v7  ;;  %v127_v18 = vld [vmem:[%s19223_s1 + $0x80] sm:$0xff]  ;;  %v126_v19 = vld [vmem:[%s19223_s1 + $0x78] sm:$0xff]  ;;  %v125_v21 = vld [vmem:[%s19223_s1 + $0x70] sm:$0xff] }
   0x7   :  { %148 = vmatpush1.msra.mxu0 %v137_v8  ;;  %v1340_v20 = vld [vmem:[%s19225_s5] sm:$0xff]  ;;  %v124_v22 = vld [vmem:[%s19223_s1 + $0x68] sm:$0xff]  ;;  %v122_v25 = vld [vmem:[%s19223_s1 + $0x58] sm:$0xff] }
   0x8   :  { %149 = vmatprep.subr.mxu0 %v136_v9  ;;  %1357 = vperm.xlu0 %11827, %v1340_v20   ;;  %v1341_v23 = vld [vmem:[%s19225_s5 + $0x8] sm:$0xff]  ;;  %v123_v24 = vld [vmem:[%s19223_s1 + $0x60] sm:$0xff]  ;;  %v121_v26 = vld [vmem:[%s19223_s1 + $0x50] sm:$0xff] }
   0x9   :  { %150 = vmatpush1.msra.mxu0 %v135_v10  ;;  %v120_v27 = vld [vmem:[%s19223_s1 + $0x48] sm:$0xff]  ;;  %v1344_v28 = vld [vmem:[%s19225_s5 + $0x20] sm:$0xff]  ;;  %v118_v30 = vld [vmem:[%s19223_s1 + $0x38] sm:$0xff] }
   0xa   :  { %151 = vmatprep.subr.mxu0 %v134_v11  ;;  %v119_v29 = vld [vmem:[%s19223_s1 + $0x40] sm:$0xff]  ;;  %v117_v31 = vld [vmem:[%s19223_s1 + $0x30] sm:$0xff]  ;;  %v116_v32 = vld [vmem:[%s19223_s1 + $0x28] sm:$0xff] }
   0xb   :  { %152 = vmatpush1.msra.mxu0 %v133_v12  ;;  %v1346_v33 = vld [vmem:[%s19225_s5 + $0x30] sm:$0xff]  ;;  %v115_v34 = vld [vmem:[%s19223_s1 + $0x20] sm:$0xff]  ;;  %v114_v35 = vld [vmem:[%s19223_s1 + $0x18] sm:$0xff] }
   0xc   :  { %153 = vmatprep.subr.mxu0 %v132_v13  ;;  %1360 = vperm.xlu0 %11827, %v1341_v23   ;;  %v1342_v36 = vld [vmem:[%s19225_s5 + $0x10] sm:$0xff]  ;;  %v112_v38 = vld [vmem:[%s19223_s1 + $0x8] sm:$0xff]  ;;  %v1348_v39 = vld [vmem:[%s19225_s5 + $0x40] sm:$0xff] }
   0xd   :  { %154 = vmatpush1.msra.mxu0 %v131_v14  ;;  %v113_v37 = vld [vmem:[%s19223_s1 + $0x10] sm:$0xff]  ;;  %1363 = vperm.xlu1 %11828, %v1342_v36   ;;  %v111_v40 = vld [vmem:[%s19223_s1] sm:$0xff]  ;;  %v1343_v41 = vld [vmem:[%s19225_s5 + $0x18] sm:$0xff] }
   0xe   :  { %155 = vmatprep.subr.mxu0 %v130_v15  ;;  %v47_v42 = vld [vmem:[%s19226_s0] sm:$0xff]  ;;  %v1350_v43 = vld [vmem:[%s19225_s5 + $0x50] sm:$0xff]  ;;  %v1345_v44 = vld [vmem:[%s19225_s5 + $0x28] sm:$0xff] }
   0xf   :  { %156 = vmatpush1.msra.mxu0 %v129_v16  ;;  %v48_v45 = vld [vmem:[%s19226_s0 + $0x8] sm:$0xff]  ;;  %v1352_v46 = vld [vmem:[%s19225_s5 + $0x60] sm:$0xff]  ;;  %v1347_v47 = vld [vmem:[%s19225_s5 + $0x38] sm:$0xff] }
  0x10   :  { %157 = vmatprep.subr.mxu0 %v128_v17  ;;  %1369 = vperm.xlu0 %11827, %v1344_v28   ;;  %v49_v48 = vld [vmem:[%s19226_s0 + $0x10] sm:$0xff]  ;;  %v1349_v50 = vld [vmem:[%s19225_s5 + $0x48] sm:$0xff]  ;;  %v50_v51 = vld [vmem:[%s19226_s0 + $0x18] sm:$0xff] }
  0x11   :  { %158 = vmatpush1.msra.mxu0 %v127_v18  ;;  %1366 = vperm.xlu1 %11828, %v1343_v41   ;;  %v1354_v49 = vld [vmem:[%s19225_s5 + $0x70] sm:$0xff]  ;;  %v8130_v52 = vld [vmem:[#allocation3] ss:$0 sm:$0xff]  ;;  %v1351_v53 = vld [vmem:[%s19225_s5 + $0x58] sm:$0xff] }
  0x12   :  { %159 = vmatprep.subr.mxu0 %v126_v19  ;;  %v51_v54 = vld [vmem:[%s19226_s0 + $0x20] sm:$0xff]  ;;  %v12073_v55 = vld [vmem:[%s19227_s3 + $0x8] sm:$0xff]  ;;  %v12086_v58 = vld [vmem:[%s19227_s3 + $0x18] sm:$0xff] }
  0x13   :  { %160 = vmatpush1.msra.mxu0 %v125_v21  ;;  %v1353_v56 = vld [vmem:[%s19225_s5 + $0x68] sm:$0xff]  ;;  %v1355_v59 = vld [vmem:[%s19225_s5 + $0x78] sm:$0xff]  ;;  %v53_v60 = vld [vmem:[%s19226_s0 + $0x30] sm:$0xff]  ;;  %v2577_v20 = vadd.s32 1, %v12073_v55  ;;  %v2579_v23 = vadd.s32 1, %v12086_v58 }
  0x14   :  { %161 = vmatprep.subr.mxu0 %v124_v22  ;;  %1375 = vperm.xlu0 %11827, %v1346_v33   ;;  %v52_v57 = vld [vmem:[%s19226_s0 + $0x28] sm:$0xff]  ;;  %v12104_v62 = vld [vmem:[%s19227_s3] sm:$0xff]  ;;  %v54_v63 = vld [vmem:[%s19226_s0 + $0x38] sm:$0xff] }
  0x15   :  { %162 = vmatpush1.msra.mxu0 %v123_v24  ;;  %1372 = vperm.xlu1 %11828, %v1345_v44   ;;  %v12099_v61 = vld [vmem:[%s19227_s3 + $0x28] sm:$0xff]  ;;  %v12114_v0 = vld [vmem:[%s19227_s3 + $0x38] sm:$0xff]  ;;  %v12120_v1 = vld [vmem:[%s19227_s3 + $0x10] sm:$0xff]  ;;  %v2576_v10 = vadd.s32 1, %v12104_v62 }
  0x16   :  { %163 = vmatprep.subr.mxu0 %v122_v25  ;;  %v55_v2 = vld [vmem:[%s19226_s0 + $0x40] sm:$0xff]  ;;  %v12130_v4 = vld [vmem:[%s19227_s3 + $0x48] sm:$0xff]  ;;  %v12146_v7 = vld [vmem:[%s19227_s3 + $0x58] sm:$0xff]  ;;  %v2578_v13 = vadd.s32 1, %v12120_v1  ;;  %v3323_v41 = vadd.s32 2, %v12120_v1 }
  0x17   :  { %164 = vmatpush1.msra.mxu0 %v121_v26  ;;  %v12136_v5 = vld [vmem:[%s19227_s3 + $0x20] sm:$0xff]  ;;  %v56_v6 = vld [vmem:[%s19226_s0 + $0x48] sm:$0xff]  ;;  %v12152_v8 = vld [vmem:[%s19227_s3 + $0x30] sm:$0xff]  ;;  %v2581_v26 = vadd.s32 1, %v12099_v61 }
  0x18   :  { %165 = vmatprep.subr.mxu0 %v120_v27  ;;  %1381 = vperm.xlu0 %11827, %v1348_v39   ;;  %v57_v9 = vld [vmem:[%s19226_s0 + $0x50] sm:$0xff]  ;;  %v12164_v11 = vld [vmem:[%s19227_s3 + $0x40] sm:$0xff]  ;;  %v58_v12 = vld [vmem:[%s19226_s0 + $0x58] sm:$0xff]  ;;  %v2580_v16 = vadd.s32 1, %v12136_v5  ;;  %v2582_v19 = vadd.s32 1, %v12152_v8  ;;  %v3325_v44 = vadd.s32 2, %v12136_v5 }
  0x19   :  { %166 = vmatpush1.msra.mxu0 %v119_v29  ;;  %1378 = vperm.xlu1 %11828, %v1347_v47   ;;  %v12175_v14 = vld [vmem:[%s19227_s3 + $0x50] sm:$0xff]  ;;  %v59_v15 = vld [vmem:[%s19226_s0 + $0x60] sm:$0xff]  ;;  %v60_v18 = vld [vmem:[%s19226_s0 + $0x68] sm:$0xff]  ;;  %v2584_v22 = vadd.s32 1, %v12164_v11  ;;  %v2583_v29 = vadd.s32 1, %v12114_v0  ;;  %v3327_v47 = vadd.s32 2, %v12152_v8 }
  0x1a   :  { %167 = vmatprep.subr.mxu0 %v118_v30  ;;  %v12186_v17 = vld [vmem:[%s19227_s3 + $0x60] sm:$0xff]  ;;  %v61_v21 = vld [vmem:[%s19226_s0 + $0x70] sm:$0xff]  ;;  %v62_v24 = vld [vmem:[%s19226_s0 + $0x78] sm:$0xff]  ;;  %v2586_v25 = vadd.s32 1, %v12175_v14 }
  0x1b   :  { %168 = vmatpush1.msra.mxu0 %v117_v31  ;;  %v63_v27 = vld [vmem:[%s19226_s0 + $0x80] sm:$0xff]  ;;  %v2588_v28 = vadd.s32 1, %v12186_v17  ;;  %v64_v30 = vld [vmem:[%s19226_s0 + $0x88] sm:$0xff]  ;;  %v3322_v31 = vadd.s32 2, %v12073_v55  ;;  %v65_v33 = vld [vmem:[%s19226_s0 + $0x90] sm:$0xff] }
  0x1c   :  { %169 = vmatprep.subr.mxu0 %v116_v32  ;;  %1387 = vperm.xlu0 %11827, %v1350_v43   ;;  %v2585_v32 = vadd.s32 1, %v12130_v4  ;;  %v66_v36 = vld [vmem:[%s19226_s0 + $0x98] sm:$0xff]  ;;  %v67_v39 = vld [vmem:[%s19226_s0 + $0xa0] sm:$0xff]  ;;  %v3330_v43 = vadd.s32 2, %v12130_v4 }
  0x1d   :  { %170 = vmatpush1.msra.mxu0 %v115_v34  ;;  %1384 = vperm.xlu1 %11828, %v1349_v50   ;;  %v3324_v34 = vadd.s32 2, %v12086_v58  ;;  %v3329_v50 = vadd.s32 2, %v12164_v11 }
  0x1e   :  { %171 = vmatprep.subr.mxu0 %v114_v35  ;;  %v2587_v35 = vadd.s32 1, %v12146_v7 }
  0x1f   :  { %172 = vmatpush1.msra.mxu0 %v113_v37  ;;  %v3326_v37 = vadd.s32 2, %v12099_v61 }
  0x20   :  { %173 = vmatprep.subr.mxu0 %v112_v38  ;;  %1393 = vperm.xlu0 %11827, %v1352_v46   ;;  %v3321_v38 = vadd.s32 2, %v12104_v62  ;;  %v3332_v46 = vadd.s32 2, %v12146_v7 }
  0x21   :  { %174 = vmatpush1.msra.mxu0 %v111_v40  ;;  %1390 = vperm.xlu1 %11828, %v1351_v53   ;;  %v3328_v40 = vadd.s32 2, %v12114_v0  ;;  %v3331_v53 = vadd.s32 2, %v12175_v14 }
  0x22   :  { %208 = vmatmul.mubr.f32.vlgmr.msra.gmra.mxu0 %v47_v42  ;;  %v68_v42 = vld [vmem:[%s19226_s0 + $0xa8] sm:$0xff] }
  0x23   :  { %213 = vmatprep.mubr.f32.mxu0 %v19240_v3 }
  0x24   :  { %1399 = vperm.xlu0 %11827, %v1354_v49   ;;  %v3949_v49 = vadd.s32 16, %v12104_v62 }
  0x25   :  { %1396 = vperm.xlu1 %11828, %v1353_v56   ;;  %v3953_v56 = vadd.s32 16, %v12136_v5 }
  0x26   :  { %214 = vmatmul.mubr.f32.gmra.mxu0 %v48_v45  ;;  %v69_v45 = vld [vmem:[%s19226_s0 + $0xb0] sm:$0xff] }
  0x27   :  { %219 = vmatprep.mubr.f32.mxu0 %v19240_v3 }
  0x28   :  { %1140 = vperm.xlu0 %11827, %v8130_v52   ;;  %v3951_v52 = vadd.s32 16, %v12120_v1 }
  0x29   :  { %1402 = vperm.xlu1 %11828, %v1355_v59   ;;  %v73_v59 = vld [vmem:[%s19226_s0 + $0xd0] sm:$0xff] }
  0x2a   :  { %220 = vmatmul.mubr.f32.gmra.mxu0 %v49_v48  ;;  %v70_v48 = vld [vmem:[%s19226_s0 + $0xb8] sm:$0xff] }
  0x2b   :  { %225 = vmatprep.mubr.f32.mxu0 %v19240_v3 }
  0x2c   :  { %2045 = vperm.xlu0 %11827, %v12073_v55  }
  0x2d   :  { %2042 = vperm.xlu1 %11828, %v12104_v62  }
  0x2e   :  { %226 = vmatmul.mubr.f32.gmra.mxu0 %v50_v51  ;;  %v71_v51 = vld [vmem:[%s19226_s0 + $0xc0] sm:$0xff] }
  0x2f   :  { %231 = vmatprep.mubr.f32.mxu0 %v19240_v3 }
  0x30   :  { %2051 = vperm.xlu0 %11827, %v12086_v58  }
  0x31   :  { %2048 = vperm.xlu1 %11828, %v12120_v1  }
  0x32   :  { %232 = vmatmul.mubr.f32.gmra.mxu0 %v51_v54  ;;  %v72_v54 = vld [vmem:[%s19226_s0 + $0xc8] sm:$0xff] }
  0x33   :  { %237 = vmatprep.mubr.f32.mxu0 %v19240_v3 }
  0x34   :  { %2057 = vperm.xlu0 %11827, %v12099_v61  }
  0x35   :  { %2054 = vperm.xlu1 %11828, %v12136_v5  }
  0x36   :  { %238 = vmatmul.mubr.f32.gmra.mxu0 %v52_v57  ;;  %v3333_v57 = vadd.s32 2, %v12186_v17 }
  0x37   :  { %243 = vmatprep.mubr.f32.mxu0 %v19240_v3 }
  0x38   :  { %2063 = vperm.xlu0 %11827, %v12114_v0  }
  0x39   :  { %2060 = vperm.xlu1 %11828, %v12152_v8  }
  0x3a   :  { %244 = vmatmul.mubr.f32.gmra.mxu0 %v53_v60  ;;  %v3955_v60 = vadd.s32 16, %v12152_v8 }
  0x3b   :  { %249 = vmatprep.mubr.f32.mxu0 %v19240_v3 }
  0x3c   :  { %2069 = vperm.xlu0 %11827, %v12130_v4  }
  0x3d   :  { %2066 = vperm.xlu1 %11828, %v12164_v11  }
  0x3e   :  { %250 = vmatmul.mubr.f32.gmra.mxu0 %v54_v63  ;;  %v3950_v63 = vadd.s32 16, %v12073_v55 }
  0x3f   :  { %255 = vmatprep.mubr.f32.mxu0 %v19240_v3 }
  0x40   :  { %2075 = vperm.xlu0 %11827, %v12146_v7  }
  0x41   :  { %2072 = vperm.xlu1 %11828, %v12175_v14  }
  0x42   :  { %256 = vmatmul.mubr.f32.gmra.mxu0 %v55_v2  ;;  %v74_v2 = vld [vmem:[%s19226_s0 + $0xd8] sm:$0xff] }
  0x43   :  { %261 = vmatprep.mubr.f32.mxu0 %v19240_v3 }
  0x44   :  { %2590 = vperm.xlu0 %11827, %v2576_v10   ;;  %v75_v10 = vld [vmem:[%s19226_s0 + $0xe0] sm:$0xff] }
  0x45   :  { %2078 = vperm.xlu1 %11828, %v12186_v17  }
  0x46   :  { %262 = vmatmul.mubr.f32.gmra.mxu0 %v56_v6  ;;  %v3957_v6 = vadd.s32 16, %v12164_v11 }
  0x47   :  { %267 = vmatprep.mubr.f32.mxu0 %v19240_v3 }
  0x48   :  { %2596 = vperm.xlu0 %11827, %v2578_v13   ;;  %v3954_v13 = vadd.s32 16, %v12099_v61 }
  0x49   :  { %2593 = vperm.xlu1 %11828, %v2577_v20   ;;  %v4578_v20 = vadd.s32 17, %v12073_v55 }
  0x4a   :  { %268 = vmatmul.mubr.f32.gmra.mxu0 %v57_v9  ;;  %v3952_v9 = vadd.s32 16, %v12086_v58 }
  0x4b   :  { %273 = vmatprep.mubr.f32.mxu0 %v19240_v3 }
  0x4c   :  { %2602 = vperm.xlu0 %11827, %v2580_v16   ;;  %v3961_v16 = vadd.s32 16, %v12186_v17 }
  0x4d   :  { %2599 = vperm.xlu1 %11828, %v2579_v23   ;;  %v4580_v23 = vadd.s32 17, %v12086_v58 }
  0x4e   :  { %274 = vmatmul.mubr.f32.gmra.mxu0 %v58_v12  ;;  %v3959_v12 = vadd.s32 16, %v12175_v14 }
  0x4f   :  { %279 = vmatprep.mubr.f32.mxu0 %v19240_v3 }
  0x50   :  { %2608 = vperm.xlu0 %11827, %v2582_v19   ;;  %v77_v19 = vld [vmem:[%s19226_s0 + $0xf0] sm:$0xff] }
  0x51   :  { %2605 = vperm.xlu1 %11828, %v2581_v26   ;;  %v4582_v26 = vadd.s32 17, %v12099_v61 }
  0x52   :  { %280 = vmatmul.mubr.f32.gmra.mxu0 %v59_v15  ;;  %v76_v15 = vld [vmem:[%s19226_s0 + $0xe8] sm:$0xff] }
  0x53   :  { %285 = vmatprep.mubr.f32.mxu0 %v19240_v3 }
  0x54   :  { %2614 = vperm.xlu0 %11827, %v2584_v22   ;;  %v78_v22 = vld [vmem:[%s19226_s0 + $0xf8] sm:$0xff] }
  0x55   :  { %2611 = vperm.xlu1 %11828, %v2583_v29  }
  0x56   :  { %286 = vmatmul.mubr.f32.gmra.mxu0 %v60_v18  ;;  %v3956_v18 = vadd.s32 16, %v12114_v0 }
  0x57   :  { %291 = vmatprep.mubr.f32.mxu0 %v19240_v3 }
  0x58   :  { %2620 = vperm.xlu0 %11827, %v2586_v25   ;;  %v79_v25 = vld [vmem:[%s19226_s0 + $0x100] sm:$0xff] }
  0x59   :  { %2617 = vperm.xlu1 %11828, %v2585_v32   ;;  %v81_v32 = vld [vmem:[%s19226_s0 + $0x110] sm:$0xff] }
  0x5a   :  { %292 = vmatmul.mubr.f32.gmra.mxu0 %v61_v21  ;;  %v3958_v21 = vadd.s32 16, %v12130_v4 }
  0x5b   :  { %297 = vmatprep.mubr.f32.mxu0 %v19240_v3 }
  0x5c   :  { %2626 = vperm.xlu0 %11827, %v2588_v28   ;;  %v80_v28 = vld [vmem:[%s19226_s0 + $0x108] sm:$0xff] }
  0x5d   :  { %2623 = vperm.xlu1 %11828, %v2587_v35  }
  0x5e   :  { %298 = vmatmul.mubr.f32.gmra.mxu0 %v62_v24  ;;  %v3960_v24 = vadd.s32 16, %v12146_v7 }
  0x5f   :  { %303 = vmatprep.mubr.f32.mxu0 %v19240_v3 }
  0x60   :  { %3338 = vperm.xlu0 %11827, %v3322_v31   ;;  %v4579_v31 = vadd.s32 17, %v12120_v1 }
  0x61   :  { %3335 = vperm.xlu1 %11828, %v3321_v38   ;;  %v4583_v38 = vadd.s32 17, %v12152_v8 }
  0x62   :  { %304 = vmatmul.mubr.f32.gmra.mxu0 %v63_v27  ;;  %v4577_v27 = vadd.s32 17, %v12104_v62 }
  0x63   :  { %309 = vmatprep.mubr.f32.mxu0 %v19240_v3 }
  0x64   :  { %3344 = vperm.xlu0 %11827, %v3324_v34   ;;  %v4581_v34 = vadd.s32 17, %v12136_v5 }
  0x65   :  { %3341 = vperm.xlu1 %11828, %v3323_v41   ;;  %v5205_v41 = vadd.s32 18, %v12104_v62 }
  0x66   :  { %310 = vmatmul.mubr.f32.gmra.mxu0 %v64_v30  ;;  %v4584_v30 = vadd.s32 17, %v12114_v0 }
  0x67   :  { %315 = vmatprep.mubr.f32.mxu0 %v19240_v3 }
  0x68   :  { %3350 = vperm.xlu0 %11827, %v3326_v37   ;;  %v4588_v37 = vadd.s32 17, %v12146_v7 }
  0x69   :  { %3347 = vperm.xlu1 %11828, %v3325_v44  }
  0x6a   :  { %316 = vmatmul.mubr.f32.gmra.mxu0 %v65_v33  ;;  %v4586_v33 = vadd.s32 17, %v12130_v4 }
  0x6b   :  { %321 = vmatprep.mubr.f32.mxu0 %v19240_v3 }
  0x6c   :  { %3356 = vperm.xlu0 %11827, %v3328_v40  }
  0x6d   :  { %3353 = vperm.xlu1 %11828, %v3327_v47  }
  0x6e   :  { %322 = vmatmul.mubr.f32.gmra.mxu0 %v66_v36  ;;  %v82_v36 = vld [vmem:[%s19226_s0 + $0x118] sm:$0xff] }
  0x6f   :  { %327 = vmatprep.mubr.f32.mxu0 %v19240_v3 }
  0x70   :  { %3362 = vperm.xlu0 %11827, %v3330_v43   ;;  %v84_v43 = vld [vmem:[%s19226_s0 + $0x128] sm:$0xff] }
  0x71   :  { %3359 = vperm.xlu1 %11828, %v3329_v50  }
  0x72   :  { %328 = vmatmul.mubr.f32.gmra.mxu0 %v67_v39  ;;  %v83_v39 = vld [vmem:[%s19226_s0 + $0x120] sm:$0xff] }
  0x73   :  { %333 = vmatprep.mubr.f32.mxu0 %v19240_v3 }
  0x74   :  { %3368 = vperm.xlu0 %11827, %v3332_v46   ;;  %v4587_v46 = vadd.s32 17, %v12175_v14 }
  0x75   :  { %3365 = vperm.xlu1 %11828, %v3331_v53  }
  0x76   :  { %334 = vmatmul.mubr.f32.gmra.mxu0 %v68_v42  ;;  %v4585_v42 = vadd.s32 17, %v12164_v11 }
  0x77   :  { %339 = vmatprep.mubr.f32.mxu0 %v19240_v3 }
  0x78   :  { %3963 = vperm.xlu0 %11827, %v3949_v49   ;;  %v5209_v49 = vadd.s32 18, %v12136_v5 }
  0x79   :  { %3371 = vperm.xlu1 %11828, %v3333_v57   ;;  %v87_v57 = vld [vmem:[%s19226_s0 + $0x140] sm:$0xff] }
  0x7a   :  { %340 = vmatmul.mubr.f32.gmra.mxu0 %v69_v45  ;;  %v5207_v45 = vadd.s32 18, %v12120_v1 }
  0x7b   :  { %345 = vmatprep.mubr.f32.mxu0 %v19240_v3 }
  0x7c   :  { %3969 = vperm.xlu0 %11827, %v3951_v52   ;;  %v86_v52 = vld [vmem:[%s19226_s0 + $0x138] sm:$0xff] }
  0x7d   :  { %3966 = vperm.xlu1 %11828, %v3950_v63   ;;  %v5208_v63 = vadd.s32 18, %v12086_v58 }
  0x7e   :  { %346 = vmatmul.mubr.f32.gmra.mxu0 %v70_v48  ;;  %v85_v48 = vld [vmem:[%s19226_s0 + $0x130] sm:$0xff] }
  0x7f   :  { %351 = vmatprep.mubr.f32.mxu0 %v19240_v3 }
  0x80   :  { %3975 = vperm.xlu0 %11827, %v3953_v56   ;;  %v5206_v56 = vadd.s32 18, %v12073_v55 }
  0x81   :  { %3972 = vperm.xlu1 %11828, %v3952_v9   ;;  %v5215_v9 = vadd.s32 18, %v12175_v14 }
  0x82   :  { %352 = vmatmul.mubr.f32.gmra.mxu0 %v71_v51  ;;  %v4589_v51 = vadd.s32 17, %v12186_v17 }
  0x83   :  { %357 = vmatprep.mubr.f32.mxu0 %v19240_v3  ;;  %v12313_v29 = vpop.permute.xlu0 %1357 }
  0x84   :  { %3981 = vperm.xlu0 %11827, %v3955_v60   ;;  %v5213_v60 = vadd.s32 18, %v12164_v11 }
  0x85   :  { %3978 = vperm.xlu1 %11828, %v3954_v13   ;;  %v89_v13 = vld [vmem:[%s19226_s0 + $0x150] sm:$0xff] }
  0x86   :  { %358 = vmatmul.mubr.f32.gmra.mxu0 %v72_v54  ;;  %v5211_v54 = vadd.s32 18, %v12152_v8 }
  0x87   :  { %363 = vmatprep.mubr.f32.mxu0 %v19240_v3  ;;  %v12323_v35 = vpop.permute.xlu0 %1360 }
  0x88   :  { %3987 = vperm.xlu0 %11827, %v3957_v6   ;;  %19747 = vst [vmem:[#allocation4_spill] sm:$0xff] %v12323_v35  ;;  %v12343_v44 = vpop.permute.xlu1 %1363  ;;  %v88_v6 = vld [vmem:[%s19226_s0 + $0x148] sm:$0xff] }
  0x89   :  { %3984 = vperm.xlu1 %11828, %v3956_v18   ;;  %19749 = vst [vmem:[#allocation6_spill] sm:$0xff] %v12343_v44  ;;  %v5212_v18 = vadd.s32 18, %v12114_v0 }
  0x8a   :  { %364 = vmatmul.mubr.f32.gmra.mxu0 %v73_v59 }
  0x8b   :  { %369 = vmatprep.mubr.f32.mxu0 %v19240_v3  ;;  %v12335_v40 = vpop.permute.xlu0 %1369 }
  0x8c   :  { %3993 = vperm.xlu0 %11827, %v3959_v12   ;;  %19748 = vst [vmem:[#allocation5_spill] sm:$0xff] %v12335_v40  ;;  %v12354_v50 = vpop.permute.xlu1 %1366  ;;  %v5210_v12 = vadd.s32 18, %v12099_v61 }
  0x8d   :  { %3990 = vperm.xlu1 %11828, %v3958_v21   ;;  %19751 = vst [vmem:[#allocation8_spill] sm:$0xff] %v12354_v50  ;;  %v5834_v21 = vadd.s32 32, %v12073_v55 }
  0x8e   :  { %370 = vmatmul.mubr.f32.gmra.mxu0 %v74_v2 }
  0x8f   :  { %375 = vmatprep.mubr.f32.mxu0 %v19240_v3  ;;  %v12347_v47 = vpop.permute.xlu0 %1375 }
  0x90   :  { %3999 = vperm.xlu0 %11827, %v3961_v16   ;;  %19750 = vst [vmem:[#allocation7_spill] sm:$0xff] %v12347_v47  ;;  %v12369_v59 = vpop.permute.xlu1 %1372  ;;  %v5217_v16 = vadd.s32 18, %v12186_v17 }
  0x91   :  { %3996 = vperm.xlu1 %11828, %v3960_v24   ;;  %19753 = vst [vmem:[#allocation10_spill] sm:$0xff] %v12369_v59  ;;  %v91_v24 = vld [vmem:[%s19226_s0 + $0x160] sm:$0xff] }
  0x92   :  { %376 = vmatmul.mubr.f32.gmra.mxu0 %v75_v10 }
  0x93   :  { %381 = vmatprep.mubr.f32.mxu0 %v19240_v3  ;;  %v12361_v53 = vpop.permute.xlu0 %1381 }
  0x94   :  { %4594 = vperm.xlu0 %11827, %v4578_v20   ;;  %19752 = vst [vmem:[#allocation9_spill] sm:$0xff] %v12361_v53  ;;  %v12380_v10 = vpop.permute.xlu1 %1378 }
  0x95   :  { %4591 = vperm.xlu1 %11828, %v4577_v27   ;;  %19755 = vst [vmem:[#allocation12_spill] sm:$0xff] %v12380_v10  ;;  %v5216_v27 = vadd.s32 18, %v12146_v7 }
  0x96   :  { %382 = vmatmul.mubr.f32.gmra.mxu0 %v76_v15 }
  0x97   :  { %387 = vmatprep.mubr.f32.mxu0 %v19240_v3  ;;  %v12373_v2 = vpop.permute.xlu0 %1387 }
  0x98   :  { %4600 = vperm.xlu0 %11827, %v4580_v23   ;;  %19754 = vst [vmem:[#allocation11_spill] sm:$0xff] %v12373_v2  ;;  %v12395_v20 = vpop.permute.xlu1 %1384 }
  0x99   :  { %4597 = vperm.xlu1 %11828, %v4579_v31   ;;  %19757 = vst [vmem:[#allocation14_spill] sm:$0xff] %v12395_v20  ;;  %v5838_v31 = vadd.s32 32, %v12099_v61 }
  0x9a   :  { %388 = vmatmul.mubr.f32.gmra.mxu0 %v77_v19  ;;  %v90_v19 = vld [vmem:[%s19226_s0 + $0x158] sm:$0xff] }
  0x9b   :  { %393 = vmatprep.mubr.f32.mxu0 %v19240_v3  ;;  %v12387_v15 = vpop.permute.xlu0 %1393 }
  0x9c   :  { %4606 = vperm.xlu0 %11827, %v4582_v26   ;;  %19756 = vst [vmem:[#allocation13_spill] sm:$0xff] %v12387_v15  ;;  %v12406_v26 = vpop.permute.xlu1 %1390 }
  0x9d   :  { %4603 = vperm.xlu1 %11828, %v4581_v34   ;;  %19759 = vst [vmem:[#allocation16_spill] sm:$0xff] %v12406_v26 }
  0x9e   :  { %394 = vmatmul.mubr.f32.gmra.mxu0 %v78_v22  ;;  %v5214_v22 = vadd.s32 18, %v12130_v4 }
  0x9f   :  { %399 = vmatprep.mubr.f32.mxu0 %v19240_v3  ;;  %v12399_v23 = vpop.permute.xlu0 %1399 }
  0xa0   :  { %4612 = vperm.xlu0 %11827, %v4584_v30   ;;  %19758 = vst [vmem:[#allocation15_spill] sm:$0xff] %v12399_v23  ;;  %v12421_v34 = vpop.permute.xlu1 %1396 }
  0xa1   :  { %4609 = vperm.xlu1 %11828, %v4583_v38   ;;  %19761 = vst [vmem:[#allocation18_spill] sm:$0xff] %v12421_v34 }
  0xa2   :  { %400 = vmatmul.mubr.f32.gmra.mxu0 %v79_v25  ;;  %v5836_v25 = vadd.s32 32, %v12086_v58 }
  0xa3   :  { %405 = vmatprep.mubr.f32.mxu0 %v19240_v3  ;;  %v12413_v30 = vpop.permute.xlu0 %1140 }
  0xa4   :  { %4618 = vperm.xlu0 %11827, %v4586_v33   ;;  %19760 = vst [vmem:[#allocation17_spill] sm:$0xff] %v12413_v30  ;;  %v93_v33 = vld [vmem:[%s19226_s0 + $0x170] sm:$0xff] }
  0xa5   :  { %4615 = vperm.xlu1 %11828, %v4585_v42   ;;  %v12432_v42 = vpop.permute.xlu1 %1402 }
  0xa6   :  { %406 = vmatmul.mubr.f32.gmra.mxu0 %v80_v28  ;;  %v92_v28 = vld [vmem:[%s19226_s0 + $0x168] sm:$0xff]  ;;  %19763 = vst [vmem:[#allocation20_spill] sm:$0xff] %v12432_v42 }
  0xa7   :  { %411 = vmatprep.mubr.f32.mxu0 %v19240_v3  ;;  %v12425_v38 = vpop.permute.xlu0 %2045 }
  0xa8   :  { %4624 = vperm.xlu0 %11827, %v4588_v37   ;;  %v5835_v37 = vadd.s32 32, %v12120_v1  ;;  %19762 = vst [vmem:[#allocation19_spill] sm:$0xff] %v12425_v38 }
  0xa9   :  { %4621 = vperm.xlu1 %11828, %v4587_v46  }
  0xaa   :  { %412 = vmatmul.mubr.f32.gmra.mxu0 %v81_v32  ;;  %v5833_v32 = vadd.s32 32, %v12104_v62 }
  0xab   :  { %417 = vmatprep.mubr.f32.mxu0 %v19240_v3  ;;  %v12439_v46 = vpop.permute.xlu0 %2051 }
  0xac   :  { %5219 = vperm.xlu0 %11827, %v5205_v41   ;;  %v5842_v41 = vadd.s32 32, %v12130_v4  ;;  %19764 = vst [vmem:[#allocation21_spill] sm:$0xff] %v12439_v46 }
  0xad   :  { %4627 = vperm.xlu1 %11828, %v4589_v51  }
  0xae   :  { %418 = vmatmul.mubr.f32.gmra.mxu0 %v82_v36  ;;  %v5840_v36 = vadd.s32 32, %v12114_v0 }
  0xaf   :  { %423 = vmatprep.mubr.f32.mxu0 %v19240_v3 }
  0xb0   :  { %5225 = vperm.xlu0 %11827, %v5207_v45   ;;  %v95_v45 = vld [vmem:[%s19226_s0 + $0x180] sm:$0xff] }
  0xb1   :  { %5222 = vperm.xlu1 %11828, %v5206_v56  }
  0xb2   :  { %424 = vmatmul.mubr.f32.gmra.mxu0 %v83_v39  ;;  %v94_v39 = vld [vmem:[%s19226_s0 + $0x178] sm:$0xff] }
  0xb3   :  { %429 = vmatprep.mubr.f32.mxu0 %v19240_v3 }
  0xb4   :  { %5231 = vperm.xlu0 %11827, %v5209_v49   ;;  %v5839_v49 = vadd.s32 32, %v12152_v8 }
  0xb5   :  { %5228 = vperm.xlu1 %11828, %v5208_v63  }
  0xb6   :  { %430 = vmatmul.mubr.f32.gmra.mxu0 %v84_v43  ;;  %v5837_v43 = vadd.s32 32, %v12136_v5 }
  0xb7   :  { %435 = vmatprep.mubr.f32.mxu0 %v19240_v3 }
  0xb8   :  { %5237 = vperm.xlu0 %11827, %v5211_v54   ;;  %v12449_v54 = vpop.permute.xlu1 %2042 }
  0xb9   :  { %5234 = vperm.xlu1 %11828, %v5210_v12   ;;  %19766 = vst [vmem:[#allocation23_spill] sm:$0xff] %v12449_v54 }
  0xba   :  { %436 = vmatmul.mubr.f32.gmra.mxu0 %v85_v48  ;;  %v5844_v48 = vadd.s32 32, %v12146_v7 }
  0xbb   :  { %441 = vmatprep.mubr.f32.mxu0 %v19240_v3 }
  0xbc   :  { %5243 = vperm.xlu0 %11827, %v5213_v60   ;;  %v5841_v60 = vadd.s32 32, %v12164_v11 }
  0xbd   :  { %5240 = vperm.xlu1 %11828, %v5212_v18   ;;  %v5843_v18 = vadd.s32 32, %v12175_v14 }
  0xbe   :  { %442 = vmatmul.mubr.f32.gmra.mxu0 %v86_v52  ;;  %v96_v52 = vld [vmem:[%s19226_s0 + $0x188] sm:$0xff] }
  0xbf   :  { %447 = vmatprep.mubr.f32.mxu0 %v19240_v3 }
  0xc0   :  { %5249 = vperm.xlu0 %11827, %v5215_v9   ;;  %v97_v9 = vld [vmem:[%s19226_s0 + $0x190] sm:$0xff] }
  0xc1   :  { %5246 = vperm.xlu1 %11828, %v5214_v22  }
  0xc2   :  { %448 = vmatmul.mubr.f32.gmra.mxu0 %v87_v57  ;;  %v6461_v57 = vadd.s32 33, %v12104_v62 }
  0xc3   :  { %453 = vmatprep.mubr.f32.mxu0 %v19240_v3 }
  0xc4   :  { %5255 = vperm.xlu0 %11827, %v5217_v16   ;;  %v12466_v16 = vpop.permute.xlu1 %2048 }
  0xc5   :  { %5252 = vperm.xlu1 %11828, %v5216_v27   ;;  %19769 = vst [vmem:[#allocation26_spill] sm:$0xff] %v12466_v16  ;;  %v5845_v27 = vadd.s32 32, %v12186_v17 }
  0xc6   :  { %454 = vmatmul.mubr.f32.gmra.mxu0 %v88_v6  ;;  %v12457_v6 = vpop.permute.xlu0 %2057 }
  0xc7   :  { %459 = vmatprep.mubr.f32.mxu0 %v19240_v3  ;;  %19768 = vst [vmem:[#allocation25_spill] sm:$0xff] %v12457_v6  ;;  %v6472_v6 = vadd.s32 33, %v12146_v7 }
  0xc8   :  { %5850 = vperm.xlu0 %11827, %v5834_v21   ;;  %v98_v21 = vld [vmem:[%s19226_s0 + $0x198] sm:$0xff] }
  0xc9   :  { %5847 = vperm.xlu1 %11828, %v5833_v32   ;;  %v12487_v32 = vpop.permute.xlu1 %2054 }
  0xca   :  { %460 = vmatmul.mubr.f32.gmra.mxu0 %v89_v13  ;;  %v6463_v13 = vadd.s32 33, %v12120_v1  ;;  %19771 = vst [vmem:[#allocation28_spill] sm:$0xff] %v12487_v32 }
  0xcb   :  { %465 = vmatprep.mubr.f32.mxu0 %v19240_v3 }
  0xcc   :  { %5856 = vperm.xlu0 %11827, %v5836_v25   ;;  %v6465_v25 = vadd.s32 33, %v12136_v5 }
  0xcd   :  { %5853 = vperm.xlu1 %11828, %v5835_v37   ;;  %v6462_v37 = vadd.s32 33, %v12073_v55 }
  0xce   :  { %466 = vmatmul.mubr.f32.gmra.mxu0 %v90_v19 }
  0xcf   :  { %471 = vmatprep.mubr.f32.mxu0 %v19240_v3 }
  0xd0   :  { %5862 = vperm.xlu0 %11827, %v5838_v31   ;;  %v99_v31 = vld [vmem:[%s19226_s0 + $0x1a0] sm:$0xff] }
  0xd1   :  { %5859 = vperm.xlu1 %11828, %v5837_v43   ;;  %v100_v43 = vld [vmem:[%s19226_s0 + $0x1a8] sm:$0xff] }
  0xd2   :  { %472 = vmatmul.mubr.f32.gmra.mxu0 %v91_v24  ;;  %v12477_v24 = vpop.permute.xlu0 %2063 }
  0xd3   :  { %477 = vmatprep.mubr.f32.mxu0 %v19240_v3  ;;  %19770 = vst [vmem:[#allocation27_spill] sm:$0xff] %v12477_v24  ;;  %v19246_v24 = vmov 1.0  }
  0xd4   :  { %5868 = vperm.xlu0 %11827, %v5840_v36   ;;  %v6467_v36 = vadd.s32 33, %v12152_v8 }
  0xd5   :  { %5865 = vperm.xlu1 %11828, %v5839_v49   ;;  %v12504_v49 = vpop.permute.xlu1 %2060 }
  0xd6   :  { %478 = vmatmul.mubr.f32.gmra.mxu0 %v92_v28  ;;  %19773 = vst [vmem:[#allocation30_spill] sm:$0xff] %v12504_v49  ;;  %v19780_v49 = vmov 0.0  }
  0xd7   :  { %483 = vmatprep.mubr.f32.mxu0 %v19240_v3 }
  0xd8   :  { %5874 = vperm.xlu0 %11827, %v5842_v41   ;;  %v12495_v41 = vpop.permute.xlu0 %2069 }
  0xd9   :  { %5871 = vperm.xlu1 %11828, %v5841_v60   ;;  %19772 = vst [vmem:[#allocation29_spill] sm:$0xff] %v12495_v41  ;;  %v101_v60 = vld [vmem:[%s19226_s0 + $0x1b0] sm:$0xff] }
  0xda   :  { %484 = vmatmul.mubr.f32.gmra.mxu0 %v93_v33 }
  0xdb   :  { %489 = vmatprep.mubr.f32.mxu0 %v19240_v3 }
  0xdc   :  { %5880 = vperm.xlu0 %11827, %v5844_v48   ;;  %v6469_v48 = vadd.s32 33, %v12164_v11 }
  0xdd   :  { %5877 = vperm.xlu1 %11828, %v5843_v18   ;;  %v12515_v18 = vpop.permute.xlu0 %2075 }
  0xde   :  { %490 = vmatmul.mubr.f32.gmra.mxu0 %v94_v39  ;;  %19774 = vst [vmem:[#allocation31_spill] sm:$0xff] %v12515_v18 }
  0xdf   :  { %495 = vmatprep.mubr.f32.mxu0 %v19240_v3 }
  0xe0   :  { %6475 = vperm.xlu0 %11827, %v6461_v57  }
  0xe1   :  { %5883 = vperm.xlu1 %11828, %v5845_v27  }
  0xe2   :  { %v12443_v51 = vpop.f32.mrf.mxu0  ;;  %496 = vmatmul.mubr.f32.gmra.mxu0 %v95_v45 }
  0xe3   :  { %19765 = vst [vmem:[#allocation22_spill] sm:$0xff] %v12443_v51  ;;  %501 = vmatprep.mubr.f32.mxu0 %v19240_v3 }
  0xe4   :  { %v12451_v56 = vpop.f32.mrf.mxu0  ;;  %6481 = vperm.xlu0 %11827, %v6463_v13  }
  0xe5   :  { %6478 = vperm.xlu1 %11828, %v6462_v37   ;;  %v12527_v37 = vpop.permute.xlu1 %2066 }
  0xe6   :  { %v12455_v63 = vpop.f32.mrf.mxu0  ;;  %502 = vmatmul.mubr.f32.gmra.mxu0 %v96_v52  ;;  %v6464_v52 = vadd.s32 33, %v12086_v58  ;;  %19776 = vst [vmem:[#allocation33_spill] sm:$0xff] %v12527_v37 }
  0xe7   :  { %19767 = vst [vmem:[#allocation24_spill] sm:$0xff] %v12455_v63  ;;  %507 = vmatprep.mubr.f32.mxu0 %v19240_v3 }
  0xe8   :  { %v12463_v12 = vpop.f32.mrf.mxu0  ;;  %6487 = vperm.xlu0 %11827, %v6465_v25   ;;  %v6466_v25 = vadd.s32 33, %v12099_v61 }
  0xe9   :  { %6484 = vperm.xlu1 %11828, %v6464_v52   ;;  %v6468_v52 = vadd.s32 33, %v12114_v0  ;;  %v12547_v37 = vpop.permute.xlu1 %2072 }
  0xea   :  { %v12469_v19 = vpop.f32.mrf.mxu0  ;;  %508 = vmatmul.mubr.f32.gmra.mxu0 %v97_v9  ;;  %v1335_v9 = vlaneseq  ;;  %19779 = vst [vmem:[#allocation36_spill] sm:$0xff] %v12547_v37  ;;  %v7092_v37 = vadd.s32 34, %v12086_v58  ;;  %v7089_v58 = vadd.s32 34, %v12104_v62  ;;  %v7091_v62 = vadd.s32 34, %v12120_v1 }
  0xeb   :  { %513 = vmatprep.mubr.f32.mxu0 %v19240_v3 }
  0xec   :  { %v12475_v22 = vpop.f32.mrf.mxu0  ;;  %6493 = vperm.xlu0 %11827, %v6467_v36   ;;  %v12525_v36 = vand.u32 127, %v1335_v9  ;;  %v103_v9 = vld [vmem:[%s19226_s0 + $0x1c0] sm:$0xff] }
  0xed   :  { %6490 = vperm.xlu1 %11828, %v6466_v25   ;;  %v7090_v25 = vadd.s32 34, %v12073_v55  ;;  %v104_v55 = vld [vmem:[%s19226_s0 + $0x1c8] sm:$0xff]  ;;  %v12571_v32 = vpop.permute.xlu1 %2078 }
  0xee   :  { %v12481_v28 = vpop.f32.mrf.mxu0  ;;  %514 = vmatmul.mubr.f32.gmra.mxu0 %v98_v21  ;;  %v6471_v21 = vadd.s32 33, %v12175_v14  ;;  %19775 = vst [vmem:[#allocation32_spill] sm:$0xff] %v12525_v36  ;;  %v12542_v41 = vadd.s32 128, %v12525_v36  ;;  %19782 = vst [vmem:[#allocation38_spill] sm:$0xff] %v12571_v32  ;;  %vm1404_vm1 = vcmp.eq.s32.totalorder %v12313_v29, %v12525_v36  ;;  %vm1408_vm3 = vcmp.eq.s32.totalorder %v12323_v35, %v12525_v36 }
  0xef   :  { %519 = vmatprep.mubr.f32.mxu0 %v19240_v3  ;;  %vm1412_vm5 = vcmp.eq.s32.totalorder %v12343_v44, %v12525_v36 }
  0xf0   :  { %v12489_v33 = vpop.f32.mrf.mxu0  ;;  %6499 = vperm.xlu0 %11827, %v6469_v48   ;;  %v6473_v48 = vadd.s32 33, %v12186_v17  ;;  %19778 = vst [vmem:[#allocation35_spill] sm:$0xff] %v12542_v41  ;;  %vm1405_vm0 = vcmp.eq.s32.totalorder %v12313_v29, %v12542_v41  ;;  %vm1409_vm2 = vcmp.eq.s32.totalorder %v12323_v35, %v12542_v41  ;;  %vm1413_vm4 = vcmp.eq.s32.totalorder %v12343_v44, %v12542_v41  ;;  %v19846_v35 = vld [vmem:[#allocation12_spill] sm:$0xff] }
  0xf1   :  { %6496 = vperm.xlu1 %11828, %v6468_v52   ;;  %8195 = vmatprep.mubr.msk.f32.mxu1 %vm1405_vm0, %v19246_v24  ;;  %v105_v24 = vld [vmem:[%s19226_s0 + $0x1d0] sm:$0xff]  ;;  %vm1433_vm15 = vcmp.eq.s32.totalorder %v19846_v35, %v12542_v41  ;;  %vm1432_vm0 = vcmp.eq.s32.totalorder %v19846_v35, %v12525_v36 }
  0xf2   :  { %v12493_v39 = vpop.f32.mrf.mxu0  ;;  %520 = vmatmul.mubr.f32.gmra.mxu0 %v99_v31  ;;  %v102_v31 = vld [vmem:[%s19226_s0 + $0x1b8] sm:$0xff] }
  0xf3   :  { %525 = vmatprep.mubr.f32.mxu0 %v19240_v3 }
  0xf4   :  { %v12501_v45 = vpop.f32.mrf.mxu0  ;;  %6505 = vperm.xlu0 %11827, %v6471_v21  }
  0xf6   :  { %v12507_v57 = vpop.f32.mrf.mxu0  ;;  %526 = vmatmul.mubr.f32.gmra.mxu0 %v100_v43 }
  0xf7   :  { %531 = vmatprep.mubr.f32.mxu0 %v19240_v3 }
  0xf8   :  { %v12513_v13 = vpop.f32.mrf.mxu0  ;;  %6511 = vperm.xlu0 %11827, %v6473_v48  }
  0xfa   :  { %v12519_v27 = vpop.f32.mrf.mxu0  ;;  %532 = vmatmul.mubr.f32.gmra.mxu0 %v101_v60  ;;  %v12535_v60 = vpop.permute.xlu0 %2590 }
  0xfb   :  { %537 = vmatprep.mubr.f32.mxu0 %v19240_v3  ;;  %19777 = vst [vmem:[#allocation34_spill] sm:$0xff] %v12535_v60 }
  0xfc   :  { %v12529_v43 = vpop.f32.mrf.mxu0  ;;  %7106 = vperm.xlu0 %11827, %v7090_v25   ;;  %v7094_v25 = vadd.s32 34, %v12099_v61  ;;  %v12588_v61 = vpop.permute.xlu1 %2593 }
  0xfd   :  { %19784 = vst [vmem:[#allocation40_spill] sm:$0xff] %v12588_v61 }
  0xfe   :  { %v12533_v18 = vpop.f32.mrf.mxu0  ;;  %538 = vmatmul.mubr.f32.gmra.mxu0 %v102_v31  ;;  %v6470_v31 = vadd.s32 33, %v12130_v4  ;;  %v12559_v48 = vpop.permute.xlu0 %2596 }
  0xff   :  { %543 = vmatprep.mubr.f32.mxu0 %v19240_v3  ;;  %19781 = vst [vmem:[#allocation37_spill] sm:$0xff] %v12559_v48 }
 0x100   :  { %v12544_v21 = vpop.f32.mrf.mxu0  ;;  %6502 = vperm.xlu1 %11828, %v6470_v31   ;;  %7112 = vperm.xlu0 %11827, %v7092_v37   ;;  %v7096_v37 = vadd.s32 34, %v12114_v0  ;;  %v7098_v0 = vadd.s32 34, %v12130_v4  ;;  %v7095_v4 = vadd.s32 34, %v12152_v8  ;;  %v7097_v8 = vadd.s32 34, %v12164_v11 }
 0x101   :  { %v7099_v11 = vadd.s32 34, %v12175_v14 }
 0x102   :  { %v12552_v3 = vpop.f32.mrf.mxu0  ;;  %544 = vmatmul.mubr.f32.gmra.mxu0 %v103_v9  ;;  %v12577_v31 = vpop.permute.xlu0 %2602 }
 0x103   :  { %549 = vmatprep.mubr.f32.mxu0 %v19780_v49  ;;  %19783 = vst [vmem:[#allocation39_spill] sm:$0xff] %v12577_v31 }
 0x104   :  { %v12561_v52 = vpop.f32.mrf.mxu0  ;;  %6508 = vperm.xlu1 %11828, %v6472_v6   ;;  %7118 = vperm.xlu0 %11827, %v7094_v25   ;;  %v7093_v25 = vadd.s32 34, %v12136_v5 }
 0x106   :  { %v12565_v9 = vpop.f32.mrf.mxu0  ;;  %550 = vmatmul.mubr.f32.gmra.mxu0 %v104_v55  ;;  %v106_v55 = vld [vmem:[%s19226_s0 + $0x1d8] sm:$0xff]  ;;  %v12597_v31 = vpop.permute.xlu0 %2608 }
 0x107   :  { %555 = vmatprep.mubr.f32.mxu0 %v19780_v49  ;;  %19785 = vst [vmem:[#allocation41_spill] sm:$0xff] %v12597_v31 }
 0x108   :  { %v12573_v46 = vpop.f32.mrf.mxu0  ;;  %7103 = vperm.xlu1 %11828, %v7089_v58   ;;  %7124 = vperm.xlu0 %11827, %v7096_v37   ;;  %v108_v58 = vld [vmem:[%s19226_s0 + $0x1e8] sm:$0xff]  ;;  %v7100_v37 = vadd.s32 34, %v12146_v7  ;;  %v7838_v7 = vld [vmem:[%s19228_s4] sm:$0xff] }
 0x10a   :  { %v12579_v16 = vpop.f32.mrf.mxu0  ;;  %556 = vmatmul.mubr.f32.gmra.mxu0 %v105_v24  ;;  %v107_v24 = vld [vmem:[%s19226_s0 + $0x1e0] sm:$0xff]  ;;  %v12615_v5 = vpop.permute.xlu0 %2614 }
 0x10b   :  { %561 = vmatprep.mubr.f32.mxu0 %v19780_v49  ;;  %19787 = vst [vmem:[#allocation43_spill] sm:$0xff] %v12615_v5 }
 0x10c   :  { %v12585_v32 = vpop.f32.mrf.mxu0  ;;  %7109 = vperm.xlu1 %11828, %v7091_v62   ;;  %7130 = vperm.xlu0 %11827, %v7098_v0  }
 0x10e   :  { %v12591_v6 = vpop.f32.mrf.mxu0  ;;  %562 = vmatmul.mubr.f32.gmra.mxu0 %v106_v55  ;;  %v12609_v55 = vpop.permute.xlu1 %2599 }
 0x10f   :  { %567 = vmatprep.mubr.f32.mxu0 %v19780_v49  ;;  %19786 = vst [vmem:[#allocation42_spill] sm:$0xff] %v12609_v55  ;;  %v12637_v5 = vpop.permute.xlu0 %2620 }
 0x110   :  { %v12599_v48 = vpop.f32.mrf.mxu0  ;;  %7115 = vperm.xlu1 %11828, %v7093_v25   ;;  %7136 = vperm.xlu0 %11827, %v7100_v37   ;;  %19789 = vst [vmem:[#allocation45_spill] sm:$0xff] %v12637_v5  ;;  %v7842_v5 = vld [vmem:[%s19228_s4 + $0x20] sm:$0xff] }
 0x112   :  { %v12603_v1 = vpop.f32.mrf.mxu0  ;;  %568 = vmatmul.mubr.f32.gmra.mxu0 %v107_v24  ;;  %v109_v24 = vld [vmem:[%s19226_s0 + $0x1f0] sm:$0xff]  ;;  %v12625_v0 = vpop.permute.xlu1 %2605 }
 0x113   :  { %573 = vmatprep.mubr.f32.mxu0 %v19780_v49  ;;  %19788 = vst [vmem:[#allocation44_spill] sm:$0xff] %v12625_v0 }
 0x114   :  { %v12611_v31 = vpop.f32.mrf.mxu0  ;;  %7121 = vperm.xlu1 %11828, %v7095_v4   ;;  %7852 = vperm.xlu0 %11827, %v7838_v7   ;;  %v7840_v4 = vld [vmem:[%s19228_s4 + $0x10] sm:$0xff]  ;;  %v7101_v7 = vadd.s32 34, %v12186_v17  ;;  %v7839_v17 = vld [vmem:[%s19228_s4 + $0x8] sm:$0xff] }
 0x116   :  { %v12617_v62 = vpop.f32.mrf.mxu0  ;;  %574 = vmatmul.mubr.f32.gmra.mxu0 %v108_v58  ;;  %v110_v58 = vld [vmem:[%s19226_s0 + $0x1f8] sm:$0xff] }
 0x117   :  { %579 = vmatprep.mubr.f32.mxu0 %v19780_v49 }
 0x118   :  { %v12623_v55 = vpop.f32.mrf.mxu0  ;;  %7127 = vperm.xlu1 %11828, %v7097_v8   ;;  %7858 = vperm.xlu0 %11827, %v7840_v4   ;;  %v7844_v4 = vld [vmem:[%s19228_s4 + $0x30] sm:$0xff] }
 0x11a   :  { %v12631_v25 = vpop.f32.mrf.mxu0  ;;  %580 = vmatmul.mubr.f32.gmra.mxu0 %v109_v24  ;;  %v12647_v24 = vpop.permute.xlu1 %2611 }
 0x11b   :  { %585 = vmatprep.mubr.f32.mxu0 %v19780_v49  ;;  %19790 = vst [vmem:[#allocation46_spill] sm:$0xff] %v12647_v24  ;;  %v12655_v49 = vpop.permute.xlu0 %2626 }
 0x11c   :  { %v12639_v37 = vpop.f32.mrf.mxu0  ;;  %7133 = vperm.xlu1 %11828, %v7099_v11   ;;  %19791 = vst [vmem:[#allocation47_spill] sm:$0xff] %v12655_v49  ;;  %7864 = vperm.xlu0 %11827, %v7842_v5   ;;  %v7848_v5 = vld [vmem:[%s19228_s4 + $0x50] sm:$0xff] }
 0x11e   :  { %v12645_v0 = vpop.f32.mrf.mxu0  ;;  %586 = vmatmul.mubr.f32.gmra.mxu0 %v110_v58  ;;  %v12661_v58 = vpop.permute.xlu1 %2617 }
 0x11f   :  { %19792 = vst [vmem:[#allocation48_spill] sm:$0xff] %v12661_v58  ;;  %v12671_v11 = vpop.permute.xlu0 %3338 }
 0x120   :  { %v12649_v61 = vpop.f32.mrf.mxu0  ;;  %7139 = vperm.xlu1 %11828, %v7101_v7   ;;  %19793 = vst [vmem:[#allocation49_spill] sm:$0xff] %v12671_v11  ;;  %7870 = vperm.xlu0 %11827, %v7844_v4   ;;  %v7841_v7 = vld [vmem:[%s19228_s4 + $0x18] sm:$0xff] }
 0x121   :  { %v7849_v4 = vld [vmem:[%s19228_s4 + $0x58] sm:$0xff] }
 0x122   :  { %v12657_v8 = vpop.f32.mrf.mxu0  ;;  %v12683_v38 = vpop.permute.xlu1 %2623 }
 0x123   :  { %19794 = vst [vmem:[#allocation50_spill] sm:$0xff] %v12683_v38  ;;  %v12690_v11 = vpop.permute.xlu0 %3344 }
 0x124   :  { %v12659_v14 = vpop.f32.mrf.mxu0  ;;  %7855 = vperm.xlu1 %11828, %v7839_v17   ;;  %7882 = vperm.xlu0 %11827, %v7848_v5   ;;  %19795 = vst [vmem:[#allocation51_spill] sm:$0xff] %v12690_v11  ;;  %v7843_v17 = vld [vmem:[%s19228_s4 + $0x28] sm:$0xff]  ;;  %v7850_v5 = vld [vmem:[%s19228_s4 + $0x60] sm:$0xff] }
 0x126   :  { %v12666_v24 = vpop.f32.mrf.mxu0  ;;  %v12699_v38 = vpop.permute.xlu1 %3335 }
 0x127   :  { %19796 = vst [vmem:[#allocation52_spill] sm:$0xff] %v12699_v38  ;;  %v12709_v11 = vpop.permute.xlu0 %3350  ;;  %v7846_v38 = vld [vmem:[%s19228_s4 + $0x40] sm:$0xff] }
 0x128   :  { %v12673_v49 = vpop.f32.mrf.mxu0  ;;  %7861 = vperm.xlu1 %11828, %v7841_v7   ;;  %7885 = vperm.xlu0 %11827, %v7849_v4   ;;  %v7845_v7 = vld [vmem:[%s19228_s4 + $0x38] sm:$0xff]  ;;  %19798 = vst [vmem:[#allocation54_spill] sm:$0xff] %v12709_v11  ;;  %v7847_v11 = vld [vmem:[%s19228_s4 + $0x48] sm:$0xff] }
 0x12a   :  { %v12678_v58 = vpop.f32.mrf.mxu0  ;;  %v12718_v15 = vpop.permute.xlu1 %3341 }
 0x12b   :  { %19800 = vst [vmem:[#allocation56_spill] sm:$0xff] %v12718_v15 }
 0x12c   :  { %v12685_v54 = vpop.f32.mrf.mxu0  ;;  %7867 = vperm.xlu1 %11828, %v7843_v17   ;;  %7888 = vperm.xlu0 %11827, %v7850_v5  }
 0x12e   :  { %v12692_v30 = vpop.f32.mrf.mxu0  ;;  %v12729_v5 = vpop.permute.xlu1 %3347 }
 0x12f   :  { %19802 = vst [vmem:[#allocation58_spill] sm:$0xff] %v12729_v5 }
 0x130   :  { %v12697_v42 = vpop.f32.mrf.mxu0  ;;  %7873 = vperm.xlu1 %11828, %v7845_v7  }
 0x132   :  { %v12704_v23 = vpop.f32.mrf.mxu0 }
 0x133   :  { %19797 = vst [vmem:[#allocation53_spill] sm:$0xff] %v12704_v23 }
 0x134   :  { %v12711_v34 = vpop.f32.mrf.mxu0  ;;  %7876 = vperm.xlu1 %11828, %v7846_v38  }
 0x136   :  { %v12713_v4 = vpop.f32.mrf.mxu0 }
 0x137   :  { %19799 = vst [vmem:[#allocation55_spill] sm:$0xff] %v12713_v4 }
 0x138   :  { %v12720_v17 = vpop.f32.mrf.mxu0  ;;  %7879 = vperm.xlu1 %11828, %v7847_v11  }
 0x13a   :  { %v12722_v26 = vpop.f32.mrf.mxu0 }
 0x13b   :  { %19801 = vst [vmem:[#allocation57_spill] sm:$0xff] %v12722_v26 }
 0x13c   :  { %v12727_v2 = vpop.f32.mrf.mxu0 }
 0x13e   :  { %v12731_v7 = vpop.f32.mrf.mxu0 }
 0x13f   :  { %19803 = vst [vmem:[#allocation59_spill] sm:$0xff] %v12731_v7 }
 0x140   :  { %v12733_v20 = vpop.f32.mrf.mxu0 }
 0x142   :  { %v12735_v53 = vpop.f32.mrf.mxu0 }
 0x143   :  { %19804 = vst [vmem:[#allocation60_spill] sm:$0xff] %v12735_v53 }
 0x144   :  { %v355_v15 = vpop.f32.mrf.mxu0 }
 0x146   :  { %v12737_v10 = vpop.f32.mrf.mxu0 }
 0x147   :  { %19805 = vst [vmem:[#allocation61_spill] sm:$0xff] %v12737_v10  ;;  %v664_v10 = vmul.f32 %v12455_v63, %v12455_v63 }
 0x148   :  { %v361_v38 = vpop.f32.mrf.mxu0 }
 0x14a   :  { %v12739_v60 = vpop.f32.mrf.mxu0 }
 0x14b   :  { %19806 = vst [vmem:[#allocation62_spill] sm:$0xff] %v12739_v60 }
 0x14c   :  { %v367_v47 = vpop.f32.mrf.mxu0 }
 0x14e   :  { %v12741_v59 = vpop.f32.mrf.mxu0 }
 0x14f   :  { %19807 = vst [vmem:[#allocation63_spill] sm:$0xff] %v12741_v59 }
 0x150   :  { %v373_v40 = vpop.f32.mrf.mxu0 }
 0x152   :  { %v12743_v26 = vpop.f32.mrf.mxu0 }
 0x153   :  { %19808 = vst [vmem:[#allocation64_spill] sm:$0xff] %v12743_v26  ;;  %v663_v26 = vmul.f32 %v12443_v51, %v12443_v51 }
 0x154   :  { %v379_v5 = vpop.f32.mrf.mxu0 }
 0x155   :  { %v727_v59 = vadd.f32 %v664_v10, %v663_v26 }
 0x156   :  { %v12745_v11 = vpop.f32.mrf.mxu0 }
 0x157   :  { %19809 = vst [vmem:[#allocation65_spill] sm:$0xff] %v12745_v11  ;;  %v594_v11 = vadd.f32 %v12455_v63, %v12443_v51 }
 0x158   :  { %v385_v7 = vpop.f32.mrf.mxu0 }
 0x15a   :  { %v12747_v4 = vpop.f32.mrf.mxu0 }
 0x15b   :  { %19810 = vst [vmem:[#allocation66_spill] sm:$0xff] %v12747_v4  ;;  %v665_v4 = vmul.f32 %v12469_v19, %v12469_v19 }
 0x15c   :  { %v391_v50 = vpop.f32.mrf.mxu0 }
 0x15d   :  { %v728_v63 = vadd.f32 %v727_v59, %v665_v4  ;;  %v669_v4 = vmul.f32 %v12519_v27, %v12519_v27 }
 0x15e   :  { %v12749_v53 = vpop.f32.mrf.mxu0 }
 0x15f   :  { %19811 = vst [vmem:[#allocation67_spill] sm:$0xff] %v12749_v53 }
 0x160   :  { %v397_v23 = vpop.f32.mrf.mxu0 }
 0x161   :  { %9353 = vmatprep.subr.mxu1 %v397_v23  ;;  %v595_v23 = vadd.f32 %v594_v11, %v12469_v19 }
 0x162   :  { %v12753_v60 = vpop.f32.mrf.mxu0  ;;  %9354 = vmatpush3.msra.mxu1 %v12649_v61  ;;  %v666_v61 = vmul.f32 %v12481_v28, %v12481_v28 }
 0x163   :  { %19812 = vst [vmem:[#allocation68_spill] sm:$0xff] %v12753_v60  ;;  %9355 = vmatprep.subr.mxu1 %v391_v50  ;;  %v596_v51 = vadd.f32 %v595_v23, %v12481_v28  ;;  %v667_v50 = vmul.f32 %v12493_v39, %v12493_v39 }
 0x164   :  { %v12762_v53 = vpop.f32.mrf.mxu0  ;;  %9356 = vmatpush3.msra.mxu1 %v12639_v37  ;;  %v729_v10 = vadd.f32 %v728_v63, %v666_v61  ;;  %v668_v37 = vmul.f32 %v12507_v57, %v12507_v57 }
 0x165   :  { %19813 = vst [vmem:[#allocation69_spill] sm:$0xff] %v12762_v53  ;;  %9357 = vmatprep.subr.mxu1 %v385_v7  ;;  %v597_v26 = vadd.f32 %v596_v51, %v12493_v39 }
 0x166   :  { %v12768_v60 = vpop.f32.mrf.mxu0  ;;  %9358 = vmatpush3.msra.mxu1 %v12623_v55  ;;  %v730_v59 = vadd.f32 %v729_v10, %v667_v50 }
 0x167   :  { %9359 = vmatprep.subr.mxu1 %v379_v5  ;;  %v598_v55 = vadd.f32 %v597_v26, %v12507_v57 }
 0x168   :  { %v12774_v53 = vpop.f32.mrf.mxu0  ;;  %9360 = vmatpush3.msra.mxu1 %v12611_v31  ;;  %v731_v51 = vadd.f32 %v730_v59, %v668_v37 }
 0x169   :  { %19814 = vst [vmem:[#allocation70_spill] sm:$0xff] %v12774_v53  ;;  %9361 = vmatprep.subr.mxu1 %v373_v40  ;;  %v599_v63 = vadd.f32 %v598_v55, %v12519_v27  ;;  %v670_v40 = vmul.f32 %v12533_v18, %v12533_v18  ;;  %v12942_v53 = vadd.s32 384, %v12525_v36 }
 0x16a   :  { %v12780_v7 = vpop.f32.mrf.mxu0  ;;  %9362 = vmatpush3.msra.mxu1 %v12599_v48  ;;  %v732_v48 = vadd.f32 %v731_v51, %v669_v4 }
 0x16b   :  { %19815 = vst [vmem:[#allocation71_spill] sm:$0xff] %v12780_v7  ;;  %9363 = vmatprep.subr.mxu1 %v367_v47  ;;  %v600_v11 = vadd.f32 %v599_v63, %v12533_v18  ;;  %v671_v47 = vmul.f32 %v12552_v3, %v12552_v3  ;;  %19841 = vst [vmem:[#allocation84_spill] sm:$0xff] %v12942_v53 }
 0x16c   :  { %v12786_v5 = vpop.f32.mrf.mxu0  ;;  %9364 = vmatpush3.msra.mxu1 %v12585_v32  ;;  %v733_v32 = vadd.f32 %v732_v48, %v670_v40 }
 0x16d   :  { %19816 = vst [vmem:[#allocation72_spill] sm:$0xff] %v12786_v5  ;;  %9365 = vmatprep.subr.mxu1 %v361_v38  ;;  %v601_v61 = vadd.f32 %v600_v11, %v12552_v3  ;;  %v672_v38 = vmul.f32 %v12565_v9, %v12565_v9 }
 0x16e   :  { %v12792_v31 = vpop.f32.mrf.mxu0  ;;  %9366 = vmatpush3.msra.mxu1 %v12573_v46  ;;  %v734_v50 = vadd.f32 %v733_v32, %v671_v47 }
 0x16f   :  { %19817 = vst [vmem:[#allocation73_spill] sm:$0xff] %v12792_v31  ;;  %9367 = vmatprep.subr.mxu1 %v355_v15  ;;  %v602_v10 = vadd.f32 %v601_v61, %v12565_v9  ;;  %v673_v15 = vmul.f32 %v12579_v16, %v12579_v16  ;;  %v680_v61 = vmul.f32 %v12666_v24, %v12666_v24 }
 0x170   :  { %v12798_v23 = vpop.f32.mrf.mxu0  ;;  %9368 = vmatpush3.msra.mxu1 %v12561_v52  ;;  %v735_v26 = vadd.f32 %v734_v50, %v672_v38  ;;  %v19824_v38 = vmov 1.0  }
 0x171   :  { %19818 = vst [vmem:[#allocation74_spill] sm:$0xff] %v12798_v23  ;;  %9369 = vmatprep.subr.mxu1 %v12733_v20  ;;  %v603_v37 = vadd.f32 %v602_v10, %v12579_v16  ;;  %v674_v20 = vmul.f32 %v12591_v6, %v12591_v6  ;;  %v19842_v23 = vld [vmem:[#allocation63_spill] sm:$0xff] }
 0x172   :  { %v12805_v46 = vpop.f32.mrf.mxu0  ;;  %9370 = vmatpush3.msra.mxu1 %v12544_v21  ;;  %v736_v59 = vadd.f32 %v735_v26, %v673_v15 }
 0x173   :  { %19819 = vst [vmem:[#allocation75_spill] sm:$0xff] %v12805_v46  ;;  %9371 = vmatprep.subr.mxu1 %v12727_v2  ;;  %v604_v55 = vadd.f32 %v603_v37, %v12591_v6  ;;  %v675_v2 = vmul.f32 %v12603_v1, %v12603_v1 }
 0x174   :  { %v12812_v52 = vpop.f32.mrf.mxu0  ;;  %9372 = vmatpush3.msra.mxu1 %v12529_v43  ;;  %v737_v4 = vadd.f32 %v736_v59, %v674_v20  ;;  %v682_v20 = vmul.f32 %v12692_v30, %v12692_v30 }
 0x175   :  { %19820 = vst [vmem:[#allocation76_spill] sm:$0xff] %v12812_v52  ;;  %9373 = vmatprep.subr.mxu1 %v12720_v17  ;;  %v605_v51 = vadd.f32 %v604_v55, %v12603_v1  ;;  %v676_v17 = vmul.f32 %v12617_v62, %v12617_v62  ;;  %v19851_v52 = vld [vmem:[#allocation67_spill] sm:$0xff] }
 0x176   :  { %v12819_v21 = vpop.f32.mrf.mxu0  ;;  %9374 = vmatpush3.msra.mxu1 %v12513_v13  ;;  %v738_v63 = vadd.f32 %v737_v4, %v675_v2  ;;  %v19827_v4 = vld [vmem:[#allocation53_spill] sm:$0xff] }
 0x177   :  { %19821 = vst [vmem:[#allocation77_spill] sm:$0xff] %v12819_v21  ;;  %9375 = vmatprep.subr.mxu1 %v12711_v34  ;;  %v606_v40 = vadd.f32 %v605_v51, %v12617_v62  ;;  %v677_v34 = vmul.f32 %v12631_v25, %v12631_v25  ;;  %v683_v51 = vmul.f32 %v19827_v4, %v19827_v4 }
 0x178   :  { %v12826_v43 = vpop.f32.mrf.mxu0  ;;  %9376 = vmatpush3.msra.mxu1 %v12501_v45  ;;  %v739_v48 = vadd.f32 %v738_v63, %v676_v17  ;;  %v19828_v17 = vld [vmem:[#allocation8_spill] sm:$0xff] }
 0x179   :  { %9377 = vmatprep.subr.mxu1 %v12697_v42  ;;  %v607_v11 = vadd.f32 %v606_v40, %v12631_v25  ;;  %v678_v42 = vmul.f32 %v12645_v0, %v12645_v0  ;;  %vm1417_vm6 = vcmp.eq.s32.totalorder %v19828_v17, %v12542_v41  ;;  %vm1416_vm7 = vcmp.eq.s32.totalorder %v19828_v17, %v12525_v36 }
 0x17a   :  { %v12833_v13 = vpop.f32.mrf.mxu0  ;;  %9378 = vmatpush3.msra.mxu1 %v12489_v33 }
 0x17b   :  { %19822 = vst [vmem:[#allocation78_spill] sm:$0xff] %v12833_v13  ;;  %9379 = vmatprep.subr.mxu1 %v12685_v54  ;;  %v740_v54 = vadd.f32 %v739_v48, %v677_v34  ;;  %v608_v47 = vadd.f32 %v607_v11, %v12645_v0  ;;  %v19829_v48 = vld [vmem:[#allocation55_spill] sm:$0xff] }
 0x17c   :  { %v12840_v45 = vpop.f32.mrf.mxu0  ;;  %9380 = vmatpush3.msra.mxu1 %v12475_v22  ;;  %v679_v22 = vmul.f32 %v12657_v8, %v12657_v8  ;;  %v684_v11 = vmul.f32 %v19829_v48, %v19829_v48 }
 0x17d   :  { %9381 = vmatprep.subr.mxu1 %v12673_v49  ;;  %v741_v49 = vadd.f32 %v740_v54, %v678_v42 }
 0x17e   :  { %v12847_v33 = vpop.f32.mrf.mxu0  ;;  %9382 = vmatpush3.msra.mxu1 %v12463_v12  ;;  %v609_v12 = vadd.f32 %v608_v47, %v12657_v8 }
 0x17f   :  { %19823 = vst [vmem:[#allocation79_spill] sm:$0xff] %v12847_v33  ;;  %9383 = vmatprep.subr.mxu1 %v12659_v14  ;;  %v742_v14 = vadd.f32 %v741_v49, %v679_v22  ;;  %v19831_v22 = vld [vmem:[#allocation57_spill] sm:$0xff] }
 0x180   :  { %v12858_v32 = vpop.f32.mrf.mxu0  ;;  %9384 = vmatpush3.msra.mxu1 %v12451_v56  ;;  %v610_v10 = vadd.f32 %v609_v12, %v12666_v24  ;;  %v681_v56 = vmul.f32 %v12678_v58, %v12678_v58  ;;  %v685_v49 = vmul.f32 %v19831_v22, %v19831_v22  ;;  %v19832_v12 = vld [vmem:[#allocation5_spill] sm:$0xff] }
 0x181   :  { %8196 = vmatmul.mubr.msk.f32.vlgmr.msra.gmra.mxu1 %vm1404_vm1, %v19824_v38  ;;  %v743_v26 = vadd.f32 %v742_v14, %v680_v61  ;;  %vm1421_vm8 = vcmp.eq.s32.totalorder %v19832_v12, %v12542_v41  ;;  %vm1420_vm9 = vcmp.eq.s32.totalorder %v19832_v12, %v12525_v36 }
 0x182   :  { %v12865_v50 = vpop.f32.mrf.mxu0  ;;  %8197 = vmatprep.mubr.msk.f32.mxu1 %vm1409_vm2, %v19824_v38  ;;  %v611_v37 = vadd.f32 %v610_v10, %v12678_v58 }
 0x183   :  { %19825 = vst [vmem:[#allocation80_spill] sm:$0xff] %v12865_v50  ;;  %v744_v55 = vadd.f32 %v743_v26, %v681_v56  ;;  %v19833_v56 = vld [vmem:[#allocation59_spill] sm:$0xff] }
 0x184   :  { %v12875_v15 = vpop.f32.mrf.mxu0  ;;  %v612_v2 = vadd.f32 %v611_v37, %v12692_v30  ;;  %v686_v26 = vmul.f32 %v19833_v56, %v19833_v56 }
 0x185   :  { %8198 = vmatmul.mubr.msk.f32.gmra.mxu1 %vm1408_vm3, %v19824_v38  ;;  %v745_v40 = vadd.f32 %v744_v55, %v682_v20 }
 0x186   :  { %v12881_v59 = vpop.f32.mrf.mxu0  ;;  %8199 = vmatprep.mubr.msk.f32.mxu1 %vm1413_vm4, %v19824_v38  ;;  %v613_v34 = vadd.f32 %v612_v2, %v19827_v4  ;;  %v19835_v2 = vld [vmem:[#allocation60_spill] sm:$0xff] }
 0x187   :  { %19826 = vst [vmem:[#allocation81_spill] sm:$0xff] %v12881_v59  ;;  %v746_v54 = vadd.f32 %v745_v40, %v683_v51  ;;  %v687_v51 = vmul.f32 %v19835_v2, %v19835_v2  ;;  %v19836_v40 = vld [vmem:[#allocation10_spill] sm:$0xff] }
 0x188   :  { %v12891_v63 = vpop.f32.mrf.mxu0  ;;  %v614_v47 = vadd.f32 %v613_v34, %v19829_v48  ;;  %vm1425_vm10 = vcmp.eq.s32.totalorder %v19836_v40, %v12542_v41  ;;  %vm1424_vm11 = vcmp.eq.s32.totalorder %v19836_v40, %v12525_v36  ;;  %v690_v40 = vmul.f32 %v19842_v23, %v19842_v23 }
 0x189   :  { %8200 = vmatmul.mubr.msk.f32.gmra.mxu1 %vm1412_vm5, %v19824_v38  ;;  %v747_v14 = vadd.f32 %v746_v54, %v684_v11  ;;  %v696_v48 = vmul.f32 %v12768_v60, %v12768_v60 }
 0x18a   :  { %v12897_v42 = vpop.f32.mrf.mxu0  ;;  %8201 = vmatprep.mubr.msk.f32.mxu1 %vm1417_vm6, %v19824_v38  ;;  %v615_v10 = vadd.f32 %v614_v47, %v19831_v22  ;;  %v19837_v47 = vld [vmem:[#allocation61_spill] sm:$0xff]  ;;  %v694_v22 = vmul.f32 %v19851_v52, %v19851_v52 }
 0x18b   :  { %19830 = vst [vmem:[#allocation53_spill] sm:$0xff] %v12897_v42  ;;  %v748_v20 = vadd.f32 %v747_v14, %v685_v49  ;;  %v688_v17 = vmul.f32 %v19837_v47, %v19837_v47 }
 0x18c   :  { %v12907_v61 = vpop.f32.mrf.mxu0  ;;  %v616_v55 = vadd.f32 %v615_v10, %v19833_v56  ;;  %v19839_v10 = vld [vmem:[#allocation62_spill] sm:$0xff] }
 0x18d   :  { %8202 = vmatmul.mubr.msk.f32.gmra.mxu1 %vm1416_vm7, %v19824_v38  ;;  %v749_v11 = vadd.f32 %v748_v20, %v686_v26  ;;  %v689_v26 = vmul.f32 %v19839_v10, %v19839_v10  ;;  %v19840_v20 = vld [vmem:[#allocation7_spill] sm:$0xff] }
 0x18e   :  { %v12913_v37 = vpop.f32.mrf.mxu0  ;;  %8203 = vmatprep.mubr.msk.f32.mxu1 %vm1421_vm8, %v19824_v38  ;;  %v617_v54 = vadd.f32 %v616_v55, %v19835_v2  ;;  %vm1429_vm12 = vcmp.eq.s32.totalorder %v19840_v20, %v12542_v41  ;;  %vm1428_vm13 = vcmp.eq.s32.totalorder %v19840_v20, %v12525_v36  ;;  %v19847_v20 = vld [vmem:[#allocation65_spill] sm:$0xff] }
 0x18f   :  { %19834 = vst [vmem:[#allocation82_spill] sm:$0xff] %v12913_v37  ;;  %v750_v49 = vadd.f32 %v749_v11, %v687_v51  ;;  %v19844_v11 = vld [vmem:[#allocation34_spill] sm:$0xff]  ;;  %v692_v56 = vmul.f32 %v19847_v20, %v19847_v20 }
 0x190   :  { %v12923_v34 = vpop.f32.mrf.mxu0  ;;  %v618_v14 = vadd.f32 %v617_v54, %v19837_v47  ;;  %vm2631_vm14 = vcmp.eq.s32.totalorder %v19844_v11, %v12942_v53  ;;  %v19849_v11 = vld [vmem:[#allocation66_spill] sm:$0xff] }
 0x191   :  { %8204 = vmatmul.mubr.msk.f32.gmra.mxu1 %vm1420_vm9, %v19824_v38  ;;  %v751_v44 = vadd.f32 %v750_v49, %v688_v17  ;;  %v19845_v49 = vld [vmem:[#allocation64_spill] sm:$0xff]  ;;  %8443 = vmatprep.mubr.msk.f32.mxu0 %vm2631_vm14, %v19824_v38 }
 0x192   :  { %v12929_v12 = vpop.f32.mrf.mxu0  ;;  %8205 = vmatprep.mubr.msk.f32.mxu1 %vm1425_vm10, %v19824_v38  ;;  %v619_v5 = vadd.f32 %v618_v14, %v19839_v10  ;;  %v691_v14 = vmul.f32 %v19845_v49, %v19845_v49 }
 0x193   :  { %19838 = vst [vmem:[#allocation83_spill] sm:$0xff] %v12929_v12  ;;  %v752_v54 = vadd.f32 %v751_v44, %v689_v26 }
 0x194   :  { %v12939_v55 = vpop.f32.mrf.mxu0  ;;  %v620_v17 = vadd.f32 %v619_v5, %v19842_v23 }
 0x195   :  { %8206 = vmatmul.mubr.msk.f32.gmra.mxu1 %vm1424_vm11, %v19824_v38  ;;  %v753_v47 = vadd.f32 %v752_v54, %v690_v40  ;;  %v693_v40 = vmul.f32 %v19849_v11, %v19849_v11  ;;  %v19850_v54 = vld [vmem:[#allocation9_spill] sm:$0xff] }
 0x196   :  { %v12948_v51 = vpop.f32.mrf.mxu0  ;;  %8207 = vmatprep.mubr.msk.f32.mxu1 %vm1429_vm12, %v19824_v38  ;;  %v621_v2 = vadd.f32 %v620_v17, %v19845_v49  ;;  %vm1437_vm1 = vcmp.eq.s32.totalorder %v19850_v54, %v12542_v41  ;;  %vm1436_vm2 = vcmp.eq.s32.totalorder %v19850_v54, %v12525_v36 }
 0x197   :  { %19843 = vst [vmem:[#allocation85_spill] sm:$0xff] %v12948_v51  ;;  %v754_v5 = vadd.f32 %v753_v47, %v691_v14  ;;  %v19853_v14 = vld [vmem:[#allocation68_spill] sm:$0xff] }
 0x198   :  { %v12961_v10 = vpop.f32.mrf.mxu0  ;;  %v622_v26 = vadd.f32 %v621_v2, %v19847_v20 }
 0x199   :  { %8208 = vmatmul.mubr.msk.f32.gmra.mxu1 %vm1428_vm13, %v19824_v38  ;;  %v755_v49 = vadd.f32 %v754_v5, %v692_v56  ;;  %v695_v56 = vmul.f32 %v19853_v14, %v19853_v14  ;;  %v19854_v5 = vld [vmem:[#allocation14_spill] sm:$0xff] }
 0x19a   :  { %v12967_v44 = vpop.f32.mrf.mxu0  ;;  %8209 = vmatprep.mubr.msk.f32.mxu1 %vm1433_vm15, %v19824_v38  ;;  %v623_v23 = vadd.f32 %v622_v26, %v19849_v11  ;;  %vm1441_vm3 = vcmp.eq.s32.totalorder %v19854_v5, %v12542_v41  ;;  %vm1440_vm4 = vcmp.eq.s32.totalorder %v19854_v5, %v12525_v36 }
 0x19b   :  { %19848 = vst [vmem:[#allocation86_spill] sm:$0xff] %v12967_v44  ;;  %v756_v2 = vadd.f32 %v755_v49, %v693_v40  ;;  %v19856_v40 = vld [vmem:[#allocation11_spill] sm:$0xff] }
 0x19c   :  { %v12977_v17 = vpop.f32.mrf.mxu0  ;;  %v624_v47 = vadd.f32 %v623_v23, %v19851_v52  ;;  %vm1445_vm5 = vcmp.eq.s32.totalorder %v19856_v40, %v12542_v41  ;;  %v698_v52 = vmul.f32 %v12792_v31, %v12792_v31  ;;  %vm1444_vm6 = vcmp.eq.s32.totalorder %v19856_v40, %v12525_v36 }
 0x19d   :  { %8210 = vmatmul.mubr.msk.f32.gmra.mxu1 %vm1432_vm0, %v19824_v38  ;;  %v757_v11 = vadd.f32 %v756_v2, %v694_v22  ;;  %v697_v22 = vmul.f32 %v12780_v7, %v12780_v7 }
 0x19e   :  { %v12983_v35 = vpop.f32.mrf.mxu0  ;;  %8211 = vmatprep.mubr.msk.f32.mxu1 %vm1437_vm1, %v19824_v38  ;;  %v625_v20 = vadd.f32 %v624_v47, %v19853_v14  ;;  %vm1407_vm1 = vcmp.eq.s32.totalorder %v12313_v29, %v12942_v53 }
 0x19f   :  { %19852 = vst [vmem:[#allocation87_spill] sm:$0xff] %v12983_v35  ;;  %v758_v23 = vadd.f32 %v757_v11, %v695_v56  ;;  %v19859_v56 = vld [vmem:[#allocation16_spill] sm:$0xff] }
 0x1a0   :  { %v12993_v26 = vpop.f32.mrf.mxu0  ;;  %v626_v49 = vadd.f32 %v625_v20, %v12768_v60  ;;  %vm1449_vm7 = vcmp.eq.s32.totalorder %v19859_v56, %v12542_v41  ;;  %vm1448_vm8 = vcmp.eq.s32.totalorder %v19859_v56, %v12525_v36 }
 0x1a1   :  { %8212 = vmatmul.mubr.msk.f32.gmra.mxu1 %vm1436_vm2, %v19824_v38  ;;  %v759_v47 = vadd.f32 %v758_v23, %v696_v48  ;;  %v699_v48 = vmul.f32 %v12805_v46, %v12805_v46 }
 0x1a2   :  { %v12999_v54 = vpop.f32.mrf.mxu0  ;;  %8213 = vmatprep.mubr.msk.f32.mxu1 %vm1441_vm3, %v19824_v38  ;;  %v627_v14 = vadd.f32 %v626_v49, %v12780_v7  ;;  %v700_v7 = vmul.f32 %v12819_v21, %v12819_v21 }
 0x1a3   :  { %19855 = vst [vmem:[#allocation88_spill] sm:$0xff] %v12999_v54  ;;  %v760_v20 = vadd.f32 %v759_v47, %v697_v22  ;;  %v19862_v47 = vld [vmem:[#allocation13_spill] sm:$0xff] }
 0x1a4   :  { %v13009_v2 = vpop.f32.mrf.mxu0  ;;  %v628_v11 = vadd.f32 %v627_v14, %v12792_v31  ;;  %vm1453_vm9 = vcmp.eq.s32.totalorder %v19862_v47, %v12542_v41  ;;  %vm1452_vm10 = vcmp.eq.s32.totalorder %v19862_v47, %v12525_v36 }
 0x1a5   :  { %19857 = vst [vmem:[#allocation89_spill] sm:$0xff] %v13009_v2  ;;  %8214 = vmatmul.mubr.msk.f32.gmra.mxu1 %vm1440_vm4, %v19824_v38  ;;  %v761_v49 = vadd.f32 %v760_v20, %v698_v52  ;;  %v701_v52 = vmul.f32 %v12833_v13, %v12833_v13 }
 0x1a6   :  { %v13015_v5 = vpop.f32.mrf.mxu0  ;;  %8215 = vmatprep.mubr.msk.f32.mxu1 %vm1445_vm5, %v19824_v38  ;;  %v629_v2 = vadd.f32 %v628_v11, %v12805_v46  ;;  %v702_v46 = vmul.f32 %v12847_v33, %v12847_v33 }
 0x1a7   :  { %19858 = vst [vmem:[#allocation90_spill] sm:$0xff] %v13015_v5  ;;  %v762_v14 = vadd.f32 %v761_v49, %v699_v48  ;;  %v19864_v49 = vld [vmem:[#allocation18_spill] sm:$0xff] }
 0x1a8   :  { %v13025_v23 = vpop.f32.mrf.mxu0  ;;  %v630_v22 = vadd.f32 %v629_v2, %v12819_v21  ;;  %vm1457_vm11 = vcmp.eq.s32.totalorder %v19864_v49, %v12542_v41  ;;  %v704_v21 = vmul.f32 %v12881_v59, %v12881_v59  ;;  %vm1456_vm12 = vcmp.eq.s32.totalorder %v19864_v49, %v12525_v36 }
 0x1a9   :  { %19860 = vst [vmem:[#allocation91_spill] sm:$0xff] %v13025_v23  ;;  %8216 = vmatmul.mubr.msk.f32.gmra.mxu1 %vm1444_vm6, %v19824_v38  ;;  %v763_v11 = vadd.f32 %v762_v14, %v700_v7  ;;  %v703_v7 = vmul.f32 %v12865_v50, %v12865_v50 }
 0x1aa   :  { %v13031_v40 = vpop.f32.mrf.mxu0  ;;  %8217 = vmatprep.mubr.msk.f32.mxu1 %vm1449_vm7, %v19824_v38  ;;  %v631_v23 = vadd.f32 %v630_v22, %v12833_v13 }
 0x1ab   :  { %19861 = vst [vmem:[#allocation92_spill] sm:$0xff] %v13031_v40  ;;  %v764_v2 = vadd.f32 %v763_v11, %v701_v52  ;;  %v19866_v11 = vld [vmem:[#allocation15_spill] sm:$0xff] }
 0x1ac   :  { %v13041_v20 = vpop.f32.mrf.mxu0  ;;  %v632_v48 = vadd.f32 %v631_v23, %v12847_v33  ;;  %vm1461_vm13 = vcmp.eq.s32.totalorder %v19866_v11, %v12542_v41  ;;  %v706_v33 = vmul.f32 %v12913_v37, %v12913_v37  ;;  %vm1460_vm14 = vcmp.eq.s32.totalorder %v19866_v11, %v12525_v36 }
 0x1ad   :  { %8218 = vmatmul.mubr.msk.f32.gmra.mxu1 %vm1448_vm8, %v19824_v38  ;;  %v765_v22 = vadd.f32 %v764_v2, %v702_v46  ;;  %v705_v46 = vmul.f32 %v12897_v42, %v12897_v42 }
 0x1ae   :  { %v13047_v56 = vpop.f32.mrf.mxu0  ;;  %8219 = vmatprep.mubr.msk.f32.mxu1 %vm1453_vm9, %v19824_v38  ;;  %v633_v13 = vadd.f32 %v632_v48, %v12865_v50 }
 0x1af   :  { %19863 = vst [vmem:[#allocation93_spill] sm:$0xff] %v13047_v56  ;;  %v766_v23 = vadd.f32 %v765_v22, %v703_v7  ;;  %v19868_v22 = vld [vmem:[#allocation20_spill] sm:$0xff] }
 0x1b0   :  { %v13057_v14 = vpop.f32.mrf.mxu0  ;;  %v634_v52 = vadd.f32 %v633_v13, %v12881_v59  ;;  %vm1465_vm15 = vcmp.eq.s32.totalorder %v19868_v22, %v12542_v41  ;;  %v708_v59 = vmul.f32 %v12948_v51, %v12948_v51  ;;  %vm1464_vm0 = vcmp.eq.s32.totalorder %v19868_v22, %v12525_v36 }
 0x1b1   :  { %8220 = vmatmul.mubr.msk.f32.gmra.mxu1 %vm1452_vm10, %v19824_v38  ;;  %v767_v48 = vadd.f32 %v766_v23, %v704_v21  ;;  %v707_v21 = vmul.f32 %v12929_v12, %v12929_v12  ;;  %v710_v41 = vmul.f32 %v12983_v35, %v12983_v35 }
 0x1b2   :  { %v13063_v47 = vpop.f32.mrf.mxu0  ;;  %8221 = vmatprep.mubr.msk.f32.mxu1 %vm1457_vm11, %v19824_v38  ;;  %v635_v50 = vadd.f32 %v634_v52, %v12897_v42 }
 0x1b3   :  { %19865 = vst [vmem:[#allocation94_spill] sm:$0xff] %v13063_v47  ;;  %v768_v13 = vadd.f32 %v767_v48, %v705_v46 }
 0x1b4   :  { %v13073_v2 = vpop.f32.mrf.mxu0  ;;  %v636_v7 = vadd.f32 %v635_v50, %v12913_v37 }
 0x1b5   :  { %8222 = vmatmul.mubr.msk.f32.gmra.mxu1 %vm1456_vm12, %v19824_v38  ;;  %v769_v52 = vadd.f32 %v768_v13, %v706_v33  ;;  %v709_v33 = vmul.f32 %v12967_v44, %v12967_v44 }
 0x1b6   :  { %v13079_v49 = vpop.f32.mrf.mxu0  ;;  %8223 = vmatprep.mubr.msk.f32.mxu1 %vm1461_vm13, %v19824_v38  ;;  %v637_v42 = vadd.f32 %v636_v7, %v12929_v12 }
 0x1b7   :  { %19867 = vst [vmem:[#allocation95_spill] sm:$0xff] %v13079_v49  ;;  %v770_v50 = vadd.f32 %v769_v52, %v707_v21  ;;  %v711_v52 = vmul.f32 %v12999_v54, %v12999_v54 }
 0x1b8   :  { %v13089_v23 = vpop.f32.mrf.mxu0  ;;  %v638_v46 = vadd.f32 %v637_v42, %v12948_v51 }
 0x1b9   :  { %8224 = vmatmul.mubr.msk.f32.gmra.mxu1 %vm1460_vm14, %v19824_v38  ;;  %v771_v13 = vadd.f32 %v770_v50, %v708_v59 }
 0x1ba   :  { %v13095_v11 = vpop.f32.mrf.mxu0  ;;  %8225 = vmatprep.mubr.msk.f32.mxu1 %vm1465_vm15, %v19824_v38  ;;  %v639_v7 = vadd.f32 %v638_v46, %v12967_v44  ;;  %v712_v46 = vmul.f32 %v13015_v5, %v13015_v5 }
 0x1bb   :  { %19869 = vst [vmem:[#allocation96_spill] sm:$0xff] %v13095_v11  ;;  %v772_v42 = vadd.f32 %v771_v13, %v709_v33  ;;  %v713_v33 = vmul.f32 %v13031_v40, %v13031_v40 }
 0x1bc   :  { %v13105_v48 = vpop.f32.mrf.mxu0  ;;  %v640_v21 = vadd.f32 %v639_v7, %v12983_v35 }
 0x1bd   :  { %8226 = vmatmul.mubr.msk.f32.gmra.mxu1 %vm1464_vm0, %v19824_v38  ;;  %v773_v59 = vadd.f32 %v772_v42, %v710_v41  ;;  %v714_v41 = vmul.f32 %v13047_v56, %v13047_v56 }
 0x1be   :  { %v13111_v22 = vpop.f32.mrf.mxu0  ;;  %8227 = vmatprep.mubr.msk.f32.mxu1 %vm1407_vm1, %v19824_v38  ;;  %v641_v50 = vadd.f32 %v640_v21, %v12999_v54 }
 0x1bf   :  { %19870 = vst [vmem:[#allocation97_spill] sm:$0xff] %v13111_v22  ;;  %v774_v12 = vadd.f32 %v773_v59, %v711_v52  ;;  %v715_v52 = vmul.f32 %v13063_v47, %v13063_v47 }
 0x1c0   :  { %v13117_v51 = vpop.f32.mrf.mxu0  ;;  %v642_v37 = vadd.f32 %v641_v50, %v13015_v5 }
 0x1c1   :  { %v775_v7 = vadd.f32 %v774_v12, %v712_v46  ;;  %v716_v12 = vmul.f32 %v13079_v49, %v13079_v49 }
 0x1c2   :  { %v13122_v44 = vpop.f32.mrf.mxu0  ;;  %v643_v38 = vadd.f32 %v642_v37, %v13031_v40 }
 0x1c3   :  { %19871 = vst [vmem:[#allocation98_spill] sm:$0xff] %v13122_v44  ;;  %v776_v21 = vadd.f32 %v775_v7, %v713_v33  ;;  %v717_v33 = vmul.f32 %v13095_v11, %v13095_v11 }
 0x1c4   :  { %v13127_v13 = vpop.f32.mrf.mxu0  ;;  %v644_v54 = vadd.f32 %v643_v38, %v13047_v56 }
 0x1c5   :  { %v777_v50 = vadd.f32 %v776_v21, %v714_v41  ;;  %v718_v41 = vmul.f32 %v13111_v22, %v13111_v22 }
 0x1c6   :  { %v13132_v42 = vpop.f32.mrf.mxu0  ;;  %v645_v5 = vadd.f32 %v644_v54, %v13063_v47 }
 0x1c7   :  { %19872 = vst [vmem:[#allocation99_spill] sm:$0xff] %v13132_v42  ;;  %v778_v46 = vadd.f32 %v777_v50, %v715_v52  ;;  %v719_v52 = vmul.f32 %v13122_v44, %v13122_v44 }
 0x1c8   :  { %v13137_v59 = vpop.f32.mrf.mxu0  ;;  %v646_v40 = vadd.f32 %v645_v5, %v13079_v49 }
 0x1c9   :  { %v779_v7 = vadd.f32 %v778_v46, %v716_v12  ;;  %v720_v12 = vmul.f32 %v13132_v42, %v13132_v42 }
 0x1ca   :  { %v13142_v37 = vpop.f32.mrf.mxu0  ;;  %v647_v56 = vadd.f32 %v646_v40, %v13095_v11 }
 0x1cb   :  { %19873 = vst [vmem:[#allocation100_spill] sm:$0xff] %v13142_v37  ;;  %v780_v54 = vadd.f32 %v779_v7, %v717_v33  ;;  %v721_v33 = vmul.f32 %v13142_v37, %v13142_v37 }
 0x1cc   :  { %v559_v38 = vpop.f32.mrf.mxu0  ;;  %v648_v47 = vadd.f32 %v647_v56, %v13111_v22 }
 0x1cd   :  { %v781_v5 = vadd.f32 %v780_v54, %v718_v41 }
 0x1ce   :  { %v13150_v21 = vpop.f32.mrf.mxu0  ;;  %v649_v49 = vadd.f32 %v648_v47, %v13122_v44 }
 0x1cf   :  { %19874 = vst [vmem:[#allocation101_spill] sm:$0xff] %v13150_v21  ;;  %v782_v40 = vadd.f32 %v781_v5, %v719_v52  ;;  %v722_v41 = vmul.f32 %v13150_v21, %v13150_v21 }
 0x1d0   :  { %v565_v50 = vpop.f32.mrf.mxu0  ;;  %v650_v11 = vadd.f32 %v649_v49, %v13132_v42 }
 0x1d1   :  { %v783_v56 = vadd.f32 %v782_v40, %v720_v12 }
 0x1d2   :  { %v13158_v46 = vpop.f32.mrf.mxu0  ;;  %v651_v35 = vadd.f32 %v650_v11, %v13142_v37 }
 0x1d3   :  { %19875 = vst [vmem:[#allocation102_spill] sm:$0xff] %v13158_v46  ;;  %v784_v47 = vadd.f32 %v783_v56, %v721_v33  ;;  %v723_v52 = vmul.f32 %v13158_v46, %v13158_v46 }
 0x1d4   :  { %v571_v7 = vpop.f32.mrf.mxu0  ;;  %v652_v44 = vadd.f32 %v651_v35, %v13150_v21 }
 0x1d5   :  { %v785_v49 = vadd.f32 %v784_v47, %v722_v41 }
 0x1d6   :  { %v13166_v54 = vpop.f32.mrf.mxu0  ;;  %v653_v42 = vadd.f32 %v652_v44, %v13158_v46 }
 0x1d7   :  { %19876 = vst [vmem:[#allocation103_spill] sm:$0xff] %v13166_v54  ;;  %v724_v12 = vmul.f32 %v13166_v54, %v13166_v54  ;;  %v786_v11 = vadd.f32 %v785_v49, %v723_v52 }
 0x1d8   :  { %v577_v5 = vpop.f32.mrf.mxu0  ;;  %v654_v37 = vadd.f32 %v653_v42, %v13166_v54 }
 0x1d9   :  { %v787_v35 = vadd.f32 %v786_v11, %v724_v12 }
 0x1da   :  { %v13174_v40 = vpop.f32.mrf.mxu0 }
 0x1db   :  { %19877 = vst [vmem:[#allocation104_spill] sm:$0xff] %v13174_v40  ;;  %v725_v33 = vmul.f32 %v13174_v40, %v13174_v40  ;;  %v655_v21 = vadd.f32 %v654_v37, %v13174_v40 }
 0x1dc   :  { %v583_v56 = vpop.f32.mrf.mxu0 }
 0x1dd   :  { %v788_v41 = vadd.f32 %v787_v35, %v725_v33 }
 0x1de   :  { %v13180_v22 = vpop.f32.mrf.mxu0 }
 0x1df   :  { %v656_v44 = vadd.f32 %v655_v21, %v13180_v22  ;;  %v726_v47 = vmul.f32 %v13180_v22, %v13180_v22 }
 0x1e0   :  { %v589_v46 = vpop.f32.mrf.mxu0 }
 0x1e1   :  { %v657_v31 = vrot.slane %v656_v44, 4  ;;  %v789_v52 = vadd.f32 %v788_v41, %v726_v47  ;;  %9433 = vmatprep.subr.mxu1 %v589_v46  ;;  %v19901_v41 = vld [vmem:[#allocation72_spill] sm:$0xff]  ;;  %v19917_v47 = vld [vmem:[#allocation83_spill] sm:$0xff] }
 0x1e2   :  { %9434 = vmatpush3.msra.mxu1 %v12993_v26 }
 0x1e3   :  { %v658_v42 = vadd.f32 %v657_v31, %v656_v44  ;;  %v790_v49 = vrot.slane %v789_v52, 4  ;;  %9435 = vmatprep.subr.mxu1 %v583_v56  ;;  %v19900_v44 = vld [vmem:[#allocation78_spill] sm:$0xff] }
 0x1e4   :  { %9436 = vmatpush3.msra.mxu1 %v12977_v17 }
 0x1e5   :  { %v659_v37 = vrot.slane %v658_v42, 2  ;;  %v791_v12 = vadd.f32 %v790_v49, %v789_v52  ;;  %9437 = vmatprep.subr.mxu1 %v577_v5  ;;  %v19893_v49 = vld [vmem:[#allocation74_spill] sm:$0xff]  ;;  %v19896_v52 = vld [vmem:[#allocation71_spill] sm:$0xff] }
 0x1e6   :  { %9438 = vmatpush3.msra.mxu1 %v12961_v10  ;;  %v19906_v5 = vld [vmem:[#allocation91_spill] sm:$0xff] }
 0x1e7   :  { %v660_v21 = vadd.f32 %v659_v37, %v658_v42  ;;  %v792_v11 = vrot.slane %v791_v12, 2  ;;  %9439 = vmatprep.subr.mxu1 %v571_v7  ;;  %v19880_v7 = vld [vmem:[#allocation24_spill] sm:$0xff]  ;;  %v19892_v37 = vld [vmem:[#allocation66_spill] sm:$0xff] }
 0x1e8   :  { %9440 = vmatpush3.msra.mxu1 %v12939_v55  ;;  %v19907_v42 = vld [vmem:[#allocation6_spill] sm:$0xff] }
 0x1e9   :  { %v661_v33 = vrot.slane %v660_v21, 1  ;;  %v793_v35 = vadd.f32 %v792_v11, %v791_v12  ;;  %9441 = vmatprep.subr.mxu1 %v565_v50  ;;  %v19887_v11 = vld [vmem:[#allocation62_spill] sm:$0xff]  ;;  %v19890_v12 = vld [vmem:[#allocation64_spill] sm:$0xff]  ;;  %vm1415_vm5 = vcmp.eq.s32.totalorder %v19907_v42, %v12942_v53 }
 0x1ea   :  { %9442 = vmatpush3.msra.mxu1 %v12923_v34 }
 0x1eb   :  { %v662_v31 = vadd.f32 %v661_v33, %v660_v21  ;;  %v794_v26 = vrot.slane %v793_v35, 1  ;;  %9443 = vmatprep.subr.mxu1 %v559_v38  ;;  %v19881_v33 = vld [vmem:[#allocation55_spill] sm:$0xff]  ;;  %v19903_v21 = vld [vmem:[#allocation80_spill] sm:$0xff]  ;;  %v19912_v38 = vld [vmem:[#allocation70_spill] sm:$0xff] }
 0x1ec   :  { %9444 = vmatpush3.msra.mxu1 %v12907_v61  ;;  %v13201_v61 = vadd.s32 256, %v12525_v36  ;;  %v19920_v36 = vld [vmem:[#allocation69_spill] sm:$0xff] }
 0x1ed   :  { %v795_v17 = vadd.f32 %v794_v26, %v793_v35  ;;  %v13191_v46 = vmul.f32 0.001953125, %v662_v31  ;;  %9445 = vmatprep.subr.mxu1 %v13137_v59  ;;  %v19879_v59 = vld [vmem:[#allocation22_spill] sm:$0xff]  ;;  %v19882_v31 = vld [vmem:[#allocation57_spill] sm:$0xff]  ;;  %v19888_v26 = vld [vmem:[#allocation4_spill] sm:$0xff] }
 0x1ee   :  { %9446 = vmatpush3.msra.mxu1 %v12891_v63  ;;  %19878 = vst [vmem:[#allocation105_spill] sm:$0xff] %v13201_v61  ;;  %vm1406_vm2 = vcmp.eq.s32.totalorder %v12313_v29, %v13201_v61  ;;  %vm1411_vm3 = vcmp.eq.s32.totalorder %v19888_v26, %v12942_v53  ;;  %v19894_v35 = vld [vmem:[#allocation67_spill] sm:$0xff]  ;;  %vm1410_vm4 = vcmp.eq.s32.totalorder %v19888_v26, %v13201_v61 }
 0x1ef   :  { %v797_v10 = vmul.f32 0.001953125, %v795_v17  ;;  %v798_v55 = vmul.f32 %v13191_v46, %v13191_v46  ;;  %9447 = vmatprep.subr.mxu1 %v13127_v13  ;;  %v19883_v17 = vld [vmem:[#allocation76_spill] sm:$0xff]  ;;  %vm1414_vm6 = vcmp.eq.s32.totalorder %v19907_v42, %v13201_v61  ;;  %v13359_v13 = vld [vmem:[%s19229_s6] ss:$0 sm:$0xff]  ;;  %v19933_v29 = vsub.f32 %v19880_v7, %v13191_v46 }
 0x1f0   :  { %9448 = vmatpush3.msra.mxu1 %v12875_v15  ;;  %v19916_v15 = vld [vmem:[#allocation89_spill] sm:$0xff]  ;;  %v19934_v54 = vsub.f32 %v12469_v19, %v13191_v46  ;;  %v19937_v7 = vsub.f32 %v12493_v39, %v13191_v46  ;;  %v19938_v19 = vsub.f32 %v12507_v57, %v13191_v46  ;;  %v19941_v57 = vsub.f32 %v12552_v3, %v13191_v46 }
 0x1f1   :  { %v799_v34 = vsub.f32 %v797_v10, %v798_v55  ;;  %9449 = vmatprep.subr.mxu1 %v13117_v51  ;;  %v19884_v10 = vld [vmem:[#allocation59_spill] sm:$0xff]  ;;  %v19885_v55 = vld [vmem:[#allocation60_spill] sm:$0xff]  ;;  %v19944_v3 = vsub.f32 %v12579_v16, %v13191_v46 }
 0x1f2   :  { %9450 = vmatpush3.msra.mxu1 %v12858_v32 }
 0x1f3   :  { %v864_v50 = vadd.f32 1e-05, %v799_v34  ;;  %9451 = vmatprep.subr.mxu1 %v13105_v48  ;;  %v19897_v34 = vld [vmem:[#allocation73_spill] sm:$0xff] }
 0x1f4   :  { %9452 = vmatpush3.msra.mxu1 %v12840_v45  ;;  %v19895_v45 = vld [vmem:[#allocation68_spill] sm:$0xff]  ;;  %v19899_v48 = vld [vmem:[#allocation77_spill] sm:$0xff] }
 0x1f5   :  { %11829 = vrsqrt.f32 %v864_v50  ;;  %9453 = vmatprep.subr.mxu1 %v13089_v23  ;;  %v19886_v50 = vld [vmem:[#allocation61_spill] sm:$0xff] }
 0x1f6   :  { %9454 = vmatpush3.msra.mxu1 %v12826_v43  ;;  %v19891_v23 = vld [vmem:[#allocation65_spill] sm:$0xff]  ;;  %v19898_v43 = vld [vmem:[#allocation75_spill] sm:$0xff] }
 0x1f7   :  { %9455 = vmatprep.subr.mxu1 %v13073_v2  ;;  %v19902_v2 = vld [vmem:[#allocation79_spill] sm:$0xff] }
 0x1f8   :  { %9456 = vmatpush3.msra.mxu1 %v19883_v17  ;;  %v19889_v17 = vld [vmem:[#allocation63_spill] sm:$0xff] }
 0x1f9   :  { %9457 = vmatprep.subr.mxu1 %v13057_v14  ;;  %v19925_v14 = vmov 1.0  }
 0x1fa   :  { %9458 = vmatpush3.msra.mxu1 %v19893_v49  ;;  %v19918_v49 = vld [vmem:[#allocation85_spill] sm:$0xff] }
 0x1fb   :  { %9459 = vmatprep.subr.mxu1 %v13041_v20  ;;  %v19931_v20 = vsub.f32 %v13180_v22, %v13191_v46  ;;  %v13398_v22 = vld [vmem:[%s19230_s7] ss:$0 sm:$0xff] }
 0x1fc   :  { %9460 = vmatpush3.msra.mxu1 %v19901_v41  ;;  %v19908_v41 = vld [vmem:[#allocation82_spill] sm:$0xff]  ;;  %19935 = vst [vmem:[#allocation22_spill] sm:$0xff] %v13398_v22 }
 0x1fd   :  { %9461 = vmatprep.subr.mxu1 %v19906_v5  ;;  %v19928_v5 = vld [vmem:[#allocation94_spill] sm:$0xff] }
 0x1fe   :  { %9462 = vmatpush3.msra.mxu1 %v19912_v38  ;;  %v19927_v38 = vld [vmem:[#allocation93_spill] sm:$0xff] }
 0x1ff   :  { %9463 = vmatprep.subr.mxu1 %v19916_v15  ;;  %v19932_v15 = vsub.f32 %v19879_v59, %v13191_v46  ;;  %v19936_v59 = vsub.f32 %v12481_v28, %v13191_v46 }
 0x200   :  { %9464 = vmatpush3.msra.mxu1 %v19920_v36  ;;  %v19926_v36 = vld [vmem:[#allocation8_spill] sm:$0xff] }
 0x201   :  { %8228 = vmatmul.mubr.msk.f32.vlgmr.msra.gmra.mxu1 %vm1406_vm2, %v19925_v14  ;;  %vm1419_vm7 = vcmp.eq.s32.totalorder %v19926_v36, %v12942_v53  ;;  %vm1418_vm8 = vcmp.eq.s32.totalorder %v19926_v36, %v13201_v61 }
 0x202   :  { %v13354_v56 = vpop.eup %11829  ;;  %8229 = vmatprep.mubr.msk.f32.mxu1 %vm1411_vm3, %v19925_v14 }
 0x203   :  { %v929_v63 = vmul.f32 %v13354_v56, %v19931_v20  ;;  %v13381_v40 = vmul.f32 %v13354_v56, %v19932_v15  ;;  %v13387_v51 = vmul.f32 %v13354_v56, %v19933_v29  ;;  %v13393_v32 = vmul.f32 %v13354_v56, %v19934_v54 }
 0x204   :  { %v13404_v20 = vmul.f32 %v13354_v56, %v19936_v59  ;;  %v13410_v15 = vmul.f32 %v13354_v56, %v19937_v7  ;;  %v13416_v54 = vmul.f32 %v13354_v56, %v19938_v19  ;;  %v19939_v29 = vsub.f32 %v12519_v27, %v13191_v46 }
 0x205   :  { %v999_v39 = vmul.f32 %v13359_v13, %v929_v63  ;;  %v19940_v59 = vsub.f32 %v12533_v18, %v13191_v46  ;;  %v13437_v19 = vmul.f32 %v13354_v56, %v19941_v57  ;;  %v19942_v27 = vsub.f32 %v12565_v9, %v13191_v46  ;;  %8230 = vmatmul.mubr.msk.f32.gmra.mxu1 %vm1410_vm4, %v19925_v14  ;;  %v19943_v18 = vld [vmem:[#allocation5_spill] sm:$0xff] }
 0x206   :  { %v13422_v28 = vmul.f32 %v13354_v56, %v19939_v29  ;;  %vm1423_vm9 = vcmp.eq.s32.totalorder %v19943_v18, %v12942_v53  ;;  %v13455_v63 = vmul.f32 %v13354_v56, %v19944_v3  ;;  %v19945_v9 = vsub.f32 %v12591_v6, %v13191_v46  ;;  %8231 = vmatprep.mubr.msk.f32.mxu1 %vm1415_vm5, %v19925_v14 }
 0x207   :  { %v13431_v7 = vmul.f32 %v13354_v56, %v19940_v59  ;;  %v13443_v29 = vmul.f32 %v13354_v56, %v19942_v27  ;;  %v19946_v57 = vsub.f32 %v12603_v1, %v13191_v46  ;;  %v19947_v27 = vsub.f32 %v12617_v62, %v13191_v46 }
 0x208   :  { %v13461_v59 = vmul.f32 %v13354_v56, %v19945_v9  ;;  %v1069_v6 = vadd.f32 %v13398_v22, %v999_v39  ;;  %v19948_v3 = vsub.f32 %v12631_v25, %v13191_v46  ;;  %v19949_v9 = vsub.f32 %v12645_v0, %v13191_v46 }
 0x209   :  { %v13467_v26 = vmul.f32 %v13354_v56, %v19946_v57  ;;  %v13473_v16 = vmul.f32 %v13354_v56, %v19947_v27  ;;  %v19950_v57 = vsub.f32 %v12657_v8, %v13191_v46  ;;  %v19951_v39 = vsub.f32 %v12666_v24, %v13191_v46  ;;  %8232 = vmatmul.mubr.msk.f32.gmra.mxu1 %vm1414_vm6, %v19925_v14 }
 0x20a   :  { %v13484_v1 = vmul.f32 %v13354_v56, %v19948_v3  ;;  %v13490_v62 = vmul.f32 %v13354_v56, %v19949_v9  ;;  %v19952_v3 = vsub.f32 %v12678_v58, %v13191_v46  ;;  %v19953_v9 = vsub.f32 %v12692_v30, %v13191_v46  ;;  %v19955_v58 = vld [vmem:[#allocation17_spill] sm:$0xff]  ;;  %8233 = vmatprep.mubr.msk.f32.mxu1 %vm1419_vm7, %v19925_v14 }
 0x20b   :  { %v13496_v27 = vmul.f32 %v13354_v56, %v19950_v57  ;;  %v13502_v25 = vmul.f32 %v13354_v56, %v19951_v39  ;;  %v19954_v57 = vsub.f32 %v19827_v4, %v13191_v46  ;;  %vm1422_vm10 = vcmp.eq.s32.totalorder %v19943_v18, %v13201_v61 }
 0x20c   :  { %v13508_v0 = vmul.f32 %v13354_v56, %v19952_v3  ;;  %v13514_v8 = vmul.f32 %v13354_v56, %v19953_v9  ;;  %vm1133_vm11 = vcmp.gt.f32.partialorder %v1069_v6, 0.0  ;;  %v1206_v39 = vmul.f32 %v19955_v58, %v1069_v6 }
 0x20d   :  { %v13520_v24 = vmul.f32 %v13354_v56, %v19954_v57  ;;  %v19956_v3 = vsub.f32 %v19881_v33, %v13191_v46  ;;  %v19957_v9 = vsub.f32 %v19882_v31, %v13191_v46  ;;  %v19958_v57 = vld [vmem:[#allocation10_spill] sm:$0xff]  ;;  %v19959_v33 = vsub.f32 %v19884_v10, %v13191_v46  ;;  %8234 = vmatmul.mubr.msk.f32.gmra.mxu1 %vm1418_vm8, %v19925_v14 }
 0x20e   :  { %vm1427_vm12 = vcmp.eq.s32.totalorder %v19958_v57, %v12942_v53  ;;  %v19960_v31 = vsub.f32 %v19885_v55, %v13191_v46  ;;  %v19961_v58 = vsub.f32 %v19886_v50, %v13191_v46  ;;  %v19962_v22 = vsub.f32 %v19887_v11, %v13191_v46  ;;  %8235 = vmatprep.mubr.msk.f32.mxu1 %vm1423_vm9, %v19925_v14 }
 0x20f   :  { %v13529_v30 = vmul.f32 %v13354_v56, %v19956_v3  ;;  %v13535_v4 = vmul.f32 %v13354_v56, %v19957_v9  ;;  %v13547_v3 = vmul.f32 %v13354_v56, %v19959_v33  ;;  %v13571_v55 = vsel %vm1133_vm11, %v1069_v6, %v1206_v39 }
 0x210   :  { %v13553_v9 = vmul.f32 %v13354_v56, %v19960_v31  ;;  %v13559_v42 = vmul.f32 %v13354_v56, %v19961_v58  ;;  %v13565_v10 = vmul.f32 %v13354_v56, %v19962_v22  ;;  %19963 = vst [vmem:[#allocation24_spill] sm:$0xff] %v13571_v55  ;;  %v19964_v33 = vsub.f32 %v19889_v17, %v13191_v46 }
 0x211   :  { %v19965_v58 = vsub.f32 %v19890_v12, %v13191_v46  ;;  %v19966_v22 = vsub.f32 %v19891_v23, %v13191_v46  ;;  %v19967_v6 = vsub.f32 %v19892_v37, %v13191_v46  ;;  %v19968_v39 = vsub.f32 %v19894_v35, %v13191_v46  ;;  %9726 = vmatprep.subr.mxu0 %v13571_v55 }
 0x212   :  { %v13577_v50 = vmul.f32 %v13354_v56, %v19964_v33  ;;  %v19969_v33 = vsub.f32 %v19895_v45, %v13191_v46  ;;  %vm1426_vm13 = vcmp.eq.s32.totalorder %v19958_v57, %v13201_v61  ;;  %v19971_v35 = vsub.f32 %v19896_v52, %v13191_v46  ;;  %8236 = vmatmul.mubr.msk.f32.gmra.mxu1 %vm1422_vm10, %v19925_v14 }
 0x213   :  { %v13583_v11 = vmul.f32 %v13354_v56, %v19965_v58  ;;  %v13589_v31 = vmul.f32 %v13354_v56, %v19966_v22  ;;  %v13595_v17 = vmul.f32 %v13354_v56, %v19967_v6  ;;  %v13601_v12 = vmul.f32 %v13354_v56, %v19968_v39  ;;  %8237 = vmatprep.mubr.msk.f32.mxu1 %vm1427_vm12, %v19925_v14 }
 0x214   :  { %v13607_v23 = vmul.f32 %v13354_v56, %v19969_v33  ;;  %v19970_v58 = vsub.f32 %v12768_v60, %v13191_v46  ;;  %v13622_v22 = vmul.f32 %v13354_v56, %v19971_v35  ;;  %v19972_v45 = vsub.f32 %v19897_v34, %v13191_v46  ;;  %v19975_v34 = vld [vmem:[#allocation7_spill] sm:$0xff] }
 0x215   :  { %v19973_v60 = vsub.f32 %v19898_v43, %v13191_v46  ;;  %v19974_v33 = vsub.f32 %v19899_v48, %v13191_v46  ;;  %vm1431_vm14 = vcmp.eq.s32.totalorder %v19975_v34, %v12942_v53  ;;  %v19976_v43 = vsub.f32 %v19900_v44, %v13191_v46 }
 0x216   :  { %v13613_v37 = vmul.f32 %v13354_v56, %v19970_v58  ;;  %v13628_v6 = vmul.f32 %v13354_v56, %v19972_v45  ;;  %v19977_v48 = vsub.f32 %v19902_v2, %v13191_v46  ;;  %v19978_v45 = vsub.f32 %v19903_v21, %v13191_v46  ;;  %v19981_v2 = vld [vmem:[#allocation53_spill] sm:$0xff]  ;;  %8238 = vmatmul.mubr.msk.f32.gmra.mxu1 %vm1426_vm13, %v19925_v14 }
 0x217   :  { %v13634_v39 = vmul.f32 %v13354_v56, %v19973_v60  ;;  %v13640_v52 = vmul.f32 %v13354_v56, %v19974_v33  ;;  %v13652_v58 = vmul.f32 %v13354_v56, %v19976_v43  ;;  %v19979_v60 = vld [vmem:[#allocation81_spill] sm:$0xff]  ;;  %v19982_v43 = vsub.f32 %v19981_v2, %v13191_v46  ;;  %8239 = vmatprep.mubr.msk.f32.mxu1 %vm1431_vm14, %v19925_v14 }
 0x218   :  { %v13658_v35 = vmul.f32 %v13354_v56, %v19977_v48  ;;  %v13664_v36 = vmul.f32 %v13354_v56, %v19978_v45  ;;  %v19980_v33 = vsub.f32 %v19979_v60, %v13191_v46  ;;  %v19984_v21 = vsub.f32 %v19908_v41, %v13191_v46 }
 0x219   :  { %v13680_v48 = vmul.f32 %v13354_v56, %v19982_v43  ;;  %v19986_v60 = vsub.f32 %v19917_v47, %v13191_v46  ;;  %v19988_v55 = vsub.f32 %v19918_v49, %v13191_v46  ;;  %v19990_v43 = vld [vmem:[#allocation86_spill] sm:$0xff]  ;;  %vm1430_vm15 = vcmp.eq.s32.totalorder %v19975_v34, %v13201_v61 }
 0x21a   :  { %v13670_v44 = vmul.f32 %v13354_v56, %v19980_v33  ;;  %v13686_v45 = vmul.f32 %v13354_v56, %v19984_v21  ;;  %v19992_v21 = vld [vmem:[#allocation87_spill] sm:$0xff]  ;;  %v13888_v57 = vmul.f32 %v13359_v13, %v13490_v62  ;;  %v13910_v62 = vmul.f32 %v13359_v13, %v13520_v24  ;;  %8240 = vmatmul.mubr.msk.f32.gmra.mxu1 %vm1430_vm15, %v19925_v14 }
 0x21b   :  { %19983 = vst [vmem:[#allocation55_spill] sm:$0xff] %v13680_v48  ;;  %v13692_v33 = vmul.f32 %v13354_v56, %v19986_v60  ;;  %v13698_v2 = vmul.f32 %v13354_v56, %v19988_v55  ;;  %v19991_v48 = vsub.f32 %v19990_v43, %v13191_v46  ;;  %v19994_v60 = vld [vmem:[#allocation88_spill] sm:$0xff]  ;;  %v19997_v55 = vld [vmem:[#allocation90_spill] sm:$0xff]  ;;  %v13932_v24 = vmul.f32 %v13359_v13, %v13553_v9 }
 0x21c   :  { %19985 = vst [vmem:[#allocation57_spill] sm:$0xff] %v13686_v45  ;;  %v19993_v45 = vsub.f32 %v19992_v21, %v13191_v46  ;;  %v13952_v9 = vmul.f32 %v13359_v13, %v13583_v11  ;;  %v13964_v34 = vmul.f32 %v13359_v13, %v13601_v12  ;;  %v13972_v11 = vmul.f32 %v13359_v13, %v13613_v37 }
 0x21d   :  { %19987 = vst [vmem:[#allocation76_spill] sm:$0xff] %v13692_v33  ;;  %19989 = vst [vmem:[#allocation59_spill] sm:$0xff] %v13698_v2  ;;  %v13704_v41 = vmul.f32 %v13354_v56, %v19991_v48  ;;  %v19995_v33 = vsub.f32 %v19994_v60, %v13191_v46  ;;  %v19998_v2 = vsub.f32 %v19997_v55, %v13191_v46  ;;  %v20000_v48 = vld [vmem:[#allocation92_spill] sm:$0xff] }
 0x21e   :  { %v13710_v47 = vmul.f32 %v13354_v56, %v19993_v45  ;;  %v20001_v21 = vsub.f32 %v20000_v48, %v13191_v46  ;;  %v20003_v60 = vsub.f32 %v19927_v38, %v13191_v46  ;;  %v20005_v55 = vsub.f32 %v19928_v5, %v13191_v46  ;;  %v20010_v38 = vld [vmem:[#allocation12_spill] sm:$0xff] }
 0x21f   :  { %v13716_v49 = vmul.f32 %v13354_v56, %v19995_v33  ;;  %v13722_v43 = vmul.f32 %v13354_v56, %v19998_v2  ;;  %vm1435_vm0 = vcmp.eq.s32.totalorder %v20010_v38, %v12942_v53  ;;  %vm1434_vm1 = vcmp.eq.s32.totalorder %v20010_v38, %v13201_v61 }
 0x220   :  { %v13730_v45 = vmul.f32 %v13354_v56, %v20001_v21  ;;  %v13736_v33 = vmul.f32 %v13354_v56, %v20003_v60  ;;  %v13742_v2 = vmul.f32 %v13354_v56, %v20005_v55  ;;  %v20011_v21 = vld [vmem:[#allocation96_spill] sm:$0xff]  ;;  %v20014_v55 = vld [vmem:[#allocation97_spill] sm:$0xff]  ;;  %8241 = vmatprep.mubr.msk.f32.mxu1 %vm1435_vm0, %v19925_v14  ;;  %v13986_v12 = vmul.f32 %v13359_v13, %v13634_v39 }
 0x221   :  { %19996 = vst [vmem:[#allocation60_spill] sm:$0xff] %v13716_v49  ;;  %19999 = vst [vmem:[#allocation61_spill] sm:$0xff] %v13722_v43  ;;  %v20007_v43 = vld [vmem:[#allocation95_spill] sm:$0xff]  ;;  %v20012_v5 = vsub.f32 %v20011_v21, %v13191_v46  ;;  %v13994_v37 = vmul.f32 %v13359_v13, %v13652_v58  ;;  %8242 = vmatmul.mubr.msk.f32.gmra.mxu1 %vm1434_vm1, %v19925_v14  ;;  %v14008_v39 = vmul.f32 %v13359_v13, %v13664_v36 }
 0x222   :  { %20002 = vst [vmem:[#allocation62_spill] sm:$0xff] %v13730_v45  ;;  %20004 = vst [vmem:[#allocation4_spill] sm:$0xff] %v13736_v33  ;;  %v20008_v49 = vsub.f32 %v20007_v43, %v13191_v46  ;;  %v20015_v43 = vsub.f32 %v20014_v55, %v13191_v46  ;;  %v20020_v33 = vld [vmem:[#allocation99_spill] sm:$0xff] }
 0x223   :  { %20006 = vst [vmem:[#allocation63_spill] sm:$0xff] %v13742_v2  ;;  %v13760_v60 = vmul.f32 %v13354_v56, %v20012_v5  ;;  %v20021_v45 = vsub.f32 %v20020_v33, %v13191_v46  ;;  %v20023_v5 = vld [vmem:[#allocation100_spill] sm:$0xff]  ;;  %v20028_v33 = vld [vmem:[#allocation102_spill] sm:$0xff]  ;;  %v20037_v58 = vld [vmem:[#allocation55_spill] sm:$0xff] }
 0x224   :  { %v13748_v48 = vmul.f32 %v13354_v56, %v20008_v49  ;;  %v13766_v49 = vmul.f32 %v13354_v56, %v20015_v43  ;;  %v20024_v55 = vsub.f32 %v20023_v5, %v13191_v46  ;;  %v20039_v38 = vld [vmem:[#allocation57_spill] sm:$0xff] }
 0x225   :  { %20013 = vst [vmem:[#allocation65_spill] sm:$0xff] %v13760_v60  ;;  %v13778_v21 = vmul.f32 %v13354_v56, %v20021_v45  ;;  %v20029_v45 = vsub.f32 %v20028_v33, %v13191_v46  ;;  %v13820_v33 = vmul.f32 %v13359_v13, %v13387_v51  ;;  %v13842_v51 = vmul.f32 %v13359_v13, %v13422_v28 }
 0x226   :  { %20009 = vst [vmem:[#allocation64_spill] sm:$0xff] %v13748_v48  ;;  %20016 = vst [vmem:[#allocation66_spill] sm:$0xff] %v13766_v49  ;;  %v20017_v48 = vld [vmem:[#allocation98_spill] sm:$0xff]  ;;  %v13788_v43 = vmul.f32 %v13354_v56, %v20024_v55  ;;  %v20030_v49 = vld [vmem:[#allocation103_spill] sm:$0xff]  ;;  %v13864_v28 = vmul.f32 %v13359_v13, %v13455_v63  ;;  %v13884_v63 = vmul.f32 %v13359_v13, %v13484_v1 }
 0x227   :  { %v20018_v2 = vsub.f32 %v20017_v48, %v13191_v46  ;;  %20022 = vst [vmem:[#allocation67_spill] sm:$0xff] %v13778_v21  ;;  %v20026_v48 = vld [vmem:[#allocation101_spill] sm:$0xff]  ;;  %v13800_v21 = vmul.f32 %v13354_v56, %v20029_v45  ;;  %v20031_v60 = vsub.f32 %v20030_v49, %v13191_v46  ;;  %v20032_v55 = vld [vmem:[#allocation104_spill] sm:$0xff]  ;;  %v13824_v49 = vmul.f32 %v13359_v13, %v13393_v32  ;;  %v20043_v45 = vld [vmem:[#allocation59_spill] sm:$0xff] }
 0x228   :  { %20025 = vst [vmem:[#allocation68_spill] sm:$0xff] %v13788_v43  ;;  %v20033_v43 = vsub.f32 %v20032_v55, %v13191_v46  ;;  %v20034_v32 = vld [vmem:[#allocation9_spill] sm:$0xff]  ;;  %v13906_v1 = vmul.f32 %v13359_v13, %v13514_v8  ;;  %v13928_v8 = vmul.f32 %v13359_v13, %v13547_v3  ;;  %v13948_v3 = vmul.f32 %v13359_v13, %v13577_v50 }
 0x229   :  { %v13772_v18 = vmul.f32 %v13354_v56, %v20018_v2  ;;  %v20027_v2 = vsub.f32 %v20026_v48, %v13191_v46  ;;  %v13806_v5 = vmul.f32 %v13354_v56, %v20031_v60  ;;  %v13830_v46 = vmul.f32 %v13359_v13, %v13404_v20 }
 0x22a   :  { %v13812_v48 = vmul.f32 %v13354_v56, %v20033_v43  ;;  %vm1439_vm2 = vcmp.eq.s32.totalorder %v20034_v32, %v12942_v53  ;;  %v13852_v20 = vmul.f32 %v13359_v13, %v13431_v7  ;;  %v13872_v7 = vmul.f32 %v13359_v13, %v13461_v59  ;;  %v20041_v43 = vld [vmem:[#allocation76_spill] sm:$0xff] }
 0x22b   :  { %20019 = vst [vmem:[#allocation74_spill] sm:$0xff] %v13772_v18  ;;  %v13794_v18 = vmul.f32 %v13354_v56, %v20027_v2  ;;  %v13816_v2 = vmul.f32 %v13359_v13, %v13381_v40  ;;  %v13834_v56 = vmul.f32 %v13359_v13, %v13410_v15  ;;  %v13838_v40 = vmul.f32 %v13359_v13, %v13416_v54 }
 0x22c   :  { %v13856_v15 = vmul.f32 %v13359_v13, %v13437_v19  ;;  %v13860_v54 = vmul.f32 %v13359_v13, %v13443_v29  ;;  %v13876_v19 = vmul.f32 %v13359_v13, %v13467_v26  ;;  %v13880_v29 = vmul.f32 %v13359_v13, %v13473_v16  ;;  %8243 = vmatprep.mubr.msk.f32.mxu1 %vm1439_vm2, %v19925_v14 }
 0x22d   :  { %v13892_v59 = vmul.f32 %v13359_v13, %v13496_v27  ;;  %v13896_v26 = vmul.f32 %v13359_v13, %v13502_v25  ;;  %v13900_v16 = vmul.f32 %v13359_v13, %v13508_v0  ;;  %vm1438_vm3 = vcmp.eq.s32.totalorder %v20034_v32, %v13201_v61  ;;  %v20035_v0 = vld [vmem:[#allocation14_spill] sm:$0xff] }
 0x22e   :  { %v13914_v27 = vmul.f32 %v13359_v13, %v13529_v30  ;;  %v13918_v25 = vmul.f32 %v13359_v13, %v13535_v4  ;;  %vm1443_vm4 = vcmp.eq.s32.totalorder %v20035_v0, %v12942_v53  ;;  %v13936_v30 = vmul.f32 %v13359_v13, %v13559_v42  ;;  %8244 = vmatmul.mubr.msk.f32.gmra.mxu1 %vm1438_vm3, %v19925_v14 }
 0x22f   :  { %v13940_v4 = vmul.f32 %v13359_v13, %v13565_v10  ;;  %v13956_v42 = vmul.f32 %v13359_v13, %v13589_v31  ;;  %v13960_v10 = vmul.f32 %v13359_v13, %v13595_v17  ;;  %v13968_v50 = vmul.f32 %v13359_v13, %v13607_v23  ;;  %8245 = vmatprep.mubr.msk.f32.mxu1 %vm1443_vm4, %v19925_v14 }
 0x230   :  { %v13976_v31 = vmul.f32 %v13359_v13, %v13622_v22  ;;  %vm1442_vm5 = vcmp.eq.s32.totalorder %v20035_v0, %v13201_v61  ;;  %v13982_v17 = vmul.f32 %v13359_v13, %v13628_v6  ;;  %v13990_v23 = vmul.f32 %v13359_v13, %v13640_v52  ;;  %v20036_v22 = vld [vmem:[#allocation11_spill] sm:$0xff] }
 0x231   :  { %vm1447_vm6 = vcmp.eq.s32.totalorder %v20036_v22, %v12942_v53  ;;  %v14004_v6 = vmul.f32 %v13359_v13, %v13658_v35  ;;  %v14012_v52 = vmul.f32 %v13359_v13, %v13670_v44  ;;  %v14016_v60 = vmul.f32 %v13359_v13, %v20037_v58 }
 0x232   :  { %v14024_v35 = vmul.f32 %v13359_v13, %v20039_v38  ;;  %v14028_v36 = vmul.f32 %v13359_v13, %v20041_v43  ;;  %v14032_v44 = vmul.f32 %v13359_v13, %v20043_v45  ;;  %v14036_v55 = vmul.f32 %v13359_v13, %v13704_v41  ;;  %v20051_v41 = vld [vmem:[#allocation4_spill] sm:$0xff]  ;;  %8246 = vmatmul.mubr.msk.f32.gmra.mxu1 %vm1442_vm5, %v19925_v14 }
 0x233   :  { %20038 = vst [vmem:[#allocation71_spill] sm:$0xff] %v14016_v60  ;;  %v14040_v58 = vmul.f32 %v13359_v13, %v13710_v47  ;;  %v20046_v60 = vld [vmem:[#allocation60_spill] sm:$0xff]  ;;  %vm1446_vm7 = vcmp.eq.s32.totalorder %v20036_v22, %v13201_v61  ;;  %v20053_v47 = vld [vmem:[#allocation63_spill] sm:$0xff]  ;;  %v14100_v32 = vmul.f32 %v13359_v13, %v13794_v18  ;;  %8247 = vmatprep.mubr.msk.f32.mxu1 %vm1447_vm6, %v19925_v14 }
 0x234   :  { %20040 = vst [vmem:[#allocation73_spill] sm:$0xff] %v14024_v35  ;;  %20042 = vst [vmem:[#allocation75_spill] sm:$0xff] %v14028_v36  ;;  %v14044_v38 = vmul.f32 %v13359_v13, %v20046_v60  ;;  %v20048_v35 = vld [vmem:[#allocation61_spill] sm:$0xff]  ;;  %v20050_v36 = vld [vmem:[#allocation62_spill] sm:$0xff] }
 0x235   :  { %20044 = vst [vmem:[#allocation77_spill] sm:$0xff] %v14036_v55  ;;  %20045 = vst [vmem:[#allocation78_spill] sm:$0xff] %v14040_v58  ;;  %v14048_v43 = vmul.f32 %v13359_v13, %v20048_v35  ;;  %v14052_v45 = vmul.f32 %v13359_v13, %v20050_v36  ;;  %v14058_v55 = vmul.f32 %v13359_v13, %v20051_v41  ;;  %v20055_v60 = vld [vmem:[#allocation64_spill] sm:$0xff]  ;;  %v20057_v35 = vld [vmem:[#allocation65_spill] sm:$0xff] }
 0x236   :  { %20047 = vst [vmem:[#allocation72_spill] sm:$0xff] %v14044_v38  ;;  %v14062_v58 = vmul.f32 %v13359_v13, %v20053_v47  ;;  %v14066_v38 = vmul.f32 %v13359_v13, %v20055_v60  ;;  %v20059_v36 = vld [vmem:[#allocation16_spill] sm:$0xff]  ;;  %v20060_v41 = vld [vmem:[#allocation66_spill] sm:$0xff]  ;;  %8248 = vmatmul.mubr.msk.f32.gmra.mxu1 %vm1446_vm7, %v19925_v14 }
 0x237   :  { %20049 = vst [vmem:[#allocation79_spill] sm:$0xff] %v14048_v43  ;;  %20052 = vst [vmem:[#allocation80_spill] sm:$0xff] %v14058_v55  ;;  %v14070_v43 = vmul.f32 %v13359_v13, %v20057_v35  ;;  %vm1451_vm8 = vcmp.eq.s32.totalorder %v20059_v36, %v12942_v53  ;;  %v14080_v47 = vmul.f32 %v13359_v13, %v20060_v41  ;;  %v20065_v41 = vld [vmem:[#allocation22_spill] sm:$0xff] }
 0x238   :  { %20054 = vst [vmem:[#allocation91_spill] sm:$0xff] %v14062_v58  ;;  %20056 = vst [vmem:[#allocation6_spill] sm:$0xff] %v14066_v38  ;;  %v20061_v58 = vld [vmem:[#allocation74_spill] sm:$0xff]  ;;  %v20062_v38 = vld [vmem:[#allocation67_spill] sm:$0xff]  ;;  %v14120_v18 = vadd.f32 %v20065_v41, %v13820_v33  ;;  %vm1450_vm9 = vcmp.eq.s32.totalorder %v20059_v36, %v13201_v61  ;;  %v14146_v33 = vadd.f32 %v20065_v41, %v13852_v20  ;;  %8249 = vmatprep.mubr.msk.f32.mxu1 %vm1451_vm8, %v19925_v14 }
 0x239   :  { %20058 = vst [vmem:[#allocation82_spill] sm:$0xff] %v14070_v43  ;;  %v14084_v60 = vmul.f32 %v13359_v13, %v20061_v58  ;;  %v14088_v35 = vmul.f32 %v13359_v13, %v20062_v38  ;;  %v20063_v43 = vld [vmem:[#allocation68_spill] sm:$0xff]  ;;  %v14104_v58 = vmul.f32 %v13359_v13, %v13800_v21  ;;  %v14108_v38 = vmul.f32 %v13359_v13, %v13806_v5 }
 0x23a   :  { %v14092_v55 = vmul.f32 %v13359_v13, %v20063_v43  ;;  %v14112_v43 = vmul.f32 %v13359_v13, %v13812_v48  ;;  %v14124_v21 = vadd.f32 %v20065_v41, %v13824_v49  ;;  %v14128_v5 = vadd.f32 %v20065_v41, %v13830_v46  ;;  %v20067_v49 = vld [vmem:[#allocation13_spill] sm:$0xff]  ;;  %8250 = vmatmul.mubr.msk.f32.gmra.mxu1 %vm1450_vm9, %v19925_v14 }
 0x23b   :  { %v14134_v13 = vadd.f32 %v20065_v41, %v13834_v56  ;;  %v14138_v48 = vadd.f32 %v20065_v41, %v13838_v40  ;;  %vm1455_vm10 = vcmp.eq.s32.totalorder %v20067_v49, %v12942_v53  ;;  %v14156_v46 = vadd.f32 %v20065_v41, %v13856_v15  ;;  %v20078_v22 = vld [vmem:[#allocation73_spill] sm:$0xff]  ;;  %v20079_v36 = vld [vmem:[#allocation75_spill] sm:$0xff] }
 0x23c   :  { %20064 = vst [vmem:[#allocation70_spill] sm:$0xff] %v14092_v55  ;;  %v14116_v55 = vadd.f32 %v20065_v41, %v13816_v2  ;;  %v14142_v2 = vadd.f32 %v20065_v41, %v13842_v51  ;;  %v14160_v56 = vadd.f32 %v20065_v41, %v13860_v54  ;;  %v14164_v40 = vadd.f32 %v20065_v41, %v13864_v28 }
 0x23d   :  { %v14168_v51 = vadd.f32 %v20065_v41, %v13872_v7  ;;  %v14176_v20 = vadd.f32 %v20065_v41, %v13876_v19  ;;  %v14180_v15 = vadd.f32 %v20065_v41, %v13880_v29  ;;  %v14184_v54 = vadd.f32 %v20065_v41, %v13884_v63  ;;  %8251 = vmatprep.mubr.msk.f32.mxu1 %vm1455_vm10, %v19925_v14 }
 0x23e   :  { %20066 = vst [vmem:[#allocation89_spill] sm:$0xff] %v14116_v55  ;;  %v14188_v28 = vadd.f32 %v20065_v41, %v13888_v57  ;;  %v14192_v7 = vadd.f32 %v20065_v41, %v13892_v59  ;;  %v14196_v19 = vadd.f32 %v20065_v41, %v13896_v26  ;;  %v14200_v29 = vadd.f32 %v20065_v41, %v13900_v16 }
 0x23f   :  { %v14204_v63 = vadd.f32 %v20065_v41, %v13906_v1  ;;  %vm1454_vm11 = vcmp.eq.s32.totalorder %v20067_v49, %v13201_v61  ;;  %v14210_v57 = vadd.f32 %v20065_v41, %v13910_v62  ;;  %v14214_v59 = vadd.f32 %v20065_v41, %v13914_v27  ;;  %v20069_v1 = vld [vmem:[#allocation18_spill] sm:$0xff]  ;;  %v20089_v55 = vld [vmem:[#allocation91_spill] sm:$0xff] }
 0x240   :  { %20068 = vst [vmem:[#allocation83_spill] sm:$0xff] %v14192_v7  ;;  %v14218_v26 = vadd.f32 %v20065_v41, %v13918_v25  ;;  %v14222_v16 = vadd.f32 %v20065_v41, %v13928_v8  ;;  %vm1459_vm12 = vcmp.eq.s32.totalorder %v20069_v1, %v12942_v53  ;;  %v14232_v62 = vadd.f32 %v20065_v41, %v13932_v24 }
 0x241   :  { %v14236_v27 = vadd.f32 %v20065_v41, %v13936_v30  ;;  %v14240_v25 = vadd.f32 %v20065_v41, %v13940_v4  ;;  %v14244_v0 = vadd.f32 %v20065_v41, %v13948_v3  ;;  %v14252_v8 = vadd.f32 %v20065_v41, %v13952_v9  ;;  %8252 = vmatmul.mubr.msk.f32.gmra.mxu1 %vm1454_vm11, %v19925_v14 }
 0x242   :  { %v14256_v24 = vadd.f32 %v20065_v41, %v13956_v42  ;;  %v14260_v30 = vadd.f32 %v20065_v41, %v13960_v10  ;;  %v14264_v4 = vadd.f32 %v20065_v41, %v13964_v34  ;;  %v14268_v3 = vadd.f32 %v20065_v41, %v13968_v50  ;;  %8253 = vmatprep.mubr.msk.f32.mxu1 %vm1459_vm12, %v19925_v14 }
 0x243   :  { %v14272_v9 = vadd.f32 %v20065_v41, %v13972_v11  ;;  %v14276_v42 = vadd.f32 %v20065_v41, %v13976_v31  ;;  %v14280_v10 = vadd.f32 %v20065_v41, %v13982_v17  ;;  %v14284_v34 = vadd.f32 %v20065_v41, %v13986_v12 }
 0x244   :  { %20070 = vst [vmem:[#allocation85_spill] sm:$0xff] %v14268_v3  ;;  %v14288_v50 = vadd.f32 %v20065_v41, %v13990_v23  ;;  %v14292_v11 = vadd.f32 %v20065_v41, %v13994_v37  ;;  %v14296_v31 = vadd.f32 %v20065_v41, %v14004_v6  ;;  %v14304_v17 = vadd.f32 %v20065_v41, %v14008_v39  ;;  %v20077_v23 = vld [vmem:[#allocation71_spill] sm:$0xff]  ;;  %v20080_v3 = vld [vmem:[#allocation77_spill] sm:$0xff] }
 0x245   :  { %20071 = vst [vmem:[#allocation69_spill] sm:$0xff] %v14272_v9  ;;  %20072 = vst [vmem:[#allocation8_spill] sm:$0xff] %v14276_v42  ;;  %v14308_v12 = vadd.f32 %v20065_v41, %v14012_v52  ;;  %v14312_v37 = vadd.f32 %v20065_v41, %v20077_v23  ;;  %v14316_v6 = vadd.f32 %v20065_v41, %v20078_v22  ;;  %v20081_v9 = vld [vmem:[#allocation78_spill] sm:$0xff]  ;;  %v20082_v42 = vld [vmem:[#allocation72_spill] sm:$0xff]  ;;  %vm1083_vm3 = vcmp.gt.f32.partialorder %v14180_v15, 0.0 }
 0x246   :  { %20073 = vst [vmem:[#allocation93_spill] sm:$0xff] %v14284_v34  ;;  %20074 = vst [vmem:[#allocation94_spill] sm:$0xff] %v14288_v50  ;;  %v14324_v39 = vadd.f32 %v20065_v41, %v20079_v36  ;;  %v14328_v52 = vadd.f32 %v20065_v41, %v14032_v44  ;;  %v14332_v23 = vadd.f32 %v20065_v41, %v20080_v3  ;;  %v20084_v50 = vld [vmem:[#allocation79_spill] sm:$0xff]  ;;  %vm1084_vm4 = vcmp.gt.f32.partialorder %v14184_v54, 0.0 }
 0x247   :  { %20075 = vst [vmem:[#allocation5_spill] sm:$0xff] %v14292_v11  ;;  %20076 = vst [vmem:[#allocation10_spill] sm:$0xff] %v14296_v31  ;;  %v14336_v22 = vadd.f32 %v20065_v41, %v20081_v9  ;;  %v14340_v34 = vadd.f32 %v20065_v41, %v20082_v42  ;;  %v14344_v36 = vadd.f32 %v20065_v41, %v20084_v50  ;;  %v20087_v11 = vld [vmem:[#allocation80_spill] sm:$0xff]  ;;  %v20091_v31 = vld [vmem:[#allocation6_spill] sm:$0xff]  ;;  %vm1085_vm5 = vcmp.gt.f32.partialorder %v14188_v28, 0.0 }
 0x248   :  { %v14348_v44 = vadd.f32 %v20065_v41, %v14052_v45  ;;  %v14352_v3 = vadd.f32 %v20065_v41, %v20087_v11  ;;  %v14356_v9 = vadd.f32 %v20065_v41, %v20089_v55  ;;  %v14360_v42 = vadd.f32 %v20065_v41, %v20091_v31  ;;  %v20095_v31 = vld [vmem:[#allocation70_spill] sm:$0xff] }
 0x249   :  { %20083 = vst [vmem:[#allocation7_spill] sm:$0xff] %v14340_v34  ;;  %20085 = vst [vmem:[#allocation81_spill] sm:$0xff] %v14344_v36  ;;  %v20093_v34 = vld [vmem:[#allocation82_spill] sm:$0xff]  ;;  %v14368_v45 = vadd.f32 %v20065_v41, %v14080_v47  ;;  %v14376_v55 = vadd.f32 %v20065_v41, %v14084_v60  ;;  %v14380_v11 = vadd.f32 %v20065_v41, %v14088_v35  ;;  %vm1098_vm6 = vcmp.gt.f32.partialorder %v14252_v8, 0.0 }
 0x24a   :  { %20086 = vst [vmem:[#allocation53_spill] sm:$0xff] %v14348_v44  ;;  %20088 = vst [vmem:[#allocation86_spill] sm:$0xff] %v14352_v3  ;;  %v14364_v50 = vadd.f32 %v20065_v41, %v20093_v34  ;;  %v14384_v34 = vadd.f32 %v20065_v41, %v20095_v31  ;;  %v14388_v47 = vadd.f32 %v20065_v41, %v14100_v32  ;;  %v20096_v32 = vld [vmem:[#allocation15_spill] sm:$0xff]  ;;  %vm1099_vm7 = vcmp.gt.f32.partialorder %v14256_v24, 0.0 }
 0x24b   :  { %20090 = vst [vmem:[#allocation87_spill] sm:$0xff] %v14356_v9  ;;  %20092 = vst [vmem:[#allocation88_spill] sm:$0xff] %v14360_v42  ;;  %v14396_v60 = vadd.f32 %v20065_v41, %v14104_v58  ;;  %v14400_v35 = vadd.f32 %v20065_v41, %v14108_v38  ;;  %v14404_v49 = vadd.f32 %v20065_v41, %v14112_v43  ;;  %v20097_v58 = vld [vmem:[#allocation20_spill] sm:$0xff]  ;;  %v20098_v38 = vld [vmem:[#allocation35_spill] sm:$0xff]  ;;  %v14424_v41 = vpop.f32.mrf.mxu1  ;;  %vm1100_vm8 = vcmp.gt.f32.partialorder %v14260_v30, 0.0 }
 0x24c   :  { %20094 = vst [vmem:[#allocation90_spill] sm:$0xff] %v14364_v50  ;;  %vm1458_vm13 = vcmp.eq.s32.totalorder %v20069_v1, %v13201_v61  ;;  %vm1463_vm14 = vcmp.eq.s32.totalorder %v20096_v32, %v12942_v53  ;;  %vm1462_vm15 = vcmp.eq.s32.totalorder %v20096_v32, %v13201_v61  ;;  %vm1467_vm0 = vcmp.eq.s32.totalorder %v20097_v58, %v12942_v53  ;;  %v20099_v43 = vld [vmem:[#allocation23_spill] sm:$0xff] }
 0x24d   :  { %8254 = vmatmul.mubr.msk.f32.gmra.mxu1 %vm1458_vm13, %v19925_v14  ;;  %vm1466_vm1 = vcmp.eq.s32.totalorder %v20097_v58, %v13201_v61  ;;  %vm2081_vm2 = vcmp.eq.s32.totalorder %v20099_v43, %v20098_v38  ;;  %20100 = vst [vmem:[#allocation92_spill] sm:$0xff] %v14424_v41  ;;  %v14426_v1 = vpop.f32.mrf.mxu1  ;;  %v20104_v58 = vld [vmem:[#allocation17_spill] sm:$0xff]  ;;  %vm1101_vm9 = vcmp.gt.f32.partialorder %v14264_v4, 0.0  ;;  %vm1082_vm10 = vcmp.gt.f32.partialorder %v14176_v20, 0.0 }
 0x24e   :  { %8255 = vmatprep.mubr.msk.f32.mxu1 %vm1463_vm14, %v19925_v14  ;;  %20101 = vst [vmem:[#allocation95_spill] sm:$0xff] %v14426_v1  ;;  %v1158_v53 = vmul.f32 %v20104_v58, %v14188_v28  ;;  %vm1117_vm11 = vcmp.gt.f32.partialorder %v14336_v22, 0.0  ;;  %vm1132_vm12 = vcmp.gt.f32.partialorder %v14404_v49, 0.0  ;;  %vm1097_vm13 = vcmp.gt.f32.partialorder %v14244_v0, 0.0 }
 0x24f   :  { %v14428_v31 = vpop.f32.mrf.mxu1  ;;  %vm1116_vm14 = vcmp.gt.f32.partialorder %v14332_v23, 0.0  ;;  %v14460_v1 = vmul.f32 %v20104_v58, %v14128_v5  ;;  %v14464_v41 = vmul.f32 %v20104_v58, %v14134_v13  ;;  %v14468_v38 = vmul.f32 %v20104_v58, %v14138_v48 }
 0x250   :  { %20102 = vst [vmem:[#allocation12_spill] sm:$0xff] %v14428_v31  ;;  %v14454_v31 = vmul.f32 %v20104_v58, %v14124_v21  ;;  %v14476_v43 = vmul.f32 %v20104_v58, %v14142_v2  ;;  %v1157_v36 = vmul.f32 %v20104_v58, %v14184_v54  ;;  %v14499_v3 = vmul.f32 %v20104_v58, %v14160_v56 }
 0x251   :  { %8256 = vmatmul.mubr.msk.f32.gmra.mxu1 %vm1462_vm15, %v19925_v14  ;;  %v14430_v32 = vpop.f32.mrf.mxu1  ;;  %20108 = vst [vmem:[#allocation100_spill] sm:$0xff] %v14460_v1  ;;  %20109 = vst [vmem:[#allocation101_spill] sm:$0xff] %v14464_v41  ;;  %vm1081_vm15 = vcmp.gt.f32.partialorder %v14168_v51, 0.0  ;;  %v14495_v1 = vmul.f32 %v20104_v58, %v14156_v46  ;;  %v1190_v41 = vmul.f32 %v20104_v58, %v14336_v22 }
 0x252   :  { %8257 = vmatprep.mubr.msk.f32.mxu1 %vm1467_vm0, %v19925_v14  ;;  %20103 = vst [vmem:[#allocation96_spill] sm:$0xff] %v14430_v32  ;;  %v1174_v32 = vmul.f32 %v20104_v58, %v14264_v4  ;;  %20107 = vst [vmem:[#allocation99_spill] sm:$0xff] %v14454_v31  ;;  %vm1131_vm0 = vcmp.gt.f32.partialorder %v14400_v35, 0.0  ;;  %v14487_v31 = vsel %vm1085_vm5, %v14188_v28, %v1158_v53  ;;  %vm1080_vm5 = vcmp.gt.f32.partialorder %v14164_v40, 0.0 }
 0x253   :  { %v14437_v61 = vpop.f32.mrf.mxu1  ;;  %20110 = vst [vmem:[#allocation102_spill] sm:$0xff] %v14468_v38  ;;  %20111 = vst [vmem:[#allocation103_spill] sm:$0xff] %v14476_v43  ;;  %v14511_v28 = vmul.f32 %v20104_v58, %v14164_v40  ;;  %v1155_v9 = vmul.f32 %v20104_v58, %v14176_v20  ;;  %v1172_v38 = vmul.f32 %v20104_v58, %v14256_v24 }
 0x254   :  { %20105 = vst [vmem:[#allocation97_spill] sm:$0xff] %v14437_v61  ;;  %v14450_v61 = vmul.f32 %v20104_v58, %v14120_v18  ;;  %20112 = vst [vmem:[#allocation104_spill] sm:$0xff] %v14487_v31  ;;  %v14506_v53 = vsel %vm1101_vm9, %v14264_v4, %v1174_v32  ;;  %v1156_v4 = vmul.f32 %v20104_v58, %v14180_v15  ;;  %vm1079_vm9 = vcmp.gt.f32.partialorder %v14160_v56, 0.0 }
 0x255   :  { %8258 = vmatmul.mubr.msk.f32.gmra.mxu1 %vm1466_vm1, %v19925_v14  ;;  %v14489_v44 = vpop.f32.mrf.mxu1  ;;  %vm1096_vm1 = vcmp.gt.f32.partialorder %v14240_v25, 0.0  ;;  %20114 = vst [vmem:[#allocation14_spill] sm:$0xff] %v14506_v53  ;;  %9513 = vmatprep.subr.mxu1 %v14506_v53  ;;  %v14525_v32 = vmul.f32 %v20104_v58, %v14192_v7  ;;  %v14529_v42 = vmul.f32 %v20104_v58, %v14196_v19 }
 0x256   :  { %8313 = vmatprep.mubr.msk.f32.mxu1 %vm2081_vm2, %v19925_v14  ;;  %20106 = vst [vmem:[#allocation98_spill] sm:$0xff] %v14450_v61  ;;  %v1173_v14 = vmul.f32 %v20104_v58, %v14260_v30  ;;  %v14480_v61 = vmul.f32 %v20104_v58, %v14146_v33  ;;  %20113 = vst [vmem:[#allocation9_spill] sm:$0xff] %v14489_v44  ;;  %vm1115_vm2 = vcmp.gt.f32.partialorder %v14328_v52, 0.0  ;;  %9514 = vmatpush3.msra.mxu1 %v14487_v31 }
 0x257   :  { %v1154_v44 = vmul.f32 %v20104_v58, %v14168_v51  ;;  %20115 = vst [vmem:[#allocation11_spill] sm:$0xff] %v14525_v32  ;;  %20116 = vst [vmem:[#allocation55_spill] sm:$0xff] %v14529_v42  ;;  %v14540_v53 = vmul.f32 %v20104_v58, %v14200_v29  ;;  %v14544_v32 = vmul.f32 %v20104_v58, %v14204_v63 }
 0x258   :  { %v14534_v43 = vsel %vm1100_vm8, %v14260_v30, %v1173_v14  ;;  %v1171_v42 = vmul.f32 %v20104_v58, %v14252_v8  ;;  %v14551_v14 = vsel %vm1084_vm4, %v14184_v54, %v1157_v36  ;;  %v14554_v30 = vpop.f32.mrf.mxu1  ;;  %vm1094_vm8 = vcmp.gt.f32.partialorder %v14232_v62, 0.0 }
 0x259   :  { %20117 = vst [vmem:[#allocation57_spill] sm:$0xff] %v14534_v43  ;;  %20118 = vst [vmem:[#allocation76_spill] sm:$0xff] %v14540_v53  ;;  %9515 = vmatprep.subr.mxu1 %v14534_v43  ;;  %v14559_v31 = vmul.f32 %v20104_v58, %v14210_v57  ;;  %v14563_v53 = vmul.f32 %v20104_v58, %v14214_v59  ;;  %v14570_v54 = vsel %vm1117_vm11, %v14336_v22, %v1190_v41 }
 0x25a   :  { %20119 = vst [vmem:[#allocation59_spill] sm:$0xff] %v14544_v32  ;;  %20120 = vst [vmem:[#allocation60_spill] sm:$0xff] %v14551_v14  ;;  %v1205_v32 = vmul.f32 %v20104_v58, %v14404_v49  ;;  %9516 = vmatpush3.msra.mxu1 %v14551_v14  ;;  %vm1078_vm4 = vcmp.gt.f32.partialorder %v14156_v46, 0.0  ;;  %v14576_v36 = vmul.f32 %v20104_v58, %v14218_v26  ;;  %9727 = vmatpush3.msra.mxu0 %v14570_v54 }
 0x25b   :  { %20121 = vst [vmem:[#allocation61_spill] sm:$0xff] %v14554_v30  ;;  %20122 = vst [vmem:[#allocation62_spill] sm:$0xff] %v14559_v31  ;;  %v1170_v30 = vmul.f32 %v20104_v58, %v14244_v0  ;;  %v1189_v43 = vmul.f32 %v20104_v58, %v14332_v23  ;;  %v14585_v31 = vsel %vm1099_vm7, %v14256_v24, %v1172_v38  ;;  %vm1093_vm11 = vcmp.gt.f32.partialorder %v14222_v16, 0.0 }
 0x25c   :  { %20123 = vst [vmem:[#allocation4_spill] sm:$0xff] %v14563_v53  ;;  %20124 = vst [vmem:[#allocation63_spill] sm:$0xff] %v14570_v54  ;;  %v14591_v22 = vmul.f32 %v20104_v58, %v14222_v16  ;;  %v14595_v41 = vmul.f32 %v20104_v58, %v14232_v62  ;;  %v1204_v14 = vmul.f32 %v20104_v58, %v14400_v35  ;;  %9517 = vmatprep.subr.mxu1 %v14585_v31 }
 0x25d   :  { %20125 = vst [vmem:[#allocation64_spill] sm:$0xff] %v14585_v31  ;;  %v14602_v24 = vsel %vm1083_vm3, %v14180_v15, %v1156_v4  ;;  %vm1077_vm7 = vcmp.gt.f32.partialorder %v14146_v33, 0.0  ;;  %v1168_v38 = vmul.f32 %v20104_v58, %v14236_v27  ;;  %v1169_v54 = vmul.f32 %v20104_v58, %v14240_v25  ;;  %v14618_v15 = vpop.f32.mrf.mxu1 }
 0x25e   :  { %20126 = vst [vmem:[#allocation65_spill] sm:$0xff] %v14602_v24  ;;  %v1188_v53 = vmul.f32 %v20104_v58, %v14328_v52  ;;  %v14615_v50 = vsel %vm1098_vm6, %v14252_v8, %v1171_v42  ;;  %9518 = vmatpush3.msra.mxu1 %v14602_v24  ;;  %20128 = vst [vmem:[#allocation66_spill] sm:$0xff] %v14618_v15  ;;  %v14623_v4 = vmul.f32 %v20104_v58, %v14280_v10 }
 0x25f   :  { %20127 = vst [vmem:[#allocation16_spill] sm:$0xff] %v14615_v50  ;;  %v1203_v31 = vmul.f32 %v20104_v58, %v14396_v60  ;;  %v14630_v7 = vsel %vm1082_vm10, %v14176_v20, %v1155_v9  ;;  %v14635_v8 = vsel %vm1132_vm12, %v14404_v49, %v1205_v32  ;;  %9519 = vmatprep.subr.mxu1 %v14615_v50  ;;  %vm1076_vm6 = vcmp.gt.f32.partialorder %v14142_v2, 0.0 }
 0x260   :  { %20129 = vst [vmem:[#allocation74_spill] sm:$0xff] %v14630_v7  ;;  %20130 = vst [vmem:[#allocation67_spill] sm:$0xff] %v14635_v8  ;;  %vm1130_vm3 = vcmp.gt.f32.partialorder %v14396_v60, 0.0  ;;  %v1187_v42 = vmul.f32 %v20104_v58, %v14324_v39  ;;  %v14645_v15 = vsel %vm1097_vm13, %v14244_v0, %v1170_v30  ;;  %v14650_v20 = vsel %vm1116_vm14, %v14332_v23, %v1189_v43  ;;  %v20152_v30 = vld [vmem:[#allocation10_spill] sm:$0xff] }
 0x261   :  { %20131 = vst [vmem:[#allocation68_spill] sm:$0xff] %v14645_v15  ;;  %20132 = vst [vmem:[#allocation22_spill] sm:$0xff] %v14650_v20  ;;  %9728 = vmatprep.subr.mxu0 %v14635_v8  ;;  %9520 = vmatpush3.msra.mxu1 %v14630_v7  ;;  %vm1091_vm10 = vcmp.gt.f32.partialorder %v14214_v59, 0.0  ;;  %vm1114_vm12 = vcmp.gt.f32.partialorder %v14324_v39, 0.0  ;;  %v1202_v9 = vmul.f32 %v20104_v58, %v14388_v47  ;;  %vm1075_vm13 = vcmp.gt.f32.partialorder %v14138_v48, 0.0 }
 0x262   :  { %v14661_v0 = vsel %vm1081_vm15, %v14168_v51, %v1154_v44  ;;  %v14666_v23 = vsel %vm1131_vm0, %v14400_v35, %v1204_v14  ;;  %9729 = vmatpush3.msra.mxu0 %v14650_v20  ;;  %9521 = vmatprep.subr.mxu1 %v14645_v15  ;;  %vm1129_vm14 = vcmp.gt.f32.partialorder %v14388_v47, 0.0  ;;  %v1186_v49 = vmul.f32 %v20104_v58, %v14316_v6  ;;  %v14686_v35 = vpop.f32.mrf.mxu1 }
 0x263   :  { %20133 = vst [vmem:[#allocation13_spill] sm:$0xff] %v14661_v0  ;;  %20134 = vst [vmem:[#allocation18_spill] sm:$0xff] %v14666_v23  ;;  %v14677_v51 = vsel %vm1096_vm1, %v14240_v25, %v1169_v54  ;;  %v14682_v44 = vsel %vm1115_vm2, %v14328_v52, %v1188_v53  ;;  %9730 = vmatprep.subr.mxu0 %v14666_v23  ;;  %9522 = vmatpush3.msra.mxu1 %v14661_v0  ;;  %vm1090_vm15 = vcmp.gt.f32.partialorder %v14210_v57, 0.0 }
 0x264   :  { %20135 = vst [vmem:[#allocation71_spill] sm:$0xff] %v14677_v51  ;;  %20136 = vst [vmem:[#allocation73_spill] sm:$0xff] %v14682_v44  ;;  %vm1113_vm0 = vcmp.gt.f32.partialorder %v14316_v6, 0.0  ;;  %v1201_v43 = vmul.f32 %v20104_v58, %v14384_v34  ;;  %v14696_v25 = vsel %vm1080_vm5, %v14164_v40, %v14511_v28  ;;  %v14701_v52 = vsel %vm1130_vm3, %v14396_v60, %v1203_v31 }
 0x265   :  { %20137 = vst [vmem:[#allocation75_spill] sm:$0xff] %v14696_v25  ;;  %20138 = vst [vmem:[#allocation77_spill] sm:$0xff] %v14701_v52  ;;  %9731 = vmatpush3.msra.mxu0 %v14682_v44  ;;  %9523 = vmatprep.subr.mxu1 %v14677_v51  ;;  %vm1128_vm2 = vcmp.gt.f32.partialorder %v14384_v34, 0.0  ;;  %v1185_v53 = vmul.f32 %v20104_v58, %v14312_v37  ;;  %vm20139_vm5 = vcmp.gt.f32.partialorder %v14236_v27, 0.0  ;;  %vm1089_vm3 = vcmp.gt.f32.partialorder %v14204_v63, 0.0 }
 0x266   :  { %v14712_v40 = vsel %vm20139_vm5, %v14236_v27, %v1168_v38  ;;  %v14717_v60 = vsel %vm1114_vm12, %v14324_v39, %v1187_v42  ;;  %9732 = vmatprep.subr.mxu0 %v14701_v52  ;;  %9524 = vmatpush3.msra.mxu1 %v14696_v25  ;;  %vm1112_vm1 = vcmp.gt.f32.partialorder %v14312_v37, 0.0  ;;  %v1200_v31 = vmul.f32 %v20104_v58, %v14380_v11  ;;  %v20161_v42 = vld [vmem:[#allocation89_spill] sm:$0xff] }
 0x267   :  { %20140 = vst [vmem:[#allocation78_spill] sm:$0xff] %v14712_v40  ;;  %20141 = vst [vmem:[#allocation72_spill] sm:$0xff] %v14717_v60  ;;  %v14729_v27 = vsel %vm1079_vm9, %v14160_v56, %v14499_v3  ;;  %v14734_v39 = vsel %vm1129_vm14, %v14388_v47, %v1202_v9  ;;  %9733 = vmatpush3.msra.mxu0 %v14717_v60  ;;  %9525 = vmatprep.subr.mxu1 %v14712_v40  ;;  %vm1073_vm12 = vcmp.gt.f32.partialorder %v14128_v5, 0.0  ;;  %v14755_v47 = vpop.f32.mrf.mxu1  ;;  %v20162_v9 = vld [vmem:[#allocation5_spill] sm:$0xff] }
 0x268   :  { %20142 = vst [vmem:[#allocation79_spill] sm:$0xff] %v14729_v27  ;;  %20143 = vst [vmem:[#allocation80_spill] sm:$0xff] %v14734_v39  ;;  %vm1127_vm5 = vcmp.gt.f32.partialorder %v14380_v11, 0.0  ;;  %v1184_v28 = vmul.f32 %v20104_v58, %v14308_v12  ;;  %v14746_v56 = vsel %vm1094_vm8, %v14232_v62, %v14595_v41  ;;  %v14751_v3 = vsel %vm1113_vm0, %v14316_v6, %v1186_v49  ;;  %v20157_v41 = vld [vmem:[#allocation90_spill] sm:$0xff] }
 0x269   :  { %20144 = vst [vmem:[#allocation91_spill] sm:$0xff] %v14746_v56  ;;  %20145 = vst [vmem:[#allocation6_spill] sm:$0xff] %v14751_v3  ;;  %9734 = vmatprep.subr.mxu0 %v14734_v39  ;;  %9526 = vmatpush3.msra.mxu1 %v14729_v27  ;;  %vm1088_vm9 = vcmp.gt.f32.partialorder %v14200_v29, 0.0  ;;  %vm1111_vm14 = vcmp.gt.f32.partialorder %v14308_v12, 0.0  ;;  %v1199_v32 = vmul.f32 %v20104_v58, %v14376_v55  ;;  %vm1072_vm8 = vcmp.gt.f32.partialorder %v14124_v21, 0.0 }
 0x26a   :  { %v14765_v62 = vsel %vm1078_vm4, %v14156_v46, %v14495_v1  ;;  %v14770_v6 = vsel %vm1128_vm2, %v14384_v34, %v1201_v43  ;;  %9735 = vmatpush3.msra.mxu0 %v14751_v3  ;;  %9527 = vmatprep.subr.mxu1 %v14746_v56  ;;  %vm1126_vm0 = vcmp.gt.f32.partialorder %v14376_v55, 0.0  ;;  %v1183_v14 = vmul.f32 %v20104_v58, %v14304_v17  ;;  %v20163_v43 = vld [vmem:[#allocation4_spill] sm:$0xff] }
 0x26b   :  { %20146 = vst [vmem:[#allocation82_spill] sm:$0xff] %v14765_v62  ;;  %20147 = vst [vmem:[#allocation70_spill] sm:$0xff] %v14770_v6  ;;  %v14782_v46 = vsel %vm1093_vm11, %v14222_v16, %v14591_v22  ;;  %v14787_v34 = vsel %vm1112_vm1, %v14312_v37, %v1185_v53  ;;  %9736 = vmatprep.subr.mxu0 %v14770_v6  ;;  %9528 = vmatpush3.msra.mxu1 %v14765_v62  ;;  %vm1087_vm4 = vcmp.gt.f32.partialorder %v14196_v19, 0.0  ;;  %v20156_v22 = vld [vmem:[#allocation83_spill] sm:$0xff]  ;;  %v20166_v53 = vld [vmem:[#allocation88_spill] sm:$0xff] }
 0x26c   :  { %20148 = vst [vmem:[#allocation15_spill] sm:$0xff] %v14782_v46  ;;  %20149 = vst [vmem:[#allocation20_spill] sm:$0xff] %v14787_v34  ;;  %vm1110_vm2 = vcmp.gt.f32.partialorder %v14304_v17, 0.0  ;;  %v1198_v1 = vmul.f32 %v20104_v58, %v14368_v45  ;;  %v14799_v16 = vsel %vm1077_vm7, %v14146_v33, %v14480_v61  ;;  %v14804_v37 = vsel %vm1127_vm5, %v14380_v11, %v1200_v31  ;;  %v14825_v11 = vpop.f32.mrf.mxu1 }
 0x26d   :  { %20150 = vst [vmem:[#allocation106_spill] sm:$0xff] %v14799_v16  ;;  %20151 = vst [vmem:[#allocation107_spill] sm:$0xff] %v14804_v37  ;;  %9737 = vmatpush3.msra.mxu0 %v14787_v34  ;;  %9529 = vmatprep.subr.mxu1 %v14782_v46  ;;  %vm1125_vm1 = vcmp.gt.f32.partialorder %v14368_v45, 0.0  ;;  %v1182_v54 = vmul.f32 %v20104_v58, %v20152_v30  ;;  %vm20153_vm7 = vcmp.gt.f32.partialorder %v14218_v26, 0.0  ;;  %vm1086_vm5 = vcmp.gt.f32.partialorder %v20156_v22, 0.0 }
 0x26e   :  { %v14816_v61 = vsel %vm20153_vm7, %v14218_v26, %v14576_v36  ;;  %v14821_v33 = vsel %vm1111_vm14, %v14308_v12, %v1184_v28  ;;  %9738 = vmatprep.subr.mxu0 %v14804_v37  ;;  %9530 = vmatpush3.msra.mxu1 %v14799_v16  ;;  %vm1109_vm11 = vcmp.gt.f32.partialorder %v20152_v30, 0.0  ;;  %v1197_v38 = vmul.f32 %v20104_v58, %v20157_v41  ;;  %v20158_v26 = vld [vmem:[#allocation103_spill] sm:$0xff]  ;;  %v20167_v28 = vld [vmem:[#allocation102_spill] sm:$0xff] }
 0x26f   :  { %20154 = vst [vmem:[#allocation10_spill] sm:$0xff] %v14816_v61  ;;  %20155 = vst [vmem:[#allocation108_spill] sm:$0xff] %v14821_v33  ;;  %v14835_v36 = vsel %vm1076_vm6, %v14142_v2, %v20158_v26  ;;  %v14840_v12 = vsel %vm1126_vm0, %v14376_v55, %v1199_v32  ;;  %9739 = vmatpush3.msra.mxu0 %v14821_v33  ;;  %9531 = vmatprep.subr.mxu1 %v14816_v61  ;;  %vm1070_vm14 = vcmp.gt.f32.partialorder %v20161_v42, 0.0  ;;  %v20170_v32 = vld [vmem:[#allocation94_spill] sm:$0xff] }
 0x270   :  { %20159 = vst [vmem:[#allocation83_spill] sm:$0xff] %v14835_v36  ;;  %20160 = vst [vmem:[#allocation90_spill] sm:$0xff] %v14840_v12  ;;  %vm1124_vm7 = vcmp.gt.f32.partialorder %v20157_v41, 0.0  ;;  %v1181_v49 = vmul.f32 %v20104_v58, %v20162_v9  ;;  %v14852_v2 = vsel %vm1091_vm10, %v14214_v59, %v20163_v43  ;;  %v14857_v55 = vsel %vm1110_vm2, %v14304_v17, %v1183_v14  ;;  %v20171_v26 = vld [vmem:[#allocation62_spill] sm:$0xff]  ;;  %v20174_v43 = vld [vmem:[#allocation87_spill] sm:$0xff] }
 0x271   :  { %20164 = vst [vmem:[#allocation103_spill] sm:$0xff] %v14852_v2  ;;  %20165 = vst [vmem:[#allocation89_spill] sm:$0xff] %v14857_v55  ;;  %9740 = vmatprep.subr.mxu0 %v14840_v12  ;;  %9532 = vmatpush3.msra.mxu1 %v14835_v36  ;;  %vm1108_vm6 = vcmp.gt.f32.partialorder %v20162_v9, 0.0  ;;  %v1196_v31 = vmul.f32 %v20104_v58, %v20166_v53  ;;  %v14868_v59 = vsel %vm1075_vm13, %v14138_v48, %v20167_v28 }
 0x272   :  { %20168 = vst [vmem:[#allocation5_spill] sm:$0xff] %v14868_v59  ;;  %v14873_v17 = vsel %vm1125_vm1, %v14368_v45, %v1198_v1  ;;  %9741 = vmatpush3.msra.mxu0 %v14857_v55  ;;  %9533 = vmatprep.subr.mxu1 %v14852_v2  ;;  %vm1123_vm10 = vcmp.gt.f32.partialorder %v20166_v53, 0.0  ;;  %v1180_v14 = vmul.f32 %v20104_v58, %v20170_v32  ;;  %v14893_v1 = vpop.f32.mrf.mxu1  ;;  %vm1107_vm13 = vcmp.gt.f32.partialorder %v20170_v32, 0.0  ;;  %v20175_v2 = vld [vmem:[#allocation101_spill] sm:$0xff] }
 0x273   :  { %20169 = vst [vmem:[#allocation4_spill] sm:$0xff] %v14873_v17  ;;  %v14884_v48 = vsel %vm1090_vm15, %v14210_v57, %v20171_v26  ;;  %v14889_v45 = vsel %vm1109_vm11, %v20152_v30, %v1182_v54  ;;  %9742 = vmatprep.subr.mxu0 %v14873_v17  ;;  %9534 = vmatpush3.msra.mxu1 %v14868_v59  ;;  %vm20176_vm15 = vcmp.gt.f32.partialorder %v14134_v13, 0.0  ;;  %vm1122_vm0 = vcmp.gt.f32.partialorder %v20174_v43, 0.0  ;;  %v20179_v54 = vld [vmem:[#allocation93_spill] sm:$0xff]  ;;  %v20180_v59 = vld [vmem:[#allocation59_spill] sm:$0xff] }
 0x274   :  { %20172 = vst [vmem:[#allocation88_spill] sm:$0xff] %v14884_v48  ;;  %20173 = vst [vmem:[#allocation102_spill] sm:$0xff] %v14889_v45  ;;  %v1195_v28 = vmul.f32 %v20104_v58, %v20174_v43  ;;  %v14902_v57 = vsel %vm20176_vm15, %v14134_v13, %v20175_v2  ;;  %v14907_v30 = vsel %vm1124_vm7, %v20157_v41, %v1197_v38  ;;  %9743 = vmatpush3.msra.mxu0 %v14889_v45  ;;  %v20183_v38 = vld [vmem:[#allocation86_spill] sm:$0xff] }
 0x275   :  { %20177 = vst [vmem:[#allocation94_spill] sm:$0xff] %v14902_v57  ;;  %20178 = vst [vmem:[#allocation62_spill] sm:$0xff] %v14907_v30  ;;  %9535 = vmatprep.subr.mxu1 %v14884_v48  ;;  %v1179_v26 = vmul.f32 %v20104_v58, %v20179_v54  ;;  %v14918_v13 = vsel %vm1089_vm3, %v14204_v63, %v20180_v59  ;;  %v14923_v41 = vsel %vm1108_vm6, %v20162_v9, %v1181_v49  ;;  %v20184_v48 = vld [vmem:[#allocation100_spill] sm:$0xff]  ;;  %v20187_v49 = vld [vmem:[#allocation53_spill] sm:$0xff] }
 0x276   :  { %20181 = vst [vmem:[#allocation87_spill] sm:$0xff] %v14918_v13  ;;  %20182 = vst [vmem:[#allocation101_spill] sm:$0xff] %v14923_v41  ;;  %9744 = vmatprep.subr.mxu0 %v14907_v30  ;;  %9536 = vmatpush3.msra.mxu1 %v14902_v57  ;;  %vm1106_vm2 = vcmp.gt.f32.partialorder %v20179_v54, 0.0  ;;  %v1194_v2 = vmul.f32 %v20104_v58, %v20183_v38  ;;  %v14934_v63 = vsel %vm1073_vm12, %v14128_v5, %v20184_v48  ;;  %v20188_v57 = vld [vmem:[#allocation76_spill] sm:$0xff]  ;;  %v20191_v48 = vld [vmem:[#allocation99_spill] sm:$0xff] }
 0x277   :  { %20185 = vst [vmem:[#allocation93_spill] sm:$0xff] %v14934_v63  ;;  %v14939_v9 = vsel %vm1123_vm10, %v20166_v53, %v1196_v31  ;;  %9745 = vmatpush3.msra.mxu0 %v14923_v41  ;;  %9537 = vmatprep.subr.mxu1 %v14918_v13  ;;  %vm1121_vm3 = vcmp.gt.f32.partialorder %v20183_v38, 0.0  ;;  %v1193_v59 = vmul.f32 %v20104_v58, %v20187_v49  ;;  %v14959_v31 = vpop.f32.mrf.mxu1  ;;  %vm1105_vm12 = vcmp.gt.f32.partialorder %v14280_v10, 0.0 }
 0x278   :  { %20186 = vst [vmem:[#allocation59_spill] sm:$0xff] %v14939_v9  ;;  %v14950_v5 = vsel %vm1088_vm9, %v14200_v29, %v20188_v57  ;;  %v14955_v53 = vsel %vm1107_vm13, %v20170_v32, %v1180_v14  ;;  %9746 = vmatprep.subr.mxu0 %v14939_v9  ;;  %9538 = vmatpush3.msra.mxu1 %v14934_v63  ;;  %vm1120_vm9 = vcmp.gt.f32.partialorder %v20187_v49, 0.0  ;;  %v20194_v14 = vld [vmem:[#allocation8_spill] sm:$0xff]  ;;  %v20195_v63 = vld [vmem:[#allocation55_spill] sm:$0xff]  ;;  %vm20200_vm11 = vcmp.gt.f32.partialorder %v14120_v18, 0.0 }
 0x279   :  { %20189 = vst [vmem:[#allocation86_spill] sm:$0xff] %v14950_v5  ;;  %20190 = vst [vmem:[#allocation100_spill] sm:$0xff] %v14955_v53  ;;  %v14966_v13 = vsel %vm1072_vm8, %v14124_v21, %v20191_v48  ;;  %v14971_v29 = vsel %vm1122_vm0, %v20174_v43, %v1195_v28  ;;  %9747 = vmatpush3.msra.mxu0 %v14955_v53  ;;  %9539 = vmatprep.subr.mxu1 %v14950_v5  ;;  %vm1104_vm8 = vcmp.gt.f32.partialorder %v20194_v14, 0.0  ;;  %v20198_v28 = vld [vmem:[#allocation81_spill] sm:$0xff]  ;;  %v20199_v5 = vld [vmem:[#allocation98_spill] sm:$0xff] }
 0x27a   :  { %20192 = vst [vmem:[#allocation53_spill] sm:$0xff] %v14966_v13  ;;  %20193 = vst [vmem:[#allocation76_spill] sm:$0xff] %v14971_v29  ;;  %v1143_v32 = vmul.f32 %v20104_v58, %v20161_v42  ;;  %v1177_v57 = vmul.f32 %v20104_v58, %v20194_v14  ;;  %v14984_v21 = vsel %vm1087_vm4, %v14196_v19, %v20195_v63  ;;  %9748 = vmatprep.subr.mxu0 %v14971_v29 }
 0x27b   :  { %20196 = vst [vmem:[#allocation99_spill] sm:$0xff] %v14984_v21  ;;  %v14989_v43 = vsel %vm1106_vm2, %v20179_v54, %v1179_v26  ;;  %9540 = vmatpush3.msra.mxu1 %v14966_v13  ;;  %v1192_v48 = vmul.f32 %v20104_v58, %v20198_v28  ;;  %v15000_v19 = vsel %vm20200_vm11, %v14120_v18, %v20199_v5  ;;  %vm1119_vm4 = vcmp.gt.f32.partialorder %v20198_v28, 0.0  ;;  %v20203_v26 = vld [vmem:[#allocation69_spill] sm:$0xff]  ;;  %v20204_v13 = vld [vmem:[#allocation11_spill] sm:$0xff] }
 0x27c   :  { %20197 = vst [vmem:[#allocation8_spill] sm:$0xff] %v14989_v43  ;;  %20201 = vst [vmem:[#allocation55_spill] sm:$0xff] %v15000_v19  ;;  %v15005_v54 = vsel %vm1121_vm3, %v20183_v38, %v1194_v2  ;;  %9749 = vmatpush3.msra.mxu0 %v14989_v43  ;;  %9541 = vmatprep.subr.mxu1 %v14984_v21  ;;  %v1176_v63 = vmul.f32 %v20104_v58, %v20203_v26  ;;  %v15026_v2 = vpop.f32.mrf.mxu1  ;;  %vm1103_vm1 = vcmp.gt.f32.partialorder %v20203_v26, 0.0  ;;  %v20208_v5 = vld [vmem:[#allocation7_spill] sm:$0xff] }
 0x27d   :  { %20202 = vst [vmem:[#allocation81_spill] sm:$0xff] %v15005_v54  ;;  %v15016_v18 = vsel %vm1086_vm5, %v20156_v22, %v20204_v13  ;;  %v15022_v38 = vsel %vm1105_vm12, %v14280_v10, %v14623_v4  ;;  %9750 = vmatprep.subr.mxu0 %v15005_v54  ;;  %9542 = vmatpush3.msra.mxu1 %v15000_v19  ;;  %20207 = vst [vmem:[#allocation11_spill] sm:$0xff] %v15026_v2  ;;  %vm1118_vm5 = vcmp.gt.f32.partialorder %v20208_v5, 0.0  ;;  %v20211_v4 = vld [vmem:[#allocation85_spill] sm:$0xff] }
 0x27e   :  { %20205 = vst [vmem:[#allocation98_spill] sm:$0xff] %v15016_v18  ;;  %20206 = vst [vmem:[#allocation69_spill] sm:$0xff] %v15022_v38  ;;  %v1191_v21 = vmul.f32 %v20104_v58, %v20208_v5  ;;  %v15034_v22 = vsel %vm1120_vm9, %v20187_v49, %v1193_v59  ;;  %9751 = vmatpush3.msra.mxu0 %v15022_v38  ;;  %9543 = vmatprep.subr.mxu1 %v15016_v18  ;;  %vm1102_vm7 = vcmp.gt.f32.partialorder %v20211_v4, 0.0  ;;  %v20214_v49 = vld [vmem:[#allocation24_spill] sm:$0xff]  ;;  %v20223_v18 = vld [vmem:[#allocation19_spill] sm:$0xff] }
 0x27f   :  { %20209 = vst [vmem:[#allocation7_spill] sm:$0xff] %v15034_v22  ;;  %v15041_v10 = vsel %vm1070_vm14, %v20161_v42, %v1143_v32  ;;  %v1175_v13 = vmul.f32 %v20104_v58, %v20211_v4  ;;  %v15049_v19 = vsel %vm1104_vm8, %v20194_v14, %v1177_v57  ;;  %9752 = vmatprep.subr.mxu0 %v15034_v22  ;;  %v20215_v59 = vld [vmem:[#allocation32_spill] sm:$0xff]  ;;  %v20216_v32 = vld [vmem:[#allocation23_spill] sm:$0xff]  ;;  %v20218_v57 = vmov 1.0   ;;  %v15070_v58 = vpop.f32.mrf.mxu1 }
 0x280   :  { %20210 = vst [vmem:[#allocation109_spill] sm:$0xff] %v15041_v10  ;;  %20212 = vst [vmem:[#allocation85_spill] sm:$0xff] %v15049_v19  ;;  %9544 = vmatpush3.msra.mxu1 %v15041_v10  ;;  %v15057_v42 = vsel %vm1119_vm4, %v20198_v28, %v1192_v48  ;;  %9753 = vmatpush3.msra.mxu0 %v15049_v19  ;;  %vm2080_vm14 = vcmp.eq.s32.totalorder %v20216_v32, %v20215_v59  ;;  %v20221_v48 = vld [vmem:[#allocation63_spill] sm:$0xff] }
 0x281   :  { %20213 = vst [vmem:[#allocation110_spill] sm:$0xff] %v15057_v42  ;;  %9584 = vmatprep.subr.mxu1 %v20214_v49  ;;  %v15066_v14 = vsel %vm1103_vm1, %v20203_v26, %v1176_v63  ;;  %9754 = vmatprep.subr.mxu0 %v15057_v42  ;;  %20219 = vst [vmem:[#allocation111_spill] sm:$0xff] %v15070_v58  ;;  %v15073_v28 = vsel %vm1118_vm5, %v20208_v5, %v1191_v21  ;;  %v20222_v10 = vld [vmem:[#allocation35_spill] sm:$0xff]  ;;  %v20225_v21 = vld [vmem:[#allocation105_spill] sm:$0xff]  ;;  %v20227_v5 = vmov 0.0   ;;  %v15098_v58 = vpop.f32.mrf.mxu1 }
 0x282   :  { %20217 = vst [vmem:[#allocation23_spill] sm:$0xff] %v15066_v14  ;;  %8314 = vmatmul.mubr.msk.f32.vlgmr.msra.gmra.mxu1 %vm2080_vm14, %v20218_v57  ;;  %20220 = vst [vmem:[#allocation112_spill] sm:$0xff] %v15073_v28  ;;  %9755 = vmatpush3.msra.mxu0 %v15066_v14  ;;  %vm2085_vm6 = vcmp.eq.s32.totalorder %v20223_v18, %v20222_v10  ;;  %v15080_v2 = vsel %vm1102_vm7, %v20211_v4, %v1175_v13  ;;  %v2575_v26 = vld [vmem:[%s19231_s2 + $0x78] sm:$0xff]  ;;  %v20228_v4 = vld [vmem:[#allocation84_spill] sm:$0xff] }
 0x283   :  { %9585 = vmatpush3.msra.mxu1 %v20221_v48  ;;  %20224 = vst [vmem:[#allocation19_spill] sm:$0xff] %v15080_v2  ;;  %9756 = vmatprep.subr.mxu0 %v15073_v28  ;;  %v20226_v63 = vld [vmem:[#allocation34_spill] sm:$0xff]  ;;  %v20229_v13 = vld [vmem:[#allocation40_spill] sm:$0xff]  ;;  %20230 = vst [vmem:[#allocation84_spill] sm:$0xff] %v15098_v58  ;;  %v15116_v58 = vpop.f32.mrf.mxu1  ;;  %vm2084_vm2 = vcmp.eq.s32.totalorder %v20223_v18, %v20215_v59 }
 0x284   :  { %8315 = vmatprep.mubr.msk.f32.mxu1 %vm2085_vm6, %v20218_v57  ;;  %vm2630_vm10 = vcmp.eq.s32.totalorder %v20226_v63, %v20225_v21  ;;  %9757 = vmatpush3.msra.mxu0 %v15080_v2  ;;  %vm2635_vm13 = vcmp.eq.s32.totalorder %v20229_v13, %v20228_v4  ;;  %v2574_v48 = vld [vmem:[%s19231_s2 + $0x70] sm:$0xff]  ;;  %vm2634_vm15 = vcmp.eq.s32.totalorder %v20229_v13, %v20225_v21  ;;  %v2572_v63 = vld [vmem:[%s19231_s2 + $0x60] sm:$0xff] }
 0x285   :  { %9586 = vmatprep.subr.mxu1 %v14635_v8  ;;  %8444 = vmatmul.mubr.msk.f32.vlgmr.msra.gmra.mxu0 %vm2630_vm10, %v20218_v57  ;;  %v2573_v8 = vld [vmem:[%s19231_s2 + $0x68] sm:$0xff] }
 0x286   :  { %11152 = vmatprep.subr.mxu0 %v20227_v5  ;;  %8445 = vmatprep.mubr.msk.f32.mxu0 %vm2635_vm13, %v20218_v57 }
 0x287   :  { %11153 = vmatpush3.msra.mxu0 %v2575_v26  ;;  %9587 = vmatpush3.msra.mxu1 %v14650_v20  ;;  %v20231_v26 = vld [vmem:[#allocation37_spill] sm:$0xff]  ;;  %v15136_v20 = vpop.f32.mrf.mxu1 }
 0x288   :  { %11154 = vmatprep.subr.mxu0 %v20227_v5  ;;  %9588 = vmatprep.subr.mxu1 %v14666_v23  ;;  %vm2639_vm0 = vcmp.eq.s32.totalorder %v20231_v26, %v20228_v4  ;;  %vm2638_vm3 = vcmp.eq.s32.totalorder %v20231_v26, %v20225_v21  ;;  %v2570_v23 = vld [vmem:[%s19231_s2 + $0x50] sm:$0xff]  ;;  %v2568_v26 = vld [vmem:[%s19231_s2 + $0x40] sm:$0xff] }
 0x289   :  { %11155 = vmatpush3.msra.mxu0 %v2574_v48  ;;  %v2571_v48 = vld [vmem:[%s19231_s2 + $0x58] sm:$0xff]  ;;  %8316 = vmatmul.mubr.msk.f32.gmra.mxu1 %vm2084_vm2, %v20218_v57  ;;  %v15156_v13 = vpop.f32.mrf.mxu1 }
 0x28a   :  { %8446 = vmatmul.mubr.msk.f32.gmra.mxu0 %vm2634_vm15, %v20218_v57  ;;  %11156 = vmatprep.subr.mxu0 %v20227_v5 }
 0x28b   :  { %8447 = vmatprep.mubr.msk.f32.mxu0 %vm2639_vm0, %v20218_v57  ;;  %11157 = vmatpush3.msra.mxu0 %v2573_v8  ;;  %v20232_v8 = vld [vmem:[#allocation42_spill] sm:$0xff] }
 0x28c   :  { %11158 = vmatprep.subr.mxu0 %v20227_v5  ;;  %9589 = vmatpush3.msra.mxu1 %v14682_v44  ;;  %vm2643_vm12 = vcmp.eq.s32.totalorder %v20232_v8, %v20228_v4  ;;  %v2569_v44 = vld [vmem:[%s19231_s2 + $0x48] sm:$0xff]  ;;  %vm2642_vm8 = vcmp.eq.s32.totalorder %v20232_v8, %v20225_v21  ;;  %v15174_v8 = vpop.f32.mrf.mxu1 }
 0x28d   :  { %11159 = vmatpush3.msra.mxu0 %v2572_v63  ;;  %v20233_v63 = vld [vmem:[#allocation26_spill] sm:$0xff]  ;;  %9590 = vmatprep.subr.mxu1 %v14701_v52 }
 0x28e   :  { %8448 = vmatmul.mubr.msk.f32.gmra.mxu0 %vm2638_vm3, %v20218_v57  ;;  %11160 = vmatprep.subr.mxu0 %v20227_v5  ;;  %vm2089_vm9 = vcmp.eq.s32.totalorder %v20233_v63, %v20222_v10  ;;  %v2566_v52 = vld [vmem:[%s19231_s2 + $0x30] sm:$0xff]  ;;  %vm2088_vm5 = vcmp.eq.s32.totalorder %v20233_v63, %v20215_v59 }
 0x28f   :  { %8449 = vmatprep.mubr.msk.f32.mxu0 %vm2643_vm12, %v20218_v57  ;;  %11161 = vmatpush3.msra.mxu0 %v2571_v48  ;;  %v20234_v48 = vld [vmem:[#allocation39_spill] sm:$0xff] }
 0x290   :  { %11162 = vmatprep.subr.mxu0 %v20227_v5  ;;  %8317 = vmatprep.mubr.msk.f32.mxu1 %vm2089_vm9, %v20218_v57  ;;  %vm2647_vm11 = vcmp.eq.s32.totalorder %v20234_v48, %v20228_v4  ;;  %vm2646_vm4 = vcmp.eq.s32.totalorder %v20234_v48, %v20225_v21 }
 0x291   :  { %11163 = vmatpush3.msra.mxu0 %v2570_v23  ;;  %v2567_v23 = vld [vmem:[%s19231_s2 + $0x38] sm:$0xff]  ;;  %9591 = vmatpush3.msra.mxu1 %v14717_v60  ;;  %v15194_v60 = vpop.f32.mrf.mxu1 }
 0x292   :  { %8450 = vmatmul.mubr.msk.f32.gmra.mxu0 %vm2642_vm8, %v20218_v57  ;;  %11164 = vmatprep.subr.mxu0 %v20227_v5 }
 0x293   :  { %8451 = vmatprep.mubr.msk.f32.mxu0 %vm2647_vm11, %v20218_v57  ;;  %11165 = vmatpush3.msra.mxu0 %v2569_v44  ;;  %v20235_v44 = vld [vmem:[#allocation44_spill] sm:$0xff]  ;;  %v15214_v48 = vpop.f32.mrf.mxu1 }
 0x294   :  { %11166 = vmatprep.subr.mxu0 %v20227_v5  ;;  %9592 = vmatprep.subr.mxu1 %v14734_v39  ;;  %vm2651_vm1 = vcmp.eq.s32.totalorder %v20235_v44, %v20228_v4  ;;  %vm2650_vm7 = vcmp.eq.s32.totalorder %v20235_v44, %v20225_v21  ;;  %v2564_v39 = vld [vmem:[%s19231_s2 + $0x20] sm:$0xff]  ;;  %v2562_v44 = vld [vmem:[%s19231_s2 + $0x10] sm:$0xff] }
 0x295   :  { %11167 = vmatpush3.msra.mxu0 %v2568_v26  ;;  %v2565_v26 = vld [vmem:[%s19231_s2 + $0x28] sm:$0xff]  ;;  %8318 = vmatmul.mubr.msk.f32.gmra.mxu1 %vm2088_vm5, %v20218_v57 }
 0x296   :  { %8452 = vmatmul.mubr.msk.f32.gmra.mxu0 %vm2646_vm4, %v20218_v57  ;;  %11168 = vmatprep.subr.mxu0 %v20227_v5 }
 0x297   :  { %8453 = vmatprep.mubr.msk.f32.mxu0 %vm2651_vm1, %v20218_v57  ;;  %11169 = vmatpush3.msra.mxu0 %v2567_v23  ;;  %v20236_v23 = vld [vmem:[#allocation41_spill] sm:$0xff] }
 0x298   :  { %11170 = vmatprep.subr.mxu0 %v20227_v5  ;;  %9593 = vmatpush3.msra.mxu1 %v14751_v3  ;;  %vm2655_vm14 = vcmp.eq.s32.totalorder %v20236_v23, %v20228_v4  ;;  %v2563_v3 = vld [vmem:[%s19231_s2 + $0x18] sm:$0xff]  ;;  %vm2654_vm10 = vcmp.eq.s32.totalorder %v20236_v23, %v20225_v21  ;;  %v15232_v23 = vpop.f32.mrf.mxu1 }
 0x299   :  { %11171 = vmatpush3.msra.mxu0 %v2566_v52  ;;  %v20237_v52 = vld [vmem:[#allocation21_spill] sm:$0xff]  ;;  %9594 = vmatprep.subr.mxu1 %v14770_v6  ;;  %v2560_v6 = vld [vmem:[%s19231_s2] sm:$0xff] }
 0x29a   :  { %8454 = vmatmul.mubr.msk.f32.gmra.mxu0 %vm2650_vm7, %v20218_v57  ;;  %11172 = vmatprep.subr.mxu0 %v20227_v5  ;;  %vm2093_vm6 = vcmp.eq.s32.totalorder %v20237_v52, %v20222_v10  ;;  %vm2092_vm2 = vcmp.eq.s32.totalorder %v20237_v52, %v20215_v59 }
 0x29b   :  { %8455 = vmatprep.mubr.msk.f32.mxu0 %vm2655_vm14, %v20218_v57  ;;  %11173 = vmatpush3.msra.mxu0 %v2565_v26  ;;  %v20238_v26 = vld [vmem:[#allocation46_spill] sm:$0xff] }
 0x29c   :  { %11174 = vmatprep.subr.mxu0 %v20227_v5  ;;  %8319 = vmatprep.mubr.msk.f32.mxu1 %vm2093_vm6, %v20218_v57  ;;  %vm2659_vm13 = vcmp.eq.s32.totalorder %v20238_v26, %v20228_v4  ;;  %vm2658_vm15 = vcmp.eq.s32.totalorder %v20238_v26, %v20225_v21 }
 0x29d   :  { %11175 = vmatpush3.msra.mxu0 %v2564_v39  ;;  %v2561_v39 = vld [vmem:[%s19231_s2 + $0x8] sm:$0xff]  ;;  %9595 = vmatpush3.msra.mxu1 %v14787_v34 }
 0x29e   :  { %8456 = vmatmul.mubr.msk.f32.gmra.mxu0 %vm2654_vm10, %v20218_v57  ;;  %11176 = vmatprep.subr.mxu0 %v20227_v5 }
 0x29f   :  { %8457 = vmatprep.mubr.msk.f32.mxu0 %vm2659_vm13, %v20218_v57  ;;  %11177 = vmatpush3.msra.mxu0 %v2563_v3  ;;  %v20239_v3 = vld [vmem:[#allocation43_spill] sm:$0xff] }
 0x2a0   :  { %11178 = vmatprep.subr.mxu0 %v20227_v5  ;;  %9596 = vmatprep.subr.mxu1 %v14804_v37  ;;  %vm2663_vm0 = vcmp.eq.s32.totalorder %v20239_v3, %v20228_v4  ;;  %vm2662_vm3 = vcmp.eq.s32.totalorder %v20239_v3, %v20225_v21  ;;  %v15248_v37 = vpop.f32.mrf.mxu1 }
 0x2a1   :  { %11179 = vmatpush3.msra.mxu0 %v2562_v44  ;;  %8320 = vmatmul.mubr.msk.f32.gmra.mxu1 %vm2092_vm2, %v20218_v57  ;;  %v20240_v44 = vld [vmem:[#allocation48_spill] sm:$0xff] }
 0x2a2   :  { %8458 = vmatmul.mubr.msk.f32.gmra.mxu0 %vm2658_vm15, %v20218_v57  ;;  %11180 = vmatprep.subr.mxu0 %v20227_v5  ;;  %vm2667_vm12 = vcmp.eq.s32.totalorder %v20240_v44, %v20228_v4  ;;  %vm2666_vm4 = vcmp.eq.s32.totalorder %v20240_v44, %v20225_v21 }
 0x2a3   :  { %8459 = vmatprep.mubr.msk.f32.mxu0 %vm2663_vm0, %v20218_v57  ;;  %11181 = vmatpush3.msra.mxu0 %v2561_v39  ;;  %v20241_v39 = vld [vmem:[#allocation28_spill] sm:$0xff] }
 0x2a4   :  { %11182 = vmatprep.subr.mxu0 %v20227_v5  ;;  %9597 = vmatpush3.msra.mxu1 %v14821_v33  ;;  %vm2097_vm9 = vcmp.eq.s32.totalorder %v20241_v39, %v20222_v10  ;;  %vm2096_vm8 = vcmp.eq.s32.totalorder %v20241_v39, %v20215_v59 }
 0x2a5   :  { %11183 = vmatpush3.msra.mxu0 %v2560_v6  ;;  %8321 = vmatprep.mubr.msk.f32.mxu1 %vm2097_vm9, %v20218_v57  ;;  %v20242_v6 = vld [vmem:[#allocation25_spill] sm:$0xff] }
 0x2a6   :  { %8460 = vmatmul.mubr.msk.f32.gmra.mxu0 %vm2662_vm3, %v20218_v57  ;;  %9926 = vmatprep.subr.mxu0 %v20214_v49  ;;  %vm2101_vm11 = vcmp.eq.s32.totalorder %v20242_v6, %v20222_v10  ;;  %v20243_v49 = vld [vmem:[#allocation45_spill] sm:$0xff]  ;;  %vm2100_vm5 = vcmp.eq.s32.totalorder %v20242_v6, %v20215_v59 }
 0x2a7   :  { %8461 = vmatprep.mubr.msk.f32.mxu0 %vm2667_vm12, %v20218_v57  ;;  %9598 = vmatprep.subr.mxu1 %v14840_v12  ;;  %vm2671_vm1 = vcmp.eq.s32.totalorder %v20243_v49, %v20228_v4  ;;  %v15266_v12 = vpop.f32.mrf.mxu1  ;;  %vm2670_vm14 = vcmp.eq.s32.totalorder %v20243_v49, %v20225_v21 }
 0x2a8   :  { %8322 = vmatmul.mubr.msk.f32.gmra.mxu1 %vm2096_vm8, %v20218_v57 }
 0x2a9   :  { %9599 = vmatpush3.msra.mxu1 %v14857_v55  ;;  %8323 = vmatprep.mubr.msk.f32.mxu1 %vm2101_vm11, %v20218_v57 }
 0x2aa   :  { %9600 = vmatprep.subr.mxu1 %v14873_v17  ;;  %8462 = vmatmul.mubr.msk.f32.gmra.mxu0 %vm2666_vm4, %v20218_v57  ;;  %v20244_v17 = vld [vmem:[#allocation30_spill] sm:$0xff] }
 0x2ab   :  { %9601 = vmatpush3.msra.mxu1 %v14889_v45  ;;  %8463 = vmatprep.mubr.msk.f32.mxu0 %vm2671_vm1, %v20218_v57  ;;  %vm2105_vm7 = vcmp.eq.s32.totalorder %v20244_v17, %v20222_v10  ;;  %v20245_v45 = vld [vmem:[#allocation50_spill] sm:$0xff]  ;;  %vm2104_vm10 = vcmp.eq.s32.totalorder %v20244_v17, %v20215_v59 }
 0x2ac   :  { %9602 = vmatprep.subr.mxu1 %v14907_v30  ;;  %8324 = vmatmul.mubr.msk.f32.gmra.mxu1 %vm2100_vm5, %v20218_v57  ;;  %vm2675_vm6 = vcmp.eq.s32.totalorder %v20245_v45, %v20228_v4  ;;  %v15284_v30 = vpop.f32.mrf.mxu1  ;;  %vm2674_vm15 = vcmp.eq.s32.totalorder %v20245_v45, %v20225_v21  ;;  %v20258_v45 = vld [vmem:[#allocation95_spill] sm:$0xff] }
 0x2ad   :  { %9603 = vmatpush3.msra.mxu1 %v14923_v41  ;;  %8325 = vmatprep.mubr.msk.f32.mxu1 %vm2105_vm7, %v20218_v57  ;;  %v20255_v41 = vld [vmem:[#allocation38_spill] sm:$0xff] }
 0x2ae   :  { %9604 = vmatprep.subr.mxu1 %v14939_v9  ;;  %8464 = vmatmul.mubr.msk.f32.gmra.mxu0 %vm2670_vm14, %v20218_v57  ;;  %v20246_v9 = vld [vmem:[#allocation27_spill] sm:$0xff]  ;;  %vm2129_vm14 = vcmp.eq.s32.totalorder %v20255_v41, %v20222_v10 }
 0x2af   :  { %9605 = vmatpush3.msra.mxu1 %v14955_v53  ;;  %8465 = vmatprep.mubr.msk.f32.mxu0 %vm2675_vm6, %v20218_v57  ;;  %vm2109_vm13 = vcmp.eq.s32.totalorder %v20246_v9, %v20222_v10  ;;  %v20247_v53 = vld [vmem:[#allocation47_spill] sm:$0xff]  ;;  %vm2108_vm2 = vcmp.eq.s32.totalorder %v20246_v9, %v20215_v59  ;;  %vm2128_vm6 = vcmp.eq.s32.totalorder %v20255_v41, %v20215_v59 }
 0x2b0   :  { %9606 = vmatprep.subr.mxu1 %v14971_v29  ;;  %8326 = vmatmul.mubr.msk.f32.gmra.mxu1 %vm2104_vm10, %v20218_v57  ;;  %vm2679_vm0 = vcmp.eq.s32.totalorder %v20247_v53, %v20228_v4  ;;  %v15302_v29 = vpop.f32.mrf.mxu1  ;;  %vm2678_vm12 = vcmp.eq.s32.totalorder %v20247_v53, %v20225_v21  ;;  %vm2083_vm10 = vcmp.eq.s32.totalorder %v20216_v32, %v20228_v4  ;;  %v20257_v53 = vld [vmem:[#allocation92_spill] sm:$0xff] }
 0x2b1   :  { %9607 = vmatpush3.msra.mxu1 %v14989_v43  ;;  %8327 = vmatprep.mubr.msk.f32.mxu1 %vm2109_vm13, %v20218_v57  ;;  %v9387_v49 = vadd.f32 %v20258_v45, %v20257_v53  ;;  %vm2082_vm13 = vcmp.eq.s32.totalorder %v20216_v32, %v20225_v21  ;;  %v20263_v32 = vld [vmem:[#allocation60_spill] sm:$0xff] }
 0x2b2   :  { %9608 = vmatprep.subr.mxu1 %v15005_v54  ;;  %8466 = vmatmul.mubr.msk.f32.gmra.mxu0 %vm2674_vm15, %v20218_v57  ;;  %v20248_v54 = vld [vmem:[#allocation33_spill] sm:$0xff]  ;;  %vm2087_vm15 = vcmp.eq.s32.totalorder %v20223_v18, %v20228_v4 }
 0x2b3   :  { %9609 = vmatpush3.msra.mxu1 %v15022_v38  ;;  %8467 = vmatprep.mubr.msk.f32.mxu0 %vm2679_vm0, %v20218_v57  ;;  %vm2113_vm3 = vcmp.eq.s32.totalorder %v20248_v54, %v20222_v10  ;;  %v15318_v38 = vpop.f32.mrf.mxu1  ;;  %vm2112_vm9 = vcmp.eq.s32.totalorder %v20248_v54, %v20215_v59  ;;  %vm2086_vm0 = vcmp.eq.s32.totalorder %v20223_v18, %v20225_v21 }
 0x2b4   :  { %9610 = vmatprep.subr.mxu1 %v15034_v22  ;;  %8328 = vmatmul.mubr.msk.f32.gmra.mxu1 %vm2108_vm2, %v20218_v57  ;;  %vm2091_vm2 = vcmp.eq.s32.totalorder %v20233_v63, %v20228_v4 }
 0x2b5   :  { %9611 = vmatpush3.msra.mxu1 %v15049_v19  ;;  %8329 = vmatprep.mubr.msk.f32.mxu1 %vm2113_vm3, %v20218_v57  ;;  %v20249_v19 = vld [vmem:[#allocation29_spill] sm:$0xff]  ;;  %v15330_v22 = vpop.f32.mrf.mxu1  ;;  %vm2090_vm3 = vcmp.eq.s32.totalorder %v20233_v63, %v20225_v21 }
 0x2b6   :  { %9612 = vmatprep.subr.mxu1 %v15057_v42  ;;  %8468 = vmatmul.mubr.msk.f32.gmra.mxu0 %vm2678_vm12, %v20218_v57  ;;  %vm2117_vm8 = vcmp.eq.s32.totalorder %v20249_v19, %v20222_v10  ;;  %v20250_v42 = vld [vmem:[#allocation14_spill] sm:$0xff]  ;;  %vm2116_vm11 = vcmp.eq.s32.totalorder %v20249_v19, %v20215_v59  ;;  %vm2095_vm12 = vcmp.eq.s32.totalorder %v20237_v52, %v20228_v4 }
 0x2b7   :  { %9613 = vmatpush3.msra.mxu1 %v15066_v14  ;;  %v15338_v14 = vpop.f32.mrf.mxu1 }
 0x2b8   :  { %9614 = vmatprep.subr.mxu1 %v15073_v28  ;;  %8330 = vmatmul.mubr.msk.f32.gmra.mxu1 %vm2112_vm9, %v20218_v57  ;;  %v20251_v28 = vld [vmem:[#allocation36_spill] sm:$0xff]  ;;  %20252 = vst [vmem:[#allocation26_spill] sm:$0xff] %v15338_v14  ;;  %vm2094_vm9 = vcmp.eq.s32.totalorder %v20237_v52, %v20225_v21 }
 0x2b9   :  { %9615 = vmatpush3.msra.mxu1 %v15080_v2  ;;  %8331 = vmatprep.mubr.msk.f32.mxu1 %vm2117_vm8, %v20218_v57  ;;  %vm2121_vm4 = vcmp.eq.s32.totalorder %v20251_v28, %v20222_v10  ;;  %vm2120_vm1 = vcmp.eq.s32.totalorder %v20251_v28, %v20215_v59  ;;  %v20253_v2 = vld [vmem:[#allocation31_spill] sm:$0xff]  ;;  %v15345_v43 = vpop.f32.mrf.mxu1  ;;  %v20261_v14 = vld [vmem:[#allocation96_spill] sm:$0xff]  ;;  %vm2099_vm8 = vcmp.eq.s32.totalorder %v20241_v39, %v20228_v4 }
 0x2ba   :  { %9655 = vmatprep.subr.mxu1 %v20250_v42  ;;  %vm2125_vm5 = vcmp.eq.s32.totalorder %v20253_v2, %v20222_v10  ;;  %20254 = vst [vmem:[#allocation21_spill] sm:$0xff] %v15345_v43  ;;  %vm2124_vm7 = vcmp.eq.s32.totalorder %v20253_v2, %v20215_v59  ;;  %v20260_v43 = vld [vmem:[#allocation12_spill] sm:$0xff] }
 0x2bb   :  { %v15353_v55 = vpop.f32.mrf.mxu1  ;;  %v9390_v45 = vadd.f32 %v20261_v14, %v20260_v43  ;;  %v20266_v14 = vld [vmem:[#allocation9_spill] sm:$0xff] }
 0x2bc   :  { %8332 = vmatmul.mubr.msk.f32.gmra.mxu1 %vm2116_vm11, %v20218_v57  ;;  %20256 = vst [vmem:[#allocation28_spill] sm:$0xff] %v15353_v55  ;;  %v20259_v55 = vld [vmem:[#allocation104_spill] sm:$0xff]  ;;  %vm2098_vm11 = vcmp.eq.s32.totalorder %v20241_v39, %v20225_v21 }
 0x2bd   :  { %8333 = vmatprep.mubr.msk.f32.mxu1 %vm2121_vm4, %v20218_v57  ;;  %vm2103_vm4 = vcmp.eq.s32.totalorder %v20242_v6, %v20228_v4 }
 0x2c0   :  { %8334 = vmatmul.mubr.msk.f32.gmra.mxu1 %vm2120_vm1, %v20218_v57  ;;  %vm2102_vm1 = vcmp.eq.s32.totalorder %v20242_v6, %v20225_v21  ;;  %v20271_v6 = vld [vmem:[#allocation11_spill] sm:$0xff] }
 0x2c1   :  { %8335 = vmatprep.mubr.msk.f32.mxu1 %vm2125_vm5, %v20218_v57  ;;  %v9465_v33 = vpop.f32.mrf.mxu1  ;;  %vm2107_vm5 = vcmp.eq.s32.totalorder %v20244_v17, %v20228_v4 }
 0x2c3   :  { %v9466_v34 = vpop.f32.mrf.mxu1 }
 0x2c4   :  { %8336 = vmatmul.mubr.msk.f32.gmra.mxu1 %vm2124_vm7, %v20218_v57  ;;  %v9467_v44 = vadd.f32 %v9466_v34, %v9465_v33  ;;  %v20262_v33 = vld [vmem:[#allocation57_spill] sm:$0xff]  ;;  %vm2106_vm7 = vcmp.eq.s32.totalorder %v20244_v17, %v20225_v21  ;;  %v20277_v17 = vld [vmem:[#allocation84_spill] sm:$0xff] }
 0x2c5   :  { %8337 = vmatprep.mubr.msk.f32.mxu1 %vm2129_vm14, %v20218_v57  ;;  %v9468_v42 = vpop.f32.mrf.mxu1  ;;  %vm2111_vm14 = vcmp.eq.s32.totalorder %v20246_v9, %v20228_v4 }
 0x2c6   :  { %v15366_v3 = vadd.f32 %v9467_v44, %v9387_v49  ;;  %v20264_v44 = vld [vmem:[#allocation64_spill] sm:$0xff] }
 0x2c7   :  { %v9469_v26 = vpop.f32.mrf.mxu1 }
 0x2c8   :  { %8338 = vmatmul.mubr.msk.f32.gmra.mxu1 %vm2128_vm6, %v20218_v57  ;;  %v9470_v34 = vadd.f32 %v9469_v26, %v9468_v42  ;;  %v20265_v42 = vld [vmem:[#allocation97_spill] sm:$0xff]  ;;  %vm2110_vm6 = vcmp.eq.s32.totalorder %v20246_v9, %v20225_v21  ;;  %v20281_v9 = vld [vmem:[#allocation55_spill] sm:$0xff] }
 0x2c9   :  { %8339 = vmatprep.mubr.msk.f32.mxu1 %vm2083_vm10, %v20218_v57  ;;  %v9471_v53 = vpop.f32.mrf.mxu1  ;;  %v9393_v26 = vadd.f32 %v20266_v14, %v20265_v42  ;;  %vm2115_vm10 = vcmp.eq.s32.totalorder %v20248_v54, %v20228_v4 }
 0x2ca   :  { %v15379_v49 = vadd.f32 %v9470_v34, %v9390_v45 }
 0x2cb   :  { %v9472_v43 = vpop.f32.mrf.mxu1 }
 0x2cc   :  { %8340 = vmatmul.mubr.msk.f32.vlgmr.msra.gmra.mxu1 %vm2082_vm13, %v20218_v57  ;;  %v1910_v39 = vmul.f32 %v15379_v49, %v15379_v49  ;;  %vm2114_vm13 = vcmp.eq.s32.totalorder %v20248_v54, %v20225_v21 }
 0x2cd   :  { %9656 = vmatpush3.msra.mxu1 %v20259_v55  ;;  %8341 = vmatprep.mubr.msk.f32.mxu1 %vm2087_vm15, %v20218_v57  ;;  %v9474_v18 = vpop.f32.mrf.mxu1  ;;  %vm2119_vm15 = vcmp.eq.s32.totalorder %v20249_v19, %v20228_v4 }
 0x2ce   :  { %9657 = vmatprep.subr.mxu1 %v20262_v33 }
 0x2cf   :  { %9658 = vmatpush3.msra.mxu1 %v20263_v32  ;;  %v9473_v32 = vadd.f32 %v9472_v43, %v9471_v53  ;;  %v9475_v34 = vpop.f32.mrf.mxu1  ;;  %v20267_v53 = vld [vmem:[#allocation61_spill] sm:$0xff]  ;;  %v20268_v43 = vld [vmem:[#allocation66_spill] sm:$0xff] }
 0x2d0   :  { %9659 = vmatprep.subr.mxu1 %v20264_v44  ;;  %8342 = vmatmul.mubr.msk.f32.gmra.mxu1 %vm2086_vm0, %v20218_v57  ;;  %v9396_v42 = vadd.f32 %v20268_v43, %v20267_v53  ;;  %v9476_v14 = vadd.f32 %v9475_v34, %v9474_v18  ;;  %v9399_v18 = vadd.f32 %v14755_v47, %v14686_v35 }
 0x2d1   :  { %9660 = vmatpush3.msra.mxu1 %v14602_v24  ;;  %8343 = vmatprep.mubr.msk.f32.mxu1 %vm2091_vm2, %v20218_v57  ;;  %v15393_v45 = vadd.f32 %v9473_v32, %v9393_v26  ;;  %v9402_v47 = vadd.f32 %v14893_v1, %v14825_v11  ;;  %v1909_v11 = vmul.f32 %v15366_v3, %v15366_v3 }
 0x2d2   :  { %9661 = vmatprep.subr.mxu1 %v14615_v50  ;;  %v9477_v63 = vpop.f32.mrf.mxu1  ;;  %v15407_v32 = vadd.f32 %v9476_v14, %v9396_v42  ;;  %vm2118_vm0 = vcmp.eq.s32.totalorder %v20249_v19, %v20225_v21  ;;  %vm2123_vm2 = vcmp.eq.s32.totalorder %v20251_v28, %v20228_v4 }
 0x2d3   :  { %9662 = vmatpush3.msra.mxu1 %v14630_v7  ;;  %v1911_v1 = vmul.f32 %v15393_v45, %v15393_v45 }
 0x2d4   :  { %9663 = vmatprep.subr.mxu1 %v14645_v15  ;;  %8344 = vmatmul.mubr.msk.f32.gmra.mxu1 %vm2090_vm3, %v20218_v57  ;;  %v9478_v26 = vpop.f32.mrf.mxu1  ;;  %vm2122_vm3 = vcmp.eq.s32.totalorder %v20251_v28, %v20225_v21 }
 0x2d5   :  { %9664 = vmatpush3.msra.mxu1 %v14661_v0  ;;  %8345 = vmatprep.mubr.msk.f32.mxu1 %vm2095_vm12, %v20218_v57  ;;  %v9479_v34 = vadd.f32 %v9478_v26, %v9477_v63  ;;  %v20269_v63 = vld [vmem:[#allocation103_spill] sm:$0xff]  ;;  %vm2127_vm12 = vcmp.eq.s32.totalorder %v20253_v2, %v20228_v4 }
 0x2d6   :  { %9665 = vmatprep.subr.mxu1 %v14677_v51  ;;  %v9480_v52 = vpop.f32.mrf.mxu1 }
 0x2d7   :  { %9666 = vmatpush3.msra.mxu1 %v14696_v25  ;;  %v15421_v53 = vadd.f32 %v9479_v34, %v9399_v18  ;;  %v20270_v18 = vld [vmem:[#allocation5_spill] sm:$0xff]  ;;  %v9405_v34 = vadd.f32 %v20271_v6, %v14959_v31 }
 0x2d8   :  { %9667 = vmatprep.subr.mxu1 %v14712_v40  ;;  %8346 = vmatmul.mubr.msk.f32.gmra.mxu1 %vm2094_vm9, %v20218_v57  ;;  %v9481_v35 = vpop.f32.mrf.mxu1  ;;  %vm2126_vm9 = vcmp.eq.s32.totalorder %v20253_v2, %v20225_v21 }
 0x2d9   :  { %9668 = vmatpush3.msra.mxu1 %v14729_v27  ;;  %8347 = vmatprep.mubr.msk.f32.mxu1 %vm2099_vm8, %v20218_v57  ;;  %v9482_v43 = vadd.f32 %v9481_v35, %v9480_v52  ;;  %v1888_v52 = vadd.f32 %v15379_v49, %v15366_v3  ;;  %vm2131_vm8 = vcmp.eq.s32.totalorder %v20255_v41, %v20228_v4 }
 0x2da   :  { %9669 = vmatprep.subr.mxu1 %v14746_v56  ;;  %v9483_v42 = vpop.f32.mrf.mxu1 }
 0x2db   :  { %9670 = vmatpush3.msra.mxu1 %v14765_v62  ;;  %v15437_v14 = vadd.f32 %v9482_v43, %v9402_v47  ;;  %v20272_v47 = vld [vmem:[#allocation88_spill] sm:$0xff]  ;;  %v1925_v43 = vadd.f32 %v1910_v39, %v1909_v11  ;;  %v1889_v31 = vadd.f32 %v1888_v52, %v15393_v45 }
 0x2dc   :  { %9671 = vmatprep.subr.mxu1 %v14782_v46  ;;  %8348 = vmatmul.mubr.msk.f32.gmra.mxu1 %vm2098_vm11, %v20218_v57  ;;  %v9484_v26 = vpop.f32.mrf.mxu1  ;;  %v20279_v46 = vld [vmem:[#allocation53_spill] sm:$0xff]  ;;  %vm2130_vm11 = vcmp.eq.s32.totalorder %v20255_v41, %v20225_v21 }
 0x2dd   :  { %9672 = vmatpush3.msra.mxu1 %v14799_v16  ;;  %8349 = vmatprep.mubr.msk.f32.mxu1 %vm2103_vm4, %v20218_v57  ;;  %v9485_v35 = vadd.f32 %v9484_v26, %v9483_v42  ;;  %v1926_v39 = vadd.f32 %v1925_v43, %v1911_v1  ;;  %v1913_v42 = vmul.f32 %v15421_v53, %v15421_v53  ;;  %v20275_v26 = vld [vmem:[#allocation93_spill] sm:$0xff] }
 0x2de   :  { %9673 = vmatprep.subr.mxu1 %v14816_v61  ;;  %v20273_v61 = vld [vmem:[#allocation94_spill] sm:$0xff]  ;;  %v1914_v43 = vmul.f32 %v15437_v14, %v15437_v14 }
 0x2df   :  { %9674 = vmatpush3.msra.mxu1 %v14835_v36  ;;  %v15460_v6 = vadd.f32 %v9485_v35, %v9405_v34  ;;  %v1890_v34 = vadd.f32 %v1889_v31, %v15407_v32  ;;  %v20278_v35 = vld [vmem:[#allocation86_spill] sm:$0xff] }
 0x2e0   :  { %9675 = vmatprep.subr.mxu1 %v20269_v63  ;;  %8350 = vmatmul.mubr.msk.f32.gmra.mxu1 %vm2102_vm1, %v20218_v57  ;;  %v1912_v63 = vmul.f32 %v15407_v32, %v15407_v32 }
 0x2e1   :  { %9676 = vmatpush3.msra.mxu1 %v20270_v18  ;;  %8351 = vmatprep.mubr.msk.f32.mxu1 %vm2107_vm5, %v20218_v57  ;;  %v9486_v36 = vpop.f32.mrf.mxu1  ;;  %v20274_v18 = vld [vmem:[#allocation87_spill] sm:$0xff]  ;;  %v1891_v1 = vadd.f32 %v1890_v34, %v15421_v53  ;;  %v20282_v34 = vld [vmem:[#allocation98_spill] sm:$0xff] }
 0x2e2   :  { %9677 = vmatprep.subr.mxu1 %v20272_v47 }
 0x2e3   :  { %9678 = vmatpush3.msra.mxu1 %v20273_v61  ;;  %v9487_v11 = vpop.f32.mrf.mxu1  ;;  %v20276_v61 = vld [vmem:[#allocation111_spill] sm:$0xff] }
 0x2e4   :  { %9679 = vmatprep.subr.mxu1 %v20274_v18  ;;  %8352 = vmatmul.mubr.msk.f32.gmra.mxu1 %vm2106_vm7, %v20218_v57  ;;  %v9408_v47 = vadd.f32 %v20277_v17, %v20276_v61  ;;  %v9488_v52 = vadd.f32 %v9487_v11, %v9486_v36  ;;  %v1927_v18 = vadd.f32 %v1926_v39, %v1912_v63  ;;  %v20280_v17 = vld [vmem:[#allocation99_spill] sm:$0xff] }
 0x2e5   :  { %9680 = vmatpush3.msra.mxu1 %v20275_v26  ;;  %8353 = vmatprep.mubr.msk.f32.mxu1 %vm2111_vm14, %v20218_v57  ;;  %v9411_v36 = vadd.f32 %v15136_v20, %v15116_v58  ;;  %v1892_v39 = vadd.f32 %v1891_v1, %v15437_v14  ;;  %v20283_v20 = vld [vmem:[#allocation109_spill] sm:$0xff] }
 0x2e6   :  { %9681 = vmatprep.subr.mxu1 %v20278_v35  ;;  %v15480_v61 = vadd.f32 %v9488_v52, %v9408_v47  ;;  %v1928_v63 = vadd.f32 %v1927_v18, %v1913_v42  ;;  %v1915_v47 = vmul.f32 %v15460_v6, %v15460_v6 }
 0x2e7   :  { %9682 = vmatpush3.msra.mxu1 %v20279_v46  ;;  %v1893_v42 = vadd.f32 %v1892_v39, %v15460_v6 }
 0x2e8   :  { %9683 = vmatprep.subr.mxu1 %v20280_v17  ;;  %8354 = vmatmul.mubr.msk.f32.gmra.mxu1 %vm2110_vm6, %v20218_v57  ;;  %v1929_v18 = vadd.f32 %v1928_v63, %v1914_v43  ;;  %v1916_v52 = vmul.f32 %v15480_v61, %v15480_v61 }
 0x2e9   :  { %9684 = vmatpush3.msra.mxu1 %v20281_v9  ;;  %8355 = vmatprep.mubr.msk.f32.mxu1 %vm2115_vm10, %v20218_v57  ;;  %v1894_v43 = vadd.f32 %v1893_v42, %v15480_v61 }
 0x2ea   :  { %9685 = vmatprep.subr.mxu1 %v20282_v34  ;;  %v1930_v1 = vadd.f32 %v1929_v18, %v1915_v47  ;;  %v9417_v47 = vadd.f32 %v15214_v48, %v15194_v60  ;;  %v9420_v48 = vadd.f32 %v15248_v37, %v15232_v23  ;;  %v9423_v23 = vadd.f32 %v15284_v30, %v15266_v12 }
 0x2eb   :  { %9686 = vmatpush3.msra.mxu1 %v20283_v20  ;;  %v9426_v30 = vadd.f32 %v15318_v38, %v15302_v29  ;;  %v20285_v29 = vld [vmem:[#allocation26_spill] sm:$0xff] }
 0x2ec   :  { %8356 = vmatmul.mubr.msk.f32.gmra.mxu1 %vm2114_vm13, %v20218_v57  ;;  %11081 = vmatprep.subr.mxu1 %v20227_v5  ;;  %v9429_v38 = vadd.f32 %v20285_v29, %v15330_v22  ;;  %v8482_v22 = vld [vmem:[%s19231_s2 + $0xe8] sm:$0xff]  ;;  %v20290_v29 = vld [vmem:[#allocation42_spill] sm:$0xff] }
 0x2ed   :  { %8357 = vmatprep.mubr.msk.f32.mxu1 %vm2119_vm15, %v20218_v57  ;;  %vm2641_vm10 = vcmp.eq.s32.totalorder %v20290_v29, %v20222_v10  ;;  %vm2640_vm13 = vcmp.eq.s32.totalorder %v20290_v29, %v20215_v59  ;;  %v8473_v29 = vld [vmem:[%s19231_s2 + $0xa0] sm:$0xff] }
 0x2ee   :  { %v9489_v16 = vpop.f32.mrf.mxu1 }
 0x2f0   :  { %v9490_v31 = vpop.f32.mrf.mxu1  ;;  %8358 = vmatmul.mubr.msk.f32.gmra.mxu1 %vm2118_vm0, %v20218_v57 }
 0x2f1   :  { %v9491_v11 = vadd.f32 %v9490_v31, %v9489_v16  ;;  %v9414_v16 = vadd.f32 %v15174_v8, %v15156_v13  ;;  %v1931_v13 = vadd.f32 %v1930_v1, %v1916_v52  ;;  %8359 = vmatprep.mubr.msk.f32.mxu1 %vm2123_vm2, %v20218_v57 }
 0x2f2   :  { %v9492_v58 = vpop.f32.mrf.mxu1 }
 0x2f3   :  { %v15500_v9 = vadd.f32 %v9491_v11, %v9411_v36 }
 0x2f4   :  { %v9493_v54 = vpop.f32.mrf.mxu1  ;;  %8360 = vmatmul.mubr.msk.f32.gmra.mxu1 %vm2122_vm3, %v20218_v57 }
 0x2f5   :  { %v1917_v36 = vmul.f32 %v15500_v9, %v15500_v9  ;;  %v9494_v63 = vadd.f32 %v9493_v54, %v9492_v58  ;;  %v1895_v8 = vadd.f32 %v1894_v43, %v15500_v9  ;;  %8361 = vmatprep.mubr.msk.f32.mxu1 %vm2127_vm12, %v20218_v57 }
 0x2f6   :  { %v9495_v31 = vpop.f32.mrf.mxu1 }
 0x2f7   :  { %v15515_v39 = vadd.f32 %v9494_v63, %v9414_v16  ;;  %v1932_v58 = vadd.f32 %v1931_v13, %v1917_v36 }
 0x2f8   :  { %v9496_v11 = vpop.f32.mrf.mxu1  ;;  %8362 = vmatmul.mubr.msk.f32.gmra.mxu1 %vm2126_vm9, %v20218_v57  ;;  %vm11838_vm9 = vmmov 0  }
 0x2f9   :  { %v1896_v18 = vadd.f32 %v1895_v8, %v15515_v39  ;;  %v1918_v19 = vmul.f32 %v15515_v39, %v15515_v39  ;;  %v9497_v42 = vadd.f32 %v9496_v11, %v9495_v31  ;;  %8363 = vmatprep.mubr.msk.f32.mxu1 %vm2131_vm8, %v20218_v57  ;;  %11184 = vmatprep.mubr.msk.f32.mxu0 %vm11838_vm9, %v20227_v5 }
 0x2fa   :  { %v9498_v52 = vpop.f32.mrf.mxu1 }
 0x2fb   :  { %v1933_v16 = vadd.f32 %v1932_v58, %v1918_v19  ;;  %v15528_v54 = vadd.f32 %v9497_v42, %v9417_v47 }
 0x2fc   :  { %v9499_v60 = vpop.f32.mrf.mxu1  ;;  %8364 = vmatmul.mubr.msk.f32.gmra.mxu1 %vm2130_vm11, %v20218_v57 }
 0x2fd   :  { %v1897_v1 = vadd.f32 %v1896_v18, %v15528_v54  ;;  %v1919_v43 = vmul.f32 %v15528_v54, %v15528_v54  ;;  %v9500_v28 = vadd.f32 %v9499_v60, %v9498_v52  ;;  %v20284_v18 = vld [vmem:[#allocation34_spill] sm:$0xff] }
 0x2fe   :  { %vm2629_vm4 = vcmp.eq.s32.totalorder %v20284_v18, %v20222_v10  ;;  %v8484_v52 = vld [vmem:[%s19231_s2 + $0xf8] sm:$0xff]  ;;  %vm2628_vm1 = vcmp.eq.s32.totalorder %v20284_v18, %v20215_v59  ;;  %v20289_v18 = vld [vmem:[#allocation28_spill] sm:$0xff] }
 0x2ff   :  { %v1934_v63 = vadd.f32 %v1933_v16, %v1919_v43  ;;  %v15541_v31 = vadd.f32 %v9500_v28, %v9420_v48  ;;  %8417 = vmatprep.mubr.msk.f32.mxu1 %vm2629_vm4, %v20218_v57  ;;  %v8483_v43 = vld [vmem:[%s19231_s2 + $0xf0] sm:$0xff] }
 0x300   :  { %8418 = vmatmul.mubr.msk.f32.vlgmr.msra.gmra.mxu1 %vm2628_vm1, %v20218_v57 }
 0x301   :  { %v9501_v36 = vpop.f32.mrf.mxu1  ;;  %v1898_v13 = vadd.f32 %v1897_v1, %v15541_v31  ;;  %v1920_v8 = vmul.f32 %v15541_v31, %v15541_v31  ;;  %v20286_v1 = vld [vmem:[#allocation40_spill] sm:$0xff]  ;;  %11082 = vmatpush3.msra.mxu1 %v8484_v52  ;;  %v8480_v52 = vld [vmem:[%s19231_s2 + $0xd8] sm:$0xff] }
 0x302   :  { %vm2633_vm5 = vcmp.eq.s32.totalorder %v20286_v1, %v20222_v10  ;;  %11083 = vmatprep.subr.mxu1 %v20227_v5  ;;  %vm2632_vm7 = vcmp.eq.s32.totalorder %v20286_v1, %v20215_v59 }
 0x303   :  { %v9502_v37 = vpop.f32.mrf.mxu1  ;;  %v1935_v11 = vadd.f32 %v1934_v63, %v1920_v8  ;;  %8419 = vmatprep.mubr.msk.f32.mxu1 %vm2633_vm5, %v20218_v57  ;;  %11084 = vmatpush3.msra.mxu1 %v8483_v43 }
 0x304   :  { %v9503_v2 = vadd.f32 %v9502_v37, %v9501_v36  ;;  %11085 = vmatprep.subr.mxu1 %v20227_v5  ;;  %8420 = vmatmul.mubr.msk.f32.gmra.mxu1 %vm2632_vm7, %v20218_v57 }
 0x305   :  { %11086 = vmatpush3.msra.mxu1 %v8482_v22  ;;  %v8477_v22 = vld [vmem:[%s19231_s2 + $0xc0] sm:$0xff] }
 0x306   :  { %v15554_v58 = vadd.f32 %v9503_v2, %v9423_v23  ;;  %v20287_v2 = vld [vmem:[#allocation37_spill] sm:$0xff]  ;;  %11087 = vmatprep.subr.mxu1 %v20227_v5 }
 0x307   :  { %vm2637_vm14 = vcmp.eq.s32.totalorder %v20287_v2, %v20222_v10  ;;  %vm2636_vm6 = vcmp.eq.s32.totalorder %v20287_v2, %v20215_v59  ;;  %v8476_v2 = vld [vmem:[%s19231_s2 + $0xb8] sm:$0xff] }
 0x308   :  { %v1899_v19 = vadd.f32 %v1898_v13, %v15554_v58  ;;  %v1921_v42 = vmul.f32 %v15554_v58, %v15554_v58  ;;  %8421 = vmatprep.mubr.msk.f32.mxu1 %vm2637_vm14, %v20218_v57 }
 0x309   :  { %8422 = vmatmul.mubr.msk.f32.gmra.mxu1 %vm2636_vm6, %v20218_v57 }
 0x30a   :  { %v1936_v60 = vadd.f32 %v1935_v11, %v1921_v42  ;;  %v20288_v11 = vld [vmem:[#allocation21_spill] sm:$0xff]  ;;  %8423 = vmatprep.mubr.msk.f32.mxu1 %vm2641_vm10, %v20218_v57 }
 0x30d   :  { %v9504_v47 = vpop.f32.mrf.mxu1  ;;  %8424 = vmatmul.mubr.msk.f32.gmra.mxu1 %vm2640_vm13, %v20218_v57 }
 0x30f   :  { %v9505_v12 = vpop.f32.mrf.mxu1 }
 0x310   :  { %v9506_v41 = vadd.f32 %v9505_v12, %v9504_v47  ;;  %v8481_v47 = vld [vmem:[%s19231_s2 + $0xe0] sm:$0xff]  ;;  %v9432_v12 = vadd.f32 %v20289_v18, %v20288_v11 }
 0x311   :  { %v9507_v16 = vpop.f32.mrf.mxu1  ;;  %11088 = vmatpush3.msra.mxu1 %v8481_v47  ;;  %v20292_v18 = vld [vmem:[#allocation44_spill] sm:$0xff] }
 0x312   :  { %v15570_v48 = vadd.f32 %v9506_v41, %v9426_v30  ;;  %11089 = vmatprep.subr.mxu1 %v20227_v5  ;;  %vm2649_vm2 = vcmp.eq.s32.totalorder %v20292_v18, %v20222_v10  ;;  %vm2648_vm3 = vcmp.eq.s32.totalorder %v20292_v18, %v20215_v59 }
 0x313   :  { %v9508_v28 = vpop.f32.mrf.mxu1  ;;  %11090 = vmatpush3.msra.mxu1 %v8480_v52 }
 0x314   :  { %v1900_v36 = vadd.f32 %v1899_v19, %v15570_v48  ;;  %v1922_v63 = vmul.f32 %v15570_v48, %v15570_v48  ;;  %v9509_v37 = vadd.f32 %v9508_v28, %v9507_v16  ;;  %11091 = vmatprep.subr.mxu1 %v20227_v5  ;;  %v8478_v28 = vld [vmem:[%s19231_s2 + $0xc8] sm:$0xff] }
 0x315   :  { %v9510_v23 = vpop.f32.mrf.mxu1 }
 0x316   :  { %v1937_v13 = vadd.f32 %v1936_v60, %v1922_v63  ;;  %v15590_v8 = vadd.f32 %v9509_v37, %v9429_v38  ;;  %v8479_v38 = vld [vmem:[%s19231_s2 + $0xd0] sm:$0xff]  ;;  %v20291_v37 = vld [vmem:[#allocation39_spill] sm:$0xff] }
 0x317   :  { %v9511_v30 = vpop.f32.mrf.mxu1  ;;  %11092 = vmatpush3.msra.mxu1 %v8479_v38  ;;  %vm2645_vm15 = vcmp.eq.s32.totalorder %v20291_v37, %v20222_v10  ;;  %vm2644_vm0 = vcmp.eq.s32.totalorder %v20291_v37, %v20215_v59  ;;  %v8471_v37 = vld [vmem:[%s19231_s2 + $0x90] sm:$0xff] }
 0x318   :  { %v1901_v19 = vadd.f32 %v1900_v36, %v15590_v8  ;;  %v1923_v42 = vmul.f32 %v15590_v8, %v15590_v8  ;;  %v9512_v41 = vadd.f32 %v9511_v30, %v9510_v23  ;;  %11093 = vmatprep.subr.mxu1 %v20227_v5  ;;  %8425 = vmatprep.mubr.msk.f32.mxu1 %vm2645_vm15, %v20218_v57 }
 0x319   :  { %11094 = vmatpush3.msra.mxu1 %v8478_v28 }
 0x31a   :  { %v1938_v16 = vadd.f32 %v1937_v13, %v1923_v42  ;;  %v15611_v60 = vadd.f32 %v9512_v41, %v9432_v12  ;;  %11095 = vmatprep.subr.mxu1 %v20227_v5  ;;  %8426 = vmatmul.mubr.msk.f32.gmra.mxu1 %vm2644_vm0, %v20218_v57  ;;  %v8475_v12 = vld [vmem:[%s19231_s2 + $0xb0] sm:$0xff]  ;;  %v8474_v42 = vld [vmem:[%s19231_s2 + $0xa8] sm:$0xff] }
 0x31b   :  { %11096 = vmatpush3.msra.mxu1 %v8477_v22  ;;  %8427 = vmatprep.mubr.msk.f32.mxu1 %vm2649_vm2, %v20218_v57 }
 0x31c   :  { %v1902_v1 = vadd.f32 %v1901_v19, %v15611_v60  ;;  %v1924_v43 = vmul.f32 %v15611_v60, %v15611_v60  ;;  %11097 = vmatprep.subr.mxu1 %v20227_v5 }
 0x31d   :  { %11098 = vmatpush3.msra.mxu1 %v8476_v2  ;;  %v8470_v2 = vld [vmem:[%s19231_s2 + $0x88] sm:$0xff] }
 0x31e   :  { %v1903_v36 = vrot.slane %v1902_v1, 4  ;;  %v1939_v63 = vadd.f32 %v1938_v16, %v1924_v43  ;;  %11099 = vmatprep.subr.mxu1 %v20227_v5  ;;  %8428 = vmatmul.mubr.msk.f32.gmra.mxu1 %vm2648_vm3, %v20218_v57  ;;  %v20293_v16 = vld [vmem:[#allocation41_spill] sm:$0xff]  ;;  %v8472_v43 = vld [vmem:[%s19231_s2 + $0x98] sm:$0xff] }
 0x31f   :  { %11100 = vmatpush3.msra.mxu1 %v8475_v12  ;;  %vm2653_vm12 = vcmp.eq.s32.totalorder %v20293_v16, %v20222_v10  ;;  %vm2652_vm8 = vcmp.eq.s32.totalorder %v20293_v16, %v20215_v59  ;;  %v20296_v12 = vld [vmem:[#allocation14_spill] sm:$0xff] }
 0x320   :  { %v1904_v23 = vadd.f32 %v1903_v36, %v1902_v1  ;;  %v1940_v13 = vrot.slane %v1939_v63, 4  ;;  %11101 = vmatprep.subr.mxu1 %v20227_v5  ;;  %8429 = vmatprep.mubr.msk.f32.mxu1 %vm2653_vm12, %v20218_v57 }
 0x321   :  { %11102 = vmatpush3.msra.mxu1 %v8474_v42  ;;  %v20299_v42 = vld [vmem:[#allocation50_spill] sm:$0xff] }
 0x322   :  { %v1905_v47 = vrot.slane %v1904_v23, 2  ;;  %v1941_v11 = vadd.f32 %v1940_v13, %v1939_v63  ;;  %11103 = vmatprep.subr.mxu1 %v20227_v5  ;;  %8430 = vmatmul.mubr.msk.f32.gmra.mxu1 %vm2652_vm8, %v20218_v57  ;;  %v20294_v63 = vld [vmem:[#allocation46_spill] sm:$0xff]  ;;  %vm2673_vm13 = vcmp.eq.s32.totalorder %v20299_v42, %v20222_v10  ;;  %vm2672_vm15 = vcmp.eq.s32.totalorder %v20299_v42, %v20215_v59 }
 0x323   :  { %11104 = vmatpush3.msra.mxu1 %v8473_v29  ;;  %vm2657_vm11 = vcmp.eq.s32.totalorder %v20294_v63, %v20222_v10  ;;  %vm2656_vm4 = vcmp.eq.s32.totalorder %v20294_v63, %v20215_v59 }
 0x324   :  { %v1906_v30 = vadd.f32 %v1905_v47, %v1904_v23  ;;  %v1942_v19 = vrot.slane %v1941_v11, 2  ;;  %11105 = vmatprep.subr.mxu1 %v20227_v5  ;;  %8431 = vmatprep.mubr.msk.f32.mxu1 %vm2657_vm11, %v20218_v57 }
 0x325   :  { %11106 = vmatpush3.msra.mxu1 %v8472_v43 }
 0x326   :  { %v1907_v41 = vrot.slane %v1906_v30, 1  ;;  %v1943_v52 = vadd.f32 %v1942_v19, %v1941_v11  ;;  %11107 = vmatprep.subr.mxu1 %v20227_v5  ;;  %8432 = vmatmul.mubr.msk.f32.gmra.mxu1 %vm2656_vm4, %v20218_v57  ;;  %v20295_v11 = vld [vmem:[#allocation43_spill] sm:$0xff]  ;;  %v20298_v19 = vld [vmem:[#allocation45_spill] sm:$0xff] }
 0x327   :  { %11108 = vmatpush3.msra.mxu1 %v8471_v37  ;;  %vm2661_vm1 = vcmp.eq.s32.totalorder %v20295_v11, %v20222_v10  ;;  %vm2660_vm5 = vcmp.eq.s32.totalorder %v20295_v11, %v20215_v59  ;;  %vm2669_vm6 = vcmp.eq.s32.totalorder %v20298_v19, %v20222_v10  ;;  %vm2668_vm10 = vcmp.eq.s32.totalorder %v20298_v19, %v20215_v59 }
 0x328   :  { %v1908_v38 = vadd.f32 %v1907_v41, %v1906_v30  ;;  %v1944_v1 = vrot.slane %v1943_v52, 1  ;;  %11109 = vmatprep.subr.mxu1 %v20227_v5  ;;  %8433 = vmatprep.mubr.msk.f32.mxu1 %vm2661_vm1, %v20218_v57  ;;  %v20297_v30 = vld [vmem:[#allocation48_spill] sm:$0xff] }
 0x329   :  { %11110 = vmatpush3.msra.mxu1 %v8470_v2  ;;  %vm2665_vm7 = vcmp.eq.s32.totalorder %v20297_v30, %v20222_v10  ;;  %vm2664_vm14 = vcmp.eq.s32.totalorder %v20297_v30, %v20215_v59 }
 0x32a   :  { %v1945_v28 = vadd.f32 %v1944_v1, %v1943_v52  ;;  %v15674_v36 = vmul.f32 0.0078125, %v1908_v38  ;;  %11111 = vmatprep.subr.mxu1 %v20227_v5  ;;  %8434 = vmatmul.mubr.msk.f32.gmra.mxu1 %vm2660_vm5, %v20218_v57  ;;  %v20300_v52 = vld [vmem:[#allocation47_spill] sm:$0xff] }
 0x32b   :  { %8435 = vmatprep.mubr.msk.f32.mxu1 %vm2665_vm7, %v20218_v57  ;;  %vm2677_vm0 = vcmp.eq.s32.totalorder %v20300_v52, %v20222_v10  ;;  %vm2676_vm2 = vcmp.eq.s32.totalorder %v20300_v52, %v20215_v59 }
 0x32c   :  { %v1947_v22 = vmul.f32 0.0078125, %v1945_v28  ;;  %v1948_v23 = vmul.f32 %v15674_v36, %v15674_v36  ;;  %v1965_v13 = vsub.f32 %v15611_v60, %v15674_v36  ;;  %v8469_v60 = vld [vmem:[%s19231_s2 + $0x80] sm:$0xff]  ;;  %v1963_v10 = vsub.f32 %v15570_v48, %v15674_v36 }
 0x32d   :  { %11112 = vmatpush3.msra.mxu1 %v8469_v60  ;;  %v1962_v20 = vsub.f32 %v15554_v58, %v15674_v36  ;;  %v1961_v34 = vsub.f32 %v15541_v31, %v15674_v36  ;;  %v1960_v17 = vsub.f32 %v15528_v54, %v15674_v36  ;;  %v1959_v46 = vsub.f32 %v15515_v39, %v15674_v36 }
 0x32e   :  { %v1949_v47 = vsub.f32 %v1947_v22, %v1948_v23  ;;  %9855 = vmatprep.subr.mxu1 %v20296_v12  ;;  %8436 = vmatmul.mubr.msk.f32.gmra.mxu1 %vm2664_vm14, %v20218_v57 }
 0x32f   :  { %8437 = vmatprep.mubr.msk.f32.mxu1 %vm2669_vm6, %v20218_v57 }
 0x330   :  { %v1966_v18 = vadd.f32 1e-05, %v1949_v47 }
 0x332   :  { %11831 = vrsqrt.f32 %v1966_v18  ;;  %8438 = vmatmul.mubr.msk.f32.gmra.mxu1 %vm2668_vm10, %v20218_v57 }
 0x333   :  { %8439 = vmatprep.mubr.msk.f32.mxu1 %vm2673_vm13, %v20218_v57 }
 0x336   :  { %8440 = vmatmul.mubr.msk.f32.gmra.mxu1 %vm2672_vm15, %v20218_v57 }
 0x337   :  { %8441 = vmatprep.mubr.msk.f32.mxu1 %vm2677_vm0, %v20218_v57 }
 0x33a   :  { %8442 = vmatmul.mubr.msk.f32.gmra.mxu1 %vm2676_vm2, %v20218_v57 }
 0x33b   :  { %11113 = vmatprep.mubr.msk.f32.mxu1 %vm11838_vm9, %v20227_v5 }
 0x33f   :  { %v15724_v41 = vpop.eup %11831 }
 0x340   :  { %v15731_v16 = vmul.f32 %v15724_v41, %v1965_v13  ;;  %v15796_v0 = vmul.f32 %v15724_v41, %v1963_v10  ;;  %v15799_v15 = vmul.f32 %v15724_v41, %v1962_v20  ;;  %v15802_v7 = vmul.f32 %v15724_v41, %v1961_v34  ;;  %v20309_v20 = vld [vmem:[#allocation67_spill] sm:$0xff] }
 0x342   :  { %20301 = vst [vmem:[#allocation25_spill] sm:$0xff] %v15731_v16  ;;  %v9545_v29 = vpop.f32.mrf.mxu1  ;;  %v1964_v16 = vsub.f32 %v15590_v8, %v15674_v36  ;;  %v1958_v8 = vsub.f32 %v15500_v9, %v15674_v36  ;;  %20303 = vst [vmem:[#allocation27_spill] sm:$0xff] %v15796_v0  ;;  %v20347_v0 = vld [vmem:[#allocation19_spill] sm:$0xff] }
 0x343   :  { %20304 = vst [vmem:[#allocation33_spill] sm:$0xff] %v15799_v15  ;;  %20305 = vst [vmem:[#allocation29_spill] sm:$0xff] %v15802_v7 }
 0x344   :  { %v9546_v38 = vpop.f32.mrf.mxu1  ;;  %v15793_v9 = vmul.f32 %v15724_v41, %v1964_v16 }
 0x345   :  { %v9547_v27 = vadd.f32 %v9546_v38, %v9545_v29  ;;  %v20310_v29 = vld [vmem:[#allocation22_spill] sm:$0xff] }
 0x346   :  { %20302 = vst [vmem:[#allocation30_spill] sm:$0xff] %v15793_v9 }
 0x349   :  { %v9548_v1 = vpop.f32.mrf.mxu1 }
 0x34b   :  { %v9549_v43 = vpop.f32.mrf.mxu1 }
 0x34c   :  { %v9550_v50 = vadd.f32 %v9549_v43, %v9548_v1  ;;  %v20312_v1 = vld [vmem:[#allocation18_spill] sm:$0xff]  ;;  %v20313_v43 = vld [vmem:[#allocation73_spill] sm:$0xff] }
 0x355   :  { %v9551_v28 = vpop.f32.mrf.mxu1 }
 0x357   :  { %v9552_v63 = vpop.f32.mrf.mxu1 }
 0x358   :  { %v9553_v34 = vadd.f32 %v9552_v63, %v9551_v28  ;;  %v1952_v63 = vsub.f32 %v15393_v45, %v15674_v36 }
 0x35a   :  { %v15854_v45 = vmul.f32 %v15724_v41, %v1952_v63 }
 0x35c   :  { %20321 = vst [vmem:[#allocation9_spill] sm:$0xff] %v15854_v45 }
 0x361   :  { %v15738_v37 = vpop.f32.mrf.mxu1 }
 0x363   :  { %v15740_v22 = vpop.f32.mrf.mxu1 }
 0x368   :  { %v15742_v23 = vpop.f32.mrf.mxu1 }
 0x36a   :  { %v15744_v13 = vpop.f32.mrf.mxu1 }
 0x36c   :  { %v15746_v2 = vpop.f32.mrf.mxu1 }
 0x36e   :  { %v15748_v47 = vpop.f32.mrf.mxu1 }
 0x370   :  { %v15750_v11 = vpop.f32.mrf.mxu1 }
 0x372   :  { %v15752_v60 = vpop.f32.mrf.mxu1 }
 0x374   :  { %v15754_v18 = vpop.f32.mrf.mxu1 }
 0x376   :  { %v15756_v30 = vpop.f32.mrf.mxu1 }
 0x378   :  { %v15758_v19 = vpop.f32.mrf.mxu1 }
 0x37a   :  { %v15760_v42 = vpop.f32.mrf.mxu1 }
 0x37c   :  { %v15762_v52 = vpop.f32.mrf.mxu1 }
 0x37e   :  { %v15766_v59 = vpop.f32.mrf.mxu1 }
 0x380   :  { %v15780_v35 = vpop.f32.mrf.mxu1 }
 0x382   :  { %v15782_v26 = vpop.f32.mrf.mxu1 }
 0x384   :  { %v15784_v48 = vpop.f32.mrf.mxu1 }
 0x386   :  { %v15786_v62 = vpop.f32.mrf.mxu1 }
 0x388   :  { %v15788_v58 = vpop.f32.mrf.mxu1 }
 0x38a   :  { %v15790_v31 = vpop.f32.mrf.mxu1 }
 0x38c   :  { %v9616_v56 = vpop.f32.mrf.mxu1 }
 0x38e   :  { %v9617_v54 = vpop.f32.mrf.mxu1 }
 0x38f   :  { %v9618_v40 = vadd.f32 %v9617_v54, %v9616_v56  ;;  %v15805_v56 = vmul.f32 %v15724_v41, %v1960_v17  ;;  %v1956_v17 = vsub.f32 %v15460_v6, %v15674_v36  ;;  %v1953_v6 = vsub.f32 %v15407_v32, %v15674_v36  ;;  %v20315_v54 = vld [vmem:[#allocation77_spill] sm:$0xff] }
 0x390   :  { %v9619_v39 = vpop.f32.mrf.mxu1 }
 0x391   :  { %v2497_v25 = vadd.f32 %v9618_v40, %v9547_v27  ;;  %20306 = vst [vmem:[#allocation36_spill] sm:$0xff] %v15805_v56  ;;  %v15808_v40 = vmul.f32 %v15724_v41, %v1959_v46  ;;  %v20308_v27 = vld [vmem:[#allocation63_spill] sm:$0xff]  ;;  %v1957_v46 = vsub.f32 %v15480_v61, %v15674_v36  ;;  %v20343_v56 = vld [vmem:[#allocation85_spill] sm:$0xff] }
 0x392   :  { %v9620_v51 = vpop.f32.mrf.mxu1 }
 0x393   :  { %v9621_v24 = vadd.f32 %v9620_v51, %v9619_v39  ;;  %11185 = vmatmul.mubr.f32.vlgmr.msra.gmra.mxu0 %v2497_v25  ;;  %20307 = vst [vmem:[#allocation31_spill] sm:$0xff] %v15808_v40  ;;  %v15816_v25 = vmul.f32 %v15724_v41, %v1958_v8  ;;  %v15831_v61 = vmul.f32 %v15724_v41, %v1957_v46  ;;  %v15837_v8 = vpop.f32.mrf.mxu0 }
 0x394   :  { %9927 = vmatpush3.msra.mxu0 %v20308_v27  ;;  %v9622_v16 = vpop.f32.mrf.mxu1  ;;  %11187 = vmatprep.mubr.msk.f32.mxu0 %vm11838_vm9, %v20227_v5 }
 0x395   :  { %v2502_v10 = vadd.f32 %v9621_v24, %v9550_v50  ;;  %9928 = vmatprep.subr.mxu0 %v20309_v20  ;;  %20311 = vst [vmem:[#allocation38_spill] sm:$0xff] %v15816_v25  ;;  %v1955_v50 = vsub.f32 %v15437_v14, %v15674_v36  ;;  %v1954_v24 = vsub.f32 %v15421_v53, %v15674_v36  ;;  %20314 = vst [vmem:[#allocation92_spill] sm:$0xff] %v15831_v61  ;;  %v15866_v63 = vpop.f32.mrf.mxu0  ;;  %v20339_v61 = vld [vmem:[#allocation8_spill] sm:$0xff] }
 0x396   :  { %9929 = vmatpush3.msra.mxu0 %v20310_v29  ;;  %v9623_v51 = vpop.f32.mrf.mxu1  ;;  %v15841_v53 = vmul.f32 %v15724_v41, %v1956_v17  ;;  %v20322_v17 = vld [vmem:[#allocation80_spill] sm:$0xff] }
 0x397   :  { %v9624_v38 = vadd.f32 %v9623_v51, %v9622_v16  ;;  %9930 = vmatprep.subr.mxu0 %v20312_v1  ;;  %11188 = vmatmul.mubr.f32.gmra.mxu0 %v2502_v10  ;;  %v15844_v39 = vmul.f32 %v15724_v41, %v1955_v50  ;;  %v15847_v16 = vmul.f32 %v15724_v41, %v1954_v24  ;;  %v20319_v10 = vld [vmem:[#allocation72_spill] sm:$0xff] }
 0x398   :  { %9931 = vmatpush3.msra.mxu0 %v20313_v43  ;;  %v9625_v28 = vpop.f32.mrf.mxu1  ;;  %11190 = vmatprep.mubr.msk.f32.mxu0 %vm11838_vm9, %v20227_v5  ;;  %20316 = vst [vmem:[#allocation95_spill] sm:$0xff] %v15841_v53  ;;  %v15851_v51 = vmul.f32 %v15724_v41, %v1953_v6  ;;  %v1951_v24 = vsub.f32 %v15379_v49, %v15674_v36 }
 0x399   :  { %v2507_v14 = vadd.f32 %v9624_v38, %v9553_v34  ;;  %9932 = vmatprep.subr.mxu0 %v20315_v54  ;;  %20317 = vst [vmem:[#allocation12_spill] sm:$0xff] %v15844_v39  ;;  %20318 = vst [vmem:[#allocation96_spill] sm:$0xff] %v15847_v16  ;;  %v9556_v34 = vadd.f32 %v15740_v22, %v15738_v37  ;;  %v20323_v38 = vld [vmem:[#allocation6_spill] sm:$0xff]  ;;  %v1950_v6 = vsub.f32 %v15366_v3, %v15674_v36  ;;  %v20325_v22 = vld [vmem:[#allocation20_spill] sm:$0xff] }
 0x39a   :  { %9933 = vmatpush3.msra.mxu0 %v20319_v10  ;;  %v9626_v32 = vpop.f32.mrf.mxu1  ;;  %20320 = vst [vmem:[#allocation97_spill] sm:$0xff] %v15851_v51  ;;  %v20324_v37 = vld [vmem:[#allocation70_spill] sm:$0xff]  ;;  %v9559_v49 = vadd.f32 %v15744_v13, %v15742_v23  ;;  %v20328_v16 = vld [vmem:[#allocation107_spill] sm:$0xff]  ;;  %v20329_v3 = vld [vmem:[#allocation108_spill] sm:$0xff]  ;;  %v9562_v23 = vadd.f32 %v15748_v47, %v15746_v2  ;;  %v9565_v2 = vadd.f32 %v15752_v60, %v15750_v11 }
 0x39b   :  { %v9627_v46 = vadd.f32 %v9626_v32, %v9625_v28  ;;  %9934 = vmatprep.subr.mxu0 %v20322_v17  ;;  %11191 = vmatmul.mubr.f32.gmra.mxu0 %v2507_v14  ;;  %v15871_v14 = vmul.f32 %v15724_v41, %v1951_v24  ;;  %v15874_v32 = vmul.f32 %v15724_v41, %v1950_v6  ;;  %v20330_v24 = vld [vmem:[#allocation90_spill] sm:$0xff]  ;;  %v20331_v41 = vld [vmem:[#allocation89_spill] sm:$0xff] }
 0x39c   :  { %9935 = vmatpush3.msra.mxu0 %v20323_v38  ;;  %v9628_v50 = vpop.f32.mrf.mxu1  ;;  %11193 = vmatprep.mubr.msk.f32.mxu0 %vm11838_vm9, %v20227_v5  ;;  %v9568_v11 = vadd.f32 %v15756_v30, %v15754_v18  ;;  %v9571_v18 = vadd.f32 %v15760_v42, %v15758_v19 }
 0x39d   :  { %v2512_v45 = vadd.f32 %v9627_v46, %v9556_v34  ;;  %9936 = vmatprep.subr.mxu0 %v20324_v37  ;;  %20326 = vst [vmem:[#allocation61_spill] sm:$0xff] %v15871_v14  ;;  %20327 = vst [vmem:[#allocation66_spill] sm:$0xff] %v15874_v32  ;;  %v15882_v34 = vpop.f32.mrf.mxu0  ;;  %v20335_v14 = vld [vmem:[#allocation101_spill] sm:$0xff] }
 0x39e   :  { %9937 = vmatpush3.msra.mxu0 %v20325_v22  ;;  %v9629_v28 = vpop.f32.mrf.mxu1 }
 0x39f   :  { %v9630_v51 = vadd.f32 %v9629_v28, %v9628_v50  ;;  %9938 = vmatprep.subr.mxu0 %v20328_v16  ;;  %11194 = vmatmul.mubr.f32.gmra.mxu0 %v2512_v45  ;;  %v20332_v50 = vld [vmem:[#allocation4_spill] sm:$0xff]  ;;  %v20333_v45 = vld [vmem:[#allocation102_spill] sm:$0xff]  ;;  %v15892_v32 = vpop.f32.mrf.mxu0 }
 0x3a0   :  { %9939 = vmatpush3.msra.mxu0 %v20329_v3  ;;  %v9631_v36 = vpop.f32.mrf.mxu1  ;;  %11196 = vmatprep.mubr.msk.f32.mxu0 %vm11838_vm9, %v20227_v5 }
 0x3a1   :  { %v2517_v46 = vadd.f32 %v9630_v51, %v9559_v49  ;;  %9940 = vmatprep.subr.mxu0 %v20330_v24  ;;  %v20334_v49 = vld [vmem:[#allocation62_spill] sm:$0xff]  ;;  %v15902_v53 = vpop.f32.mrf.mxu0 }
 0x3a2   :  { %9941 = vmatpush3.msra.mxu0 %v20331_v41  ;;  %v9632_v6 = vpop.f32.mrf.mxu1 }
 0x3a3   :  { %v9633_v13 = vadd.f32 %v9632_v6, %v9631_v36  ;;  %9942 = vmatprep.subr.mxu0 %v20332_v50  ;;  %11197 = vmatmul.mubr.f32.gmra.mxu0 %v2517_v46  ;;  %v20336_v36 = vld [vmem:[#allocation59_spill] sm:$0xff]  ;;  %v20337_v46 = vld [vmem:[#allocation100_spill] sm:$0xff]  ;;  %v15912_v40 = vpop.f32.mrf.mxu0 }
 0x3a4   :  { %9943 = vmatpush3.msra.mxu0 %v20333_v45  ;;  %v9634_v28 = vpop.f32.mrf.mxu1  ;;  %11199 = vmatprep.mubr.msk.f32.mxu0 %vm11838_vm9, %v20227_v5 }
 0x3a5   :  { %v2522_v51 = vadd.f32 %v9633_v13, %v9562_v23  ;;  %9944 = vmatprep.subr.mxu0 %v20334_v49  ;;  %v20338_v13 = vld [vmem:[#allocation76_spill] sm:$0xff]  ;;  %v15922_v15 = vpop.f32.mrf.mxu0 }
 0x3a6   :  { %9945 = vmatpush3.msra.mxu0 %v20335_v14  ;;  %v9635_v39 = vpop.f32.mrf.mxu1 }
 0x3a7   :  { %v9636_v47 = vadd.f32 %v9635_v39, %v9634_v28  ;;  %9946 = vmatprep.subr.mxu0 %v20336_v36  ;;  %11200 = vmatmul.mubr.f32.gmra.mxu0 %v2522_v51  ;;  %v20340_v39 = vld [vmem:[#allocation81_spill] sm:$0xff] }
 0x3a8   :  { %9947 = vmatpush3.msra.mxu0 %v20337_v46  ;;  %v9637_v6 = vpop.f32.mrf.mxu1  ;;  %11202 = vmatprep.mubr.msk.f32.mxu0 %vm11838_vm9, %v20227_v5  ;;  %v20341_v28 = vld [vmem:[#allocation69_spill] sm:$0xff] }
 0x3a9   :  { %v2527_v23 = vadd.f32 %v9636_v47, %v9565_v2  ;;  %9948 = vmatprep.subr.mxu0 %v20338_v13  ;;  %v20342_v47 = vld [vmem:[#allocation7_spill] sm:$0xff] }
 0x3aa   :  { %9949 = vmatpush3.msra.mxu0 %v20339_v61  ;;  %v9638_v25 = vpop.f32.mrf.mxu1 }
 0x3ab   :  { %v9639_v60 = vadd.f32 %v9638_v25, %v9637_v6  ;;  %9950 = vmatprep.subr.mxu0 %v20340_v39  ;;  %11203 = vmatmul.mubr.f32.gmra.mxu0 %v2527_v23  ;;  %v20344_v25 = vld [vmem:[#allocation110_spill] sm:$0xff]  ;;  %v20345_v6 = vld [vmem:[#allocation23_spill] sm:$0xff] }
 0x3ac   :  { %9951 = vmatpush3.msra.mxu0 %v20341_v28  ;;  %v9640_v51 = vpop.f32.mrf.mxu1  ;;  %11205 = vmatprep.mubr.msk.f32.mxu0 %vm11838_vm9, %v20227_v5 }
 0x3ad   :  { %v2532_v2 = vadd.f32 %v9639_v60, %v9568_v11  ;;  %9952 = vmatprep.subr.mxu0 %v20342_v47  ;;  %v20346_v60 = vld [vmem:[#allocation112_spill] sm:$0xff] }
 0x3ae   :  { %9953 = vmatpush3.msra.mxu0 %v20343_v56  ;;  %v9641_v7 = vpop.f32.mrf.mxu1 }
 0x3af   :  { %v9642_v30 = vadd.f32 %v9641_v7, %v9640_v51  ;;  %9954 = vmatprep.subr.mxu0 %v20344_v25  ;;  %11206 = vmatmul.mubr.f32.gmra.mxu0 %v2532_v2  ;;  %v9574_v7 = vadd.f32 %v15766_v59, %v15762_v52  ;;  %v15931_v51 = vpop.f32.mrf.mxu0 }
 0x3b0   :  { %9955 = vmatpush3.msra.mxu0 %v20345_v6  ;;  %v9643_v23 = vpop.f32.mrf.mxu1  ;;  %11208 = vmatprep.mubr.msk.f32.mxu0 %vm11838_vm9, %v20227_v5 }
 0x3b1   :  { %v2537_v11 = vadd.f32 %v9642_v30, %v9571_v18  ;;  %9956 = vmatprep.subr.mxu0 %v20346_v60  ;;  %v9577_v30 = vadd.f32 %v15782_v26, %v15780_v35  ;;  %v15937_v59 = vpop.f32.mrf.mxu0 }
 0x3b2   :  { %9957 = vmatpush3.msra.mxu0 %v20347_v0  ;;  %v9644_v9 = vpop.f32.mrf.mxu1 }
 0x3b3   :  { %v9645_v19 = vadd.f32 %v9644_v9, %v9643_v23  ;;  %10026 = vmatprep.subr.mxu0 %v20296_v12  ;;  %11209 = vmatmul.mubr.f32.gmra.mxu0 %v2537_v11  ;;  %v9580_v23 = vadd.f32 %v15786_v62, %v15784_v48  ;;  %v15943_v26 = vpop.f32.mrf.mxu0 }
 0x3b4   :  { %v9646_v42 = vpop.f32.mrf.mxu1  ;;  %11211 = vmatprep.mubr.msk.f32.mxu0 %vm11838_vm9, %v20227_v5 }
 0x3b5   :  { %v2542_v2 = vadd.f32 %v9645_v19, %v9574_v7  ;;  %v15949_v62 = vpop.f32.mrf.mxu0 }
 0x3b6   :  { %v9647_v18 = vpop.f32.mrf.mxu1 }
 0x3b7   :  { %v9648_v0 = vadd.f32 %v9647_v18, %v9646_v42  ;;  %11212 = vmatmul.mubr.f32.gmra.mxu0 %v2542_v2  ;;  %v9583_v42 = vadd.f32 %v15790_v31, %v15788_v58  ;;  %v9760_v18 = vadd.f32 %v15866_v63, %v15837_v8  ;;  %v15956_v58 = vpop.f32.mrf.mxu0  ;;  %v20349_v63 = vld [vmem:[#allocation49_spill] sm:$0xff] }
 0x3b8   :  { %v9649_v60 = vpop.f32.mrf.mxu1  ;;  %11214 = vmatprep.mubr.msk.f32.mxu0 %vm11838_vm9, %v20227_v5  ;;  %vm3380_vm8 = vcmp.eq.s32.totalorder %v20349_v63, %v20228_v4  ;;  %vm3379_vm11 = vcmp.eq.s32.totalorder %v20349_v63, %v20225_v21 }
 0x3b9   :  { %v2547_v52 = vadd.f32 %v9648_v0, %v9577_v30 }
 0x3ba   :  { %v9650_v9 = vpop.f32.mrf.mxu1 }
 0x3bb   :  { %v9651_v11 = vadd.f32 %v9650_v9, %v9649_v60  ;;  %11215 = vmatmul.mubr.f32.gmra.mxu0 %v2547_v52  ;;  %v20348_v52 = vld [vmem:[#allocation52_spill] sm:$0xff] }
 0x3bc   :  { %v9652_v7 = vpop.f32.mrf.mxu1  ;;  %11217 = vmatprep.mubr.msk.f32.mxu0 %vm11838_vm9, %v20227_v5  ;;  %vm3376_vm3 = vcmp.eq.s32.totalorder %v20348_v52, %v20228_v4  ;;  %vm3375_vm12 = vcmp.eq.s32.totalorder %v20348_v52, %v20225_v21 }
 0x3bd   :  { %v2552_v35 = vadd.f32 %v9651_v11, %v9580_v23  ;;  %v9763_v11 = vadd.f32 %v15892_v32, %v15882_v34  ;;  %v20350_v32 = vld [vmem:[#allocation60_spill] sm:$0xff] }
 0x3be   :  { %v9653_v19 = vpop.f32.mrf.mxu1 }
 0x3bf   :  { %v9654_v2 = vadd.f32 %v9653_v19, %v9652_v7  ;;  %11218 = vmatmul.mubr.f32.gmra.mxu0 %v2552_v35  ;;  %v15967_v35 = vpop.f32.mrf.mxu0 }
 0x3c0   :  { %v9687_v0 = vpop.f32.mrf.mxu1  ;;  %11220 = vmatprep.mubr.msk.f32.mxu0 %vm11838_vm9, %v20227_v5 }
 0x3c1   :  { %v2557_v48 = vadd.f32 %v9654_v2, %v9583_v42 }
 0x3c2   :  { %v9688_v60 = vpop.f32.mrf.mxu1 }
 0x3c3   :  { %v9689_v30 = vadd.f32 %v9688_v60, %v9687_v0  ;;  %11221 = vmatmul.mubr.f32.gmra.mxu0 %v2557_v48  ;;  %v9766_v0 = vadd.f32 %v15912_v40, %v15902_v53  ;;  %v15982_v48 = vpop.f32.mrf.mxu0  ;;  %v20351_v60 = vld [vmem:[#allocation65_spill] sm:$0xff]  ;;  %v20354_v40 = vld [vmem:[#allocation74_spill] sm:$0xff] }
 0x3c4   :  { %v9690_v9 = vpop.f32.mrf.mxu1  ;;  %8563 = vmatprep.mubr.msk.f32.mxu0 %vm3376_vm3, %v20218_v57 }
 0x3c5   :  { %v2981_v31 = vadd.f32 %v9760_v18, %v9689_v30  ;;  %v20352_v18 = vld [vmem:[#allocation56_spill] sm:$0xff] }
 0x3c6   :  { %v9691_v23 = vpop.f32.mrf.mxu1  ;;  %vm3384_vm4 = vcmp.eq.s32.totalorder %v20352_v18, %v20228_v4  ;;  %vm3383_vm1 = vcmp.eq.s32.totalorder %v20352_v18, %v20225_v21 }
 0x3c7   :  { %v9692_v7 = vadd.f32 %v9691_v23, %v9690_v9  ;;  %11114 = vmatmul.mubr.f32.vlgmr.msra.gmra.mxu1 %v2981_v31  ;;  %8564 = vmatmul.mubr.msk.f32.vlgmr.msra.gmra.mxu0 %vm3375_vm12, %v20218_v57  ;;  %v20353_v31 = vld [vmem:[#allocation16_spill] sm:$0xff]  ;;  %v15993_v23 = vpop.f32.mrf.mxu0 }
 0x3c8   :  { %9856 = vmatpush3.msra.mxu1 %v20259_v55  ;;  %10027 = vmatpush3.msra.mxu0 %v20259_v55 }
 0x3c9   :  { %v9693_v8 = vpop.f32.mrf.mxu1  ;;  %v2986_v19 = vadd.f32 %v9763_v11, %v9692_v7  ;;  %9857 = vmatprep.subr.mxu1 %v20262_v33  ;;  %8565 = vmatprep.mubr.msk.f32.mxu0 %vm3380_vm8, %v20218_v57  ;;  %v20355_v7 = vld [vmem:[#allocation68_spill] sm:$0xff] }
 0x3ca   :  { %10028 = vmatprep.subr.mxu0 %v20262_v33  ;;  %9858 = vmatpush3.msra.mxu1 %v20350_v32  ;;  %v20378_v33 = vld [vmem:[#allocation99_spill] sm:$0xff] }
 0x3cb   :  { %v9694_v34 = vpop.f32.mrf.mxu1  ;;  %10029 = vmatpush3.msra.mxu0 %v20350_v32  ;;  %11116 = vmatprep.mubr.msk.f32.mxu1 %vm11838_vm9, %v20227_v5 }
 0x3cc   :  { %v9695_v42 = vadd.f32 %v9694_v34, %v9693_v8  ;;  %9859 = vmatprep.subr.mxu1 %v20264_v44  ;;  %10030 = vmatprep.subr.mxu0 %v20264_v44  ;;  %v20356_v34 = vld [vmem:[#allocation13_spill] sm:$0xff] }
 0x3cd   :  { %v9696_v2 = vpop.f32.mrf.mxu1  ;;  %11117 = vmatmul.mubr.f32.gmra.mxu1 %v2986_v19  ;;  %8566 = vmatmul.mubr.msk.f32.gmra.mxu0 %vm3379_vm11, %v20218_v57  ;;  %v9769_v19 = vadd.f32 %v15931_v51, %v15922_v15  ;;  %v20359_v15 = vld [vmem:[#allocation75_spill] sm:$0xff] }
 0x3ce   :  { %9860 = vmatpush3.msra.mxu1 %v20351_v60  ;;  %10031 = vmatpush3.msra.mxu0 %v20351_v60  ;;  %v2991_v9 = vadd.f32 %v9766_v0, %v9695_v42  ;;  %v20357_v42 = vld [vmem:[#allocation51_spill] sm:$0xff]  ;;  %v16009_v0 = vpop.f32.mrf.mxu0  ;;  %v20368_v60 = vld [vmem:[#allocation10_spill] sm:$0xff] }
 0x3cf   :  { %v9697_v30 = vpop.f32.mrf.mxu1  ;;  %9861 = vmatprep.subr.mxu1 %v20353_v31  ;;  %8567 = vmatprep.mubr.msk.f32.mxu0 %vm3384_vm4, %v20218_v57  ;;  %vm3388_vm5 = vcmp.eq.s32.totalorder %v20357_v42, %v20228_v4  ;;  %vm3387_vm7 = vcmp.eq.s32.totalorder %v20357_v42, %v20225_v21 }
 0x3d0   :  { %10032 = vmatprep.subr.mxu0 %v20353_v31  ;;  %9862 = vmatpush3.msra.mxu1 %v20354_v40  ;;  %v9698_v11 = vadd.f32 %v9697_v30, %v9696_v2 }
 0x3d1   :  { %10033 = vmatpush3.msra.mxu0 %v20354_v40  ;;  %11119 = vmatprep.mubr.msk.f32.mxu1 %vm11838_vm9, %v20227_v5  ;;  %v20363_v40 = vld [vmem:[#allocation91_spill] sm:$0xff] }
 0x3d2   :  { %9863 = vmatprep.subr.mxu1 %v20355_v7  ;;  %10034 = vmatprep.subr.mxu0 %v20355_v7  ;;  %v2996_v30 = vadd.f32 %v9769_v19, %v9698_v11  ;;  %v20358_v7 = vld [vmem:[#allocation71_spill] sm:$0xff]  ;;  %v9772_v19 = vadd.f32 %v15943_v26, %v15937_v59  ;;  %v20364_v59 = vld [vmem:[#allocation82_spill] sm:$0xff] }
 0x3d3   :  { %11120 = vmatmul.mubr.f32.gmra.mxu1 %v2991_v9  ;;  %8568 = vmatmul.mubr.msk.f32.gmra.mxu0 %vm3383_vm1, %v20218_v57 }
 0x3d4   :  { %9864 = vmatpush3.msra.mxu1 %v20356_v34  ;;  %10035 = vmatpush3.msra.mxu0 %v20356_v34  ;;  %v20360_v34 = vld [vmem:[#allocation78_spill] sm:$0xff] }
 0x3d5   :  { %9865 = vmatprep.subr.mxu1 %v20358_v7  ;;  %8569 = vmatprep.mubr.msk.f32.mxu0 %vm3388_vm5, %v20218_v57 }
 0x3d6   :  { %10036 = vmatprep.subr.mxu0 %v20358_v7  ;;  %9866 = vmatpush3.msra.mxu1 %v20359_v15  ;;  %v16024_v7 = vpop.f32.mrf.mxu0 }
 0x3d7   :  { %10037 = vmatpush3.msra.mxu0 %v20359_v15  ;;  %11122 = vmatprep.mubr.msk.f32.mxu1 %vm11838_vm9, %v20227_v5 }
 0x3d8   :  { %9867 = vmatprep.subr.mxu1 %v20360_v34  ;;  %10038 = vmatprep.subr.mxu0 %v20360_v34 }
 0x3d9   :  { %11123 = vmatmul.mubr.f32.gmra.mxu1 %v2996_v30  ;;  %8570 = vmatmul.mubr.msk.f32.gmra.mxu0 %vm3387_vm7, %v20218_v57  ;;  %v16035_v30 = vpop.f32.mrf.mxu0 }
 0x3da   :  { %v9699_v53 = vpop.f32.mrf.mxu1  ;;  %11125 = vmatprep.mubr.msk.f32.mxu1 %vm11838_vm9, %v20227_v5 }
 0x3dc   :  { %v9700_v8 = vpop.f32.mrf.mxu1 }
 0x3dd   :  { %v9701_v9 = vadd.f32 %v9700_v8, %v9699_v53  ;;  %v20361_v53 = vld [vmem:[#allocation79_spill] sm:$0xff]  ;;  %v20362_v8 = vld [vmem:[#allocation58_spill] sm:$0xff] }
 0x3de   :  { %v9702_v2 = vpop.f32.mrf.mxu1  ;;  %9868 = vmatpush3.msra.mxu1 %v20361_v53  ;;  %10039 = vmatpush3.msra.mxu0 %v20361_v53  ;;  %vm3392_vm14 = vcmp.eq.s32.totalorder %v20362_v8, %v20228_v4  ;;  %v20365_v53 = vld [vmem:[#allocation15_spill] sm:$0xff]  ;;  %vm3391_vm6 = vcmp.eq.s32.totalorder %v20362_v8, %v20225_v21 }
 0x3df   :  { %v3001_v15 = vadd.f32 %v9772_v19, %v9701_v9  ;;  %9869 = vmatprep.subr.mxu1 %v20363_v40  ;;  %8571 = vmatprep.mubr.msk.f32.mxu0 %vm3392_vm14, %v20218_v57  ;;  %v9775_v19 = vadd.f32 %v15956_v58, %v15949_v62  ;;  %v20369_v62 = vld [vmem:[#allocation83_spill] sm:$0xff] }
 0x3e0   :  { %v9703_v51 = vpop.f32.mrf.mxu1  ;;  %10040 = vmatprep.subr.mxu0 %v20363_v40  ;;  %9870 = vmatpush3.msra.mxu1 %v20364_v59  ;;  %v20366_v40 = vld [vmem:[#allocation106_spill] sm:$0xff] }
 0x3e1   :  { %10041 = vmatpush3.msra.mxu0 %v20364_v59  ;;  %v9704_v31 = vadd.f32 %v9703_v51, %v9702_v2  ;;  %9871 = vmatprep.subr.mxu1 %v20365_v53  ;;  %v20367_v2 = vld [vmem:[#allocation54_spill] sm:$0xff]  ;;  %v16051_v59 = vpop.f32.mrf.mxu0 }
 0x3e2   :  { %v9705_v11 = vpop.f32.mrf.mxu1  ;;  %10042 = vmatprep.subr.mxu0 %v20365_v53  ;;  %11126 = vmatmul.mubr.f32.gmra.mxu1 %v3001_v15  ;;  %vm3396_vm10 = vcmp.eq.s32.totalorder %v20367_v2, %v20228_v4  ;;  %vm3395_vm13 = vcmp.eq.s32.totalorder %v20367_v2, %v20225_v21 }
 0x3e3   :  { %8572 = vmatmul.mubr.msk.f32.gmra.mxu0 %vm3391_vm6, %v20218_v57  ;;  %9872 = vmatpush3.msra.mxu1 %v20366_v40  ;;  %v3006_v53 = vadd.f32 %v9775_v19, %v9704_v31  ;;  %v16064_v19 = vpop.permute.xlu1 %3353  ;;  %v9786_v44 = vpop.f32.mrf.mxu0 }
 0x3e4   :  { %v9706_v34 = vpop.f32.mrf.mxu1  ;;  %10043 = vmatpush3.msra.mxu0 %v20366_v40  ;;  %9873 = vmatprep.subr.mxu1 %v20368_v60  ;;  %v20370_v40 = vld [vmem:[#allocation103_spill] sm:$0xff]  ;;  %vm3400_vm15 = vcmp.eq.s32.totalorder %v16064_v19, %v20228_v4  ;;  %vm3399_vm0 = vcmp.eq.s32.totalorder %v16064_v19, %v20225_v21 }
 0x3e5   :  { %8573 = vmatprep.mubr.msk.f32.mxu0 %vm3396_vm10, %v20218_v57  ;;  %10044 = vmatprep.subr.mxu0 %v20368_v60  ;;  %v9707_v15 = vadd.f32 %v9706_v34, %v9705_v11  ;;  %v9778_v60 = vadd.f32 %v15982_v48, %v15967_v35  ;;  %v20371_v34 = vld [vmem:[#allocation5_spill] sm:$0xff]  ;;  %v20373_v35 = vld [vmem:[#allocation94_spill] sm:$0xff] }
 0x3e6   :  { %v9708_v26 = vpop.f32.mrf.mxu1  ;;  %9874 = vmatpush3.msra.mxu1 %v20369_v62  ;;  %10045 = vmatpush3.msra.mxu0 %v20369_v62  ;;  %v20372_v62 = vld [vmem:[#allocation88_spill] sm:$0xff] }
 0x3e7   :  { %11128 = vmatprep.mubr.msk.f32.mxu1 %vm11838_vm9, %v20227_v5  ;;  %9875 = vmatprep.subr.mxu1 %v20370_v40 }
 0x3e8   :  { %v9709_v9 = vpop.f32.mrf.mxu1  ;;  %10046 = vmatprep.subr.mxu0 %v20370_v40  ;;  %11129 = vmatmul.mubr.f32.gmra.mxu1 %v3006_v53  ;;  %v3011_v40 = vadd.f32 %v9778_v60, %v9707_v15  ;;  %v9788_v53 = vpop.f32.mrf.mxu0  ;;  %v9781_v15 = vadd.f32 %v16009_v0, %v15993_v23  ;;  %v20377_v23 = vld [vmem:[#allocation53_spill] sm:$0xff] }
 0x3e9   :  { %8574 = vmatmul.mubr.msk.f32.gmra.mxu0 %vm3395_vm13, %v20218_v57  ;;  %9876 = vmatpush3.msra.mxu1 %v20371_v34  ;;  %v9710_v32 = vadd.f32 %v9709_v9, %v9708_v26  ;;  %v16084_v60 = vpop.permute.xlu0 %3356  ;;  %v20375_v26 = vld [vmem:[#allocation93_spill] sm:$0xff] }
 0x3ea   :  { %v9711_v51 = vpop.f32.mrf.mxu1  ;;  %10047 = vmatpush3.msra.mxu0 %v20371_v34  ;;  %9877 = vmatprep.subr.mxu1 %v20372_v62  ;;  %v20374_v34 = vld [vmem:[#allocation87_spill] sm:$0xff]  ;;  %vm3404_vm2 = vcmp.eq.s32.totalorder %v16084_v60, %v20228_v4  ;;  %v9789_v9 = vpop.f32.mrf.mxu0  ;;  %vm3403_vm3 = vcmp.eq.s32.totalorder %v16084_v60, %v20225_v21 }
 0x3eb   :  { %8575 = vmatprep.mubr.msk.f32.mxu0 %vm3400_vm15, %v20218_v57  ;;  %10048 = vmatprep.subr.mxu0 %v20372_v62  ;;  %v20376_v62 = vld [vmem:[#allocation86_spill] sm:$0xff] }
 0x3ec   :  { %v9712_v58 = vpop.f32.mrf.mxu1  ;;  %9878 = vmatpush3.msra.mxu1 %v20373_v35  ;;  %10049 = vmatpush3.msra.mxu0 %v20373_v35 }
 0x3ed   :  { %11131 = vmatprep.mubr.msk.f32.mxu1 %vm11838_vm9, %v20227_v5  ;;  %9879 = vmatprep.subr.mxu1 %v20374_v34 }
 0x3ee   :  { %v9714_v31 = vpop.f32.mrf.mxu1  ;;  %10050 = vmatprep.subr.mxu0 %v20374_v34  ;;  %11132 = vmatmul.mubr.f32.gmra.mxu1 %v3011_v40  ;;  %v3016_v34 = vadd.f32 %v9781_v15, %v9710_v32  ;;  %v9713_v40 = vadd.f32 %v9712_v58, %v9711_v51  ;;  %v16106_v32 = vpop.permute.xlu1 %3359  ;;  %v20379_v58 = vld [vmem:[#allocation55_spill] sm:$0xff] }
 0x3ef   :  { %8576 = vmatmul.mubr.msk.f32.gmra.mxu0 %vm3399_vm0, %v20218_v57  ;;  %9880 = vmatpush3.msra.mxu1 %v20375_v26  ;;  %v9791_v15 = vpop.f32.mrf.mxu0  ;;  %vm3408_vm12 = vcmp.eq.s32.totalorder %v16106_v32, %v20228_v4  ;;  %vm3407_vm8 = vcmp.eq.s32.totalorder %v16106_v32, %v20225_v21 }
 0x3f0   :  { %v9715_v11 = vpop.f32.mrf.mxu1  ;;  %10051 = vmatpush3.msra.mxu0 %v20375_v26  ;;  %9881 = vmatprep.subr.mxu1 %v20376_v62  ;;  %v9784_v26 = vadd.f32 %v16035_v30, %v16024_v7  ;;  %v20380_v30 = vld [vmem:[#allocation98_spill] sm:$0xff] }
 0x3f1   :  { %8577 = vmatprep.mubr.msk.f32.mxu0 %vm3404_vm2, %v20218_v57  ;;  %10052 = vmatprep.subr.mxu0 %v20376_v62  ;;  %v9716_v7 = vadd.f32 %v9715_v11, %v9714_v31  ;;  %v9790_v11 = vadd.f32 %v9789_v9, %v9788_v53 }
 0x3f2   :  { %v9717_v48 = vpop.f32.mrf.mxu1  ;;  %9882 = vmatpush3.msra.mxu1 %v20377_v23  ;;  %10053 = vmatpush3.msra.mxu0 %v20377_v23  ;;  %v3021_v51 = vadd.f32 %v9784_v26, %v9713_v40  ;;  %v9787_v23 = vadd.f32 %v9786_v44, %v16051_v59  ;;  %v16118_v26 = vpop.permute.xlu0 %3362 }
 0x3f3   :  { %11134 = vmatprep.mubr.msk.f32.mxu1 %vm11838_vm9, %v20227_v5  ;;  %9883 = vmatprep.subr.mxu1 %v20378_v33  ;;  %v9792_v40 = vpop.f32.mrf.mxu0  ;;  %vm3412_vm11 = vcmp.eq.s32.totalorder %v16118_v26, %v20228_v4  ;;  %vm3411_vm4 = vcmp.eq.s32.totalorder %v16118_v26, %v20225_v21 }
 0x3f4   :  { %v9718_v35 = vpop.f32.mrf.mxu1  ;;  %10054 = vmatprep.subr.mxu0 %v20378_v33  ;;  %11135 = vmatmul.mubr.f32.gmra.mxu1 %v3016_v34  ;;  %v20381_v34 = vld [vmem:[#allocation109_spill] sm:$0xff]  ;;  %v3026_v31 = vadd.f32 %v9787_v23, %v9716_v7  ;;  %v9793_v53 = vadd.f32 %v9792_v40, %v9791_v15 }
 0x3f5   :  { %8578 = vmatmul.mubr.msk.f32.gmra.mxu0 %vm3403_vm3, %v20218_v57  ;;  %9884 = vmatpush3.msra.mxu1 %v20379_v58  ;;  %v9719_v44 = vadd.f32 %v9718_v35, %v9717_v48  ;;  %v9794_v23 = vpop.f32.mrf.mxu0 }
 0x3f6   :  { %v9720_v0 = vpop.f32.mrf.mxu1  ;;  %10055 = vmatpush3.msra.mxu0 %v20379_v58  ;;  %9885 = vmatprep.subr.mxu1 %v20380_v30  ;;  %v16143_v9 = vpop.permute.xlu0 %3368 }
 0x3f7   :  { %8579 = vmatprep.mubr.msk.f32.mxu0 %vm3408_vm12, %v20218_v57  ;;  %10056 = vmatprep.subr.mxu0 %v20380_v30  ;;  %v9795_v7 = vpop.f32.mrf.mxu0  ;;  %vm3420_vm7 = vcmp.eq.s32.totalorder %v16143_v9, %v20228_v4  ;;  %vm3419_vm14 = vcmp.eq.s32.totalorder %v16143_v9, %v20225_v21 }
 0x3f8   :  { %v9721_v33 = vpop.f32.mrf.mxu1  ;;  %9886 = vmatpush3.msra.mxu1 %v20381_v34  ;;  %10057 = vmatpush3.msra.mxu0 %v20381_v34  ;;  %v16133_v34 = vpop.permute.xlu1 %3365 }
 0x3f9   :  { %11137 = vmatprep.mubr.msk.f32.mxu1 %vm11838_vm9, %v20227_v5  ;;  %8580 = vmatmul.mubr.msk.f32.gmra.mxu0 %vm3407_vm8, %v20218_v57  ;;  %vm3416_vm1 = vcmp.eq.s32.totalorder %v16133_v34, %v20228_v4  ;;  %v9722_v35 = vadd.f32 %v9721_v33, %v9720_v0  ;;  %vm3415_vm5 = vcmp.eq.s32.totalorder %v16133_v34, %v20225_v21 }
 0x3fa   :  { %11138 = vmatmul.mubr.f32.gmra.mxu1 %v3021_v51  ;;  %8581 = vmatprep.mubr.msk.f32.mxu0 %vm3412_vm11, %v20218_v57  ;;  %v9723_v59 = vpop.f32.mrf.mxu1  ;;  %v3031_v51 = vadd.f32 %v9790_v11, %v9719_v44  ;;  %v9796_v0 = vadd.f32 %v9795_v7, %v9794_v23  ;;  %v16163_v44 = vpop.permute.xlu0 %3963  ;;  %v8604_v11 = vld [vmem:[%s19231_s2 + $0x178] sm:$0xff]  ;;  %v8722_v7 = vld [vmem:[%s19231_s2 + $0x1e8] sm:$0xff] }
 0x3fb   :  { %11140 = vmatprep.mubr.msk.f32.mxu1 %vm11838_vm9, %v20227_v5  ;;  %11223 = vmatprep.subr.mxu1 %v20227_v5  ;;  %v8724_v23 = vld [vmem:[%s19231_s2 + $0x1f8] sm:$0xff] }
 0x3fc   :  { %11294 = vmatprep.subr.mxu0 %v20227_v5  ;;  %v9724_v48 = vpop.f32.mrf.mxu1  ;;  %v16153_v15 = vpop.permute.xlu1 %3371 }
 0x3fd   :  { %8582 = vmatmul.mubr.msk.f32.gmra.mxu0 %vm3411_vm4, %v20218_v57  ;;  %v9725_v33 = vadd.f32 %v9724_v48, %v9723_v59  ;;  %vm3424_vm6 = vcmp.eq.s32.totalorder %v16153_v15, %v20228_v4  ;;  %vm3423_vm10 = vcmp.eq.s32.totalorder %v16153_v15, %v20225_v21  ;;  %v20382_v59 = vld [vmem:[#allocation35_spill] sm:$0xff]  ;;  %v8603_v48 = vld [vmem:[%s19231_s2 + $0x170] sm:$0xff] }
 0x3fe   :  { %11141 = vmatmul.mubr.f32.gmra.mxu1 %v3026_v31  ;;  %8583 = vmatprep.mubr.msk.f32.mxu0 %vm3416_vm1, %v20218_v57  ;;  %v3036_v31 = vadd.f32 %v9793_v53, %v9722_v35  ;;  %vm3374_vm13 = vcmp.eq.s32.totalorder %v20348_v52, %v20382_v59  ;;  %vm4002_vm15 = vcmp.eq.s32.totalorder %v16163_v44, %v20382_v59  ;;  %v8723_v53 = vld [vmem:[%s19231_s2 + $0x1f0] sm:$0xff] }
 0x3ff   :  { %11143 = vmatprep.mubr.msk.f32.mxu1 %vm11838_vm9, %v20227_v5  ;;  %v3041_v40 = vadd.f32 %v9796_v0, %v9725_v33  ;;  %vm3378_vm3 = vcmp.eq.s32.totalorder %v20349_v63, %v20382_v59  ;;  %vm3382_vm4 = vcmp.eq.s32.totalorder %v20352_v18, %v20382_v59  ;;  %v8601_v33 = vld [vmem:[%s19231_s2 + $0x160] sm:$0xff]  ;;  %v8600_v0 = vld [vmem:[%s19231_s2 + $0x158] sm:$0xff] }
 0x400   :  { %v16186_v35 = vpop.permute.xlu1 %3966 }
 0x401   :  { %8584 = vmatmul.mubr.msk.f32.gmra.mxu0 %vm3415_vm5, %v20218_v57  ;;  %vm4006_vm12 = vcmp.eq.s32.totalorder %v16186_v35, %v20382_v59 }
 0x402   :  { %11144 = vmatmul.mubr.f32.gmra.mxu1 %v3031_v51  ;;  %8585 = vmatprep.mubr.msk.f32.mxu0 %vm3420_vm7, %v20218_v57  ;;  %v20383_v51 = vld [vmem:[#allocation32_spill] sm:$0xff] }
 0x403   :  { %11146 = vmatprep.mubr.msk.f32.mxu1 %vm11838_vm9, %v20227_v5  ;;  %vm4001_vm0 = vcmp.eq.s32.totalorder %v16163_v44, %v20383_v51  ;;  %vm3373_vm2 = vcmp.eq.s32.totalorder %v20348_v52, %v20383_v51  ;;  %v8602_v52 = vld [vmem:[%s19231_s2 + $0x168] sm:$0xff]  ;;  %vm3377_vm8 = vcmp.eq.s32.totalorder %v20349_v63, %v20383_v51  ;;  %vm4005_vm11 = vcmp.eq.s32.totalorder %v16186_v35, %v20383_v51  ;;  %v8721_v63 = vld [vmem:[%s19231_s2 + $0x1e0] sm:$0xff] }
 0x404   :  { %vm3381_vm5 = vcmp.eq.s32.totalorder %v20352_v18, %v20383_v51  ;;  %v8719_v18 = vld [vmem:[%s19231_s2 + $0x1d0] sm:$0xff] }
 0x405   :  { %8586 = vmatmul.mubr.msk.f32.gmra.mxu0 %vm3419_vm14, %v20218_v57  ;;  %vm3386_vm14 = vcmp.eq.s32.totalorder %v20357_v42, %v20382_v59 }
 0x406   :  { %11147 = vmatmul.mubr.f32.gmra.mxu1 %v3036_v31  ;;  %8587 = vmatprep.mubr.msk.f32.mxu0 %vm3424_vm6, %v20218_v57  ;;  %v16216_v31 = vpop.permute.xlu0 %3969 }
 0x407   :  { %11149 = vmatprep.mubr.msk.f32.mxu1 %vm11838_vm9, %v20227_v5  ;;  %vm4010_vm1 = vcmp.eq.s32.totalorder %v16216_v31, %v20382_v59  ;;  %vm4009_vm7 = vcmp.eq.s32.totalorder %v16216_v31, %v20383_v51 }
 0x409   :  { %8588 = vmatmul.mubr.msk.f32.gmra.mxu0 %vm3423_vm10, %v20218_v57  ;;  %vm3385_vm10 = vcmp.eq.s32.totalorder %v20357_v42, %v20383_v51  ;;  %v8717_v42 = vld [vmem:[%s19231_s2 + $0x1c0] sm:$0xff] }
 0x40a   :  { %11150 = vmatmul.mubr.f32.gmra.mxu1 %v3041_v40  ;;  %8657 = vmatprep.mubr.msk.f32.mxu0 %vm4002_vm15, %v20218_v57  ;;  %v8720_v40 = vld [vmem:[%s19231_s2 + $0x1d8] sm:$0xff]  ;;  %vm3390_vm15 = vcmp.eq.s32.totalorder %v20362_v8, %v20382_v59 }
 0x40b   :  { %8537 = vmatprep.mubr.msk.f32.mxu1 %vm3374_vm13, %v20218_v57 }
 0x40d   :  { %8658 = vmatmul.mubr.msk.f32.vlgmr.msra.gmra.mxu0 %vm4001_vm0, %v20218_v57 }
 0x40e   :  { %8538 = vmatmul.mubr.msk.f32.vlgmr.msra.gmra.mxu1 %vm3373_vm2, %v20218_v57  ;;  %11295 = vmatpush3.msra.mxu0 %v8724_v23  ;;  %v8599_v23 = vld [vmem:[%s19231_s2 + $0x150] sm:$0xff]  ;;  %vm3389_vm2 = vcmp.eq.s32.totalorder %v20362_v8, %v20383_v51 }
 0x40f   :  { %11224 = vmatpush3.msra.mxu1 %v8604_v11  ;;  %8539 = vmatprep.mubr.msk.f32.mxu1 %vm3378_vm3, %v20218_v57  ;;  %v16246_v11 = vpop.permute.xlu1 %3972  ;;  %v8715_v8 = vld [vmem:[%s19231_s2 + $0x1b0] sm:$0xff] }
 0x410   :  { %11225 = vmatprep.subr.mxu1 %v20227_v5  ;;  %8659 = vmatprep.mubr.msk.f32.mxu0 %vm4006_vm12, %v20218_v57  ;;  %vm4014_vm6 = vcmp.eq.s32.totalorder %v16246_v11, %v20382_v59  ;;  %vm4013_vm13 = vcmp.eq.s32.totalorder %v16246_v11, %v20383_v51  ;;  %vm3394_vm12 = vcmp.eq.s32.totalorder %v20367_v2, %v20382_v59 }
 0x411   :  { %11296 = vmatprep.subr.mxu0 %v20227_v5  ;;  %11226 = vmatpush3.msra.mxu1 %v8603_v48  ;;  %v8598_v48 = vld [vmem:[%s19231_s2 + $0x148] sm:$0xff] }
 0x412   :  { %11297 = vmatpush3.msra.mxu0 %v8723_v53  ;;  %11227 = vmatprep.subr.mxu1 %v20227_v5  ;;  %v8718_v53 = vld [vmem:[%s19231_s2 + $0x1c8] sm:$0xff] }
 0x413   :  { %11298 = vmatprep.subr.mxu0 %v20227_v5  ;;  %8540 = vmatmul.mubr.msk.f32.gmra.mxu1 %vm3377_vm8, %v20218_v57 }
 0x414   :  { %8660 = vmatmul.mubr.msk.f32.gmra.mxu0 %vm4005_vm11, %v20218_v57  ;;  %11228 = vmatpush3.msra.mxu1 %v8602_v52  ;;  %v16276_v52 = vpop.permute.xlu0 %3975  ;;  %vm3393_vm11 = vcmp.eq.s32.totalorder %v20367_v2, %v20383_v51  ;;  %v8713_v2 = vld [vmem:[%s19231_s2 + $0x1a0] sm:$0xff] }
 0x415   :  { %11299 = vmatpush3.msra.mxu0 %v8722_v7  ;;  %8541 = vmatprep.mubr.msk.f32.mxu1 %vm3382_vm4, %v20218_v57  ;;  %v8597_v7 = vld [vmem:[%s19231_s2 + $0x140] sm:$0xff]  ;;  %vm4018_vm0 = vcmp.eq.s32.totalorder %v16276_v52, %v20382_v59  ;;  %vm4017_vm3 = vcmp.eq.s32.totalorder %v16276_v52, %v20383_v51 }
 0x416   :  { %11229 = vmatprep.subr.mxu1 %v20227_v5  ;;  %8661 = vmatprep.mubr.msk.f32.mxu0 %vm4010_vm1, %v20218_v57  ;;  %vm3398_vm1 = vcmp.eq.s32.totalorder %v16064_v19, %v20382_v59 }
 0x417   :  { %11300 = vmatprep.subr.mxu0 %v20227_v5  ;;  %11230 = vmatpush3.msra.mxu1 %v8601_v33  ;;  %v8596_v33 = vld [vmem:[%s19231_s2 + $0x138] sm:$0xff] }
 0x418   :  { %11301 = vmatpush3.msra.mxu0 %v8721_v63  ;;  %11231 = vmatprep.subr.mxu1 %v20227_v5  ;;  %v8716_v63 = vld [vmem:[%s19231_s2 + $0x1b8] sm:$0xff] }
 0x419   :  { %11302 = vmatprep.subr.mxu0 %v20227_v5  ;;  %8542 = vmatmul.mubr.msk.f32.gmra.mxu1 %vm3381_vm5, %v20218_v57 }
 0x41a   :  { %8662 = vmatmul.mubr.msk.f32.gmra.mxu0 %vm4009_vm7, %v20218_v57  ;;  %11232 = vmatpush3.msra.mxu1 %v8600_v0  ;;  %v16306_v0 = vpop.permute.xlu1 %3978  ;;  %vm3397_vm7 = vcmp.eq.s32.totalorder %v16064_v19, %v20383_v51  ;;  %v8711_v19 = vld [vmem:[%s19231_s2 + $0x190] sm:$0xff] }
 0x41b   :  { %11303 = vmatpush3.msra.mxu0 %v8720_v40  ;;  %8543 = vmatprep.mubr.msk.f32.mxu1 %vm3386_vm14, %v20218_v57  ;;  %v8595_v40 = vld [vmem:[%s19231_s2 + $0x130] sm:$0xff]  ;;  %vm4022_vm8 = vcmp.eq.s32.totalorder %v16306_v0, %v20382_v59  ;;  %vm4021_vm4 = vcmp.eq.s32.totalorder %v16306_v0, %v20383_v51 }
 0x41c   :  { %11233 = vmatprep.subr.mxu1 %v20227_v5  ;;  %8663 = vmatprep.mubr.msk.f32.mxu0 %vm4014_vm6, %v20218_v57  ;;  %vm3402_vm6 = vcmp.eq.s32.totalorder %v16084_v60, %v20382_v59 }
 0x41d   :  { %11304 = vmatprep.subr.mxu0 %v20227_v5  ;;  %11234 = vmatpush3.msra.mxu1 %v8599_v23  ;;  %v8594_v23 = vld [vmem:[%s19231_s2 + $0x128] sm:$0xff] }
 0x41e   :  { %11305 = vmatpush3.msra.mxu0 %v8719_v18  ;;  %11235 = vmatprep.subr.mxu1 %v20227_v5  ;;  %v8714_v18 = vld [vmem:[%s19231_s2 + $0x1a8] sm:$0xff] }
 0x41f   :  { %11306 = vmatprep.subr.mxu0 %v20227_v5  ;;  %8544 = vmatmul.mubr.msk.f32.gmra.mxu1 %vm3385_vm10, %v20218_v57 }
 0x420   :  { %8664 = vmatmul.mubr.msk.f32.gmra.mxu0 %vm4013_vm13, %v20218_v57  ;;  %11236 = vmatpush3.msra.mxu1 %v8598_v48  ;;  %v16336_v48 = vpop.permute.xlu0 %3981  ;;  %vm3401_vm13 = vcmp.eq.s32.totalorder %v16084_v60, %v20383_v51  ;;  %v8709_v60 = vld [vmem:[%s19231_s2 + $0x180] sm:$0xff] }
 0x421   :  { %11307 = vmatpush3.msra.mxu0 %v8718_v53  ;;  %8545 = vmatprep.mubr.msk.f32.mxu1 %vm3390_vm15, %v20218_v57  ;;  %20384 = vst [vmem:[#allocation11_spill] sm:$0xff] %v16336_v48  ;;  %v8593_v53 = vld [vmem:[%s19231_s2 + $0x120] sm:$0xff]  ;;  %vm4026_vm5 = vcmp.eq.s32.totalorder %v16336_v48, %v20382_v59  ;;  %vm4025_vm14 = vcmp.eq.s32.totalorder %v16336_v48, %v20383_v51 }
 0x422   :  { %11237 = vmatprep.subr.mxu1 %v20227_v5  ;;  %8665 = vmatprep.mubr.msk.f32.mxu0 %vm4018_vm0, %v20218_v57  ;;  %vm3406_vm0 = vcmp.eq.s32.totalorder %v16106_v32, %v20382_v59 }
 0x423   :  { %11308 = vmatprep.subr.mxu0 %v20227_v5  ;;  %11238 = vmatpush3.msra.mxu1 %v8597_v7  ;;  %v8592_v7 = vld [vmem:[%s19231_s2 + $0x118] sm:$0xff] }
 0x424   :  { %11309 = vmatpush3.msra.mxu0 %v8717_v42  ;;  %11239 = vmatprep.subr.mxu1 %v20227_v5  ;;  %v8712_v42 = vld [vmem:[%s19231_s2 + $0x198] sm:$0xff] }
 0x425   :  { %11310 = vmatprep.subr.mxu0 %v20227_v5  ;;  %8546 = vmatmul.mubr.msk.f32.gmra.mxu1 %vm3389_vm2, %v20218_v57 }
 0x426   :  { %8666 = vmatmul.mubr.msk.f32.gmra.mxu0 %vm4017_vm3, %v20218_v57  ;;  %11240 = vmatpush3.msra.mxu1 %v8596_v33  ;;  %v16366_v33 = vpop.permute.xlu1 %3984  ;;  %vm3405_vm3 = vcmp.eq.s32.totalorder %v16106_v32, %v20383_v51 }
 0x427   :  { %11311 = vmatpush3.msra.mxu0 %v8716_v63  ;;  %8547 = vmatprep.mubr.msk.f32.mxu1 %vm3394_vm12, %v20218_v57  ;;  %20385 = vst [vmem:[#allocation111_spill] sm:$0xff] %v16366_v33  ;;  %v8591_v63 = vld [vmem:[%s19231_s2 + $0x110] sm:$0xff]  ;;  %vm4030_vm10 = vcmp.eq.s32.totalorder %v16366_v33, %v20382_v59  ;;  %vm4029_vm15 = vcmp.eq.s32.totalorder %v16366_v33, %v20383_v51 }
 0x428   :  { %11241 = vmatprep.subr.mxu1 %v20227_v5  ;;  %8667 = vmatprep.mubr.msk.f32.mxu0 %vm4022_vm8, %v20218_v57  ;;  %vm3410_vm8 = vcmp.eq.s32.totalorder %v16118_v26, %v20382_v59 }
 0x429   :  { %11312 = vmatprep.subr.mxu0 %v20227_v5  ;;  %11242 = vmatpush3.msra.mxu1 %v8595_v40  ;;  %v8590_v40 = vld [vmem:[%s19231_s2 + $0x108] sm:$0xff] }
 0x42a   :  { %11313 = vmatpush3.msra.mxu0 %v8715_v8  ;;  %11243 = vmatprep.subr.mxu1 %v20227_v5  ;;  %v8710_v8 = vld [vmem:[%s19231_s2 + $0x188] sm:$0xff] }
 0x42b   :  { %11314 = vmatprep.subr.mxu0 %v20227_v5  ;;  %8548 = vmatmul.mubr.msk.f32.gmra.mxu1 %vm3393_vm11, %v20218_v57 }
 0x42c   :  { %8668 = vmatmul.mubr.msk.f32.gmra.mxu0 %vm4021_vm4, %v20218_v57  ;;  %11244 = vmatpush3.msra.mxu1 %v8594_v23  ;;  %v16396_v23 = vpop.permute.xlu0 %3987  ;;  %vm3409_vm4 = vcmp.eq.s32.totalorder %v16118_v26, %v20383_v51 }
 0x42d   :  { %11315 = vmatpush3.msra.mxu0 %v8714_v18  ;;  %8549 = vmatprep.mubr.msk.f32.mxu1 %vm3398_vm1, %v20218_v57  ;;  %20386 = vst [vmem:[#allocation84_spill] sm:$0xff] %v16396_v23  ;;  %v8589_v18 = vld [vmem:[%s19231_s2 + $0x100] sm:$0xff]  ;;  %vm4034_vm2 = vcmp.eq.s32.totalorder %v16396_v23, %v20382_v59  ;;  %vm4033_vm12 = vcmp.eq.s32.totalorder %v16396_v23, %v20383_v51 }
 0x42e   :  { %11245 = vmatprep.subr.mxu1 %v20227_v5  ;;  %8669 = vmatprep.mubr.msk.f32.mxu0 %vm4026_vm5, %v20218_v57  ;;  %vm3414_vm5 = vcmp.eq.s32.totalorder %v16133_v34, %v20382_v59 }
 0x42f   :  { %11316 = vmatprep.subr.mxu0 %v20227_v5  ;;  %11246 = vmatpush3.msra.mxu1 %v8593_v53  ;;  %v16412_v53 = vpop.permute.xlu1 %3990 }
 0x430   :  { %11317 = vmatpush3.msra.mxu0 %v8713_v2  ;;  %11247 = vmatprep.subr.mxu1 %v20227_v5  ;;  %20387 = vst [vmem:[#allocation34_spill] sm:$0xff] %v16412_v53  ;;  %v20388_v2 = vld [vmem:[#allocation24_spill] sm:$0xff]  ;;  %vm4038_vm11 = vcmp.eq.s32.totalorder %v16412_v53, %v20382_v59  ;;  %vm4037_vm1 = vcmp.eq.s32.totalorder %v16412_v53, %v20383_v51 }
 0x431   :  { %11318 = vmatprep.subr.mxu0 %v20227_v5  ;;  %8550 = vmatmul.mubr.msk.f32.gmra.mxu1 %vm3397_vm7, %v20218_v57 }
 0x432   :  { %8670 = vmatmul.mubr.msk.f32.gmra.mxu0 %vm4025_vm14, %v20218_v57  ;;  %11248 = vmatpush3.msra.mxu1 %v8592_v7  ;;  %v16428_v7 = vpop.permute.xlu0 %3993  ;;  %vm3413_vm14 = vcmp.eq.s32.totalorder %v16133_v34, %v20383_v51 }
 0x433   :  { %11319 = vmatpush3.msra.mxu0 %v8712_v42  ;;  %8551 = vmatprep.mubr.msk.f32.mxu1 %vm3402_vm6, %v20218_v57  ;;  %20389 = vst [vmem:[#allocation26_spill] sm:$0xff] %v16428_v7  ;;  %vm4042_vm7 = vcmp.eq.s32.totalorder %v16428_v7, %v20382_v59  ;;  %v16442_v32 = vpop.permute.xlu1 %3996  ;;  %vm4041_vm6 = vcmp.eq.s32.totalorder %v16428_v7, %v20383_v51 }
 0x434   :  { %11249 = vmatprep.subr.mxu1 %v20227_v5  ;;  %8671 = vmatprep.mubr.msk.f32.mxu0 %vm4030_vm10, %v20218_v57  ;;  %20390 = vst [vmem:[#allocation40_spill] sm:$0xff] %v16442_v32  ;;  %vm3418_vm10 = vcmp.eq.s32.totalorder %v16143_v9, %v20382_v59 }
 0x435   :  { %11320 = vmatprep.subr.mxu0 %v20227_v5  ;;  %11250 = vmatpush3.msra.mxu1 %v8591_v63 }
 0x436   :  { %11321 = vmatpush3.msra.mxu0 %v8711_v19  ;;  %11251 = vmatprep.subr.mxu1 %v20227_v5  ;;  %v16456_v26 = vpop.permute.xlu0 %3999 }
 0x437   :  { %11322 = vmatprep.subr.mxu0 %v20227_v5  ;;  %8552 = vmatmul.mubr.msk.f32.gmra.mxu1 %vm3401_vm13, %v20218_v57  ;;  %vm4046_vm13 = vcmp.eq.s32.totalorder %v16442_v32, %v20382_v59  ;;  %20391 = vst [vmem:[#allocation37_spill] sm:$0xff] %v16456_v26 }
 0x438   :  { %8672 = vmatmul.mubr.msk.f32.gmra.mxu0 %vm4029_vm15, %v20218_v57  ;;  %11252 = vmatpush3.msra.mxu1 %v8590_v40  ;;  %vm3417_vm15 = vcmp.eq.s32.totalorder %v16143_v9, %v20383_v51 }
 0x439   :  { %11323 = vmatpush3.msra.mxu0 %v8710_v8  ;;  %8553 = vmatprep.mubr.msk.f32.mxu1 %vm3406_vm0, %v20218_v57  ;;  %vm4045_vm0 = vcmp.eq.s32.totalorder %v16442_v32, %v20383_v51 }
 0x43a   :  { %11253 = vmatprep.subr.mxu1 %v20227_v5  ;;  %8673 = vmatprep.mubr.msk.f32.mxu0 %vm4034_vm2, %v20218_v57  ;;  %vm3422_vm2 = vcmp.eq.s32.totalorder %v16153_v15, %v20382_v59 }
 0x43b   :  { %11324 = vmatprep.subr.mxu0 %v20227_v5  ;;  %11254 = vmatpush3.msra.mxu1 %v8589_v18 }
 0x43c   :  { %11325 = vmatpush3.msra.mxu0 %v8709_v60  ;;  %10097 = vmatprep.subr.mxu1 %v20388_v2 }
 0x43d   :  { %10268 = vmatprep.subr.mxu0 %v20388_v2  ;;  %8554 = vmatmul.mubr.msk.f32.gmra.mxu1 %vm3405_vm3, %v20218_v57  ;;  %vm4050_vm3 = vcmp.eq.s32.totalorder %v16456_v26, %v20382_v59 }
 0x43e   :  { %8674 = vmatmul.mubr.msk.f32.gmra.mxu0 %vm4033_vm12, %v20218_v57  ;;  %8555 = vmatprep.mubr.msk.f32.mxu1 %vm3410_vm8, %v20218_v57  ;;  %vm3421_vm12 = vcmp.eq.s32.totalorder %v16153_v15, %v20383_v51  ;;  %vm4049_vm8 = vcmp.eq.s32.totalorder %v16456_v26, %v20383_v51 }
 0x43f   :  { %8675 = vmatprep.mubr.msk.f32.mxu0 %vm4038_vm11, %v20218_v57  ;;  %vm4004_vm11 = vcmp.eq.s32.totalorder %v16163_v44, %v20228_v4 }
 0x441   :  { %8556 = vmatmul.mubr.msk.f32.gmra.mxu1 %vm3409_vm4, %v20218_v57  ;;  %vm4003_vm4 = vcmp.eq.s32.totalorder %v16163_v44, %v20225_v21  ;;  %v20415_v44 = vld [vmem:[#allocation65_spill] sm:$0xff] }
 0x442   :  { %8676 = vmatmul.mubr.msk.f32.gmra.mxu0 %vm4037_vm1, %v20218_v57  ;;  %8557 = vmatprep.mubr.msk.f32.mxu1 %vm3414_vm5, %v20218_v57  ;;  %vm4008_vm1 = vcmp.eq.s32.totalorder %v16186_v35, %v20228_v4  ;;  %vm4007_vm5 = vcmp.eq.s32.totalorder %v16186_v35, %v20225_v21  ;;  %v20419_v35 = vld [vmem:[#allocation13_spill] sm:$0xff] }
 0x443   :  { %8677 = vmatprep.mubr.msk.f32.mxu0 %vm4042_vm7, %v20218_v57  ;;  %vm4012_vm7 = vcmp.eq.s32.totalorder %v16216_v31, %v20228_v4 }
 0x445   :  { %8558 = vmatmul.mubr.msk.f32.gmra.mxu1 %vm3413_vm14, %v20218_v57  ;;  %vm4011_vm14 = vcmp.eq.s32.totalorder %v16216_v31, %v20225_v21  ;;  %v20423_v31 = vld [vmem:[#allocation79_spill] sm:$0xff] }
 0x446   :  { %8678 = vmatmul.mubr.msk.f32.gmra.mxu0 %vm4041_vm6, %v20218_v57  ;;  %8559 = vmatprep.mubr.msk.f32.mxu1 %vm3418_vm10, %v20218_v57  ;;  %vm4016_vm6 = vcmp.eq.s32.totalorder %v16246_v11, %v20228_v4  ;;  %vm4015_vm10 = vcmp.eq.s32.totalorder %v16246_v11, %v20225_v21  ;;  %v20427_v11 = vld [vmem:[#allocation106_spill] sm:$0xff] }
 0x447   :  { %8679 = vmatprep.mubr.msk.f32.mxu0 %vm4046_vm13, %v20218_v57  ;;  %vm4020_vm13 = vcmp.eq.s32.totalorder %v16276_v52, %v20228_v4 }
 0x449   :  { %8560 = vmatmul.mubr.msk.f32.gmra.mxu1 %vm3417_vm15, %v20218_v57  ;;  %vm4019_vm15 = vcmp.eq.s32.totalorder %v16276_v52, %v20225_v21  ;;  %v20431_v52 = vld [vmem:[#allocation11_spill] sm:$0xff] }
 0x44a   :  { %8680 = vmatmul.mubr.msk.f32.gmra.mxu0 %vm4045_vm0, %v20218_v57  ;;  %8561 = vmatprep.mubr.msk.f32.mxu1 %vm3422_vm2, %v20218_v57  ;;  %vm4024_vm0 = vcmp.eq.s32.totalorder %v16306_v0, %v20228_v4  ;;  %vm4023_vm2 = vcmp.eq.s32.totalorder %v16306_v0, %v20225_v21  ;;  %v20436_v0 = vld [vmem:[#allocation111_spill] sm:$0xff] }
 0x44b   :  { %8681 = vmatprep.mubr.msk.f32.mxu0 %vm4050_vm3, %v20218_v57  ;;  %vm4028_vm3 = vcmp.eq.s32.totalorder %v20431_v52, %v20228_v4 }
 0x44d   :  { %8562 = vmatmul.mubr.msk.f32.gmra.mxu1 %vm3421_vm12, %v20218_v57  ;;  %vm4027_vm12 = vcmp.eq.s32.totalorder %v20431_v52, %v20225_v21  ;;  %v20442_v52 = vld [vmem:[#allocation55_spill] sm:$0xff] }
 0x44e   :  { %8682 = vmatmul.mubr.msk.f32.gmra.mxu0 %vm4049_vm8, %v20218_v57  ;;  %11255 = vmatprep.mubr.msk.f32.mxu1 %vm11838_vm9, %v20227_v5  ;;  %vm4032_vm8 = vcmp.eq.s32.totalorder %v20436_v0, %v20228_v4 }
 0x44f   :  { %11326 = vmatprep.mubr.msk.f32.mxu0 %vm11838_vm9, %v20227_v5 }
 0x453   :  { %v3257_v34 = vpop.f32.mrf.mxu0 }
 0x455   :  { %v11186_v9 = vpop.f32.mrf.mxu0 }
 0x457   :  { %v3262_v42 = vpop.f32.mrf.mxu0 }
 0x459   :  { %v11189_v63 = vpop.f32.mrf.mxu0 }
 0x45b   :  { %v3267_v19 = vpop.f32.mrf.mxu0 }
 0x45d   :  { %v11192_v40 = vpop.f32.mrf.mxu0 }
 0x45f   :  { %v3272_v15 = vpop.f32.mrf.mxu0 }
 0x461   :  { %v11195_v8 = vpop.f32.mrf.mxu0 }
 0x463   :  { %v3277_v18 = vpop.f32.mrf.mxu0 }
 0x465   :  { %v11198_v60 = vpop.f32.mrf.mxu0 }
 0x467   :  { %v3282_v2 = vpop.f32.mrf.mxu0 }
 0x469   :  { %v11201_v51 = vpop.f32.mrf.mxu0 }
 0x46b   :  { %v3287_v59 = vpop.f32.mrf.mxu0 }
 0x46d   :  { %v11204_v26 = vpop.f32.mrf.mxu0 }
 0x46f   :  { %v16480_v32 = vpop.f32.mrf.mxu0 }
 0x470   :  { %20392 = vst [vmem:[#allocation21_spill] sm:$0xff] %v16480_v32 }
 0x471   :  { %v11207_v7 = vpop.f32.mrf.mxu0 }
 0x473   :  { %v16482_v53 = vpop.f32.mrf.mxu0 }
 0x474   :  { %20393 = vst [vmem:[#allocation28_spill] sm:$0xff] %v16482_v53 }
 0x475   :  { %v11210_v30 = vpop.f32.mrf.mxu0 }
 0x477   :  { %v16484_v58 = vpop.f32.mrf.mxu0 }
 0x478   :  { %20394 = vst [vmem:[#allocation42_spill] sm:$0xff] %v16484_v58 }
 0x479   :  { %v11213_v9 = vpop.f32.mrf.mxu0 }
 0x47b   :  { %v16486_v63 = vpop.f32.mrf.mxu0 }
 0x47c   :  { %20395 = vst [vmem:[#allocation39_spill] sm:$0xff] %v16486_v63 }
 0x47d   :  { %v11216_v40 = vpop.f32.mrf.mxu0 }
 0x47f   :  { %v16488_v23 = vpop.f32.mrf.mxu0 }
 0x480   :  { %20396 = vst [vmem:[#allocation44_spill] sm:$0xff] %v16488_v23 }
 0x481   :  { %v11219_v8 = vpop.f32.mrf.mxu0 }
 0x483   :  { %v16490_v60 = vpop.f32.mrf.mxu0 }
 0x484   :  { %20397 = vst [vmem:[#allocation41_spill] sm:$0xff] %v16490_v60 }
 0x485   :  { %v11222_v51 = vpop.f32.mrf.mxu0 }
 0x487   :  { %v3127_v62 = vpop.f32.mrf.mxu1 }
 0x488   :  { %v16492_v26 = vadd.f32 %v3257_v34, %v3127_v62  ;;  %v9958_v62 = vpop.f32.mrf.mxu0 }
 0x489   :  { %v11115_v32 = vpop.f32.mrf.mxu1 }
 0x48a   :  { %20398 = vst [vmem:[#allocation46_spill] sm:$0xff] %v16492_v26 }
 0x48d   :  { %v3132_v7 = vpop.f32.mrf.mxu1 }
 0x48e   :  { %v16494_v33 = vadd.f32 %v3262_v42, %v3132_v7  ;;  %v9959_v42 = vpop.f32.mrf.mxu0 }
 0x48f   :  { %v11118_v30 = vpop.f32.mrf.mxu1 }
 0x490   :  { %20399 = vst [vmem:[#allocation43_spill] sm:$0xff] %v16494_v33 }
 0x493   :  { %v3137_v53 = vpop.f32.mrf.mxu1 }
 0x494   :  { %v16496_v58 = vadd.f32 %v3267_v19, %v3137_v53  ;;  %v9961_v19 = vpop.f32.mrf.mxu0 }
 0x495   :  { %v11121_v9 = vpop.f32.mrf.mxu1 }
 0x496   :  { %20400 = vst [vmem:[#allocation48_spill] sm:$0xff] %v16496_v58 }
 0x499   :  { %v3142_v63 = vpop.f32.mrf.mxu1 }
 0x49a   :  { %v16498_v40 = vadd.f32 %v3272_v15, %v3142_v63  ;;  %v9962_v15 = vpop.f32.mrf.mxu0 }
 0x49b   :  { %v11124_v23 = vpop.f32.mrf.mxu1 }
 0x49c   :  { %20401 = vst [vmem:[#allocation45_spill] sm:$0xff] %v16498_v40  ;;  %v9964_v23 = vpop.f32.mrf.mxu0 }
 0x4a2   :  { %v3147_v8 = vpop.f32.mrf.mxu1 }
 0x4a3   :  { %v16500_v48 = vadd.f32 %v3277_v18, %v3147_v8  ;;  %v9965_v8 = vpop.f32.mrf.mxu0 }
 0x4a4   :  { %v11127_v51 = vpop.f32.mrf.mxu1 }
 0x4a5   :  { %20402 = vst [vmem:[#allocation50_spill] sm:$0xff] %v16500_v48 }
 0x4a8   :  { %v3152_v60 = vpop.f32.mrf.mxu1 }
 0x4a9   :  { %v16502_v34 = vadd.f32 %v3282_v2, %v3152_v60  ;;  %v9967_v60 = vpop.f32.mrf.mxu0 }
 0x4aa   :  { %v11130_v32 = vpop.f32.mrf.mxu1 }
 0x4ab   :  { %20403 = vst [vmem:[#allocation47_spill] sm:$0xff] %v16502_v34 }
 0x4ae   :  { %v3157_v7 = vpop.f32.mrf.mxu1 }
 0x4af   :  { %v16504_v30 = vadd.f32 %v3287_v59, %v3157_v7  ;;  %v9968_v59 = vpop.f32.mrf.mxu0 }
 0x4b0   :  { %v11133_v53 = vpop.f32.mrf.mxu1 }
 0x4b1   :  { %20404 = vst [vmem:[#allocation63_spill] sm:$0xff] %v16504_v30  ;;  %v9970_v30 = vpop.f32.mrf.mxu0 }
 0x4b3   :  { %v9971_v48 = vpop.f32.mrf.mxu0 }
 0x4b4   :  { %v16506_v9 = vpop.f32.mrf.mxu1 }
 0x4b5   :  { %20405 = vst [vmem:[#allocation67_spill] sm:$0xff] %v16506_v9  ;;  %v16518_v26 = vpop.f32.mrf.mxu0 }
 0x4b6   :  { %v11136_v63 = vpop.f32.mrf.mxu1 }
 0x4ba   :  { %v16508_v40 = vpop.f32.mrf.mxu1 }
 0x4bb   :  { %20406 = vst [vmem:[#allocation22_spill] sm:$0xff] %v16508_v40 }
 0x4bc   :  { %v11139_v18 = vpop.f32.mrf.mxu1 }
 0x4bd   :  { %v9960_v18 = vadd.f32 %v9959_v42, %v9958_v62  ;;  %v9966_v42 = vadd.f32 %v9965_v8, %v9964_v23  ;;  %v9969_v23 = vadd.f32 %v9968_v59, %v9967_v60  ;;  %v9972_v60 = vadd.f32 %v9971_v48, %v9970_v30 }
 0x4be   :  { %v16510_v51 = vpop.f32.mrf.mxu1 }
 0x4bf   :  { %20407 = vst [vmem:[#allocation18_spill] sm:$0xff] %v16510_v51 }
 0x4c0   :  { %v11142_v2 = vpop.f32.mrf.mxu1 }
 0x4c2   :  { %v16512_v32 = vpop.f32.mrf.mxu1 }
 0x4c3   :  { %20408 = vst [vmem:[#allocation73_spill] sm:$0xff] %v16512_v32  ;;  %v9974_v32 = vpop.f32.mrf.mxu0 }
 0x4c4   :  { %v11145_v34 = vpop.f32.mrf.mxu1  ;;  %v9975_v48 = vadd.f32 %v9974_v32, %v16518_v26  ;;  %v20411_v26 = vld [vmem:[#allocation19_spill] sm:$0xff] }
 0x4c6   :  { %v16514_v7 = vpop.f32.mrf.mxu1 }
 0x4c8   :  { %v11148_v53 = vpop.f32.mrf.mxu1 }
 0x4c9   :  { %v9963_v53 = vadd.f32 %v9962_v15, %v9961_v19 }
 0x4ca   :  { %v16516_v9 = vpop.f32.mrf.mxu1 }
 0x4cb   :  { %20409 = vst [vmem:[#allocation77_spill] sm:$0xff] %v16516_v9 }
 0x4cc   :  { %v11151_v63 = vpop.f32.mrf.mxu1 }
 0x4ce   :  { %v9887_v58 = vpop.f32.mrf.mxu1 }
 0x4d0   :  { %v9888_v40 = vpop.f32.mrf.mxu1 }
 0x4d1   :  { %v9889_v33 = vadd.f32 %v9888_v40, %v9887_v58  ;;  %v16526_v58 = vpop.f32.mrf.mxu0 }
 0x4d3   :  { %v3726_v2 = vadd.f32 %v9960_v18, %v9889_v33  ;;  %v9890_v51 = vpop.f32.mrf.mxu1 }
 0x4d5   :  { %11256 = vmatmul.mubr.f32.vlgmr.msra.gmra.mxu1 %v3726_v2  ;;  %v9891_v34 = vpop.f32.mrf.mxu1 }
 0x4d6   :  { %10098 = vmatpush3.msra.mxu1 %v20308_v27  ;;  %11258 = vmatprep.mubr.msk.f32.mxu1 %vm11838_vm9, %v20227_v5  ;;  %v9892_v9 = vadd.f32 %v9891_v34, %v9890_v51 }
 0x4d7   :  { %10099 = vmatprep.subr.mxu1 %v20309_v20 }
 0x4d8   :  { %10100 = vmatpush3.msra.mxu1 %v20310_v29  ;;  %v3731_v62 = vadd.f32 %v9963_v53, %v9892_v9  ;;  %v9977_v9 = vpop.f32.mrf.mxu0 }
 0x4d9   :  { %10101 = vmatprep.subr.mxu1 %v20312_v1  ;;  %v9893_v33 = vpop.f32.mrf.mxu1  ;;  %v9978_v32 = vadd.f32 %v9977_v9, %v16526_v58 }
 0x4da   :  { %10102 = vmatpush3.msra.mxu1 %v20313_v43  ;;  %v9979_v63 = vpop.f32.mrf.mxu0 }
 0x4db   :  { %11259 = vmatmul.mubr.f32.gmra.mxu1 %v3731_v62  ;;  %10103 = vmatprep.subr.mxu1 %v20315_v54  ;;  %v9894_v40 = vpop.f32.mrf.mxu1 }
 0x4dc   :  { %10104 = vmatpush3.msra.mxu1 %v20319_v10  ;;  %11261 = vmatprep.mubr.msk.f32.mxu1 %vm11838_vm9, %v20227_v5  ;;  %v9895_v19 = vadd.f32 %v9894_v40, %v9893_v33  ;;  %v9980_v34 = vpop.f32.mrf.mxu0 }
 0x4dd   :  { %10105 = vmatprep.subr.mxu1 %v20322_v17 }
 0x4de   :  { %10106 = vmatpush3.msra.mxu1 %v20323_v38  ;;  %v3736_v15 = vadd.f32 %v9966_v42, %v9895_v19  ;;  %v9982_v33 = vpop.f32.mrf.mxu0 }
 0x4df   :  { %10107 = vmatprep.subr.mxu1 %v20324_v37  ;;  %v9896_v51 = vpop.f32.mrf.mxu1 }
 0x4e0   :  { %10108 = vmatpush3.msra.mxu1 %v20325_v22  ;;  %v9983_v19 = vpop.f32.mrf.mxu0 }
 0x4e1   :  { %11262 = vmatmul.mubr.f32.gmra.mxu1 %v3736_v15  ;;  %10109 = vmatprep.subr.mxu1 %v20328_v16  ;;  %v9897_v18 = vpop.f32.mrf.mxu1  ;;  %v9984_v58 = vadd.f32 %v9983_v19, %v9982_v33 }
 0x4e2   :  { %11264 = vmatprep.mubr.msk.f32.mxu1 %vm11838_vm9, %v20227_v5  ;;  %10110 = vmatpush3.msra.mxu1 %v20329_v3  ;;  %v9898_v8 = vadd.f32 %v9897_v18, %v9896_v51  ;;  %v9985_v18 = vpop.f32.mrf.mxu0 }
 0x4e3   :  { %10111 = vmatprep.subr.mxu1 %v20330_v24 }
 0x4e4   :  { %10112 = vmatpush3.msra.mxu1 %v20331_v41  ;;  %v3741_v2 = vadd.f32 %v9969_v23, %v9898_v8  ;;  %v20410_v8 = vld [vmem:[#allocation112_spill] sm:$0xff] }
 0x4e5   :  { %10113 = vmatprep.subr.mxu1 %v20332_v50  ;;  %v9899_v53 = vpop.f32.mrf.mxu1 }
 0x4e6   :  { %10114 = vmatpush3.msra.mxu1 %v20333_v45 }
 0x4e7   :  { %11265 = vmatmul.mubr.f32.gmra.mxu1 %v3741_v2  ;;  %10115 = vmatprep.subr.mxu1 %v20334_v49  ;;  %v9900_v62 = vpop.f32.mrf.mxu1 }
 0x4e8   :  { %11267 = vmatprep.mubr.msk.f32.mxu1 %vm11838_vm9, %v20227_v5  ;;  %10116 = vmatpush3.msra.mxu1 %v20335_v14  ;;  %v9901_v59 = vadd.f32 %v9900_v62, %v9899_v53  ;;  %v9986_v62 = vpop.f32.mrf.mxu0 }
 0x4e9   :  { %10117 = vmatprep.subr.mxu1 %v20336_v36 }
 0x4ea   :  { %10118 = vmatpush3.msra.mxu1 %v20337_v46  ;;  %v3746_v40 = vadd.f32 %v9972_v60, %v9901_v59 }
 0x4eb   :  { %10119 = vmatprep.subr.mxu1 %v20338_v13  ;;  %v9902_v42 = vpop.f32.mrf.mxu1 }
 0x4ec   :  { %10120 = vmatpush3.msra.mxu1 %v20339_v61 }
 0x4ed   :  { %11268 = vmatmul.mubr.f32.gmra.mxu1 %v3746_v40  ;;  %10121 = vmatprep.subr.mxu1 %v20340_v39  ;;  %v9903_v15 = vpop.f32.mrf.mxu1  ;;  %v9988_v40 = vpop.f32.mrf.mxu0 }
 0x4ee   :  { %11270 = vmatprep.mubr.msk.f32.mxu1 %vm11838_vm9, %v20227_v5  ;;  %10122 = vmatpush3.msra.mxu1 %v20341_v28  ;;  %v9904_v30 = vadd.f32 %v9903_v15, %v9902_v42  ;;  %v9981_v15 = vadd.f32 %v9980_v34, %v9979_v63 }
 0x4ef   :  { %10123 = vmatprep.subr.mxu1 %v20342_v47 }
 0x4f0   :  { %10124 = vmatpush3.msra.mxu1 %v20343_v56  ;;  %v3751_v51 = vadd.f32 %v9975_v48, %v9904_v30 }
 0x4f1   :  { %10125 = vmatprep.subr.mxu1 %v20344_v25  ;;  %v9905_v23 = vpop.f32.mrf.mxu1 }
 0x4f2   :  { %10126 = vmatpush3.msra.mxu1 %v20345_v6 }
 0x4f3   :  { %11271 = vmatmul.mubr.f32.gmra.mxu1 %v3751_v51  ;;  %10127 = vmatprep.subr.mxu1 %v20410_v8  ;;  %v9906_v2 = vpop.f32.mrf.mxu1  ;;  %v9989_v51 = vpop.f32.mrf.mxu0 }
 0x4f4   :  { %11273 = vmatprep.mubr.msk.f32.mxu1 %vm11838_vm9, %v20227_v5  ;;  %10128 = vmatpush3.msra.mxu1 %v20411_v26  ;;  %v9907_v53 = vadd.f32 %v9906_v2, %v9905_v23 }
 0x4f5   :  { %10197 = vmatprep.subr.mxu1 %v20296_v12  ;;  %v9991_v23 = vpop.f32.mrf.mxu0 }
 0x4f6   :  { %v3756_v60 = vadd.f32 %v9978_v32, %v9907_v53 }
 0x4f7   :  { %v9908_v59 = vpop.f32.mrf.mxu1  ;;  %v9992_v6 = vpop.f32.mrf.mxu0 }
 0x4f8   :  { %11274 = vmatmul.mubr.f32.gmra.mxu1 %v3756_v60  ;;  %v9987_v60 = vadd.f32 %v9986_v62, %v9985_v18  ;;  %v9993_v18 = vadd.f32 %v9992_v6, %v9991_v23  ;;  %v20412_v6 = vld [vmem:[#allocation57_spill] sm:$0xff]  ;;  %v20413_v23 = vld [vmem:[#allocation60_spill] sm:$0xff] }
 0x4f9   :  { %v9909_v42 = vpop.f32.mrf.mxu1  ;;  %11276 = vmatprep.mubr.msk.f32.mxu1 %vm11838_vm9, %v20227_v5 }
 0x4fa   :  { %v9910_v48 = vadd.f32 %v9909_v42, %v9908_v59  ;;  %v9990_v42 = vadd.f32 %v9989_v51, %v9988_v40 }
 0x4fc   :  { %v3761_v30 = vadd.f32 %v9981_v15, %v9910_v48  ;;  %v9994_v48 = vpop.f32.mrf.mxu0 }
 0x4fd   :  { %v9911_v8 = vpop.f32.mrf.mxu1 }
 0x4fe   :  { %11277 = vmatmul.mubr.f32.gmra.mxu1 %v3761_v30  ;;  %v9995_v62 = vpop.f32.mrf.mxu0 }
 0x4ff   :  { %v9912_v26 = vpop.f32.mrf.mxu1  ;;  %11279 = vmatprep.mubr.msk.f32.mxu1 %vm11838_vm9, %v20227_v5  ;;  %v9996_v40 = vadd.f32 %v9995_v62, %v9994_v48  ;;  %v20426_v48 = vld [vmem:[#allocation15_spill] sm:$0xff]  ;;  %v20434_v62 = vld [vmem:[#allocation94_spill] sm:$0xff] }
 0x500   :  { %v9913_v9 = vadd.f32 %v9912_v26, %v9911_v8 }
 0x501   :  { %v9914_v2 = vpop.f32.mrf.mxu1 }
 0x502   :  { %v3766_v32 = vadd.f32 %v9984_v58, %v9913_v9 }
 0x503   :  { %v9915_v53 = vpop.f32.mrf.mxu1 }
 0x504   :  { %v9916_v12 = vadd.f32 %v9915_v53, %v9914_v2  ;;  %11280 = vmatmul.mubr.f32.gmra.mxu1 %v3766_v32  ;;  %v20414_v2 = vld [vmem:[#allocation64_spill] sm:$0xff]  ;;  %v20417_v53 = vld [vmem:[#allocation74_spill] sm:$0xff] }
 0x505   :  { %v9917_v63 = vpop.f32.mrf.mxu1  ;;  %11282 = vmatprep.mubr.msk.f32.mxu1 %vm11838_vm9, %v20227_v5  ;;  %v20416_v32 = vld [vmem:[#allocation16_spill] sm:$0xff] }
 0x506   :  { %v3771_v34 = vadd.f32 %v9987_v60, %v9916_v12  ;;  %v20418_v60 = vld [vmem:[#allocation68_spill] sm:$0xff] }
 0x507   :  { %v9918_v59 = vpop.f32.mrf.mxu1 }
 0x508   :  { %v9919_v15 = vadd.f32 %v9918_v59, %v9917_v63  ;;  %11283 = vmatmul.mubr.f32.gmra.mxu1 %v3771_v34  ;;  %v20420_v63 = vld [vmem:[#allocation71_spill] sm:$0xff]  ;;  %v20422_v59 = vld [vmem:[#allocation78_spill] sm:$0xff] }
 0x509   :  { %v9920_v33 = vpop.f32.mrf.mxu1  ;;  %11285 = vmatprep.mubr.msk.f32.mxu1 %vm11838_vm9, %v20227_v5  ;;  %v20421_v34 = vld [vmem:[#allocation75_spill] sm:$0xff] }
 0x50a   :  { %v3776_v19 = vadd.f32 %v9990_v42, %v9919_v15  ;;  %v20424_v42 = vld [vmem:[#allocation91_spill] sm:$0xff]  ;;  %v20425_v15 = vld [vmem:[#allocation82_spill] sm:$0xff] }
 0x50b   :  { %v9921_v8 = vpop.f32.mrf.mxu1 }
 0x50c   :  { %v9922_v26 = vadd.f32 %v9921_v8, %v9920_v33  ;;  %11286 = vmatmul.mubr.f32.gmra.mxu1 %v3776_v19  ;;  %v20428_v33 = vld [vmem:[#allocation10_spill] sm:$0xff]  ;;  %v20429_v19 = vld [vmem:[#allocation83_spill] sm:$0xff] }
 0x50d   :  { %v9923_v30 = vpop.f32.mrf.mxu1  ;;  %11288 = vmatprep.mubr.msk.f32.mxu1 %vm11838_vm9, %v20227_v5  ;;  %v20430_v8 = vld [vmem:[#allocation103_spill] sm:$0xff] }
 0x50e   :  { %v3781_v12 = vadd.f32 %v9993_v18, %v9922_v26  ;;  %v20432_v18 = vld [vmem:[#allocation5_spill] sm:$0xff]  ;;  %v20433_v26 = vld [vmem:[#allocation88_spill] sm:$0xff] }
 0x50f   :  { %v9924_v58 = vpop.f32.mrf.mxu1 }
 0x510   :  { %v9925_v51 = vadd.f32 %v9924_v58, %v9923_v30  ;;  %11289 = vmatmul.mubr.f32.gmra.mxu1 %v3781_v12  ;;  %v20435_v30 = vld [vmem:[#allocation87_spill] sm:$0xff]  ;;  %v20437_v12 = vld [vmem:[#allocation93_spill] sm:$0xff]  ;;  %v20438_v58 = vld [vmem:[#allocation86_spill] sm:$0xff] }
 0x511   :  { %11291 = vmatprep.mubr.msk.f32.mxu1 %vm11838_vm9, %v20227_v5 }
 0x512   :  { %v3786_v9 = vadd.f32 %v9996_v40, %v9925_v51  ;;  %v20439_v40 = vld [vmem:[#allocation53_spill] sm:$0xff]  ;;  %v20440_v51 = vld [vmem:[#allocation99_spill] sm:$0xff] }
 0x514   :  { %11292 = vmatmul.mubr.f32.gmra.mxu1 %v3786_v9  ;;  %v20441_v9 = vld [vmem:[#allocation84_spill] sm:$0xff] }
 0x515   :  { %8683 = vmatprep.mubr.msk.f32.mxu1 %vm4004_vm11, %v20218_v57  ;;  %vm4031_vm11 = vcmp.eq.s32.totalorder %v20436_v0, %v20225_v21  ;;  %v20445_v0 = vld [vmem:[#allocation34_spill] sm:$0xff] }
 0x518   :  { %8684 = vmatmul.mubr.msk.f32.vlgmr.msra.gmra.mxu1 %vm4003_vm4, %v20218_v57  ;;  %vm4036_vm4 = vcmp.eq.s32.totalorder %v20441_v9, %v20228_v4 }
 0x519   :  { %10198 = vmatpush3.msra.mxu1 %v20259_v55  ;;  %8685 = vmatprep.mubr.msk.f32.mxu1 %vm4008_vm1, %v20218_v57  ;;  %vm4035_vm1 = vcmp.eq.s32.totalorder %v20441_v9, %v20225_v21  ;;  %v20447_v9 = vld [vmem:[#allocation40_spill] sm:$0xff] }
 0x51a   :  { %10199 = vmatprep.subr.mxu1 %v20412_v6 }
 0x51b   :  { %10200 = vmatpush3.msra.mxu1 %v20413_v23 }
 0x51c   :  { %10201 = vmatprep.subr.mxu1 %v20414_v2  ;;  %8686 = vmatmul.mubr.msk.f32.gmra.mxu1 %vm4007_vm5, %v20218_v57  ;;  %vm4040_vm5 = vcmp.eq.s32.totalorder %v20445_v0, %v20228_v4 }
 0x51d   :  { %10202 = vmatpush3.msra.mxu1 %v20415_v44  ;;  %8687 = vmatprep.mubr.msk.f32.mxu1 %vm4012_vm7, %v20218_v57  ;;  %vm4039_vm7 = vcmp.eq.s32.totalorder %v20445_v0, %v20225_v21  ;;  %v20448_v0 = vld [vmem:[#allocation37_spill] sm:$0xff] }
 0x51e   :  { %10203 = vmatprep.subr.mxu1 %v20416_v32 }
 0x51f   :  { %10204 = vmatpush3.msra.mxu1 %v20417_v53 }
 0x520   :  { %10205 = vmatprep.subr.mxu1 %v20418_v60  ;;  %8688 = vmatmul.mubr.msk.f32.gmra.mxu1 %vm4011_vm14, %v20218_v57  ;;  %v20478_v60 = vld [vmem:[#allocation21_spill] sm:$0xff] }
 0x521   :  { %10206 = vmatpush3.msra.mxu1 %v20419_v35  ;;  %8689 = vmatprep.mubr.msk.f32.mxu1 %vm4016_vm6, %v20218_v57 }
 0x522   :  { %10207 = vmatprep.subr.mxu1 %v20420_v63 }
 0x523   :  { %10208 = vmatpush3.msra.mxu1 %v20421_v34 }
 0x524   :  { %10209 = vmatprep.subr.mxu1 %v20422_v59  ;;  %8690 = vmatmul.mubr.msk.f32.gmra.mxu1 %vm4015_vm10, %v20218_v57  ;;  %vm4048_vm10 = vcmp.eq.s32.totalorder %v20447_v9, %v20228_v4 }
 0x525   :  { %10210 = vmatpush3.msra.mxu1 %v20423_v31  ;;  %8691 = vmatprep.mubr.msk.f32.mxu1 %vm4020_vm13, %v20218_v57  ;;  %vm4047_vm13 = vcmp.eq.s32.totalorder %v20447_v9, %v20225_v21  ;;  %v8844_v9 = vld [vmem:[%s19231_s2 + $0x278] sm:$0xff] }
 0x526   :  { %10211 = vmatprep.subr.mxu1 %v20424_v42 }
 0x527   :  { %10212 = vmatpush3.msra.mxu1 %v20425_v15  ;;  %v20467_v15 = vld [vmem:[#allocation48_spill] sm:$0xff] }
 0x528   :  { %10213 = vmatprep.subr.mxu1 %v20426_v48  ;;  %8692 = vmatmul.mubr.msk.f32.gmra.mxu1 %vm4019_vm15, %v20218_v57  ;;  %vm4052_vm15 = vcmp.eq.s32.totalorder %v20448_v0, %v20228_v4 }
 0x529   :  { %10214 = vmatpush3.msra.mxu1 %v20427_v11  ;;  %8693 = vmatprep.mubr.msk.f32.mxu1 %vm4024_vm0, %v20218_v57  ;;  %vm4051_vm0 = vcmp.eq.s32.totalorder %v20448_v0, %v20225_v21  ;;  %v8843_v0 = vld [vmem:[%s19231_s2 + $0x270] sm:$0xff]  ;;  %v20465_v11 = vld [vmem:[#allocation43_spill] sm:$0xff] }
 0x52a   :  { %10215 = vmatprep.subr.mxu1 %v20428_v33 }
 0x52b   :  { %10216 = vmatpush3.msra.mxu1 %v20429_v19 }
 0x52c   :  { %10217 = vmatprep.subr.mxu1 %v20430_v8  ;;  %8694 = vmatmul.mubr.msk.f32.gmra.mxu1 %vm4023_vm2, %v20218_v57 }
 0x52d   :  { %10218 = vmatpush3.msra.mxu1 %v20432_v18  ;;  %8695 = vmatprep.mubr.msk.f32.mxu1 %vm4028_vm3, %v20218_v57 }
 0x52e   :  { %10219 = vmatprep.subr.mxu1 %v20433_v26 }
 0x52f   :  { %10220 = vmatpush3.msra.mxu1 %v20434_v62 }
 0x530   :  { %10221 = vmatprep.subr.mxu1 %v20435_v30  ;;  %8696 = vmatmul.mubr.msk.f32.gmra.mxu1 %vm4027_vm12, %v20218_v57  ;;  %v20444_v30 = vld [vmem:[#allocation109_spill] sm:$0xff] }
 0x531   :  { %10222 = vmatpush3.msra.mxu1 %v20437_v12  ;;  %8697 = vmatprep.mubr.msk.f32.mxu1 %vm4032_vm8, %v20218_v57  ;;  %v20443_v12 = vld [vmem:[#allocation98_spill] sm:$0xff] }
 0x532   :  { %10223 = vmatprep.subr.mxu1 %v20438_v58 }
 0x533   :  { %10224 = vmatpush3.msra.mxu1 %v20439_v40  ;;  %v8842_v40 = vld [vmem:[%s19231_s2 + $0x268] sm:$0xff] }
 0x534   :  { %10225 = vmatprep.subr.mxu1 %v20440_v51  ;;  %8698 = vmatmul.mubr.msk.f32.gmra.mxu1 %vm4031_vm11, %v20218_v57  ;;  %v20450_v51 = vld [vmem:[#allocation32_spill] sm:$0xff] }
 0x535   :  { %10226 = vmatpush3.msra.mxu1 %v20442_v52  ;;  %8699 = vmatprep.mubr.msk.f32.mxu1 %vm4036_vm4, %v20218_v57  ;;  %v16698_v52 = vpop.permute.xlu0 %4594 }
 0x536   :  { %10227 = vmatprep.subr.mxu1 %v20443_v12  ;;  %v20446_v12 = vld [vmem:[#allocation26_spill] sm:$0xff]  ;;  %vm4633_vm8 = vcmp.eq.s32.totalorder %v16698_v52, %v20450_v51 }
 0x537   :  { %10228 = vmatpush3.msra.mxu1 %v20444_v30  ;;  %vm4044_vm14 = vcmp.eq.s32.totalorder %v20446_v12, %v20228_v4  ;;  %vm4043_vm6 = vcmp.eq.s32.totalorder %v20446_v12, %v20225_v21  ;;  %v16687_v30 = vpop.permute.xlu1 %4591  ;;  %v20449_v12 = vld [vmem:[#allocation35_spill] sm:$0xff] }
 0x538   :  { %8700 = vmatmul.mubr.msk.f32.gmra.mxu1 %vm4035_vm1, %v20218_v57  ;;  %11365 = vmatprep.subr.mxu1 %v20227_v5  ;;  %vm4630_vm2 = vcmp.eq.s32.totalorder %v16687_v30, %v20449_v12  ;;  %vm4629_vm3 = vcmp.eq.s32.totalorder %v16687_v30, %v20450_v51  ;;  %vm4634_vm12 = vcmp.eq.s32.totalorder %v16698_v52, %v20449_v12 }
 0x539   :  { %8701 = vmatprep.mubr.msk.f32.mxu1 %vm4040_vm5, %v20218_v57  ;;  %v16729_v62 = vpop.permute.xlu0 %4600 }
 0x53a   :  { %20452 = vst [vmem:[#allocation80_spill] sm:$0xff] %v16729_v62  ;;  %vm4642_vm1 = vcmp.eq.s32.totalorder %v16729_v62, %v20449_v12  ;;  %vm4641_vm5 = vcmp.eq.s32.totalorder %v16729_v62, %v20450_v51  ;;  %v20475_v62 = vld [vmem:[#allocation63_spill] sm:$0xff] }
 0x53b   :  { %v16713_v58 = vpop.permute.xlu1 %4597 }
 0x53c   :  { %8702 = vmatmul.mubr.msk.f32.gmra.mxu1 %vm4039_vm7, %v20218_v57  ;;  %20451 = vst [vmem:[#allocation72_spill] sm:$0xff] %v16713_v58  ;;  %vm4638_vm11 = vcmp.eq.s32.totalorder %v16713_v58, %v20449_v12  ;;  %vm4637_vm4 = vcmp.eq.s32.totalorder %v16713_v58, %v20450_v51 }
 0x53d   :  { %8703 = vmatprep.mubr.msk.f32.mxu1 %vm4044_vm14, %v20218_v57  ;;  %v16761_v18 = vpop.permute.xlu0 %4606 }
 0x53e   :  { %20454 = vst [vmem:[#allocation70_spill] sm:$0xff] %v16761_v18 }
 0x53f   :  { %v16745_v26 = vpop.permute.xlu1 %4603 }
 0x540   :  { %8704 = vmatmul.mubr.msk.f32.gmra.mxu1 %vm4043_vm6, %v20218_v57  ;;  %20453 = vst [vmem:[#allocation6_spill] sm:$0xff] %v16745_v26  ;;  %vm4646_vm7 = vcmp.eq.s32.totalorder %v16745_v26, %v20449_v12  ;;  %vm4645_vm14 = vcmp.eq.s32.totalorder %v16745_v26, %v20450_v51  ;;  %vm4650_vm6 = vcmp.eq.s32.totalorder %v16761_v18, %v20449_v12  ;;  %v20469_v26 = vld [vmem:[#allocation45_spill] sm:$0xff] }
 0x541   :  { %8705 = vmatprep.mubr.msk.f32.mxu1 %vm4048_vm10, %v20218_v57  ;;  %vm4649_vm10 = vcmp.eq.s32.totalorder %v16761_v18, %v20450_v51  ;;  %v16793_v19 = vpop.permute.xlu0 %4612 }
 0x542   :  { %20456 = vst [vmem:[#allocation107_spill] sm:$0xff] %v16793_v19 }
 0x543   :  { %v16777_v8 = vpop.permute.xlu1 %4609 }
 0x544   :  { %8706 = vmatmul.mubr.msk.f32.gmra.mxu1 %vm4047_vm13, %v20218_v57  ;;  %20455 = vst [vmem:[#allocation20_spill] sm:$0xff] %v16777_v8  ;;  %vm4654_vm13 = vcmp.eq.s32.totalorder %v16777_v8, %v20449_v12 }
 0x545   :  { %8707 = vmatprep.mubr.msk.f32.mxu1 %vm4052_vm15, %v20218_v57  ;;  %vm4653_vm15 = vcmp.eq.s32.totalorder %v16777_v8, %v20450_v51 }
 0x547   :  { %v16809_v8 = vpop.permute.xlu1 %4615 }
 0x548   :  { %8708 = vmatmul.mubr.msk.f32.gmra.mxu1 %vm4051_vm0, %v20218_v57  ;;  %vm4658_vm0 = vcmp.eq.s32.totalorder %v16793_v19, %v20449_v12  ;;  %20457 = vst [vmem:[#allocation108_spill] sm:$0xff] %v16809_v8 }
 0x549   :  { %8777 = vmatprep.mubr.msk.f32.mxu1 %vm4630_vm2, %v20218_v57  ;;  %vm4657_vm2 = vcmp.eq.s32.totalorder %v16793_v19, %v20450_v51  ;;  %v20459_v19 = vld [vmem:[#allocation24_spill] sm:$0xff] }
 0x54c   :  { %8778 = vmatmul.mubr.msk.f32.vlgmr.msra.gmra.mxu1 %vm4629_vm3, %v20218_v57  ;;  %vm4662_vm3 = vcmp.eq.s32.totalorder %v16809_v8, %v20449_v12 }
 0x54d   :  { %11366 = vmatpush3.msra.mxu1 %v8844_v9  ;;  %8779 = vmatprep.mubr.msk.f32.mxu1 %vm4634_vm12, %v20218_v57  ;;  %v8841_v9 = vld [vmem:[%s19231_s2 + $0x260] sm:$0xff]  ;;  %vm4661_vm12 = vcmp.eq.s32.totalorder %v16809_v8, %v20450_v51 }
 0x54e   :  { %11367 = vmatprep.subr.mxu1 %v20227_v5 }
 0x54f   :  { %11368 = vmatpush3.msra.mxu1 %v8843_v0  ;;  %v8840_v0 = vld [vmem:[%s19231_s2 + $0x258] sm:$0xff] }
 0x550   :  { %11369 = vmatprep.subr.mxu1 %v20227_v5  ;;  %8780 = vmatmul.mubr.msk.f32.gmra.mxu1 %vm4633_vm8, %v20218_v57 }
 0x551   :  { %11370 = vmatpush3.msra.mxu1 %v8842_v40  ;;  %8781 = vmatprep.mubr.msk.f32.mxu1 %vm4638_vm11, %v20218_v57  ;;  %v8839_v40 = vld [vmem:[%s19231_s2 + $0x250] sm:$0xff] }
 0x552   :  { %11371 = vmatprep.subr.mxu1 %v20227_v5 }
 0x553   :  { %11372 = vmatpush3.msra.mxu1 %v8841_v9  ;;  %v8838_v9 = vld [vmem:[%s19231_s2 + $0x248] sm:$0xff] }
 0x554   :  { %11373 = vmatprep.subr.mxu1 %v20227_v5  ;;  %8782 = vmatmul.mubr.msk.f32.gmra.mxu1 %vm4637_vm4, %v20218_v57 }
 0x555   :  { %11374 = vmatpush3.msra.mxu1 %v8840_v0  ;;  %8783 = vmatprep.mubr.msk.f32.mxu1 %vm4642_vm1, %v20218_v57  ;;  %v8837_v0 = vld [vmem:[%s19231_s2 + $0x240] sm:$0xff] }
 0x556   :  { %11375 = vmatprep.subr.mxu1 %v20227_v5 }
 0x557   :  { %11376 = vmatpush3.msra.mxu1 %v8839_v40  ;;  %v8836_v40 = vld [vmem:[%s19231_s2 + $0x238] sm:$0xff] }
 0x558   :  { %11377 = vmatprep.subr.mxu1 %v20227_v5  ;;  %8784 = vmatmul.mubr.msk.f32.gmra.mxu1 %vm4641_vm5, %v20218_v57 }
 0x559   :  { %11378 = vmatpush3.msra.mxu1 %v8838_v9  ;;  %8785 = vmatprep.mubr.msk.f32.mxu1 %vm4646_vm7, %v20218_v57  ;;  %v8835_v9 = vld [vmem:[%s19231_s2 + $0x230] sm:$0xff] }
 0x55a   :  { %11379 = vmatprep.subr.mxu1 %v20227_v5 }
 0x55b   :  { %11380 = vmatpush3.msra.mxu1 %v8837_v0  ;;  %v8834_v0 = vld [vmem:[%s19231_s2 + $0x228] sm:$0xff] }
 0x55c   :  { %11381 = vmatprep.subr.mxu1 %v20227_v5  ;;  %8786 = vmatmul.mubr.msk.f32.gmra.mxu1 %vm4645_vm14, %v20218_v57 }
 0x55d   :  { %11382 = vmatpush3.msra.mxu1 %v8836_v40  ;;  %8787 = vmatprep.mubr.msk.f32.mxu1 %vm4650_vm6, %v20218_v57  ;;  %v8833_v40 = vld [vmem:[%s19231_s2 + $0x220] sm:$0xff] }
 0x55e   :  { %11383 = vmatprep.subr.mxu1 %v20227_v5 }
 0x55f   :  { %11384 = vmatpush3.msra.mxu1 %v8835_v9  ;;  %v8832_v9 = vld [vmem:[%s19231_s2 + $0x218] sm:$0xff] }
 0x560   :  { %11385 = vmatprep.subr.mxu1 %v20227_v5  ;;  %8788 = vmatmul.mubr.msk.f32.gmra.mxu1 %vm4649_vm10, %v20218_v57  ;;  %vm4632_vm10 = vcmp.eq.s32.totalorder %v16687_v30, %v20228_v4 }
 0x561   :  { %11386 = vmatpush3.msra.mxu1 %v8834_v0  ;;  %8789 = vmatprep.mubr.msk.f32.mxu1 %vm4654_vm13, %v20218_v57  ;;  %v8831_v0 = vld [vmem:[%s19231_s2 + $0x210] sm:$0xff]  ;;  %vm4631_vm13 = vcmp.eq.s32.totalorder %v16687_v30, %v20225_v21  ;;  %v20501_v30 = vld [vmem:[#allocation72_spill] sm:$0xff] }
 0x562   :  { %11387 = vmatprep.subr.mxu1 %v20227_v5 }
 0x563   :  { %11388 = vmatpush3.msra.mxu1 %v8833_v40  ;;  %v8830_v40 = vld [vmem:[%s19231_s2 + $0x208] sm:$0xff] }
 0x564   :  { %11389 = vmatprep.subr.mxu1 %v20227_v5  ;;  %8790 = vmatmul.mubr.msk.f32.gmra.mxu1 %vm4653_vm15, %v20218_v57  ;;  %vm4636_vm15 = vcmp.eq.s32.totalorder %v16698_v52, %v20228_v4 }
 0x565   :  { %11390 = vmatpush3.msra.mxu1 %v8832_v9  ;;  %8791 = vmatprep.mubr.msk.f32.mxu1 %vm4658_vm0, %v20218_v57  ;;  %v8829_v9 = vld [vmem:[%s19231_s2 + $0x200] sm:$0xff]  ;;  %vm4635_vm0 = vcmp.eq.s32.totalorder %v16698_v52, %v20225_v21 }
 0x566   :  { %11391 = vmatprep.subr.mxu1 %v20227_v5  ;;  %v20506_v52 = vld [vmem:[#allocation80_spill] sm:$0xff] }
 0x567   :  { %11392 = vmatpush3.msra.mxu1 %v8831_v0  ;;  %v16822_v0 = vpop.permute.xlu0 %4618 }
 0x568   :  { %11393 = vmatprep.subr.mxu1 %v20227_v5  ;;  %8792 = vmatmul.mubr.msk.f32.gmra.mxu1 %vm4657_vm2, %v20218_v57  ;;  %20458 = vst [vmem:[#allocation90_spill] sm:$0xff] %v16822_v0  ;;  %vm4666_vm8 = vcmp.eq.s32.totalorder %v16822_v0, %v20449_v12  ;;  %vm4665_vm11 = vcmp.eq.s32.totalorder %v16822_v0, %v20450_v51  ;;  %v20463_v0 = vld [vmem:[#allocation46_spill] sm:$0xff] }
 0x569   :  { %11394 = vmatpush3.msra.mxu1 %v8830_v40  ;;  %8793 = vmatprep.mubr.msk.f32.mxu1 %vm4662_vm3, %v20218_v57  ;;  %v16831_v40 = vpop.permute.xlu1 %4621  ;;  %vm4640_vm2 = vcmp.eq.s32.totalorder %v20501_v30, %v20228_v4  ;;  %vm4639_vm3 = vcmp.eq.s32.totalorder %v20501_v30, %v20225_v21  ;;  %v20524_v30 = vld [vmem:[#allocation94_spill] sm:$0xff] }
 0x56a   :  { %11395 = vmatprep.subr.mxu1 %v20227_v5  ;;  %20460 = vst [vmem:[#allocation89_spill] sm:$0xff] %v16831_v40  ;;  %vm4670_vm4 = vcmp.eq.s32.totalorder %v16831_v40, %v20449_v12  ;;  %vm4669_vm1 = vcmp.eq.s32.totalorder %v16831_v40, %v20450_v51 }
 0x56b   :  { %11396 = vmatpush3.msra.mxu1 %v8829_v9  ;;  %v16839_v9 = vpop.permute.xlu0 %4624 }
 0x56c   :  { %10439 = vmatprep.subr.mxu1 %v20459_v19  ;;  %8794 = vmatmul.mubr.msk.f32.gmra.mxu1 %vm4661_vm12, %v20218_v57  ;;  %20461 = vst [vmem:[#allocation4_spill] sm:$0xff] %v16839_v9  ;;  %vm4674_vm5 = vcmp.eq.s32.totalorder %v16839_v9, %v20449_v12  ;;  %vm4673_vm7 = vcmp.eq.s32.totalorder %v16839_v9, %v20450_v51 }
 0x56d   :  { %8795 = vmatprep.mubr.msk.f32.mxu1 %vm4666_vm8, %v20218_v57  ;;  %v16847_v19 = vpop.permute.xlu1 %4627  ;;  %vm4644_vm12 = vcmp.eq.s32.totalorder %v20506_v52, %v20228_v4  ;;  %vm4643_vm8 = vcmp.eq.s32.totalorder %v20506_v52, %v20225_v21  ;;  %v20525_v52 = vld [vmem:[#allocation87_spill] sm:$0xff] }
 0x56e   :  { %20462 = vst [vmem:[#allocation102_spill] sm:$0xff] %v16847_v19  ;;  %vm4678_vm14 = vcmp.eq.s32.totalorder %v16847_v19, %v20449_v12  ;;  %vm4677_vm6 = vcmp.eq.s32.totalorder %v16847_v19, %v20450_v51  ;;  %v10058_v19 = vpop.f32.mrf.mxu0 }
 0x570   :  { %8796 = vmatmul.mubr.msk.f32.gmra.mxu1 %vm4665_vm11, %v20218_v57  ;;  %v10059_v34 = vpop.f32.mrf.mxu0 }
 0x571   :  { %8797 = vmatprep.mubr.msk.f32.mxu1 %vm4670_vm4, %v20218_v57 }
 0x574   :  { %8798 = vmatmul.mubr.msk.f32.gmra.mxu1 %vm4669_vm1, %v20218_v57 }
 0x575   :  { %8799 = vmatprep.mubr.msk.f32.mxu1 %vm4674_vm5, %v20218_v57 }
 0x578   :  { %8800 = vmatmul.mubr.msk.f32.gmra.mxu1 %vm4673_vm7, %v20218_v57 }
 0x579   :  { %8801 = vmatprep.mubr.msk.f32.mxu1 %vm4678_vm14, %v20218_v57 }
 0x57c   :  { %8802 = vmatmul.mubr.msk.f32.gmra.mxu1 %vm4677_vm6, %v20218_v57 }
 0x57d   :  { %11397 = vmatprep.mubr.msk.f32.mxu1 %vm11838_vm9, %v20227_v5 }
 0x595   :  { %v3872_v40 = vpop.f32.mrf.mxu1 }
 0x596   :  { %v16861_v8 = vadd.f32 %v3872_v40, %v20463_v0  ;;  %v10061_v0 = vpop.f32.mrf.mxu0 }
 0x597   :  { %v11257_v9 = vpop.f32.mrf.mxu1 }
 0x598   :  { %20464 = vst [vmem:[#allocation62_spill] sm:$0xff] %v16861_v8  ;;  %v20471_v9 = vld [vmem:[#allocation50_spill] sm:$0xff] }
 0x59b   :  { %v3877_v33 = vpop.f32.mrf.mxu1 }
 0x59c   :  { %v16864_v18 = vadd.f32 %v3877_v33, %v20465_v11  ;;  %v10062_v33 = vpop.f32.mrf.mxu0 }
 0x59d   :  { %v11260_v12 = vpop.f32.mrf.mxu1 }
 0x59e   :  { %20466 = vst [vmem:[#allocation101_spill] sm:$0xff] %v16864_v18  ;;  %v20473_v18 = vld [vmem:[#allocation47_spill] sm:$0xff] }
 0x5a1   :  { %v3882_v48 = vpop.f32.mrf.mxu1 }
 0x5a2   :  { %v16867_v42 = vadd.f32 %v3882_v48, %v20467_v15  ;;  %v10064_v15 = vpop.f32.mrf.mxu0 }
 0x5a3   :  { %v11263_v51 = vpop.f32.mrf.mxu1 }
 0x5a4   :  { %20468 = vst [vmem:[#allocation59_spill] sm:$0xff] %v16867_v42  ;;  %v10065_v51 = vpop.f32.mrf.mxu0 }
 0x5a7   :  { %v3887_v31 = vpop.f32.mrf.mxu1 }
 0x5a8   :  { %v16870_v59 = vadd.f32 %v3887_v31, %v20469_v26 }
 0x5a9   :  { %v11266_v63 = vpop.f32.mrf.mxu1 }
 0x5aa   :  { %20470 = vst [vmem:[#allocation100_spill] sm:$0xff] %v16870_v59  ;;  %v16881_v63 = vpop.f32.mrf.mxu0  ;;  %v20477_v59 = vld [vmem:[#allocation67_spill] sm:$0xff] }
 0x5ad   :  { %v3892_v40 = vpop.f32.mrf.mxu1 }
 0x5ae   :  { %v16873_v8 = vadd.f32 %v3892_v40, %v20471_v9  ;;  %v3293_v40 = vadd.f32 %v20478_v60, %v20477_v59 }
 0x5af   :  { %v11269_v11 = vpop.f32.mrf.mxu1 }
 0x5b0   :  { %20472 = vst [vmem:[#allocation76_spill] sm:$0xff] %v16873_v8  ;;  %v10068_v8 = vpop.f32.mrf.mxu0 }
 0x5b3   :  { %v3897_v12 = vpop.f32.mrf.mxu1 }
 0x5b4   :  { %v16876_v35 = vadd.f32 %v3897_v12, %v20473_v18  ;;  %v20480_v18 = vld [vmem:[#allocation22_spill] sm:$0xff]  ;;  %v20481_v12 = vld [vmem:[#allocation28_spill] sm:$0xff] }
 0x5b5   :  { %v11272_v48 = vpop.f32.mrf.mxu1 }
 0x5b6   :  { %20474 = vst [vmem:[#allocation8_spill] sm:$0xff] %v16876_v35  ;;  %v3298_v35 = vadd.f32 %v20481_v12, %v20480_v18  ;;  %v16889_v48 = vpop.f32.mrf.mxu0 }
 0x5b8   :  { %v3902_v42 = vpop.f32.mrf.mxu1  ;;  %v16895_v58 = vpop.f32.mrf.mxu0 }
 0x5b9   :  { %v16879_v31 = vadd.f32 %v3902_v42, %v20475_v62  ;;  %v20483_v62 = vld [vmem:[#allocation18_spill] sm:$0xff] }
 0x5ba   :  { %v11275_v26 = vpop.f32.mrf.mxu1  ;;  %v16901_v2 = vpop.f32.mrf.mxu0 }
 0x5bb   :  { %20476 = vst [vmem:[#allocation81_spill] sm:$0xff] %v16879_v31  ;;  %v20484_v26 = vld [vmem:[#allocation42_spill] sm:$0xff] }
 0x5bc   :  { %v3303_v31 = vadd.f32 %v20484_v26, %v20483_v62 }
 0x5be   :  { %v3907_v9 = vpop.f32.mrf.mxu1 }
 0x5bf   :  { %v16885_v11 = vadd.f32 %v3907_v9, %v3293_v40  ;;  %v20486_v9 = vld [vmem:[#allocation73_spill] sm:$0xff] }
 0x5c0   :  { %v11278_v53 = vpop.f32.mrf.mxu1 }
 0x5c1   :  { %20479 = vst [vmem:[#allocation69_spill] sm:$0xff] %v16885_v11  ;;  %v20487_v53 = vld [vmem:[#allocation39_spill] sm:$0xff] }
 0x5c2   :  { %v3308_v11 = vadd.f32 %v20487_v53, %v20486_v9 }
 0x5c4   :  { %v3912_v32 = vpop.f32.mrf.mxu1 }
 0x5c5   :  { %v16891_v44 = vadd.f32 %v3912_v32, %v3298_v35  ;;  %v20489_v35 = vld [vmem:[#allocation44_spill] sm:$0xff] }
 0x5c6   :  { %v11281_v42 = vpop.f32.mrf.mxu1 }
 0x5c7   :  { %20482 = vst [vmem:[#allocation7_spill] sm:$0xff] %v16891_v44  ;;  %v3313_v42 = vadd.f32 %v20489_v35, %v16514_v7  ;;  %v16907_v44 = vpop.f32.mrf.mxu0  ;;  %v10060_v7 = vadd.f32 %v10059_v34, %v10058_v19  ;;  %v10066_v19 = vadd.f32 %v10065_v51, %v10064_v15  ;;  %v10069_v15 = vadd.f32 %v10068_v8, %v16881_v63 }
 0x5c8   :  { %v3917_v60 = vpop.f32.mrf.mxu1  ;;  %v10072_v8 = vadd.f32 %v16895_v58, %v16889_v48  ;;  %v10075_v58 = vadd.f32 %v16907_v44, %v16901_v2 }
 0x5c9   :  { %v16897_v59 = vadd.f32 %v3917_v60, %v3303_v31  ;;  %v20491_v60 = vld [vmem:[#allocation77_spill] sm:$0xff]  ;;  %v16913_v23 = vpop.f32.mrf.mxu0 }
 0x5ca   :  { %v11284_v40 = vpop.f32.mrf.mxu1 }
 0x5cb   :  { %20485 = vst [vmem:[#allocation85_spill] sm:$0xff] %v16897_v59  ;;  %v20492_v40 = vld [vmem:[#allocation41_spill] sm:$0xff] }
 0x5cc   :  { %v3922_v18 = vpop.f32.mrf.mxu1  ;;  %v3318_v59 = vadd.f32 %v20492_v40, %v20491_v60 }
 0x5cd   :  { %v16903_v12 = vadd.f32 %v3922_v18, %v3308_v11  ;;  %v16917_v18 = vpop.f32.mrf.mxu0 }
 0x5ce   :  { %v11287_v32 = vpop.f32.mrf.mxu1  ;;  %v10078_v2 = vadd.f32 %v16917_v18, %v16913_v23 }
 0x5cf   :  { %20488 = vst [vmem:[#allocation110_spill] sm:$0xff] %v16903_v12  ;;  %v16919_v6 = vpop.f32.mrf.mxu0 }
 0x5d0   :  { %v3927_v62 = vpop.f32.mrf.mxu1 }
 0x5d1   :  { %v16909_v26 = vadd.f32 %v3927_v62, %v3313_v42  ;;  %v16921_v60 = vpop.f32.mrf.mxu0 }
 0x5d2   :  { %v11290_v31 = vpop.f32.mrf.mxu1  ;;  %v10081_v23 = vadd.f32 %v16921_v60, %v16919_v6 }
 0x5d3   :  { %20490 = vst [vmem:[#allocation52_spill] sm:$0xff] %v16909_v26  ;;  %v10063_v26 = vadd.f32 %v10062_v33, %v10061_v0  ;;  %v16929_v0 = vpop.f32.mrf.mxu0 }
 0x5d4   :  { %v3932_v9 = vpop.f32.mrf.mxu1 }
 0x5d5   :  { %v16915_v53 = vadd.f32 %v3932_v9, %v3318_v59 }
 0x5d6   :  { %v11293_v11 = vpop.f32.mrf.mxu1 }
 0x5d8   :  { %v10129_v32 = vpop.f32.mrf.mxu1 }
 0x5da   :  { %v10130_v12 = vpop.f32.mrf.mxu1 }
 0x5db   :  { %v10131_v35 = vadd.f32 %v10130_v12, %v10129_v32 }
 0x5dc   :  { %v10132_v42 = vpop.f32.mrf.mxu1 }
 0x5dd   :  { %v4354_v62 = vadd.f32 %v10131_v35, %v10060_v7 }
 0x5de   :  { %v10133_v31 = vpop.f32.mrf.mxu1 }
 0x5df   :  { %v10134_v55 = vadd.f32 %v10133_v31, %v10132_v42  ;;  %11327 = vmatmul.mubr.f32.vlgmr.msra.gmra.mxu0 %v4354_v62 }
 0x5e0   :  { %10269 = vmatpush3.msra.mxu0 %v20308_v27  ;;  %v10135_v59 = vpop.f32.mrf.mxu1  ;;  %11329 = vmatprep.mubr.msk.f32.mxu0 %vm11838_vm9, %v20227_v5 }
 0x5e1   :  { %v4359_v40 = vadd.f32 %v10134_v55, %v10063_v26  ;;  %10270 = vmatprep.subr.mxu0 %v20309_v20  ;;  %v10083_v26 = vpop.f32.mrf.mxu0 }
 0x5e2   :  { %10271 = vmatpush3.msra.mxu0 %v20310_v29  ;;  %v10136_v34 = vpop.f32.mrf.mxu1 }
 0x5e3   :  { %v10137_v12 = vadd.f32 %v10136_v34, %v10135_v59  ;;  %10272 = vmatprep.subr.mxu0 %v20312_v1  ;;  %11330 = vmatmul.mubr.f32.gmra.mxu0 %v4359_v40  ;;  %v10085_v35 = vpop.f32.mrf.mxu0 }
 0x5e4   :  { %10273 = vmatpush3.msra.mxu0 %v20313_v43  ;;  %v10138_v33 = vpop.f32.mrf.mxu1  ;;  %11332 = vmatprep.mubr.msk.f32.mxu0 %vm11838_vm9, %v20227_v5 }
 0x5e5   :  { %v4364_v9 = vadd.f32 %v10137_v12, %v10066_v19  ;;  %10274 = vmatprep.subr.mxu0 %v20315_v54  ;;  %v10086_v59 = vpop.f32.mrf.mxu0 }
 0x5e6   :  { %10275 = vmatpush3.msra.mxu0 %v20319_v10  ;;  %v10139_v55 = vpop.f32.mrf.mxu1 }
 0x5e7   :  { %v10140_v51 = vadd.f32 %v10139_v55, %v10138_v33  ;;  %10276 = vmatprep.subr.mxu0 %v20322_v17  ;;  %11333 = vmatmul.mubr.f32.gmra.mxu0 %v4364_v9  ;;  %v10088_v12 = vpop.f32.mrf.mxu0 }
 0x5e8   :  { %10277 = vmatpush3.msra.mxu0 %v20323_v38  ;;  %v10141_v11 = vpop.f32.mrf.mxu1  ;;  %11335 = vmatprep.mubr.msk.f32.mxu0 %vm11838_vm9, %v20227_v5 }
 0x5e9   :  { %v4369_v32 = vadd.f32 %v10140_v51, %v10069_v15  ;;  %10278 = vmatprep.subr.mxu0 %v20324_v37  ;;  %v10089_v15 = vpop.f32.mrf.mxu0 }
 0x5ea   :  { %10279 = vmatpush3.msra.mxu0 %v20325_v22  ;;  %v10142_v7 = vpop.f32.mrf.mxu1 }
 0x5eb   :  { %v10143_v63 = vadd.f32 %v10142_v7, %v10141_v11  ;;  %10280 = vmatprep.subr.mxu0 %v20328_v16  ;;  %11336 = vmatmul.mubr.f32.gmra.mxu0 %v4369_v32  ;;  %v10084_v7 = vadd.f32 %v10083_v26, %v16929_v0  ;;  %v10091_v60 = vpop.f32.mrf.mxu0  ;;  %v20496_v0 = vld [vmem:[#allocation14_spill] sm:$0xff] }
 0x5ec   :  { %10281 = vmatpush3.msra.mxu0 %v20329_v3  ;;  %v10144_v42 = vpop.f32.mrf.mxu1  ;;  %11338 = vmatprep.mubr.msk.f32.mxu0 %vm11838_vm9, %v20227_v5 }
 0x5ed   :  { %v4374_v62 = vadd.f32 %v10143_v63, %v10072_v8  ;;  %10282 = vmatprep.subr.mxu0 %v20330_v24  ;;  %v20493_v8 = vld [vmem:[#allocation23_spill] sm:$0xff]  ;;  %v10092_v26 = vpop.f32.mrf.mxu0 }
 0x5ee   :  { %10283 = vmatpush3.msra.mxu0 %v20331_v41  ;;  %v10145_v31 = vpop.f32.mrf.mxu1 }
 0x5ef   :  { %v10146_v48 = vadd.f32 %v10145_v31, %v10144_v42  ;;  %10284 = vmatprep.subr.mxu0 %v20332_v50  ;;  %11339 = vmatmul.mubr.f32.gmra.mxu0 %v4374_v62  ;;  %v20494_v62 = vld [vmem:[#allocation112_spill] sm:$0xff]  ;;  %v20495_v31 = vld [vmem:[#allocation19_spill] sm:$0xff] }
 0x5f0   :  { %10285 = vmatpush3.msra.mxu0 %v20333_v45  ;;  %v10147_v40 = vpop.f32.mrf.mxu1  ;;  %11341 = vmatprep.mubr.msk.f32.mxu0 %vm11838_vm9, %v20227_v5 }
 0x5f1   :  { %v4379_v34 = vadd.f32 %v10146_v48, %v10075_v58  ;;  %10286 = vmatprep.subr.mxu0 %v20334_v49  ;;  %v10087_v48 = vadd.f32 %v10086_v59, %v10085_v35 }
 0x5f2   :  { %10287 = vmatpush3.msra.mxu0 %v20335_v14  ;;  %v10148_v19 = vpop.f32.mrf.mxu1 }
 0x5f3   :  { %v10149_v44 = vadd.f32 %v10148_v19, %v10147_v40  ;;  %10288 = vmatprep.subr.mxu0 %v20336_v36  ;;  %11342 = vmatmul.mubr.f32.gmra.mxu0 %v4379_v34 }
 0x5f4   :  { %10289 = vmatpush3.msra.mxu0 %v20337_v46  ;;  %v10150_v33 = vpop.f32.mrf.mxu1  ;;  %11344 = vmatprep.mubr.msk.f32.mxu0 %vm11838_vm9, %v20227_v5 }
 0x5f5   :  { %v4384_v9 = vadd.f32 %v10149_v44, %v10078_v2  ;;  %10290 = vmatprep.subr.mxu0 %v20338_v13  ;;  %v10090_v44 = vadd.f32 %v10089_v15, %v10088_v12 }
 0x5f6   :  { %10291 = vmatpush3.msra.mxu0 %v20339_v61  ;;  %v10151_v55 = vpop.f32.mrf.mxu1 }
 0x5f7   :  { %v10152_v18 = vadd.f32 %v10151_v55, %v10150_v33  ;;  %10292 = vmatprep.subr.mxu0 %v20340_v39  ;;  %11345 = vmatmul.mubr.f32.gmra.mxu0 %v4384_v9  ;;  %v10094_v9 = vpop.f32.mrf.mxu0 }
 0x5f8   :  { %10293 = vmatpush3.msra.mxu0 %v20341_v28  ;;  %v10153_v51 = vpop.f32.mrf.mxu1  ;;  %11347 = vmatprep.mubr.msk.f32.mxu0 %vm11838_vm9, %v20227_v5 }
 0x5f9   :  { %v4389_v11 = vadd.f32 %v10152_v18, %v10081_v23  ;;  %10294 = vmatprep.subr.mxu0 %v20342_v47  ;;  %v10093_v23 = vadd.f32 %v10092_v26, %v10091_v60  ;;  %v20497_v60 = vld [vmem:[#allocation104_spill] sm:$0xff]  ;;  %v20504_v26 = vld [vmem:[#allocation74_spill] sm:$0xff] }
 0x5fa   :  { %10295 = vmatpush3.msra.mxu0 %v20343_v56  ;;  %v10154_v32 = vpop.f32.mrf.mxu1 }
 0x5fb   :  { %v10155_v6 = vadd.f32 %v10154_v32, %v10153_v51  ;;  %10296 = vmatprep.subr.mxu0 %v20344_v25  ;;  %11348 = vmatmul.mubr.f32.gmra.mxu0 %v4389_v11  ;;  %v10095_v51 = vpop.f32.mrf.mxu0 }
 0x5fc   :  { %10297 = vmatpush3.msra.mxu0 %v20493_v8  ;;  %v10156_v63 = vpop.f32.mrf.mxu1  ;;  %11350 = vmatprep.mubr.msk.f32.mxu0 %vm11838_vm9, %v20227_v5  ;;  %v10096_v12 = vadd.f32 %v10095_v51, %v10094_v9  ;;  %v20511_v9 = vld [vmem:[#allocation6_spill] sm:$0xff] }
 0x5fd   :  { %v4394_v42 = vadd.f32 %v10155_v6, %v10084_v7  ;;  %10298 = vmatprep.subr.mxu0 %v20494_v62  ;;  %vm4648_vm11 = vcmp.eq.s32.totalorder %v20511_v9, %v20228_v4  ;;  %vm4647_vm4 = vcmp.eq.s32.totalorder %v20511_v9, %v20225_v21  ;;  %v20517_v51 = vld [vmem:[#allocation106_spill] sm:$0xff]  ;;  %v20526_v9 = vld [vmem:[#allocation107_spill] sm:$0xff] }
 0x5fe   :  { %10299 = vmatpush3.msra.mxu0 %v20495_v31  ;;  %v10157_v58 = vpop.f32.mrf.mxu1  ;;  %vm4660_vm6 = vcmp.eq.s32.totalorder %v20526_v9, %v20228_v4 }
 0x5ff   :  { %v10158_v40 = vadd.f32 %v10157_v58, %v10156_v63  ;;  %10368 = vmatprep.subr.mxu0 %v20496_v0  ;;  %11351 = vmatmul.mubr.f32.gmra.mxu0 %v4394_v42  ;;  %v20498_v63 = vld [vmem:[#allocation57_spill] sm:$0xff]  ;;  %v20499_v42 = vld [vmem:[#allocation60_spill] sm:$0xff] }
 0x600   :  { %v10159_v34 = vpop.f32.mrf.mxu1  ;;  %11353 = vmatprep.mubr.msk.f32.mxu0 %vm11838_vm9, %v20227_v5  ;;  %v20500_v58 = vld [vmem:[#allocation64_spill] sm:$0xff] }
 0x601   :  { %v4399_v19 = vadd.f32 %v10158_v40, %v10087_v48  ;;  %v20502_v48 = vld [vmem:[#allocation65_spill] sm:$0xff]  ;;  %v20503_v40 = vld [vmem:[#allocation16_spill] sm:$0xff] }
 0x602   :  { %v10160_v2 = vpop.f32.mrf.mxu1 }
 0x603   :  { %v10161_v33 = vadd.f32 %v10160_v2, %v10159_v34  ;;  %11354 = vmatmul.mubr.f32.gmra.mxu0 %v4399_v19  ;;  %v20505_v34 = vld [vmem:[#allocation68_spill] sm:$0xff]  ;;  %v20507_v19 = vld [vmem:[#allocation13_spill] sm:$0xff]  ;;  %v20508_v2 = vld [vmem:[#allocation71_spill] sm:$0xff] }
 0x604   :  { %v10162_v55 = vpop.f32.mrf.mxu1  ;;  %11356 = vmatprep.mubr.msk.f32.mxu0 %vm11838_vm9, %v20227_v5 }
 0x605   :  { %v4404_v35 = vadd.f32 %v10161_v33, %v10090_v44  ;;  %v20509_v44 = vld [vmem:[#allocation75_spill] sm:$0xff]  ;;  %v20510_v33 = vld [vmem:[#allocation78_spill] sm:$0xff] }
 0x606   :  { %v10163_v59 = vpop.f32.mrf.mxu1 }
 0x607   :  { %v10164_v18 = vadd.f32 %v10163_v59, %v10162_v55  ;;  %11357 = vmatmul.mubr.f32.gmra.mxu0 %v4404_v35  ;;  %v20512_v55 = vld [vmem:[#allocation79_spill] sm:$0xff]  ;;  %v20514_v59 = vld [vmem:[#allocation82_spill] sm:$0xff] }
 0x608   :  { %v10165_v11 = vpop.f32.mrf.mxu1  ;;  %11359 = vmatprep.mubr.msk.f32.mxu0 %vm11838_vm9, %v20227_v5  ;;  %v20513_v35 = vld [vmem:[#allocation91_spill] sm:$0xff] }
 0x609   :  { %v4409_v32 = vadd.f32 %v10164_v18, %v10093_v23  ;;  %v20515_v23 = vld [vmem:[#allocation15_spill] sm:$0xff]  ;;  %v20516_v18 = vld [vmem:[#allocation70_spill] sm:$0xff] }
 0x60a   :  { %v10166_v7 = vpop.f32.mrf.mxu1  ;;  %vm4652_vm1 = vcmp.eq.s32.totalorder %v20516_v18, %v20228_v4  ;;  %vm4651_vm5 = vcmp.eq.s32.totalorder %v20516_v18, %v20225_v21  ;;  %v20527_v18 = vld [vmem:[#allocation93_spill] sm:$0xff] }
 0x60b   :  { %v10167_v15 = vadd.f32 %v10166_v7, %v10165_v11  ;;  %11360 = vmatmul.mubr.f32.gmra.mxu0 %v4409_v32  ;;  %v20518_v11 = vld [vmem:[#allocation10_spill] sm:$0xff]  ;;  %v20519_v32 = vld [vmem:[#allocation83_spill] sm:$0xff] }
 0x60c   :  { %11362 = vmatprep.mubr.msk.f32.mxu0 %vm11838_vm9, %v20227_v5  ;;  %v20520_v7 = vld [vmem:[#allocation103_spill] sm:$0xff] }
 0x60d   :  { %v4414_v6 = vadd.f32 %v10167_v15, %v10096_v12  ;;  %v20521_v12 = vld [vmem:[#allocation20_spill] sm:$0xff]  ;;  %v20522_v15 = vld [vmem:[#allocation5_spill] sm:$0xff] }
 0x60e   :  { %vm4656_vm7 = vcmp.eq.s32.totalorder %v20521_v12, %v20228_v4  ;;  %vm4655_vm14 = vcmp.eq.s32.totalorder %v20521_v12, %v20225_v21  ;;  %v20531_v12 = vld [vmem:[#allocation108_spill] sm:$0xff] }
 0x60f   :  { %11363 = vmatmul.mubr.f32.gmra.mxu0 %v4414_v6  ;;  %v20523_v6 = vld [vmem:[#allocation88_spill] sm:$0xff] }
 0x610   :  { %8803 = vmatprep.mubr.msk.f32.mxu0 %vm4632_vm10, %v20218_v57  ;;  %vm4659_vm10 = vcmp.eq.s32.totalorder %v20526_v9, %v20225_v21  ;;  %v20535_v9 = vld [vmem:[#allocation90_spill] sm:$0xff] }
 0x613   :  { %8804 = vmatmul.mubr.msk.f32.vlgmr.msra.gmra.mxu0 %vm4631_vm13, %v20218_v57  ;;  %vm4664_vm13 = vcmp.eq.s32.totalorder %v20531_v12, %v20228_v4 }
 0x614   :  { %10369 = vmatpush3.msra.mxu0 %v20497_v60  ;;  %8805 = vmatprep.mubr.msk.f32.mxu0 %vm4636_vm15, %v20218_v57  ;;  %vm4663_vm15 = vcmp.eq.s32.totalorder %v20531_v12, %v20225_v21  ;;  %v20537_v12 = vld [vmem:[#allocation4_spill] sm:$0xff] }
 0x615   :  { %10370 = vmatprep.subr.mxu0 %v20498_v63 }
 0x616   :  { %10371 = vmatpush3.msra.mxu0 %v20499_v42 }
 0x617   :  { %10372 = vmatprep.subr.mxu0 %v20500_v58  ;;  %8806 = vmatmul.mubr.msk.f32.gmra.mxu0 %vm4635_vm0, %v20218_v57  ;;  %vm4668_vm0 = vcmp.eq.s32.totalorder %v20535_v9, %v20228_v4 }
 0x618   :  { %10373 = vmatpush3.msra.mxu0 %v20502_v48  ;;  %8807 = vmatprep.mubr.msk.f32.mxu0 %vm4640_vm2, %v20218_v57  ;;  %vm4667_vm2 = vcmp.eq.s32.totalorder %v20535_v9, %v20225_v21  ;;  %v20538_v9 = vld [vmem:[#allocation102_spill] sm:$0xff] }
 0x619   :  { %10374 = vmatprep.subr.mxu0 %v20503_v40 }
 0x61a   :  { %10375 = vmatpush3.msra.mxu0 %v20504_v26  ;;  %v20560_v26 = vld [vmem:[#allocation100_spill] sm:$0xff] }
 0x61b   :  { %10376 = vmatprep.subr.mxu0 %v20505_v34  ;;  %8808 = vmatmul.mubr.msk.f32.gmra.mxu0 %vm4639_vm3, %v20218_v57 }
 0x61c   :  { %10377 = vmatpush3.msra.mxu0 %v20507_v19  ;;  %8809 = vmatprep.mubr.msk.f32.mxu0 %vm4644_vm12, %v20218_v57 }
 0x61d   :  { %10378 = vmatprep.subr.mxu0 %v20508_v2 }
 0x61e   :  { %10379 = vmatpush3.msra.mxu0 %v20509_v44 }
 0x61f   :  { %10380 = vmatprep.subr.mxu0 %v20510_v33  ;;  %8810 = vmatmul.mubr.msk.f32.gmra.mxu0 %vm4643_vm8, %v20218_v57  ;;  %vm4676_vm8 = vcmp.eq.s32.totalorder %v20537_v12, %v20228_v4 }
 0x620   :  { %10381 = vmatpush3.msra.mxu0 %v20512_v55  ;;  %8811 = vmatprep.mubr.msk.f32.mxu0 %vm4648_vm11, %v20218_v57  ;;  %vm4675_vm11 = vcmp.eq.s32.totalorder %v20537_v12, %v20225_v21  ;;  %v8964_v12 = vld [vmem:[%s19231_s2 + $0x2f8] sm:$0xff] }
 0x621   :  { %10382 = vmatprep.subr.mxu0 %v20513_v35 }
 0x622   :  { %10383 = vmatpush3.msra.mxu0 %v20514_v59 }
 0x623   :  { %10384 = vmatprep.subr.mxu0 %v20515_v23  ;;  %8812 = vmatmul.mubr.msk.f32.gmra.mxu0 %vm4647_vm4, %v20218_v57  ;;  %vm4680_vm4 = vcmp.eq.s32.totalorder %v20538_v9, %v20228_v4 }
 0x624   :  { %10385 = vmatpush3.msra.mxu0 %v20517_v51  ;;  %8813 = vmatprep.mubr.msk.f32.mxu0 %vm4652_vm1, %v20218_v57  ;;  %vm4679_vm1 = vcmp.eq.s32.totalorder %v20538_v9, %v20225_v21  ;;  %v8963_v9 = vld [vmem:[%s19231_s2 + $0x2f0] sm:$0xff] }
 0x625   :  { %10386 = vmatprep.subr.mxu0 %v20518_v11 }
 0x626   :  { %10387 = vmatpush3.msra.mxu0 %v20519_v32 }
 0x627   :  { %10388 = vmatprep.subr.mxu0 %v20520_v7  ;;  %8814 = vmatmul.mubr.msk.f32.gmra.mxu0 %vm4651_vm5, %v20218_v57  ;;  %v20529_v7 = vld [vmem:[#allocation53_spill] sm:$0xff] }
 0x628   :  { %10389 = vmatpush3.msra.mxu0 %v20522_v15  ;;  %8815 = vmatprep.mubr.msk.f32.mxu0 %vm4656_vm7, %v20218_v57  ;;  %v20528_v15 = vld [vmem:[#allocation86_spill] sm:$0xff] }
 0x629   :  { %10390 = vmatprep.subr.mxu0 %v20523_v6  ;;  %v20534_v6 = vld [vmem:[#allocation109_spill] sm:$0xff] }
 0x62a   :  { %10391 = vmatpush3.msra.mxu0 %v20524_v30  ;;  %v20530_v30 = vld [vmem:[#allocation99_spill] sm:$0xff] }
 0x62b   :  { %10392 = vmatprep.subr.mxu0 %v20525_v52  ;;  %8816 = vmatmul.mubr.msk.f32.gmra.mxu0 %vm4655_vm14, %v20218_v57  ;;  %v20532_v52 = vld [vmem:[#allocation55_spill] sm:$0xff] }
 0x62c   :  { %10393 = vmatpush3.msra.mxu0 %v20527_v18  ;;  %8817 = vmatprep.mubr.msk.f32.mxu0 %vm4660_vm6, %v20218_v57  ;;  %v20533_v18 = vld [vmem:[#allocation98_spill] sm:$0xff] }
 0x62d   :  { %10394 = vmatprep.subr.mxu0 %v20528_v15 }
 0x62e   :  { %10395 = vmatpush3.msra.mxu0 %v20529_v7  ;;  %v8962_v7 = vld [vmem:[%s19231_s2 + $0x2e8] sm:$0xff] }
 0x62f   :  { %10396 = vmatprep.subr.mxu0 %v20530_v30  ;;  %8818 = vmatmul.mubr.msk.f32.gmra.mxu0 %vm4659_vm10, %v20218_v57  ;;  %v17111_v30 = vpop.permute.xlu1 %5222 }
 0x630   :  { %10397 = vmatpush3.msra.mxu0 %v20532_v52  ;;  %8819 = vmatprep.mubr.msk.f32.mxu0 %vm4664_vm13, %v20218_v57  ;;  %v20540_v52 = vld [vmem:[#allocation32_spill] sm:$0xff]  ;;  %20541 = vst [vmem:[#allocation49_spill] sm:$0xff] %v17111_v30 }
 0x631   :  { %10398 = vmatprep.subr.mxu0 %v20533_v18  ;;  %v20536_v18 = vld [vmem:[#allocation89_spill] sm:$0xff]  ;;  %vm5261_vm6 = vcmp.eq.s32.totalorder %v17111_v30, %v20540_v52 }
 0x632   :  { %10399 = vmatpush3.msra.mxu0 %v20534_v6  ;;  %vm4672_vm3 = vcmp.eq.s32.totalorder %v20536_v18, %v20228_v4  ;;  %vm4671_vm12 = vcmp.eq.s32.totalorder %v20536_v18, %v20225_v21  ;;  %v17098_v6 = vpop.permute.xlu0 %5219  ;;  %v20539_v18 = vld [vmem:[#allocation35_spill] sm:$0xff] }
 0x633   :  { %8820 = vmatmul.mubr.msk.f32.gmra.mxu0 %vm4663_vm15, %v20218_v57  ;;  %11436 = vmatprep.subr.mxu0 %v20227_v5  ;;  %vm5258_vm5 = vcmp.eq.s32.totalorder %v17098_v6, %v20539_v18  ;;  %vm5257_vm7 = vcmp.eq.s32.totalorder %v17098_v6, %v20540_v52  ;;  %vm5262_vm14 = vcmp.eq.s32.totalorder %v17111_v30, %v20539_v18  ;;  %v17140_v32 = vpop.permute.xlu1 %5228  ;;  %v20576_v30 = vld [vmem:[#allocation52_spill] sm:$0xff] }
 0x634   :  { %8821 = vmatprep.mubr.msk.f32.mxu0 %vm4668_vm0, %v20218_v57  ;;  %20543 = vst [vmem:[#allocation51_spill] sm:$0xff] %v17140_v32  ;;  %vm5270_vm15 = vcmp.eq.s32.totalorder %v17140_v32, %v20539_v18  ;;  %vm5269_vm0 = vcmp.eq.s32.totalorder %v17140_v32, %v20540_v52 }
 0x636   :  { %v17124_v15 = vpop.permute.xlu0 %5225 }
 0x637   :  { %8822 = vmatmul.mubr.msk.f32.gmra.mxu0 %vm4667_vm2, %v20218_v57  ;;  %20542 = vst [vmem:[#allocation56_spill] sm:$0xff] %v17124_v15  ;;  %vm5266_vm10 = vcmp.eq.s32.totalorder %v17124_v15, %v20539_v18  ;;  %vm5265_vm13 = vcmp.eq.s32.totalorder %v17124_v15, %v20540_v52  ;;  %v17172_v51 = vpop.permute.xlu1 %5234 }
 0x638   :  { %8823 = vmatprep.mubr.msk.f32.mxu0 %vm4672_vm3, %v20218_v57  ;;  %20545 = vst [vmem:[#allocation54_spill] sm:$0xff] %v17172_v51 }
 0x63a   :  { %v17156_v11 = vpop.permute.xlu0 %5231 }
 0x63b   :  { %8824 = vmatmul.mubr.msk.f32.gmra.mxu0 %vm4671_vm12, %v20218_v57  ;;  %20544 = vst [vmem:[#allocation58_spill] sm:$0xff] %v17156_v11  ;;  %vm5274_vm2 = vcmp.eq.s32.totalorder %v17156_v11, %v20539_v18  ;;  %vm5273_vm3 = vcmp.eq.s32.totalorder %v17156_v11, %v20540_v52  ;;  %vm5278_vm12 = vcmp.eq.s32.totalorder %v17172_v51, %v20539_v18  ;;  %v20556_v11 = vld [vmem:[#allocation101_spill] sm:$0xff] }
 0x63c   :  { %8825 = vmatprep.mubr.msk.f32.mxu0 %vm4676_vm8, %v20218_v57  ;;  %vm5277_vm8 = vcmp.eq.s32.totalorder %v17172_v51, %v20540_v52  ;;  %v17204_v51 = vpop.permute.xlu1 %5240 }
 0x63d   :  { %20547 = vst [vmem:[#allocation111_spill] sm:$0xff] %v17204_v51 }
 0x63e   :  { %v17188_v23 = vpop.permute.xlu0 %5237 }
 0x63f   :  { %8826 = vmatmul.mubr.msk.f32.gmra.mxu0 %vm4675_vm11, %v20218_v57  ;;  %20546 = vst [vmem:[#allocation11_spill] sm:$0xff] %v17188_v23  ;;  %vm5282_vm11 = vcmp.eq.s32.totalorder %v17188_v23, %v20539_v18 }
 0x640   :  { %8827 = vmatprep.mubr.msk.f32.mxu0 %vm4680_vm4, %v20218_v57  ;;  %vm5281_vm4 = vcmp.eq.s32.totalorder %v17188_v23, %v20540_v52 }
 0x642   :  { %v17220_v23 = vpop.permute.xlu0 %5243 }
 0x643   :  { %8828 = vmatmul.mubr.msk.f32.gmra.mxu0 %vm4679_vm1, %v20218_v57  ;;  %vm5286_vm1 = vcmp.eq.s32.totalorder %v17204_v51, %v20539_v18  ;;  %20548 = vst [vmem:[#allocation84_spill] sm:$0xff] %v17220_v23 }
 0x644   :  { %8897 = vmatprep.mubr.msk.f32.mxu0 %vm5258_vm5, %v20218_v57  ;;  %vm5285_vm5 = vcmp.eq.s32.totalorder %v17204_v51, %v20540_v52  ;;  %v20550_v51 = vld [vmem:[#allocation24_spill] sm:$0xff] }
 0x647   :  { %8898 = vmatmul.mubr.msk.f32.vlgmr.msra.gmra.mxu0 %vm5257_vm7, %v20218_v57  ;;  %vm5290_vm7 = vcmp.eq.s32.totalorder %v17220_v23, %v20539_v18 }
 0x648   :  { %11437 = vmatpush3.msra.mxu0 %v8964_v12  ;;  %8899 = vmatprep.mubr.msk.f32.mxu0 %vm5262_vm14, %v20218_v57  ;;  %v8961_v12 = vld [vmem:[%s19231_s2 + $0x2e0] sm:$0xff]  ;;  %vm5289_vm14 = vcmp.eq.s32.totalorder %v17220_v23, %v20540_v52  ;;  %v20554_v23 = vld [vmem:[#allocation62_spill] sm:$0xff] }
 0x649   :  { %11438 = vmatprep.subr.mxu0 %v20227_v5 }
 0x64a   :  { %11439 = vmatpush3.msra.mxu0 %v8963_v9  ;;  %v8960_v9 = vld [vmem:[%s19231_s2 + $0x2d8] sm:$0xff] }
 0x64b   :  { %11440 = vmatprep.subr.mxu0 %v20227_v5  ;;  %8900 = vmatmul.mubr.msk.f32.gmra.mxu0 %vm5261_vm6, %v20218_v57 }
 0x64c   :  { %11441 = vmatpush3.msra.mxu0 %v8962_v7  ;;  %8901 = vmatprep.mubr.msk.f32.mxu0 %vm5266_vm10, %v20218_v57  ;;  %v8959_v7 = vld [vmem:[%s19231_s2 + $0x2d0] sm:$0xff] }
 0x64d   :  { %11442 = vmatprep.subr.mxu0 %v20227_v5 }
 0x64e   :  { %11443 = vmatpush3.msra.mxu0 %v8961_v12  ;;  %v8958_v12 = vld [vmem:[%s19231_s2 + $0x2c8] sm:$0xff] }
 0x64f   :  { %11444 = vmatprep.subr.mxu0 %v20227_v5  ;;  %8902 = vmatmul.mubr.msk.f32.gmra.mxu0 %vm5265_vm13, %v20218_v57 }
 0x650   :  { %11445 = vmatpush3.msra.mxu0 %v8960_v9  ;;  %8903 = vmatprep.mubr.msk.f32.mxu0 %vm5270_vm15, %v20218_v57  ;;  %v8957_v9 = vld [vmem:[%s19231_s2 + $0x2c0] sm:$0xff] }
 0x651   :  { %11446 = vmatprep.subr.mxu0 %v20227_v5 }
 0x652   :  { %11447 = vmatpush3.msra.mxu0 %v8959_v7  ;;  %v8956_v7 = vld [vmem:[%s19231_s2 + $0x2b8] sm:$0xff] }
 0x653   :  { %11448 = vmatprep.subr.mxu0 %v20227_v5  ;;  %8904 = vmatmul.mubr.msk.f32.gmra.mxu0 %vm5269_vm0, %v20218_v57 }
 0x654   :  { %11449 = vmatpush3.msra.mxu0 %v8958_v12  ;;  %8905 = vmatprep.mubr.msk.f32.mxu0 %vm5274_vm2, %v20218_v57  ;;  %v8955_v12 = vld [vmem:[%s19231_s2 + $0x2b0] sm:$0xff] }
 0x655   :  { %11450 = vmatprep.subr.mxu0 %v20227_v5 }
 0x656   :  { %11451 = vmatpush3.msra.mxu0 %v8957_v9  ;;  %v8954_v9 = vld [vmem:[%s19231_s2 + $0x2a8] sm:$0xff] }
 0x657   :  { %11452 = vmatprep.subr.mxu0 %v20227_v5  ;;  %8906 = vmatmul.mubr.msk.f32.gmra.mxu0 %vm5273_vm3, %v20218_v57 }
 0x658   :  { %11453 = vmatpush3.msra.mxu0 %v8956_v7  ;;  %8907 = vmatprep.mubr.msk.f32.mxu0 %vm5278_vm12, %v20218_v57  ;;  %v8953_v7 = vld [vmem:[%s19231_s2 + $0x2a0] sm:$0xff] }
 0x659   :  { %11454 = vmatprep.subr.mxu0 %v20227_v5 }
 0x65a   :  { %11455 = vmatpush3.msra.mxu0 %v8955_v12  ;;  %v8952_v12 = vld [vmem:[%s19231_s2 + $0x298] sm:$0xff] }
 0x65b   :  { %11456 = vmatprep.subr.mxu0 %v20227_v5  ;;  %8908 = vmatmul.mubr.msk.f32.gmra.mxu0 %vm5277_vm8, %v20218_v57  ;;  %vm5260_vm8 = vcmp.eq.s32.totalorder %v17098_v6, %v20228_v4 }
 0x65c   :  { %11457 = vmatpush3.msra.mxu0 %v8954_v9  ;;  %8909 = vmatprep.mubr.msk.f32.mxu0 %vm5282_vm11, %v20218_v57  ;;  %v8951_v9 = vld [vmem:[%s19231_s2 + $0x290] sm:$0xff] }
 0x65d   :  { %11458 = vmatprep.subr.mxu0 %v20227_v5 }
 0x65e   :  { %11459 = vmatpush3.msra.mxu0 %v8953_v7  ;;  %v8950_v7 = vld [vmem:[%s19231_s2 + $0x288] sm:$0xff] }
 0x65f   :  { %11460 = vmatprep.subr.mxu0 %v20227_v5  ;;  %8910 = vmatmul.mubr.msk.f32.gmra.mxu0 %vm5281_vm4, %v20218_v57 }
 0x660   :  { %11461 = vmatpush3.msra.mxu0 %v8952_v12  ;;  %8911 = vmatprep.mubr.msk.f32.mxu0 %vm5286_vm1, %v20218_v57  ;;  %v8949_v12 = vld [vmem:[%s19231_s2 + $0x280] sm:$0xff] }
 0x661   :  { %11462 = vmatprep.subr.mxu0 %v20227_v5 }
 0x662   :  { %11463 = vmatpush3.msra.mxu0 %v8951_v9  ;;  %v17233_v9 = vpop.permute.xlu1 %5246 }
 0x663   :  { %11464 = vmatprep.subr.mxu0 %v20227_v5  ;;  %8912 = vmatmul.mubr.msk.f32.gmra.mxu0 %vm5285_vm5, %v20218_v57  ;;  %20549 = vst [vmem:[#allocation34_spill] sm:$0xff] %v17233_v9  ;;  %vm5294_vm6 = vcmp.eq.s32.totalorder %v17233_v9, %v20539_v18  ;;  %vm5293_vm10 = vcmp.eq.s32.totalorder %v17233_v9, %v20540_v52 }
 0x664   :  { %11465 = vmatpush3.msra.mxu0 %v8950_v7  ;;  %8913 = vmatprep.mubr.msk.f32.mxu0 %vm5290_vm7, %v20218_v57  ;;  %v17242_v7 = vpop.permute.xlu0 %5249 }
 0x665   :  { %11466 = vmatprep.subr.mxu0 %v20227_v5  ;;  %20551 = vst [vmem:[#allocation26_spill] sm:$0xff] %v17242_v7  ;;  %vm5298_vm13 = vcmp.eq.s32.totalorder %v17242_v7, %v20539_v18  ;;  %vm5297_vm15 = vcmp.eq.s32.totalorder %v17242_v7, %v20540_v52  ;;  %v10229_v7 = vpop.f32.mrf.mxu1 }
 0x666   :  { %11467 = vmatpush3.msra.mxu0 %v8949_v12  ;;  %v17250_v12 = vpop.permute.xlu1 %5252 }
 0x667   :  { %10610 = vmatprep.subr.mxu0 %v20550_v51  ;;  %8914 = vmatmul.mubr.msk.f32.gmra.mxu0 %vm5289_vm14, %v20218_v57  ;;  %20552 = vst [vmem:[#allocation40_spill] sm:$0xff] %v17250_v12  ;;  %vm5302_vm0 = vcmp.eq.s32.totalorder %v17250_v12, %v20539_v18  ;;  %vm5301_vm2 = vcmp.eq.s32.totalorder %v17250_v12, %v20540_v52  ;;  %v10230_v35 = vpop.f32.mrf.mxu1 }
 0x668   :  { %8915 = vmatprep.mubr.msk.f32.mxu0 %vm5294_vm6, %v20218_v57  ;;  %v17258_v51 = vpop.permute.xlu0 %5255 }
 0x669   :  { %20553 = vst [vmem:[#allocation37_spill] sm:$0xff] %v17258_v51  ;;  %vm5306_vm3 = vcmp.eq.s32.totalorder %v17258_v51, %v20539_v18  ;;  %vm5305_vm12 = vcmp.eq.s32.totalorder %v17258_v51, %v20540_v52  ;;  %v10232_v44 = vpop.f32.mrf.mxu1  ;;  %v20558_v52 = vld [vmem:[#allocation59_spill] sm:$0xff] }
 0x66b   :  { %8916 = vmatmul.mubr.msk.f32.gmra.mxu0 %vm5293_vm10, %v20218_v57  ;;  %v10233_v32 = vpop.f32.mrf.mxu1 }
 0x66c   :  { %8917 = vmatprep.mubr.msk.f32.mxu0 %vm5298_vm13, %v20218_v57 }
 0x66f   :  { %8918 = vmatmul.mubr.msk.f32.gmra.mxu0 %vm5297_vm15, %v20218_v57 }
 0x670   :  { %8919 = vmatprep.mubr.msk.f32.mxu0 %vm5302_vm0, %v20218_v57 }
 0x673   :  { %8920 = vmatmul.mubr.msk.f32.gmra.mxu0 %vm5301_vm2, %v20218_v57 }
 0x674   :  { %8921 = vmatprep.mubr.msk.f32.mxu0 %vm5306_vm3, %v20218_v57 }
 0x677   :  { %8922 = vmatmul.mubr.msk.f32.gmra.mxu0 %vm5305_vm12, %v20218_v57 }
 0x678   :  { %11468 = vmatprep.mubr.msk.f32.mxu0 %vm11838_vm9, %v20227_v5 }
 0x69f   :  { %v4500_v9 = vpop.f32.mrf.mxu0 }
 0x6a0   :  { %v17272_v59 = vadd.f32 %v4500_v9, %v20554_v23  ;;  %v10235_v9 = vpop.f32.mrf.mxu1 }
 0x6a1   :  { %v11328_v12 = vpop.f32.mrf.mxu0 }
 0x6a2   :  { %20555 = vst [vmem:[#allocation46_spill] sm:$0xff] %v17272_v59  ;;  %v20562_v59 = vld [vmem:[#allocation76_spill] sm:$0xff] }
 0x6a3   :  { %v4505_v55 = vpop.f32.mrf.mxu0 }
 0x6a4   :  { %v17275_v18 = vadd.f32 %v4505_v55, %v20556_v11  ;;  %v10236_v11 = vpop.f32.mrf.mxu1 }
 0x6a5   :  { %v11331_v33 = vpop.f32.mrf.mxu0 }
 0x6a6   :  { %20557 = vst [vmem:[#allocation43_spill] sm:$0xff] %v17275_v18  ;;  %v20564_v18 = vld [vmem:[#allocation8_spill] sm:$0xff] }
 0x6a7   :  { %v4510_v2 = vpop.f32.mrf.mxu0 }
 0x6a8   :  { %v17278_v51 = vadd.f32 %v4510_v2, %v20558_v52  ;;  %v10238_v52 = vpop.f32.mrf.mxu1 }
 0x6a9   :  { %v11334_v19 = vpop.f32.mrf.mxu0 }
 0x6aa   :  { %20559 = vst [vmem:[#allocation48_spill] sm:$0xff] %v17278_v51  ;;  %v20566_v51 = vld [vmem:[#allocation81_spill] sm:$0xff] }
 0x6ab   :  { %v4515_v34 = vpop.f32.mrf.mxu0 }
 0x6ac   :  { %v17281_v40 = vadd.f32 %v4515_v34, %v20560_v26  ;;  %v10239_v34 = vpop.f32.mrf.mxu1 }
 0x6ad   :  { %v11337_v23 = vpop.f32.mrf.mxu0 }
 0x6ae   :  { %20561 = vst [vmem:[#allocation45_spill] sm:$0xff] %v17281_v40  ;;  %v20568_v40 = vld [vmem:[#allocation69_spill] sm:$0xff] }
 0x6af   :  { %v4520_v12 = vpop.f32.mrf.mxu0 }
 0x6b0   :  { %v17284_v48 = vadd.f32 %v4520_v12, %v20562_v59  ;;  %v17295_v12 = vpop.f32.mrf.mxu1 }
 0x6b1   :  { %v11340_v55 = vpop.f32.mrf.mxu0 }
 0x6b2   :  { %20563 = vst [vmem:[#allocation50_spill] sm:$0xff] %v17284_v48  ;;  %v20570_v48 = vld [vmem:[#allocation7_spill] sm:$0xff] }
 0x6b3   :  { %v4525_v33 = vpop.f32.mrf.mxu0 }
 0x6b4   :  { %v17287_v15 = vadd.f32 %v4525_v33, %v20564_v18  ;;  %v10242_v33 = vpop.f32.mrf.mxu1 }
 0x6b5   :  { %v11343_v2 = vpop.f32.mrf.mxu0 }
 0x6b6   :  { %20565 = vst [vmem:[#allocation47_spill] sm:$0xff] %v17287_v15  ;;  %v20572_v15 = vld [vmem:[#allocation85_spill] sm:$0xff] }
 0x6b7   :  { %v4530_v19 = vpop.f32.mrf.mxu0 }
 0x6b8   :  { %v17290_v58 = vadd.f32 %v4530_v19, %v20566_v51  ;;  %v17303_v19 = vpop.f32.mrf.mxu1 }
 0x6b9   :  { %v11346_v26 = vpop.f32.mrf.mxu0 }
 0x6ba   :  { %20567 = vst [vmem:[#allocation63_spill] sm:$0xff] %v17290_v58  ;;  %v20574_v58 = vld [vmem:[#allocation110_spill] sm:$0xff] }
 0x6bb   :  { %v4535_v23 = vpop.f32.mrf.mxu0 }
 0x6bc   :  { %v17293_v42 = vadd.f32 %v4535_v23, %v20568_v40 }
 0x6bd   :  { %v11349_v59 = vpop.f32.mrf.mxu0 }
 0x6be   :  { %20569 = vst [vmem:[#allocation67_spill] sm:$0xff] %v17293_v42  ;;  %v17308_v59 = vpop.f32.mrf.mxu1 }
 0x6bf   :  { %v4540_v55 = vpop.f32.mrf.mxu0 }
 0x6c0   :  { %v17298_v63 = vadd.f32 %v4540_v55, %v20570_v48 }
 0x6c1   :  { %v11352_v18 = vpop.f32.mrf.mxu0 }
 0x6c2   :  { %20571 = vst [vmem:[#allocation21_spill] sm:$0xff] %v17298_v63  ;;  %v17313_v18 = vpop.f32.mrf.mxu1 }
 0x6c3   :  { %v4545_v2 = vpop.f32.mrf.mxu0 }
 0x6c4   :  { %v17301_v60 = vadd.f32 %v4545_v2, %v20572_v15 }
 0x6c5   :  { %v11355_v51 = vpop.f32.mrf.mxu0 }
 0x6c6   :  { %20573 = vst [vmem:[#allocation22_spill] sm:$0xff] %v17301_v60  ;;  %v17318_v51 = vpop.f32.mrf.mxu1 }
 0x6c7   :  { %v4550_v26 = vpop.f32.mrf.mxu0 }
 0x6c8   :  { %v17306_v40 = vadd.f32 %v4550_v26, %v20574_v58  ;;  %v10231_v26 = vadd.f32 %v10230_v35, %v10229_v7  ;;  %v10237_v35 = vadd.f32 %v10236_v11, %v10235_v9 }
 0x6c9   :  { %v11358_v23 = vpop.f32.mrf.mxu0 }
 0x6ca   :  { %20575 = vst [vmem:[#allocation28_spill] sm:$0xff] %v17306_v40  ;;  %v17320_v40 = vpop.f32.mrf.mxu1 }
 0x6cb   :  { %v4555_v42 = vpop.f32.mrf.mxu0 }
 0x6cc   :  { %v17311_v48 = vadd.f32 %v4555_v42, %v20576_v30  ;;  %v10234_v30 = vadd.f32 %v10233_v32, %v10232_v44 }
 0x6cd   :  { %v11361_v55 = vpop.f32.mrf.mxu0 }
 0x6ce   :  { %20577 = vst [vmem:[#allocation18_spill] sm:$0xff] %v17311_v48  ;;  %v17322_v48 = vpop.f32.mrf.mxu1 }
 0x6cf   :  { %v4560_v63 = vpop.f32.mrf.mxu0 }
 0x6d0   :  { %v17316_v15 = vadd.f32 %v4560_v63, %v16915_v53 }
 0x6d1   :  { %v11364_v2 = vpop.f32.mrf.mxu0 }
 0x6d2   :  { %v10240_v2 = vadd.f32 %v10239_v34, %v10238_v52 }
 0x6d3   :  { %v10300_v60 = vpop.f32.mrf.mxu0 }
 0x6d5   :  { %v10301_v58 = vpop.f32.mrf.mxu0 }
 0x6d6   :  { %v10302_v23 = vadd.f32 %v10301_v58, %v10300_v60 }
 0x6d7   :  { %v10303_v21 = vpop.f32.mrf.mxu0 }
 0x6d8   :  { %v4982_v57 = vadd.f32 %v10302_v23, %v10231_v26 }
 0x6d9   :  { %v10304_v42 = vpop.f32.mrf.mxu0 }
 0x6da   :  { %v10305_v55 = vadd.f32 %v10304_v42, %v10303_v21  ;;  %11398 = vmatmul.mubr.f32.vlgmr.msra.gmra.mxu1 %v4982_v57  ;;  %v17330_v57 = vpop.f32.mrf.mxu1  ;;  %v10243_v42 = vadd.f32 %v10242_v33, %v17295_v12  ;;  %v10246_v12 = vadd.f32 %v17308_v59, %v17303_v19  ;;  %v10249_v19 = vadd.f32 %v17318_v51, %v17313_v18 }
 0x6db   :  { %10440 = vmatpush3.msra.mxu1 %v20308_v27  ;;  %v10306_v53 = vpop.f32.mrf.mxu0  ;;  %11400 = vmatprep.mubr.msk.f32.mxu1 %vm11838_vm9, %v20227_v5  ;;  %v10252_v18 = vadd.f32 %v17322_v48, %v17320_v40 }
 0x6dc   :  { %v4987_v63 = vadd.f32 %v10305_v55, %v10234_v30  ;;  %10441 = vmatprep.subr.mxu1 %v20309_v20  ;;  %v10254_v11 = vpop.f32.mrf.mxu1 }
 0x6dd   :  { %10442 = vmatpush3.msra.mxu1 %v20310_v29  ;;  %v10307_v60 = vpop.f32.mrf.mxu0 }
 0x6de   :  { %v10308_v7 = vadd.f32 %v10307_v60, %v10306_v53  ;;  %10443 = vmatprep.subr.mxu1 %v20312_v1  ;;  %11401 = vmatmul.mubr.f32.gmra.mxu1 %v4987_v63  ;;  %v10256_v34 = vpop.f32.mrf.mxu1 }
 0x6df   :  { %10444 = vmatpush3.msra.mxu1 %v20313_v43  ;;  %v10309_v21 = vpop.f32.mrf.mxu0  ;;  %11403 = vmatprep.mubr.msk.f32.mxu1 %vm11838_vm9, %v20227_v5 }
 0x6e0   :  { %v4992_v44 = vadd.f32 %v10308_v7, %v10237_v35  ;;  %10445 = vmatprep.subr.mxu1 %v20315_v54  ;;  %v10257_v63 = vpop.f32.mrf.mxu1 }
 0x6e1   :  { %10446 = vmatpush3.msra.mxu1 %v20319_v10  ;;  %v10310_v32 = vpop.f32.mrf.mxu0 }
 0x6e2   :  { %v10311_v9 = vadd.f32 %v10310_v32, %v10309_v21  ;;  %10447 = vmatprep.subr.mxu1 %v20322_v17  ;;  %11404 = vmatmul.mubr.f32.gmra.mxu1 %v4992_v44  ;;  %v10259_v21 = vpop.f32.mrf.mxu1 }
 0x6e3   :  { %10448 = vmatpush3.msra.mxu1 %v20323_v38  ;;  %v10312_v58 = vpop.f32.mrf.mxu0  ;;  %11406 = vmatprep.mubr.msk.f32.mxu1 %vm11838_vm9, %v20227_v5 }
 0x6e4   :  { %v4997_v26 = vadd.f32 %v10311_v9, %v10240_v2  ;;  %10449 = vmatprep.subr.mxu1 %v20324_v37  ;;  %v10260_v9 = vpop.f32.mrf.mxu1 }
 0x6e5   :  { %10450 = vmatpush3.msra.mxu1 %v20325_v22  ;;  %v10313_v23 = vpop.f32.mrf.mxu0 }
 0x6e6   :  { %v10314_v52 = vadd.f32 %v10313_v23, %v10312_v58  ;;  %10451 = vmatprep.subr.mxu1 %v20328_v16  ;;  %11407 = vmatmul.mubr.f32.gmra.mxu1 %v4997_v26  ;;  %v10262_v48 = vpop.f32.mrf.mxu1 }
 0x6e7   :  { %10452 = vmatpush3.msra.mxu1 %v20329_v3  ;;  %v10315_v30 = vpop.f32.mrf.mxu0  ;;  %11409 = vmatprep.mubr.msk.f32.mxu1 %vm11838_vm9, %v20227_v5 }
 0x6e8   :  { %v5002_v55 = vadd.f32 %v10314_v52, %v10243_v42  ;;  %10453 = vmatprep.subr.mxu1 %v20330_v24  ;;  %v10255_v42 = vadd.f32 %v10254_v11, %v17330_v57  ;;  %v10263_v57 = vpop.f32.mrf.mxu1 }
 0x6e9   :  { %10454 = vmatpush3.msra.mxu1 %v20331_v41  ;;  %v10316_v53 = vpop.f32.mrf.mxu0 }
 0x6ea   :  { %v10317_v33 = vadd.f32 %v10316_v53, %v10315_v30  ;;  %10455 = vmatprep.subr.mxu1 %v20332_v50  ;;  %11410 = vmatmul.mubr.f32.gmra.mxu1 %v5002_v55  ;;  %v10258_v53 = vadd.f32 %v10257_v63, %v10256_v34 }
 0x6eb   :  { %10456 = vmatpush3.msra.mxu1 %v20333_v45  ;;  %v10318_v60 = vpop.f32.mrf.mxu0  ;;  %11412 = vmatprep.mubr.msk.f32.mxu1 %vm11838_vm9, %v20227_v5 }
 0x6ec   :  { %v5007_v35 = vadd.f32 %v10317_v33, %v10246_v12  ;;  %10457 = vmatprep.subr.mxu1 %v20334_v49 }
 0x6ed   :  { %10458 = vmatpush3.msra.mxu1 %v20335_v14  ;;  %v10319_v7 = vpop.f32.mrf.mxu0 }
 0x6ee   :  { %v10320_v59 = vadd.f32 %v10319_v7, %v10318_v60  ;;  %10459 = vmatprep.subr.mxu1 %v20336_v36  ;;  %11413 = vmatmul.mubr.f32.gmra.mxu1 %v5007_v35  ;;  %v10261_v35 = vadd.f32 %v10260_v9, %v10259_v21 }
 0x6ef   :  { %10460 = vmatpush3.msra.mxu1 %v20337_v46  ;;  %v10321_v44 = vpop.f32.mrf.mxu0  ;;  %11415 = vmatprep.mubr.msk.f32.mxu1 %vm11838_vm9, %v20227_v5 }
 0x6f0   :  { %v5012_v32 = vadd.f32 %v10320_v59, %v10249_v19  ;;  %10461 = vmatprep.subr.mxu1 %v20338_v13  ;;  %v10265_v19 = vpop.f32.mrf.mxu1 }
 0x6f1   :  { %10462 = vmatpush3.msra.mxu1 %v20339_v61  ;;  %v10322_v2 = vpop.f32.mrf.mxu0 }
 0x6f2   :  { %v10323_v51 = vadd.f32 %v10322_v2, %v10321_v44  ;;  %10463 = vmatprep.subr.mxu1 %v20340_v39  ;;  %11416 = vmatmul.mubr.f32.gmra.mxu1 %v5012_v32  ;;  %v10264_v44 = vadd.f32 %v10263_v57, %v10262_v48  ;;  %v10266_v2 = vpop.f32.mrf.mxu1  ;;  %v20581_v48 = vld [vmem:[#allocation104_spill] sm:$0xff]  ;;  %v20588_v57 = vld [vmem:[#allocation74_spill] sm:$0xff] }
 0x6f3   :  { %10464 = vmatpush3.msra.mxu1 %v20341_v28  ;;  %v10324_v58 = vpop.f32.mrf.mxu0  ;;  %11418 = vmatprep.mubr.msk.f32.mxu1 %vm11838_vm9, %v20227_v5  ;;  %v10267_v21 = vadd.f32 %v10266_v2, %v10265_v19  ;;  %v20594_v19 = vld [vmem:[#allocation78_spill] sm:$0xff] }
 0x6f4   :  { %v5017_v26 = vadd.f32 %v10323_v51, %v10252_v18  ;;  %10465 = vmatprep.subr.mxu1 %v20342_v47  ;;  %v20600_v2 = vld [vmem:[#allocation54_spill] sm:$0xff] }
 0x6f5   :  { %10466 = vmatpush3.msra.mxu1 %v20343_v56  ;;  %v10325_v23 = vpop.f32.mrf.mxu0  ;;  %vm5280_vm15 = vcmp.eq.s32.totalorder %v20600_v2, %v20228_v4 }
 0x6f6   :  { %v10326_v40 = vadd.f32 %v10325_v23, %v10324_v58  ;;  %10467 = vmatprep.subr.mxu1 %v20344_v25  ;;  %11419 = vmatmul.mubr.f32.gmra.mxu1 %v5017_v26  ;;  %v20578_v23 = vmov 1.0  }
 0x6f7   :  { %10468 = vmatpush3.msra.mxu1 %v20493_v8  ;;  %v10327_v52 = vpop.f32.mrf.mxu0  ;;  %11421 = vmatprep.mubr.msk.f32.mxu1 %vm11838_vm9, %v20227_v5 }
 0x6f8   :  { %v5022_v30 = vadd.f32 %v10326_v40, %v10255_v42  ;;  %10469 = vmatprep.subr.mxu1 %v20494_v62  ;;  %v20579_v42 = vld [vmem:[#allocation105_spill] sm:$0xff] }
 0x6f9   :  { %10470 = vmatpush3.msra.mxu1 %v20495_v31  ;;  %v10328_v55 = vpop.f32.mrf.mxu0  ;;  %vm5259_vm11 = vcmp.eq.s32.totalorder %v17098_v6, %v20579_v42  ;;  %v20580_v40 = vld [vmem:[#allocation49_spill] sm:$0xff]  ;;  %v20585_v6 = vld [vmem:[#allocation56_spill] sm:$0xff]  ;;  %vm5279_vm0 = vcmp.eq.s32.totalorder %v20600_v2, %v20579_v42 }
 0x6fa   :  { %v10329_v12 = vadd.f32 %v10328_v55, %v10327_v52  ;;  %10539 = vmatprep.subr.mxu1 %v20496_v0  ;;  %11422 = vmatmul.mubr.f32.gmra.mxu1 %v5022_v30  ;;  %vm5264_vm4 = vcmp.eq.s32.totalorder %v20580_v40, %v20228_v4  ;;  %v20582_v52 = vld [vmem:[#allocation57_spill] sm:$0xff]  ;;  %v20583_v30 = vld [vmem:[#allocation60_spill] sm:$0xff]  ;;  %vm5263_vm1 = vcmp.eq.s32.totalorder %v20580_v40, %v20579_v42 }
 0x6fb   :  { %v10330_v11 = vpop.f32.mrf.mxu0  ;;  %11424 = vmatprep.mubr.msk.f32.mxu1 %vm11838_vm9, %v20227_v5  ;;  %v20584_v55 = vld [vmem:[#allocation64_spill] sm:$0xff]  ;;  %vm5268_vm5 = vcmp.eq.s32.totalorder %v20585_v6, %v20228_v4  ;;  %vm5267_vm7 = vcmp.eq.s32.totalorder %v20585_v6, %v20579_v42  ;;  %v20608_v6 = vld [vmem:[#allocation94_spill] sm:$0xff]  ;;  %v20611_v2 = vld [vmem:[#allocation93_spill] sm:$0xff] }
 0x6fc   :  { %v5027_v33 = vadd.f32 %v10329_v12, %v10258_v53  ;;  %v20586_v53 = vld [vmem:[#allocation65_spill] sm:$0xff]  ;;  %v20587_v12 = vld [vmem:[#allocation16_spill] sm:$0xff] }
 0x6fd   :  { %v10331_v60 = vpop.f32.mrf.mxu0  ;;  %v20607_v40 = vld [vmem:[#allocation88_spill] sm:$0xff] }
 0x6fe   :  { %v10332_v7 = vadd.f32 %v10331_v60, %v10330_v11  ;;  %11425 = vmatmul.mubr.f32.gmra.mxu1 %v5027_v33  ;;  %v20589_v11 = vld [vmem:[#allocation68_spill] sm:$0xff]  ;;  %v20590_v33 = vld [vmem:[#allocation51_spill] sm:$0xff]  ;;  %v20591_v60 = vld [vmem:[#allocation13_spill] sm:$0xff] }
 0x6ff   :  { %v10333_v59 = vpop.f32.mrf.mxu0  ;;  %11427 = vmatprep.mubr.msk.f32.mxu1 %vm11838_vm9, %v20227_v5  ;;  %vm5272_vm14 = vcmp.eq.s32.totalorder %v20590_v33, %v20228_v4  ;;  %vm5271_vm6 = vcmp.eq.s32.totalorder %v20590_v33, %v20579_v42  ;;  %v20609_v33 = vld [vmem:[#allocation87_spill] sm:$0xff] }
 0x700   :  { %v5032_v34 = vadd.f32 %v10332_v7, %v10261_v35  ;;  %v20592_v35 = vld [vmem:[#allocation71_spill] sm:$0xff] }
 0x701   :  { %v10334_v63 = vpop.f32.mrf.mxu0  ;;  %v20593_v7 = vld [vmem:[#allocation75_spill] sm:$0xff] }
 0x702   :  { %v10335_v32 = vadd.f32 %v10334_v63, %v10333_v59  ;;  %11428 = vmatmul.mubr.f32.gmra.mxu1 %v5032_v34  ;;  %v20595_v59 = vld [vmem:[#allocation58_spill] sm:$0xff]  ;;  %v20596_v34 = vld [vmem:[#allocation79_spill] sm:$0xff] }
 0x703   :  { %v10336_v18 = vpop.f32.mrf.mxu0  ;;  %11430 = vmatprep.mubr.msk.f32.mxu1 %vm11838_vm9, %v20227_v5  ;;  %vm5276_vm10 = vcmp.eq.s32.totalorder %v20595_v59, %v20228_v4  ;;  %v20597_v63 = vld [vmem:[#allocation91_spill] sm:$0xff]  ;;  %vm5275_vm13 = vcmp.eq.s32.totalorder %v20595_v59, %v20579_v42 }
 0x704   :  { %v5037_v51 = vadd.f32 %v10335_v32, %v10264_v44  ;;  %v20598_v44 = vld [vmem:[#allocation82_spill] sm:$0xff]  ;;  %v20599_v32 = vld [vmem:[#allocation15_spill] sm:$0xff] }
 0x705   :  { %v10337_v58 = vpop.f32.mrf.mxu0  ;;  %v20610_v59 = vld [vmem:[#allocation111_spill] sm:$0xff] }
 0x706   :  { %v10338_v9 = vadd.f32 %v10337_v58, %v10336_v18  ;;  %11431 = vmatmul.mubr.f32.gmra.mxu1 %v5037_v51  ;;  %v20601_v18 = vld [vmem:[#allocation106_spill] sm:$0xff]  ;;  %v20603_v58 = vld [vmem:[#allocation83_spill] sm:$0xff]  ;;  %vm5288_vm12 = vcmp.eq.s32.totalorder %v20610_v59, %v20228_v4 }
 0x707   :  { %11433 = vmatprep.mubr.msk.f32.mxu1 %vm11838_vm9, %v20227_v5  ;;  %v20602_v51 = vld [vmem:[#allocation10_spill] sm:$0xff] }
 0x708   :  { %v5042_v26 = vadd.f32 %v10338_v9, %v10267_v21  ;;  %v20604_v21 = vld [vmem:[#allocation103_spill] sm:$0xff] }
 0x709   :  { %v20605_v9 = vld [vmem:[#allocation11_spill] sm:$0xff] }
 0x70a   :  { %11434 = vmatmul.mubr.f32.gmra.mxu1 %v5042_v26  ;;  %vm5284_vm2 = vcmp.eq.s32.totalorder %v20605_v9, %v20228_v4  ;;  %v20606_v26 = vld [vmem:[#allocation5_spill] sm:$0xff]  ;;  %vm5283_vm3 = vcmp.eq.s32.totalorder %v20605_v9, %v20579_v42  ;;  %v20615_v9 = vld [vmem:[#allocation84_spill] sm:$0xff] }
 0x70b   :  { %8923 = vmatprep.mubr.msk.f32.mxu1 %vm5260_vm8, %v20578_v23  ;;  %vm5287_vm8 = vcmp.eq.s32.totalorder %v20610_v59, %v20579_v42  ;;  %v20619_v59 = vld [vmem:[#allocation34_spill] sm:$0xff] }
 0x70e   :  { %8924 = vmatmul.mubr.msk.f32.vlgmr.msra.gmra.mxu1 %vm5259_vm11, %v20578_v23  ;;  %vm5292_vm11 = vcmp.eq.s32.totalorder %v20615_v9, %v20228_v4 }
 0x70f   :  { %10540 = vmatpush3.msra.mxu1 %v20581_v48  ;;  %8925 = vmatprep.mubr.msk.f32.mxu1 %vm5264_vm4, %v20578_v23  ;;  %vm5291_vm4 = vcmp.eq.s32.totalorder %v20615_v9, %v20579_v42  ;;  %v20621_v9 = vld [vmem:[#allocation40_spill] sm:$0xff] }
 0x710   :  { %10541 = vmatprep.subr.mxu1 %v20582_v52 }
 0x711   :  { %10542 = vmatpush3.msra.mxu1 %v20583_v30 }
 0x712   :  { %10543 = vmatprep.subr.mxu1 %v20584_v55  ;;  %8926 = vmatmul.mubr.msk.f32.gmra.mxu1 %vm5263_vm1, %v20578_v23  ;;  %vm5296_vm1 = vcmp.eq.s32.totalorder %v20619_v59, %v20228_v4 }
 0x713   :  { %10544 = vmatpush3.msra.mxu1 %v20586_v53  ;;  %8927 = vmatprep.mubr.msk.f32.mxu1 %vm5268_vm5, %v20578_v23  ;;  %vm5295_vm5 = vcmp.eq.s32.totalorder %v20619_v59, %v20579_v42  ;;  %v20622_v59 = vld [vmem:[#allocation37_spill] sm:$0xff] }
 0x714   :  { %10545 = vmatprep.subr.mxu1 %v20587_v12 }
 0x715   :  { %10546 = vmatpush3.msra.mxu1 %v20588_v57  ;;  %v20644_v57 = vld [vmem:[#allocation45_spill] sm:$0xff] }
 0x716   :  { %10547 = vmatprep.subr.mxu1 %v20589_v11  ;;  %8928 = vmatmul.mubr.msk.f32.gmra.mxu1 %vm5267_vm7, %v20578_v23 }
 0x717   :  { %10548 = vmatpush3.msra.mxu1 %v20591_v60  ;;  %8929 = vmatprep.mubr.msk.f32.mxu1 %vm5272_vm14, %v20578_v23 }
 0x718   :  { %10549 = vmatprep.subr.mxu1 %v20592_v35 }
 0x719   :  { %10550 = vmatpush3.msra.mxu1 %v20593_v7 }
 0x71a   :  { %10551 = vmatprep.subr.mxu1 %v20594_v19  ;;  %8930 = vmatmul.mubr.msk.f32.gmra.mxu1 %vm5271_vm6, %v20578_v23  ;;  %vm5304_vm6 = vcmp.eq.s32.totalorder %v20621_v9, %v20228_v4 }
 0x71b   :  { %10552 = vmatpush3.msra.mxu1 %v20596_v34  ;;  %8931 = vmatprep.mubr.msk.f32.mxu1 %vm5276_vm10, %v20578_v23  ;;  %vm5303_vm10 = vcmp.eq.s32.totalorder %v20621_v9, %v20579_v42  ;;  %v9084_v9 = vld [vmem:[%s19231_s2 + $0x378] sm:$0xff] }
 0x71c   :  { %10553 = vmatprep.subr.mxu1 %v20597_v63 }
 0x71d   :  { %10554 = vmatpush3.msra.mxu1 %v20598_v44 }
 0x71e   :  { %10555 = vmatprep.subr.mxu1 %v20599_v32  ;;  %8932 = vmatmul.mubr.msk.f32.gmra.mxu1 %vm5275_vm13, %v20578_v23  ;;  %vm5308_vm13 = vcmp.eq.s32.totalorder %v20622_v59, %v20228_v4 }
 0x71f   :  { %10556 = vmatpush3.msra.mxu1 %v20601_v18  ;;  %8933 = vmatprep.mubr.msk.f32.mxu1 %vm5280_vm15, %v20578_v23  ;;  %vm5307_vm15 = vcmp.eq.s32.totalorder %v20622_v59, %v20579_v42  ;;  %v9083_v59 = vld [vmem:[%s19231_s2 + $0x370] sm:$0xff] }
 0x720   :  { %10557 = vmatprep.subr.mxu1 %v20602_v51 }
 0x721   :  { %10558 = vmatpush3.msra.mxu1 %v20603_v58 }
 0x722   :  { %10559 = vmatprep.subr.mxu1 %v20604_v21  ;;  %8934 = vmatmul.mubr.msk.f32.gmra.mxu1 %vm5279_vm0, %v20578_v23  ;;  %v20613_v21 = vld [vmem:[#allocation53_spill] sm:$0xff] }
 0x723   :  { %10560 = vmatpush3.msra.mxu1 %v20606_v26  ;;  %8935 = vmatprep.mubr.msk.f32.mxu1 %vm5284_vm2, %v20578_v23  ;;  %v20612_v26 = vld [vmem:[#allocation86_spill] sm:$0xff] }
 0x724   :  { %10561 = vmatprep.subr.mxu1 %v20607_v40  ;;  %v20618_v40 = vld [vmem:[#allocation109_spill] sm:$0xff] }
 0x725   :  { %10562 = vmatpush3.msra.mxu1 %v20608_v6  ;;  %v20614_v6 = vld [vmem:[#allocation99_spill] sm:$0xff] }
 0x726   :  { %10563 = vmatprep.subr.mxu1 %v20609_v33  ;;  %8936 = vmatmul.mubr.msk.f32.gmra.mxu1 %vm5283_vm3, %v20578_v23  ;;  %v20616_v33 = vld [vmem:[#allocation55_spill] sm:$0xff] }
 0x727   :  { %10564 = vmatpush3.msra.mxu1 %v20611_v2  ;;  %8937 = vmatprep.mubr.msk.f32.mxu1 %vm5288_vm12, %v20578_v23  ;;  %v20617_v2 = vld [vmem:[#allocation98_spill] sm:$0xff] }
 0x728   :  { %10565 = vmatprep.subr.mxu1 %v20612_v26 }
 0x729   :  { %10566 = vmatpush3.msra.mxu1 %v20613_v21  ;;  %v9082_v21 = vld [vmem:[%s19231_s2 + $0x368] sm:$0xff] }
 0x72a   :  { %10567 = vmatprep.subr.mxu1 %v20614_v6  ;;  %8938 = vmatmul.mubr.msk.f32.gmra.mxu1 %vm5287_vm8, %v20578_v23  ;;  %v20625_v6 = vld [vmem:[#allocation32_spill] sm:$0xff] }
 0x72b   :  { %10568 = vmatpush3.msra.mxu1 %v20616_v33  ;;  %8939 = vmatprep.mubr.msk.f32.mxu1 %vm5292_vm11, %v20578_v23  ;;  %v17508_v33 = vpop.permute.xlu0 %5850 }
 0x72c   :  { %10569 = vmatprep.subr.mxu1 %v20617_v2  ;;  %v20620_v2 = vld [vmem:[#allocation26_spill] sm:$0xff]  ;;  %20624 = vst [vmem:[#allocation42_spill] sm:$0xff] %v17508_v33  ;;  %vm5889_vm12 = vcmp.eq.s32.totalorder %v17508_v33, %v20625_v6 }
 0x72d   :  { %10570 = vmatpush3.msra.mxu1 %v20618_v40  ;;  %vm5300_vm7 = vcmp.eq.s32.totalorder %v20620_v2, %v20228_v4  ;;  %vm5299_vm14 = vcmp.eq.s32.totalorder %v20620_v2, %v20579_v42  ;;  %v17497_v40 = vpop.permute.xlu1 %5847  ;;  %v20623_v2 = vld [vmem:[#allocation35_spill] sm:$0xff] }
 0x72e   :  { %8940 = vmatmul.mubr.msk.f32.gmra.mxu1 %vm5291_vm4, %v20578_v23  ;;  %11507 = vmatprep.subr.mxu1 %v20227_v5  ;;  %vm5886_vm0 = vcmp.eq.s32.totalorder %v17497_v40, %v20623_v2  ;;  %vm5885_vm2 = vcmp.eq.s32.totalorder %v17497_v40, %v20625_v6  ;;  %vm5890_vm3 = vcmp.eq.s32.totalorder %v17508_v33, %v20623_v2  ;;  %v20660_v33 = vld [vmem:[#allocation18_spill] sm:$0xff] }
 0x72f   :  { %8941 = vmatprep.mubr.msk.f32.mxu1 %vm5296_vm1, %v20578_v23  ;;  %v17539_v58 = vpop.permute.xlu0 %5856 }
 0x730   :  { %20627 = vst [vmem:[#allocation39_spill] sm:$0xff] %v17539_v58  ;;  %vm5898_vm4 = vcmp.eq.s32.totalorder %v17539_v58, %v20623_v2  ;;  %vm5897_vm1 = vcmp.eq.s32.totalorder %v17539_v58, %v20625_v6 }
 0x731   :  { %v17523_v26 = vpop.permute.xlu1 %5853 }
 0x732   :  { %8942 = vmatmul.mubr.msk.f32.gmra.mxu1 %vm5295_vm5, %v20578_v23  ;;  %20626 = vst [vmem:[#allocation73_spill] sm:$0xff] %v17523_v26  ;;  %vm5894_vm8 = vcmp.eq.s32.totalorder %v17523_v26, %v20623_v2  ;;  %vm5893_vm11 = vcmp.eq.s32.totalorder %v17523_v26, %v20625_v6 }
 0x733   :  { %8943 = vmatprep.mubr.msk.f32.mxu1 %vm5300_vm7, %v20578_v23  ;;  %v17571_v18 = vpop.permute.xlu0 %5862 }
 0x734   :  { %20629 = vst [vmem:[#allocation77_spill] sm:$0xff] %v17571_v18 }
 0x735   :  { %v17555_v51 = vpop.permute.xlu1 %5859 }
 0x736   :  { %8944 = vmatmul.mubr.msk.f32.gmra.mxu1 %vm5299_vm14, %v20578_v23  ;;  %20628 = vst [vmem:[#allocation44_spill] sm:$0xff] %v17555_v51  ;;  %vm5902_vm5 = vcmp.eq.s32.totalorder %v17555_v51, %v20623_v2  ;;  %vm5901_vm7 = vcmp.eq.s32.totalorder %v17555_v51, %v20625_v6  ;;  %vm5906_vm14 = vcmp.eq.s32.totalorder %v17571_v18, %v20623_v2  ;;  %v20640_v51 = vld [vmem:[#allocation43_spill] sm:$0xff] }
 0x737   :  { %8945 = vmatprep.mubr.msk.f32.mxu1 %vm5304_vm6, %v20578_v23  ;;  %vm5905_vm6 = vcmp.eq.s32.totalorder %v17571_v18, %v20625_v6  ;;  %v17603_v18 = vpop.permute.xlu0 %5868 }
 0x738   :  { %20631 = vst [vmem:[#allocation23_spill] sm:$0xff] %v17603_v18 }
 0x739   :  { %v17587_v32 = vpop.permute.xlu1 %5865 }
 0x73a   :  { %8946 = vmatmul.mubr.msk.f32.gmra.mxu1 %vm5303_vm10, %v20578_v23  ;;  %20630 = vst [vmem:[#allocation41_spill] sm:$0xff] %v17587_v32  ;;  %vm5910_vm10 = vcmp.eq.s32.totalorder %v17587_v32, %v20623_v2 }
 0x73b   :  { %8947 = vmatprep.mubr.msk.f32.mxu1 %vm5308_vm13, %v20578_v23  ;;  %vm5909_vm13 = vcmp.eq.s32.totalorder %v17587_v32, %v20625_v6 }
 0x73d   :  { %v17619_v32 = vpop.permute.xlu1 %5871 }
 0x73e   :  { %8948 = vmatmul.mubr.msk.f32.gmra.mxu1 %vm5307_vm15, %v20578_v23  ;;  %vm5914_vm15 = vcmp.eq.s32.totalorder %v17603_v18, %v20623_v2  ;;  %20632 = vst [vmem:[#allocation112_spill] sm:$0xff] %v17619_v32 }
 0x73f   :  { %9017 = vmatprep.mubr.msk.f32.mxu1 %vm5886_vm0, %v20578_v23  ;;  %vm5913_vm0 = vcmp.eq.s32.totalorder %v17603_v18, %v20625_v6  ;;  %v20634_v18 = vld [vmem:[#allocation24_spill] sm:$0xff] }
 0x742   :  { %9018 = vmatmul.mubr.msk.f32.vlgmr.msra.gmra.mxu1 %vm5885_vm2, %v20578_v23  ;;  %vm5918_vm2 = vcmp.eq.s32.totalorder %v17619_v32, %v20623_v2 }
 0x743   :  { %11508 = vmatpush3.msra.mxu1 %v9084_v9  ;;  %9019 = vmatprep.mubr.msk.f32.mxu1 %vm5890_vm3, %v20578_v23  ;;  %v9081_v9 = vld [vmem:[%s19231_s2 + $0x360] sm:$0xff]  ;;  %vm5917_vm3 = vcmp.eq.s32.totalorder %v17619_v32, %v20625_v6  ;;  %v20638_v32 = vld [vmem:[#allocation46_spill] sm:$0xff] }
 0x744   :  { %11509 = vmatprep.subr.mxu1 %v20227_v5 }
 0x745   :  { %11510 = vmatpush3.msra.mxu1 %v9083_v59  ;;  %v9080_v59 = vld [vmem:[%s19231_s2 + $0x358] sm:$0xff] }
 0x746   :  { %11511 = vmatprep.subr.mxu1 %v20227_v5  ;;  %9020 = vmatmul.mubr.msk.f32.gmra.mxu1 %vm5889_vm12, %v20578_v23 }
 0x747   :  { %11512 = vmatpush3.msra.mxu1 %v9082_v21  ;;  %9021 = vmatprep.mubr.msk.f32.mxu1 %vm5894_vm8, %v20578_v23  ;;  %v9079_v21 = vld [vmem:[%s19231_s2 + $0x350] sm:$0xff] }
 0x748   :  { %11513 = vmatprep.subr.mxu1 %v20227_v5 }
 0x749   :  { %11514 = vmatpush3.msra.mxu1 %v9081_v9  ;;  %v9078_v9 = vld [vmem:[%s19231_s2 + $0x348] sm:$0xff] }
 0x74a   :  { %11515 = vmatprep.subr.mxu1 %v20227_v5  ;;  %9022 = vmatmul.mubr.msk.f32.gmra.mxu1 %vm5893_vm11, %v20578_v23 }
 0x74b   :  { %11516 = vmatpush3.msra.mxu1 %v9080_v59  ;;  %9023 = vmatprep.mubr.msk.f32.mxu1 %vm5898_vm4, %v20578_v23  ;;  %v9077_v59 = vld [vmem:[%s19231_s2 + $0x340] sm:$0xff] }
 0x74c   :  { %11517 = vmatprep.subr.mxu1 %v20227_v5 }
 0x74d   :  { %11518 = vmatpush3.msra.mxu1 %v9079_v21  ;;  %v9076_v21 = vld [vmem:[%s19231_s2 + $0x338] sm:$0xff] }
 0x74e   :  { %11519 = vmatprep.subr.mxu1 %v20227_v5  ;;  %9024 = vmatmul.mubr.msk.f32.gmra.mxu1 %vm5897_vm1, %v20578_v23 }
 0x74f   :  { %11520 = vmatpush3.msra.mxu1 %v9078_v9  ;;  %9025 = vmatprep.mubr.msk.f32.mxu1 %vm5902_vm5, %v20578_v23  ;;  %v9075_v9 = vld [vmem:[%s19231_s2 + $0x330] sm:$0xff] }
 0x750   :  { %11521 = vmatprep.subr.mxu1 %v20227_v5 }
 0x751   :  { %11522 = vmatpush3.msra.mxu1 %v9077_v59  ;;  %v9074_v59 = vld [vmem:[%s19231_s2 + $0x328] sm:$0xff] }
 0x752   :  { %11523 = vmatprep.subr.mxu1 %v20227_v5  ;;  %9026 = vmatmul.mubr.msk.f32.gmra.mxu1 %vm5901_vm7, %v20578_v23 }
 0x753   :  { %11524 = vmatpush3.msra.mxu1 %v9076_v21  ;;  %9027 = vmatprep.mubr.msk.f32.mxu1 %vm5906_vm14, %v20578_v23  ;;  %v9073_v21 = vld [vmem:[%s19231_s2 + $0x320] sm:$0xff] }
 0x754   :  { %11525 = vmatprep.subr.mxu1 %v20227_v5 }
 0x755   :  { %11526 = vmatpush3.msra.mxu1 %v9075_v9  ;;  %v9072_v9 = vld [vmem:[%s19231_s2 + $0x318] sm:$0xff] }
 0x756   :  { %11527 = vmatprep.subr.mxu1 %v20227_v5  ;;  %9028 = vmatmul.mubr.msk.f32.gmra.mxu1 %vm5905_vm6, %v20578_v23  ;;  %vm5888_vm6 = vcmp.eq.s32.totalorder %v17497_v40, %v20228_v4 }
 0x757   :  { %11528 = vmatpush3.msra.mxu1 %v9074_v59  ;;  %9029 = vmatprep.mubr.msk.f32.mxu1 %vm5910_vm10, %v20578_v23  ;;  %v9071_v59 = vld [vmem:[%s19231_s2 + $0x310] sm:$0xff] }
 0x758   :  { %11529 = vmatprep.subr.mxu1 %v20227_v5 }
 0x759   :  { %11530 = vmatpush3.msra.mxu1 %v9073_v21  ;;  %v9070_v21 = vld [vmem:[%s19231_s2 + $0x308] sm:$0xff] }
 0x75a   :  { %11531 = vmatprep.subr.mxu1 %v20227_v5  ;;  %9030 = vmatmul.mubr.msk.f32.gmra.mxu1 %vm5909_vm13, %v20578_v23 }
 0x75b   :  { %11532 = vmatpush3.msra.mxu1 %v9072_v9  ;;  %9031 = vmatprep.mubr.msk.f32.mxu1 %vm5914_vm15, %v20578_v23  ;;  %v9069_v9 = vld [vmem:[%s19231_s2 + $0x300] sm:$0xff] }
 0x75c   :  { %11533 = vmatprep.subr.mxu1 %v20227_v5 }
 0x75d   :  { %11534 = vmatpush3.msra.mxu1 %v9071_v59  ;;  %v17632_v59 = vpop.permute.xlu0 %5874 }
 0x75e   :  { %11535 = vmatprep.subr.mxu1 %v20227_v5  ;;  %9032 = vmatmul.mubr.msk.f32.gmra.mxu1 %vm5913_vm0, %v20578_v23  ;;  %20633 = vst [vmem:[#allocation19_spill] sm:$0xff] %v17632_v59  ;;  %vm5922_vm12 = vcmp.eq.s32.totalorder %v17632_v59, %v20623_v2  ;;  %vm5921_vm8 = vcmp.eq.s32.totalorder %v17632_v59, %v20625_v6 }
 0x75f   :  { %11536 = vmatpush3.msra.mxu1 %v9070_v21  ;;  %9033 = vmatprep.mubr.msk.f32.mxu1 %vm5918_vm2, %v20578_v23  ;;  %v17641_v21 = vpop.permute.xlu1 %5877 }
 0x760   :  { %11537 = vmatprep.subr.mxu1 %v20227_v5  ;;  %20635 = vst [vmem:[#allocation14_spill] sm:$0xff] %v17641_v21  ;;  %vm5926_vm11 = vcmp.eq.s32.totalorder %v17641_v21, %v20623_v2  ;;  %vm5925_vm4 = vcmp.eq.s32.totalorder %v17641_v21, %v20625_v6  ;;  %v10400_v21 = vpop.f32.mrf.mxu0 }
 0x761   :  { %11538 = vmatpush3.msra.mxu1 %v9069_v9  ;;  %v17649_v9 = vpop.permute.xlu0 %5880 }
 0x762   :  { %10781 = vmatprep.subr.mxu1 %v20634_v18  ;;  %9034 = vmatmul.mubr.msk.f32.gmra.mxu1 %vm5917_vm3, %v20578_v23  ;;  %20636 = vst [vmem:[#allocation72_spill] sm:$0xff] %v17649_v9  ;;  %vm5930_vm1 = vcmp.eq.s32.totalorder %v17649_v9, %v20623_v2  ;;  %vm5929_vm5 = vcmp.eq.s32.totalorder %v17649_v9, %v20625_v6  ;;  %v10401_v63 = vpop.f32.mrf.mxu0 }
 0x763   :  { %9035 = vmatprep.mubr.msk.f32.mxu1 %vm5922_vm12, %v20578_v23  ;;  %v17657_v18 = vpop.permute.xlu1 %5883 }
 0x764   :  { %20637 = vst [vmem:[#allocation80_spill] sm:$0xff] %v17657_v18  ;;  %vm5934_vm7 = vcmp.eq.s32.totalorder %v17657_v18, %v20623_v2  ;;  %vm5933_vm14 = vcmp.eq.s32.totalorder %v17657_v18, %v20625_v6  ;;  %v10403_v7 = vpop.f32.mrf.mxu0  ;;  %v20642_v6 = vld [vmem:[#allocation48_spill] sm:$0xff] }
 0x766   :  { %9036 = vmatmul.mubr.msk.f32.gmra.mxu1 %vm5921_vm8, %v20578_v23  ;;  %v10404_v58 = vpop.f32.mrf.mxu0 }
 0x767   :  { %9037 = vmatprep.mubr.msk.f32.mxu1 %vm5926_vm11, %v20578_v23 }
 0x76a   :  { %9038 = vmatmul.mubr.msk.f32.gmra.mxu1 %vm5925_vm4, %v20578_v23 }
 0x76b   :  { %9039 = vmatprep.mubr.msk.f32.mxu1 %vm5930_vm1, %v20578_v23 }
 0x76e   :  { %9040 = vmatmul.mubr.msk.f32.gmra.mxu1 %vm5929_vm5, %v20578_v23 }
 0x76f   :  { %9041 = vmatprep.mubr.msk.f32.mxu1 %vm5934_vm7, %v20578_v23 }
 0x772   :  { %9042 = vmatmul.mubr.msk.f32.gmra.mxu1 %vm5933_vm14, %v20578_v23 }
 0x773   :  { %11539 = vmatprep.mubr.msk.f32.mxu1 %vm11838_vm9, %v20227_v5 }
 0x79a   :  { %v5128_v59 = vpop.f32.mrf.mxu1 }
 0x79b   :  { %v17671_v44 = vadd.f32 %v5128_v59, %v20638_v32  ;;  %v10406_v59 = vpop.f32.mrf.mxu0 }
 0x79c   :  { %v11399_v9 = vpop.f32.mrf.mxu1 }
 0x79d   :  { %20639 = vst [vmem:[#allocation6_spill] sm:$0xff] %v17671_v44  ;;  %v20646_v44 = vld [vmem:[#allocation50_spill] sm:$0xff] }
 0x79e   :  { %v5133_v34 = vpop.f32.mrf.mxu1 }
 0x79f   :  { %v17674_v2 = vadd.f32 %v5133_v34, %v20640_v51  ;;  %v10407_v51 = vpop.f32.mrf.mxu0 }
 0x7a0   :  { %v11402_v19 = vpop.f32.mrf.mxu1 }
 0x7a1   :  { %20641 = vst [vmem:[#allocation70_spill] sm:$0xff] %v17674_v2  ;;  %v20648_v2 = vld [vmem:[#allocation47_spill] sm:$0xff] }
 0x7a2   :  { %v5138_v35 = vpop.f32.mrf.mxu1 }
 0x7a3   :  { %v17677_v18 = vadd.f32 %v5138_v35, %v20642_v6  ;;  %v10409_v6 = vpop.f32.mrf.mxu0 }
 0x7a4   :  { %v11405_v60 = vpop.f32.mrf.mxu1 }
 0x7a5   :  { %20643 = vst [vmem:[#allocation20_spill] sm:$0xff] %v17677_v18  ;;  %v20650_v18 = vld [vmem:[#allocation63_spill] sm:$0xff] }
 0x7a6   :  { %v5143_v11 = vpop.f32.mrf.mxu1 }
 0x7a7   :  { %v17680_v12 = vadd.f32 %v5143_v11, %v20644_v57  ;;  %v10410_v11 = vpop.f32.mrf.mxu0 }
 0x7a8   :  { %v11408_v32 = vpop.f32.mrf.mxu1 }
 0x7a9   :  { %20645 = vst [vmem:[#allocation107_spill] sm:$0xff] %v17680_v12  ;;  %v20652_v12 = vld [vmem:[#allocation67_spill] sm:$0xff] }
 0x7aa   :  { %v5148_v9 = vpop.f32.mrf.mxu1 }
 0x7ab   :  { %v17683_v53 = vadd.f32 %v5148_v9, %v20646_v44  ;;  %v17694_v9 = vpop.f32.mrf.mxu0 }
 0x7ac   :  { %v11411_v34 = vpop.f32.mrf.mxu1 }
 0x7ad   :  { %20647 = vst [vmem:[#allocation108_spill] sm:$0xff] %v17683_v53  ;;  %v20654_v53 = vld [vmem:[#allocation21_spill] sm:$0xff] }
 0x7ae   :  { %v5153_v19 = vpop.f32.mrf.mxu1 }
 0x7af   :  { %v17686_v26 = vadd.f32 %v5153_v19, %v20648_v2  ;;  %v10413_v19 = vpop.f32.mrf.mxu0 }
 0x7b0   :  { %v11414_v35 = vpop.f32.mrf.mxu1 }
 0x7b1   :  { %20649 = vst [vmem:[#allocation90_spill] sm:$0xff] %v17686_v26  ;;  %v20656_v26 = vld [vmem:[#allocation22_spill] sm:$0xff] }
 0x7b2   :  { %v5158_v60 = vpop.f32.mrf.mxu1 }
 0x7b3   :  { %v17689_v55 = vadd.f32 %v5158_v60, %v20650_v18  ;;  %v17702_v60 = vpop.f32.mrf.mxu0 }
 0x7b4   :  { %v11417_v57 = vpop.f32.mrf.mxu1 }
 0x7b5   :  { %20651 = vst [vmem:[#allocation89_spill] sm:$0xff] %v17689_v55  ;;  %v20658_v55 = vld [vmem:[#allocation28_spill] sm:$0xff] }
 0x7b6   :  { %v5163_v32 = vpop.f32.mrf.mxu1 }
 0x7b7   :  { %v17692_v30 = vadd.f32 %v5163_v32, %v20652_v12 }
 0x7b8   :  { %v11420_v44 = vpop.f32.mrf.mxu1 }
 0x7b9   :  { %20653 = vst [vmem:[#allocation4_spill] sm:$0xff] %v17692_v30  ;;  %v17707_v44 = vpop.f32.mrf.mxu0 }
 0x7ba   :  { %v5168_v34 = vpop.f32.mrf.mxu1 }
 0x7bb   :  { %v17697_v52 = vadd.f32 %v5168_v34, %v20654_v53 }
 0x7bc   :  { %v11423_v2 = vpop.f32.mrf.mxu1 }
 0x7bd   :  { %20655 = vst [vmem:[#allocation102_spill] sm:$0xff] %v17697_v52  ;;  %v17712_v2 = vpop.f32.mrf.mxu0 }
 0x7be   :  { %v5173_v35 = vpop.f32.mrf.mxu1 }
 0x7bf   :  { %v17700_v48 = vadd.f32 %v5173_v35, %v20656_v26 }
 0x7c0   :  { %v11426_v18 = vpop.f32.mrf.mxu1 }
 0x7c1   :  { %20657 = vst [vmem:[#allocation62_spill] sm:$0xff] %v17700_v48  ;;  %v17717_v18 = vpop.f32.mrf.mxu0 }
 0x7c2   :  { %v5178_v57 = vpop.f32.mrf.mxu1 }
 0x7c3   :  { %v17705_v12 = vadd.f32 %v5178_v57, %v20658_v55  ;;  %v10402_v57 = vadd.f32 %v10401_v63, %v10400_v21  ;;  %v10408_v63 = vadd.f32 %v10407_v51, %v10406_v59 }
 0x7c4   :  { %v11429_v32 = vpop.f32.mrf.mxu1 }
 0x7c5   :  { %20659 = vst [vmem:[#allocation101_spill] sm:$0xff] %v17705_v12  ;;  %v17719_v12 = vpop.f32.mrf.mxu0 }
 0x7c6   :  { %v5183_v30 = vpop.f32.mrf.mxu1 }
 0x7c7   :  { %v17710_v53 = vadd.f32 %v5183_v30, %v20660_v33  ;;  %v10405_v33 = vadd.f32 %v10404_v58, %v10403_v7 }
 0x7c8   :  { %v11432_v34 = vpop.f32.mrf.mxu1 }
 0x7c9   :  { %20661 = vst [vmem:[#allocation59_spill] sm:$0xff] %v17710_v53  ;;  %v17721_v53 = vpop.f32.mrf.mxu0 }
 0x7ca   :  { %v5188_v52 = vpop.f32.mrf.mxu1 }
 0x7cb   :  { %v17715_v26 = vadd.f32 %v5188_v52, %v17316_v15 }
 0x7cc   :  { %v11435_v35 = vpop.f32.mrf.mxu1 }
 0x7cd   :  { %v10411_v35 = vadd.f32 %v10410_v11, %v10409_v6 }
 0x7ce   :  { %v10471_v48 = vpop.f32.mrf.mxu1 }
 0x7d0   :  { %v10472_v55 = vpop.f32.mrf.mxu1 }
 0x7d1   :  { %v10473_v32 = vadd.f32 %v10472_v55, %v10471_v48 }
 0x7d2   :  { %v10474_v42 = vpop.f32.mrf.mxu1 }
 0x7d3   :  { %v5610_v23 = vadd.f32 %v10473_v32, %v10402_v57 }
 0x7d4   :  { %v10475_v30 = vpop.f32.mrf.mxu1 }
 0x7d5   :  { %v10476_v34 = vadd.f32 %v10475_v30, %v10474_v42  ;;  %11469 = vmatmul.mubr.f32.vlgmr.msra.gmra.mxu0 %v5610_v23  ;;  %v17729_v23 = vpop.f32.mrf.mxu0  ;;  %v10414_v30 = vadd.f32 %v10413_v19, %v17694_v9  ;;  %v10417_v9 = vadd.f32 %v17707_v44, %v17702_v60  ;;  %v10420_v60 = vadd.f32 %v17717_v18, %v17712_v2 }
 0x7d6   :  { %10611 = vmatpush3.msra.mxu0 %v20308_v27  ;;  %v10477_v15 = vpop.f32.mrf.mxu1  ;;  %11471 = vmatprep.mubr.msk.f32.mxu0 %vm11838_vm9, %v20227_v5  ;;  %v10423_v2 = vadd.f32 %v17721_v53, %v17719_v12 }
 0x7d7   :  { %v5615_v52 = vadd.f32 %v10476_v34, %v10405_v33  ;;  %10612 = vmatprep.subr.mxu0 %v20309_v20  ;;  %v10425_v51 = vpop.f32.mrf.mxu0 }
 0x7d8   :  { %10613 = vmatpush3.msra.mxu0 %v20310_v29  ;;  %v10478_v48 = vpop.f32.mrf.mxu1 }
 0x7d9   :  { %v10479_v21 = vadd.f32 %v10478_v48, %v10477_v15  ;;  %10614 = vmatprep.subr.mxu0 %v20312_v1  ;;  %11472 = vmatmul.mubr.f32.gmra.mxu0 %v5615_v52  ;;  %v10427_v11 = vpop.f32.mrf.mxu0 }
 0x7da   :  { %10615 = vmatpush3.msra.mxu0 %v20313_v43  ;;  %v10480_v42 = vpop.f32.mrf.mxu1  ;;  %11474 = vmatprep.mubr.msk.f32.mxu0 %vm11838_vm9, %v20227_v5 }
 0x7db   :  { %v5620_v7 = vadd.f32 %v10479_v21, %v10408_v63  ;;  %10616 = vmatprep.subr.mxu0 %v20315_v54  ;;  %v10428_v52 = vpop.f32.mrf.mxu0 }
 0x7dc   :  { %10617 = vmatpush3.msra.mxu0 %v20319_v10  ;;  %v10481_v58 = vpop.f32.mrf.mxu1 }
 0x7dd   :  { %v10482_v59 = vadd.f32 %v10481_v58, %v10480_v42  ;;  %10618 = vmatprep.subr.mxu0 %v20322_v17  ;;  %11475 = vmatmul.mubr.f32.gmra.mxu0 %v5620_v7  ;;  %v10430_v42 = vpop.f32.mrf.mxu0 }
 0x7de   :  { %10619 = vmatpush3.msra.mxu0 %v20323_v38  ;;  %v10483_v55 = vpop.f32.mrf.mxu1  ;;  %11477 = vmatprep.mubr.msk.f32.mxu0 %vm11838_vm9, %v20227_v5 }
 0x7df   :  { %v5625_v57 = vadd.f32 %v10482_v59, %v10411_v35  ;;  %10620 = vmatprep.subr.mxu0 %v20324_v37  ;;  %v10431_v59 = vpop.f32.mrf.mxu0 }
 0x7e0   :  { %10621 = vmatpush3.msra.mxu0 %v20325_v22  ;;  %v10484_v32 = vpop.f32.mrf.mxu1 }
 0x7e1   :  { %v10485_v6 = vadd.f32 %v10484_v32, %v10483_v55  ;;  %10622 = vmatprep.subr.mxu0 %v20328_v16  ;;  %11478 = vmatmul.mubr.f32.gmra.mxu0 %v5625_v57  ;;  %v10433_v53 = vpop.f32.mrf.mxu0 }
 0x7e2   :  { %10623 = vmatpush3.msra.mxu0 %v20329_v3  ;;  %v10486_v33 = vpop.f32.mrf.mxu1  ;;  %11480 = vmatprep.mubr.msk.f32.mxu0 %vm11838_vm9, %v20227_v5 }
 0x7e3   :  { %v5630_v34 = vadd.f32 %v10485_v6, %v10414_v30  ;;  %10624 = vmatprep.subr.mxu0 %v20330_v24  ;;  %v10426_v30 = vadd.f32 %v10425_v51, %v17729_v23  ;;  %v10434_v23 = vpop.f32.mrf.mxu0 }
 0x7e4   :  { %10625 = vmatpush3.msra.mxu0 %v20331_v41  ;;  %v10487_v15 = vpop.f32.mrf.mxu1 }
 0x7e5   :  { %v10488_v19 = vadd.f32 %v10487_v15, %v10486_v33  ;;  %10626 = vmatprep.subr.mxu0 %v20332_v50  ;;  %11481 = vmatmul.mubr.f32.gmra.mxu0 %v5630_v34  ;;  %v10429_v15 = vadd.f32 %v10428_v52, %v10427_v11 }
 0x7e6   :  { %10627 = vmatpush3.msra.mxu0 %v20333_v45  ;;  %v10489_v48 = vpop.f32.mrf.mxu1  ;;  %11483 = vmatprep.mubr.msk.f32.mxu0 %vm11838_vm9, %v20227_v5 }
 0x7e7   :  { %v5635_v63 = vadd.f32 %v10488_v19, %v10417_v9  ;;  %10628 = vmatprep.subr.mxu0 %v20334_v49 }
 0x7e8   :  { %10629 = vmatpush3.msra.mxu0 %v20335_v14  ;;  %v10490_v21 = vpop.f32.mrf.mxu1 }
 0x7e9   :  { %v10491_v44 = vadd.f32 %v10490_v21, %v10489_v48  ;;  %10630 = vmatprep.subr.mxu0 %v20336_v36  ;;  %11484 = vmatmul.mubr.f32.gmra.mxu0 %v5635_v63  ;;  %v10432_v63 = vadd.f32 %v10431_v59, %v10430_v42 }
 0x7ea   :  { %10631 = vmatpush3.msra.mxu0 %v20337_v46  ;;  %v10492_v7 = vpop.f32.mrf.mxu1  ;;  %11486 = vmatprep.mubr.msk.f32.mxu0 %vm11838_vm9, %v20227_v5 }
 0x7eb   :  { %v5640_v58 = vadd.f32 %v10491_v44, %v10420_v60  ;;  %10632 = vmatprep.subr.mxu0 %v20338_v13  ;;  %v10436_v60 = vpop.f32.mrf.mxu0 }
 0x7ec   :  { %10633 = vmatpush3.msra.mxu0 %v20339_v61  ;;  %v10493_v35 = vpop.f32.mrf.mxu1 }
 0x7ed   :  { %v10494_v18 = vadd.f32 %v10493_v35, %v10492_v7  ;;  %10634 = vmatprep.subr.mxu0 %v20340_v39  ;;  %11487 = vmatmul.mubr.f32.gmra.mxu0 %v5640_v58  ;;  %v10435_v7 = vadd.f32 %v10434_v23, %v10433_v53  ;;  %v10437_v35 = vpop.f32.mrf.mxu0  ;;  %v20665_v53 = vld [vmem:[#allocation104_spill] sm:$0xff]  ;;  %v20672_v23 = vld [vmem:[#allocation74_spill] sm:$0xff] }
 0x7ee   :  { %10635 = vmatpush3.msra.mxu0 %v20341_v28  ;;  %v10495_v55 = vpop.f32.mrf.mxu1  ;;  %11489 = vmatprep.mubr.msk.f32.mxu0 %vm11838_vm9, %v20227_v5  ;;  %v10438_v42 = vadd.f32 %v10437_v35, %v10436_v60  ;;  %v20678_v60 = vld [vmem:[#allocation78_spill] sm:$0xff]  ;;  %v20684_v35 = vld [vmem:[#allocation77_spill] sm:$0xff] }
 0x7ef   :  { %v5645_v57 = vadd.f32 %v10494_v18, %v10423_v2  ;;  %10636 = vmatprep.subr.mxu0 %v20342_v47  ;;  %vm5908_vm4 = vcmp.eq.s32.totalorder %v20684_v35, %v20228_v4 }
 0x7f0   :  { %10637 = vmatpush3.msra.mxu0 %v20343_v56  ;;  %v10496_v32 = vpop.f32.mrf.mxu1 }
 0x7f1   :  { %v10497_v12 = vadd.f32 %v10496_v32, %v10495_v55  ;;  %10638 = vmatprep.subr.mxu0 %v20344_v25  ;;  %11490 = vmatmul.mubr.f32.gmra.mxu0 %v5645_v57  ;;  %v20662_v32 = vmov 1.0  }
 0x7f2   :  { %10639 = vmatpush3.msra.mxu0 %v20493_v8  ;;  %v10498_v6 = vpop.f32.mrf.mxu1  ;;  %11492 = vmatprep.mubr.msk.f32.mxu0 %vm11838_vm9, %v20227_v5 }
 0x7f3   :  { %v5650_v33 = vadd.f32 %v10497_v12, %v10426_v30  ;;  %10640 = vmatprep.subr.mxu0 %v20494_v62  ;;  %v20663_v30 = vld [vmem:[#allocation105_spill] sm:$0xff]  ;;  %v20664_v12 = vld [vmem:[#allocation42_spill] sm:$0xff] }
 0x7f4   :  { %10641 = vmatpush3.msra.mxu0 %v20495_v31  ;;  %v10499_v34 = vpop.f32.mrf.mxu1  ;;  %vm5887_vm10 = vcmp.eq.s32.totalorder %v17497_v40, %v20663_v30  ;;  %vm5892_vm13 = vcmp.eq.s32.totalorder %v20664_v12, %v20228_v4  ;;  %vm5891_vm15 = vcmp.eq.s32.totalorder %v20664_v12, %v20663_v30  ;;  %v20669_v40 = vld [vmem:[#allocation73_spill] sm:$0xff]  ;;  %vm5907_vm1 = vcmp.eq.s32.totalorder %v20684_v35, %v20663_v30  ;;  %v20691_v12 = vld [vmem:[#allocation88_spill] sm:$0xff] }
 0x7f5   :  { %v10500_v9 = vadd.f32 %v10499_v34, %v10498_v6  ;;  %10710 = vmatprep.subr.mxu0 %v20496_v0  ;;  %11493 = vmatmul.mubr.f32.gmra.mxu0 %v5650_v33  ;;  %v20666_v6 = vld [vmem:[#allocation57_spill] sm:$0xff]  ;;  %v20667_v33 = vld [vmem:[#allocation60_spill] sm:$0xff]  ;;  %vm5896_vm0 = vcmp.eq.s32.totalorder %v20669_v40, %v20228_v4  ;;  %vm5895_vm2 = vcmp.eq.s32.totalorder %v20669_v40, %v20663_v30  ;;  %v20692_v40 = vld [vmem:[#allocation94_spill] sm:$0xff] }
 0x7f6   :  { %v10501_v51 = vpop.f32.mrf.mxu1  ;;  %11495 = vmatprep.mubr.msk.f32.mxu0 %vm11838_vm9, %v20227_v5  ;;  %v20668_v34 = vld [vmem:[#allocation64_spill] sm:$0xff]  ;;  %v20695_v35 = vld [vmem:[#allocation93_spill] sm:$0xff] }
 0x7f7   :  { %v5655_v19 = vadd.f32 %v10500_v9, %v10429_v15  ;;  %v20670_v15 = vld [vmem:[#allocation65_spill] sm:$0xff]  ;;  %v20671_v9 = vld [vmem:[#allocation16_spill] sm:$0xff] }
 0x7f8   :  { %v10502_v48 = vpop.f32.mrf.mxu1 }
 0x7f9   :  { %v10503_v21 = vadd.f32 %v10502_v48, %v10501_v51  ;;  %11496 = vmatmul.mubr.f32.gmra.mxu0 %v5655_v19  ;;  %v20673_v51 = vld [vmem:[#allocation68_spill] sm:$0xff]  ;;  %v20674_v19 = vld [vmem:[#allocation39_spill] sm:$0xff]  ;;  %v20675_v48 = vld [vmem:[#allocation13_spill] sm:$0xff] }
 0x7fa   :  { %v10504_v44 = vpop.f32.mrf.mxu1  ;;  %11498 = vmatprep.mubr.msk.f32.mxu0 %vm11838_vm9, %v20227_v5  ;;  %vm5900_vm3 = vcmp.eq.s32.totalorder %v20674_v19, %v20228_v4  ;;  %vm5899_vm12 = vcmp.eq.s32.totalorder %v20674_v19, %v20663_v30  ;;  %v20693_v19 = vld [vmem:[#allocation87_spill] sm:$0xff] }
 0x7fb   :  { %v5660_v11 = vadd.f32 %v10503_v21, %v10432_v63  ;;  %v20676_v63 = vld [vmem:[#allocation71_spill] sm:$0xff] }
 0x7fc   :  { %v10505_v52 = vpop.f32.mrf.mxu1  ;;  %v20677_v21 = vld [vmem:[#allocation75_spill] sm:$0xff] }
 0x7fd   :  { %v10506_v58 = vadd.f32 %v10505_v52, %v10504_v44  ;;  %11499 = vmatmul.mubr.f32.gmra.mxu0 %v5660_v11  ;;  %v20679_v44 = vld [vmem:[#allocation44_spill] sm:$0xff]  ;;  %v20680_v11 = vld [vmem:[#allocation79_spill] sm:$0xff] }
 0x7fe   :  { %v10507_v2 = vpop.f32.mrf.mxu1  ;;  %11501 = vmatprep.mubr.msk.f32.mxu0 %vm11838_vm9, %v20227_v5  ;;  %vm5904_vm8 = vcmp.eq.s32.totalorder %v20679_v44, %v20228_v4  ;;  %v20681_v52 = vld [vmem:[#allocation91_spill] sm:$0xff]  ;;  %vm5903_vm11 = vcmp.eq.s32.totalorder %v20679_v44, %v20663_v30 }
 0x7ff   :  { %v5665_v18 = vadd.f32 %v10506_v58, %v10435_v7  ;;  %v20682_v7 = vld [vmem:[#allocation82_spill] sm:$0xff]  ;;  %v20683_v58 = vld [vmem:[#allocation15_spill] sm:$0xff] }
 0x800   :  { %v10508_v55 = vpop.f32.mrf.mxu1  ;;  %v20694_v44 = vld [vmem:[#allocation23_spill] sm:$0xff] }
 0x801   :  { %v10509_v59 = vadd.f32 %v10508_v55, %v10507_v2  ;;  %11502 = vmatmul.mubr.f32.gmra.mxu0 %v5665_v18  ;;  %v20685_v2 = vld [vmem:[#allocation106_spill] sm:$0xff]  ;;  %v20687_v55 = vld [vmem:[#allocation83_spill] sm:$0xff]  ;;  %vm5916_vm14 = vcmp.eq.s32.totalorder %v20694_v44, %v20228_v4 }
 0x802   :  { %11504 = vmatprep.mubr.msk.f32.mxu0 %vm11838_vm9, %v20227_v5  ;;  %v20686_v18 = vld [vmem:[#allocation10_spill] sm:$0xff] }
 0x803   :  { %v5670_v57 = vadd.f32 %v10509_v59, %v10438_v42  ;;  %v20688_v42 = vld [vmem:[#allocation103_spill] sm:$0xff]  ;;  %v20689_v59 = vld [vmem:[#allocation41_spill] sm:$0xff] }
 0x804   :  { %vm5912_vm5 = vcmp.eq.s32.totalorder %v20689_v59, %v20228_v4  ;;  %vm5911_vm7 = vcmp.eq.s32.totalorder %v20689_v59, %v20663_v30  ;;  %v20699_v59 = vld [vmem:[#allocation112_spill] sm:$0xff] }
 0x805   :  { %11505 = vmatmul.mubr.f32.gmra.mxu0 %v5670_v57  ;;  %v20690_v57 = vld [vmem:[#allocation5_spill] sm:$0xff] }
 0x806   :  { %9043 = vmatprep.mubr.msk.f32.mxu0 %vm5888_vm6, %v20662_v32  ;;  %vm5915_vm6 = vcmp.eq.s32.totalorder %v20694_v44, %v20663_v30  ;;  %v20703_v44 = vld [vmem:[#allocation19_spill] sm:$0xff] }
 0x809   :  { %9044 = vmatmul.mubr.msk.f32.vlgmr.msra.gmra.mxu0 %vm5887_vm10, %v20662_v32  ;;  %vm5920_vm10 = vcmp.eq.s32.totalorder %v20699_v59, %v20228_v4 }
 0x80a   :  { %10711 = vmatpush3.msra.mxu0 %v20665_v53  ;;  %9045 = vmatprep.mubr.msk.f32.mxu0 %vm5892_vm13, %v20662_v32  ;;  %vm5919_vm13 = vcmp.eq.s32.totalorder %v20699_v59, %v20663_v30  ;;  %v20705_v59 = vld [vmem:[#allocation72_spill] sm:$0xff] }
 0x80b   :  { %10712 = vmatprep.subr.mxu0 %v20666_v6 }
 0x80c   :  { %10713 = vmatpush3.msra.mxu0 %v20667_v33 }
 0x80d   :  { %10714 = vmatprep.subr.mxu0 %v20668_v34  ;;  %9046 = vmatmul.mubr.msk.f32.gmra.mxu0 %vm5891_vm15, %v20662_v32  ;;  %vm5924_vm15 = vcmp.eq.s32.totalorder %v20703_v44, %v20228_v4 }
 0x80e   :  { %10715 = vmatpush3.msra.mxu0 %v20670_v15  ;;  %9047 = vmatprep.mubr.msk.f32.mxu0 %vm5896_vm0, %v20662_v32  ;;  %vm5923_vm0 = vcmp.eq.s32.totalorder %v20703_v44, %v20663_v30  ;;  %v20706_v44 = vld [vmem:[#allocation80_spill] sm:$0xff] }
 0x80f   :  { %10716 = vmatprep.subr.mxu0 %v20671_v9 }
 0x810   :  { %10717 = vmatpush3.msra.mxu0 %v20672_v23  ;;  %v20728_v23 = vld [vmem:[#allocation107_spill] sm:$0xff] }
 0x811   :  { %10718 = vmatprep.subr.mxu0 %v20673_v51  ;;  %9048 = vmatmul.mubr.msk.f32.gmra.mxu0 %vm5895_vm2, %v20662_v32 }
 0x812   :  { %10719 = vmatpush3.msra.mxu0 %v20675_v48  ;;  %9049 = vmatprep.mubr.msk.f32.mxu0 %vm5900_vm3, %v20662_v32 }
 0x813   :  { %10720 = vmatprep.subr.mxu0 %v20676_v63 }
 0x814   :  { %10721 = vmatpush3.msra.mxu0 %v20677_v21 }
 0x815   :  { %10722 = vmatprep.subr.mxu0 %v20678_v60  ;;  %9050 = vmatmul.mubr.msk.f32.gmra.mxu0 %vm5899_vm12, %v20662_v32  ;;  %vm5932_vm12 = vcmp.eq.s32.totalorder %v20705_v59, %v20228_v4 }
 0x816   :  { %10723 = vmatpush3.msra.mxu0 %v20680_v11  ;;  %9051 = vmatprep.mubr.msk.f32.mxu0 %vm5904_vm8, %v20662_v32  ;;  %vm5931_vm8 = vcmp.eq.s32.totalorder %v20705_v59, %v20663_v30  ;;  %v9204_v59 = vld [vmem:[%s19231_s2 + $0x3f8] sm:$0xff] }
 0x817   :  { %10724 = vmatprep.subr.mxu0 %v20681_v52 }
 0x818   :  { %10725 = vmatpush3.msra.mxu0 %v20682_v7 }
 0x819   :  { %10726 = vmatprep.subr.mxu0 %v20683_v58  ;;  %9052 = vmatmul.mubr.msk.f32.gmra.mxu0 %vm5903_vm11, %v20662_v32  ;;  %vm5936_vm11 = vcmp.eq.s32.totalorder %v20706_v44, %v20228_v4 }
 0x81a   :  { %10727 = vmatpush3.msra.mxu0 %v20685_v2  ;;  %9053 = vmatprep.mubr.msk.f32.mxu0 %vm5908_vm4, %v20662_v32  ;;  %vm5935_vm4 = vcmp.eq.s32.totalorder %v20706_v44, %v20663_v30  ;;  %v9203_v44 = vld [vmem:[%s19231_s2 + $0x3f0] sm:$0xff] }
 0x81b   :  { %10728 = vmatprep.subr.mxu0 %v20686_v18 }
 0x81c   :  { %10729 = vmatpush3.msra.mxu0 %v20687_v55 }
 0x81d   :  { %10730 = vmatprep.subr.mxu0 %v20688_v42  ;;  %9054 = vmatmul.mubr.msk.f32.gmra.mxu0 %vm5907_vm1, %v20662_v32  ;;  %v20697_v42 = vld [vmem:[#allocation53_spill] sm:$0xff] }
 0x81e   :  { %10731 = vmatpush3.msra.mxu0 %v20690_v57  ;;  %9055 = vmatprep.mubr.msk.f32.mxu0 %vm5912_vm5, %v20662_v32  ;;  %v20696_v57 = vld [vmem:[#allocation86_spill] sm:$0xff] }
 0x81f   :  { %10732 = vmatprep.subr.mxu0 %v20691_v12  ;;  %v20702_v12 = vld [vmem:[#allocation109_spill] sm:$0xff] }
 0x820   :  { %10733 = vmatpush3.msra.mxu0 %v20692_v40  ;;  %v20698_v40 = vld [vmem:[#allocation99_spill] sm:$0xff] }
 0x821   :  { %10734 = vmatprep.subr.mxu0 %v20693_v19  ;;  %9056 = vmatmul.mubr.msk.f32.gmra.mxu0 %vm5911_vm7, %v20662_v32  ;;  %v20700_v19 = vld [vmem:[#allocation55_spill] sm:$0xff] }
 0x822   :  { %10735 = vmatpush3.msra.mxu0 %v20695_v35  ;;  %9057 = vmatprep.mubr.msk.f32.mxu0 %vm5916_vm14, %v20662_v32  ;;  %v20701_v35 = vld [vmem:[#allocation98_spill] sm:$0xff] }
 0x823   :  { %10736 = vmatprep.subr.mxu0 %v20696_v57 }
 0x824   :  { %10737 = vmatpush3.msra.mxu0 %v20697_v42  ;;  %v9202_v42 = vld [vmem:[%s19231_s2 + $0x3e8] sm:$0xff] }
 0x825   :  { %10738 = vmatprep.subr.mxu0 %v20698_v40  ;;  %9058 = vmatmul.mubr.msk.f32.gmra.mxu0 %vm5915_vm6, %v20662_v32  ;;  %v17909_v40 = vpop.permute.xlu1 %6478 }
 0x826   :  { %10739 = vmatpush3.msra.mxu0 %v20700_v19  ;;  %9059 = vmatprep.mubr.msk.f32.mxu0 %vm5920_vm10, %v20662_v32  ;;  %v20708_v19 = vld [vmem:[#allocation32_spill] sm:$0xff]  ;;  %20709 = vst [vmem:[#allocation100_spill] sm:$0xff] %v17909_v40 }
 0x827   :  { %10740 = vmatprep.subr.mxu0 %v20701_v35  ;;  %v20704_v35 = vld [vmem:[#allocation14_spill] sm:$0xff]  ;;  %vm6517_vm14 = vcmp.eq.s32.totalorder %v17909_v40, %v20708_v19 }
 0x828   :  { %10741 = vmatpush3.msra.mxu0 %v20702_v12  ;;  %vm5928_vm2 = vcmp.eq.s32.totalorder %v20704_v35, %v20228_v4  ;;  %vm5927_vm3 = vcmp.eq.s32.totalorder %v20704_v35, %v20663_v30  ;;  %v17896_v12 = vpop.permute.xlu0 %6475  ;;  %v20707_v35 = vld [vmem:[#allocation35_spill] sm:$0xff] }
 0x829   :  { %9060 = vmatmul.mubr.msk.f32.gmra.mxu0 %vm5919_vm13, %v20662_v32  ;;  %11578 = vmatprep.subr.mxu0 %v20227_v5  ;;  %vm6514_vm1 = vcmp.eq.s32.totalorder %v17896_v12, %v20707_v35  ;;  %vm6513_vm5 = vcmp.eq.s32.totalorder %v17896_v12, %v20708_v19  ;;  %vm6518_vm7 = vcmp.eq.s32.totalorder %v17909_v40, %v20707_v35  ;;  %v17938_v55 = vpop.permute.xlu1 %6484  ;;  %v20744_v40 = vld [vmem:[#allocation59_spill] sm:$0xff] }
 0x82a   :  { %9061 = vmatprep.mubr.msk.f32.mxu0 %vm5924_vm15, %v20662_v32  ;;  %20711 = vst [vmem:[#allocation8_spill] sm:$0xff] %v17938_v55  ;;  %vm6526_vm13 = vcmp.eq.s32.totalorder %v17938_v55, %v20707_v35  ;;  %vm6525_vm15 = vcmp.eq.s32.totalorder %v17938_v55, %v20708_v19 }
 0x82c   :  { %v17922_v57 = vpop.permute.xlu0 %6481 }
 0x82d   :  { %9062 = vmatmul.mubr.msk.f32.gmra.mxu0 %vm5923_vm0, %v20662_v32  ;;  %20710 = vst [vmem:[#allocation76_spill] sm:$0xff] %v17922_v57  ;;  %vm6522_vm6 = vcmp.eq.s32.totalorder %v17922_v57, %v20707_v35  ;;  %vm6521_vm10 = vcmp.eq.s32.totalorder %v17922_v57, %v20708_v19  ;;  %v17970_v2 = vpop.permute.xlu1 %6490 }
 0x82e   :  { %9063 = vmatprep.mubr.msk.f32.mxu0 %vm5928_vm2, %v20662_v32  ;;  %20713 = vst [vmem:[#allocation69_spill] sm:$0xff] %v17970_v2 }
 0x830   :  { %v17954_v18 = vpop.permute.xlu0 %6487 }
 0x831   :  { %9064 = vmatmul.mubr.msk.f32.gmra.mxu0 %vm5927_vm3, %v20662_v32  ;;  %20712 = vst [vmem:[#allocation81_spill] sm:$0xff] %v17954_v18  ;;  %vm6530_vm0 = vcmp.eq.s32.totalorder %v17954_v18, %v20707_v35  ;;  %vm6529_vm2 = vcmp.eq.s32.totalorder %v17954_v18, %v20708_v19  ;;  %vm6534_vm3 = vcmp.eq.s32.totalorder %v17970_v2, %v20707_v35  ;;  %v20724_v18 = vld [vmem:[#allocation70_spill] sm:$0xff] }
 0x832   :  { %9065 = vmatprep.mubr.msk.f32.mxu0 %vm5932_vm12, %v20662_v32  ;;  %vm6533_vm12 = vcmp.eq.s32.totalorder %v17970_v2, %v20708_v19  ;;  %v18002_v2 = vpop.permute.xlu1 %6496 }
 0x833   :  { %20715 = vst [vmem:[#allocation85_spill] sm:$0xff] %v18002_v2 }
 0x834   :  { %v17986_v58 = vpop.permute.xlu0 %6493 }
 0x835   :  { %9066 = vmatmul.mubr.msk.f32.gmra.mxu0 %vm5931_vm8, %v20662_v32  ;;  %20714 = vst [vmem:[#allocation7_spill] sm:$0xff] %v17986_v58  ;;  %vm6538_vm8 = vcmp.eq.s32.totalorder %v17986_v58, %v20707_v35 }
 0x836   :  { %9067 = vmatprep.mubr.msk.f32.mxu0 %vm5936_vm11, %v20662_v32  ;;  %vm6537_vm11 = vcmp.eq.s32.totalorder %v17986_v58, %v20708_v19 }
 0x838   :  { %v18018_v58 = vpop.permute.xlu0 %6499 }
 0x839   :  { %9068 = vmatmul.mubr.msk.f32.gmra.mxu0 %vm5935_vm4, %v20662_v32  ;;  %vm6542_vm4 = vcmp.eq.s32.totalorder %v18002_v2, %v20707_v35  ;;  %20716 = vst [vmem:[#allocation110_spill] sm:$0xff] %v18018_v58 }
 0x83a   :  { %9137 = vmatprep.mubr.msk.f32.mxu0 %vm6514_vm1, %v20662_v32  ;;  %vm6541_vm1 = vcmp.eq.s32.totalorder %v18002_v2, %v20708_v19  ;;  %v20718_v2 = vld [vmem:[#allocation24_spill] sm:$0xff] }
 0x83d   :  { %9138 = vmatmul.mubr.msk.f32.vlgmr.msra.gmra.mxu0 %vm6513_vm5, %v20662_v32  ;;  %vm6546_vm5 = vcmp.eq.s32.totalorder %v18018_v58, %v20707_v35 }
 0x83e   :  { %11579 = vmatpush3.msra.mxu0 %v9204_v59  ;;  %9139 = vmatprep.mubr.msk.f32.mxu0 %vm6518_vm7, %v20662_v32  ;;  %v9201_v59 = vld [vmem:[%s19231_s2 + $0x3e0] sm:$0xff]  ;;  %vm6545_vm7 = vcmp.eq.s32.totalorder %v18018_v58, %v20708_v19  ;;  %v20722_v58 = vld [vmem:[#allocation6_spill] sm:$0xff] }
 0x83f   :  { %11580 = vmatprep.subr.mxu0 %v20227_v5 }
 0x840   :  { %11581 = vmatpush3.msra.mxu0 %v9203_v44  ;;  %v9200_v44 = vld [vmem:[%s19231_s2 + $0x3d8] sm:$0xff] }
 0x841   :  { %11582 = vmatprep.subr.mxu0 %v20227_v5  ;;  %9140 = vmatmul.mubr.msk.f32.gmra.mxu0 %vm6517_vm14, %v20662_v32 }
 0x842   :  { %11583 = vmatpush3.msra.mxu0 %v9202_v42  ;;  %9141 = vmatprep.mubr.msk.f32.mxu0 %vm6522_vm6, %v20662_v32  ;;  %v9199_v42 = vld [vmem:[%s19231_s2 + $0x3d0] sm:$0xff] }
 0x843   :  { %11584 = vmatprep.subr.mxu0 %v20227_v5 }
 0x844   :  { %11585 = vmatpush3.msra.mxu0 %v9201_v59  ;;  %v9198_v59 = vld [vmem:[%s19231_s2 + $0x3c8] sm:$0xff] }
 0x845   :  { %11586 = vmatprep.subr.mxu0 %v20227_v5  ;;  %9142 = vmatmul.mubr.msk.f32.gmra.mxu0 %vm6521_vm10, %v20662_v32 }
 0x846   :  { %11587 = vmatpush3.msra.mxu0 %v9200_v44  ;;  %9143 = vmatprep.mubr.msk.f32.mxu0 %vm6526_vm13, %v20662_v32  ;;  %v9197_v44 = vld [vmem:[%s19231_s2 + $0x3c0] sm:$0xff] }
 0x847   :  { %11588 = vmatprep.subr.mxu0 %v20227_v5 }
 0x848   :  { %11589 = vmatpush3.msra.mxu0 %v9199_v42  ;;  %v9196_v42 = vld [vmem:[%s19231_s2 + $0x3b8] sm:$0xff] }
 0x849   :  { %11590 = vmatprep.subr.mxu0 %v20227_v5  ;;  %9144 = vmatmul.mubr.msk.f32.gmra.mxu0 %vm6525_vm15, %v20662_v32 }
 0x84a   :  { %11591 = vmatpush3.msra.mxu0 %v9198_v59  ;;  %9145 = vmatprep.mubr.msk.f32.mxu0 %vm6530_vm0, %v20662_v32  ;;  %v9195_v59 = vld [vmem:[%s19231_s2 + $0x3b0] sm:$0xff] }
 0x84b   :  { %11592 = vmatprep.subr.mxu0 %v20227_v5 }
 0x84c   :  { %11593 = vmatpush3.msra.mxu0 %v9197_v44  ;;  %v9194_v44 = vld [vmem:[%s19231_s2 + $0x3a8] sm:$0xff] }
 0x84d   :  { %11594 = vmatprep.subr.mxu0 %v20227_v5  ;;  %9146 = vmatmul.mubr.msk.f32.gmra.mxu0 %vm6529_vm2, %v20662_v32 }
 0x84e   :  { %11595 = vmatpush3.msra.mxu0 %v9196_v42  ;;  %9147 = vmatprep.mubr.msk.f32.mxu0 %vm6534_vm3, %v20662_v32  ;;  %v9193_v42 = vld [vmem:[%s19231_s2 + $0x3a0] sm:$0xff] }
 0x84f   :  { %11596 = vmatprep.subr.mxu0 %v20227_v5 }
 0x850   :  { %11597 = vmatpush3.msra.mxu0 %v9195_v59  ;;  %v9192_v59 = vld [vmem:[%s19231_s2 + $0x398] sm:$0xff] }
 0x851   :  { %11598 = vmatprep.subr.mxu0 %v20227_v5  ;;  %9148 = vmatmul.mubr.msk.f32.gmra.mxu0 %vm6533_vm12, %v20662_v32  ;;  %vm6516_vm12 = vcmp.eq.s32.totalorder %v17896_v12, %v20228_v4 }
 0x852   :  { %11599 = vmatpush3.msra.mxu0 %v9194_v44  ;;  %9149 = vmatprep.mubr.msk.f32.mxu0 %vm6538_vm8, %v20662_v32  ;;  %v9191_v44 = vld [vmem:[%s19231_s2 + $0x390] sm:$0xff] }
 0x853   :  { %11600 = vmatprep.subr.mxu0 %v20227_v5 }
 0x854   :  { %11601 = vmatpush3.msra.mxu0 %v9193_v42  ;;  %v9190_v42 = vld [vmem:[%s19231_s2 + $0x388] sm:$0xff] }
 0x855   :  { %11602 = vmatprep.subr.mxu0 %v20227_v5  ;;  %9150 = vmatmul.mubr.msk.f32.gmra.mxu0 %vm6537_vm11, %v20662_v32 }
 0x856   :  { %11603 = vmatpush3.msra.mxu0 %v9192_v59  ;;  %9151 = vmatprep.mubr.msk.f32.mxu0 %vm6542_vm4, %v20662_v32  ;;  %v9189_v59 = vld [vmem:[%s19231_s2 + $0x380] sm:$0xff] }
 0x857   :  { %11604 = vmatprep.subr.mxu0 %v20227_v5 }
 0x858   :  { %11605 = vmatpush3.msra.mxu0 %v9191_v44  ;;  %v18031_v44 = vpop.permute.xlu1 %6502 }
 0x859   :  { %11606 = vmatprep.subr.mxu0 %v20227_v5  ;;  %9152 = vmatmul.mubr.msk.f32.gmra.mxu0 %vm6541_vm1, %v20662_v32  ;;  %20717 = vst [vmem:[#allocation52_spill] sm:$0xff] %v18031_v44  ;;  %vm6550_vm14 = vcmp.eq.s32.totalorder %v18031_v44, %v20707_v35  ;;  %vm6549_vm6 = vcmp.eq.s32.totalorder %v18031_v44, %v20708_v19 }
 0x85a   :  { %11607 = vmatpush3.msra.mxu0 %v9190_v42  ;;  %9153 = vmatprep.mubr.msk.f32.mxu0 %vm6546_vm5, %v20662_v32  ;;  %v18040_v42 = vpop.permute.xlu0 %6505 }
 0x85b   :  { %11608 = vmatprep.subr.mxu0 %v20227_v5  ;;  %20719 = vst [vmem:[#allocation49_spill] sm:$0xff] %v18040_v42  ;;  %vm6554_vm10 = vcmp.eq.s32.totalorder %v18040_v42, %v20707_v35  ;;  %vm6553_vm13 = vcmp.eq.s32.totalorder %v18040_v42, %v20708_v19  ;;  %v10571_v42 = vpop.f32.mrf.mxu1 }
 0x85c   :  { %11609 = vmatpush3.msra.mxu0 %v9189_v59 }
 0x85d   :  { %10952 = vmatprep.subr.mxu0 %v20718_v2  ;;  %9154 = vmatmul.mubr.msk.f32.gmra.mxu0 %vm6545_vm7, %v20662_v32  ;;  %v18048_v2 = vpop.permute.xlu1 %6508  ;;  %v10572_v52 = vpop.f32.mrf.mxu1 }
 0x85e   :  { %9155 = vmatprep.mubr.msk.f32.mxu0 %vm6550_vm14, %v20662_v32  ;;  %20720 = vst [vmem:[#allocation56_spill] sm:$0xff] %v18048_v2  ;;  %vm6558_vm15 = vcmp.eq.s32.totalorder %v18048_v2, %v20707_v35  ;;  %v18056_v59 = vpop.permute.xlu0 %6511  ;;  %vm6557_vm0 = vcmp.eq.s32.totalorder %v18048_v2, %v20708_v19 }
 0x85f   :  { %20721 = vst [vmem:[#allocation51_spill] sm:$0xff] %v18056_v59  ;;  %vm6562_vm2 = vcmp.eq.s32.totalorder %v18056_v59, %v20707_v35  ;;  %vm6561_vm3 = vcmp.eq.s32.totalorder %v18056_v59, %v20708_v19  ;;  %v10574_v21 = vpop.f32.mrf.mxu1  ;;  %v20726_v19 = vld [vmem:[#allocation20_spill] sm:$0xff] }
 0x861   :  { %9156 = vmatmul.mubr.msk.f32.gmra.mxu0 %vm6549_vm6, %v20662_v32  ;;  %v10575_v55 = vpop.f32.mrf.mxu1 }
 0x862   :  { %9157 = vmatprep.mubr.msk.f32.mxu0 %vm6554_vm10, %v20662_v32 }
 0x865   :  { %9158 = vmatmul.mubr.msk.f32.gmra.mxu0 %vm6553_vm13, %v20662_v32 }
 0x866   :  { %9159 = vmatprep.mubr.msk.f32.mxu0 %vm6558_vm15, %v20662_v32 }
 0x869   :  { %9160 = vmatmul.mubr.msk.f32.gmra.mxu0 %vm6557_vm0, %v20662_v32 }
 0x86a   :  { %9161 = vmatprep.mubr.msk.f32.mxu0 %vm6562_vm2, %v20662_v32 }
 0x86d   :  { %9162 = vmatmul.mubr.msk.f32.gmra.mxu0 %vm6561_vm3, %v20662_v32 }
 0x86e   :  { %11610 = vmatprep.mubr.msk.f32.mxu0 %vm11838_vm9, %v20227_v5 }
 0x895   :  { %v5756_v44 = vpop.f32.mrf.mxu0 }
 0x896   :  { %v18070_v7 = vadd.f32 %v5756_v44, %v20722_v58  ;;  %v10577_v44 = vpop.f32.mrf.mxu1 }
 0x897   :  { %v11470_v2 = vpop.f32.mrf.mxu0 }
 0x898   :  { %20723 = vst [vmem:[#allocation58_spill] sm:$0xff] %v18070_v7  ;;  %v20730_v7 = vld [vmem:[#allocation108_spill] sm:$0xff] }
 0x899   :  { %v5761_v11 = vpop.f32.mrf.mxu0 }
 0x89a   :  { %v18073_v35 = vadd.f32 %v5761_v11, %v20724_v18  ;;  %v10578_v18 = vpop.f32.mrf.mxu1 }
 0x89b   :  { %v11473_v60 = vpop.f32.mrf.mxu0 }
 0x89c   :  { %20725 = vst [vmem:[#allocation54_spill] sm:$0xff] %v18073_v35  ;;  %v20732_v35 = vld [vmem:[#allocation90_spill] sm:$0xff] }
 0x89d   :  { %v5766_v63 = vpop.f32.mrf.mxu0 }
 0x89e   :  { %v18076_v59 = vadd.f32 %v5766_v63, %v20726_v19  ;;  %v10580_v19 = vpop.f32.mrf.mxu1 }
 0x89f   :  { %v11476_v48 = vpop.f32.mrf.mxu0 }
 0x8a0   :  { %20727 = vst [vmem:[#allocation11_spill] sm:$0xff] %v18076_v59  ;;  %v20734_v59 = vld [vmem:[#allocation89_spill] sm:$0xff] }
 0x8a1   :  { %v5771_v51 = vpop.f32.mrf.mxu0 }
 0x8a2   :  { %v18079_v9 = vadd.f32 %v5771_v51, %v20728_v23  ;;  %v10581_v51 = vpop.f32.mrf.mxu1 }
 0x8a3   :  { %v11479_v58 = vpop.f32.mrf.mxu0 }
 0x8a4   :  { %20729 = vst [vmem:[#allocation111_spill] sm:$0xff] %v18079_v9  ;;  %v20736_v9 = vld [vmem:[#allocation4_spill] sm:$0xff] }
 0x8a5   :  { %v5776_v2 = vpop.f32.mrf.mxu0 }
 0x8a6   :  { %v18082_v15 = vadd.f32 %v5776_v2, %v20730_v7  ;;  %v18093_v2 = vpop.f32.mrf.mxu1 }
 0x8a7   :  { %v11482_v11 = vpop.f32.mrf.mxu0 }
 0x8a8   :  { %20731 = vst [vmem:[#allocation84_spill] sm:$0xff] %v18082_v15  ;;  %v20738_v15 = vld [vmem:[#allocation102_spill] sm:$0xff] }
 0x8a9   :  { %v5781_v60 = vpop.f32.mrf.mxu0 }
 0x8aa   :  { %v18085_v57 = vadd.f32 %v5781_v60, %v20732_v35  ;;  %v10584_v60 = vpop.f32.mrf.mxu1 }
 0x8ab   :  { %v11485_v63 = vpop.f32.mrf.mxu0 }
 0x8ac   :  { %20733 = vst [vmem:[#allocation34_spill] sm:$0xff] %v18085_v57  ;;  %v20740_v57 = vld [vmem:[#allocation62_spill] sm:$0xff] }
 0x8ad   :  { %v5786_v48 = vpop.f32.mrf.mxu0 }
 0x8ae   :  { %v18088_v34 = vadd.f32 %v5786_v48, %v20734_v59  ;;  %v18101_v48 = vpop.f32.mrf.mxu1 }
 0x8af   :  { %v11488_v23 = vpop.f32.mrf.mxu0 }
 0x8b0   :  { %20735 = vst [vmem:[#allocation26_spill] sm:$0xff] %v18088_v34  ;;  %v20742_v34 = vld [vmem:[#allocation101_spill] sm:$0xff] }
 0x8b1   :  { %v5791_v58 = vpop.f32.mrf.mxu0 }
 0x8b2   :  { %v18091_v33 = vadd.f32 %v5791_v58, %v20736_v9 }
 0x8b3   :  { %v11491_v7 = vpop.f32.mrf.mxu0 }
 0x8b4   :  { %20737 = vst [vmem:[#allocation40_spill] sm:$0xff] %v18091_v33  ;;  %v18106_v7 = vpop.f32.mrf.mxu1 }
 0x8b5   :  { %v5796_v11 = vpop.f32.mrf.mxu0 }
 0x8b6   :  { %v18096_v6 = vadd.f32 %v5796_v11, %v20738_v15 }
 0x8b7   :  { %v11494_v35 = vpop.f32.mrf.mxu0 }
 0x8b8   :  { %20739 = vst [vmem:[#allocation37_spill] sm:$0xff] %v18096_v6  ;;  %v18111_v35 = vpop.f32.mrf.mxu1 }
 0x8b9   :  { %v5801_v63 = vpop.f32.mrf.mxu0 }
 0x8ba   :  { %v18099_v53 = vadd.f32 %v5801_v63, %v20740_v57 }
 0x8bb   :  { %v11497_v59 = vpop.f32.mrf.mxu0 }
 0x8bc   :  { %20741 = vst [vmem:[#allocation46_spill] sm:$0xff] %v18099_v53  ;;  %v18116_v59 = vpop.f32.mrf.mxu1 }
 0x8bd   :  { %v5806_v23 = vpop.f32.mrf.mxu0 }
 0x8be   :  { %v18104_v9 = vadd.f32 %v5806_v23, %v20742_v34  ;;  %v10573_v23 = vadd.f32 %v10572_v52, %v10571_v42  ;;  %v10579_v52 = vadd.f32 %v10578_v18, %v10577_v44 }
 0x8bf   :  { %v11500_v58 = vpop.f32.mrf.mxu0 }
 0x8c0   :  { %20743 = vst [vmem:[#allocation43_spill] sm:$0xff] %v18104_v9  ;;  %v18118_v9 = vpop.f32.mrf.mxu1 }
 0x8c1   :  { %v5811_v33 = vpop.f32.mrf.mxu0 }
 0x8c2   :  { %v18109_v15 = vadd.f32 %v5811_v33, %v20744_v40  ;;  %v10576_v40 = vadd.f32 %v10575_v55, %v10574_v21 }
 0x8c3   :  { %v11503_v11 = vpop.f32.mrf.mxu0 }
 0x8c4   :  { %20745 = vst [vmem:[#allocation48_spill] sm:$0xff] %v18109_v15  ;;  %v18120_v15 = vpop.f32.mrf.mxu1 }
 0x8c5   :  { %v5816_v6 = vpop.f32.mrf.mxu0 }
 0x8c6   :  { %v18114_v57 = vadd.f32 %v5816_v6, %v17715_v26 }
 0x8c7   :  { %v11506_v63 = vpop.f32.mrf.mxu0 }
 0x8c8   :  { %v10582_v63 = vadd.f32 %v10581_v51, %v10580_v19 }
 0x8c9   :  { %v10642_v53 = vpop.f32.mrf.mxu0 }
 0x8cb   :  { %v10643_v34 = vpop.f32.mrf.mxu0 }
 0x8cc   :  { %v10644_v58 = vadd.f32 %v10643_v34, %v10642_v53 }
 0x8cd   :  { %v10645_v30 = vpop.f32.mrf.mxu0 }
 0x8ce   :  { %v6238_v32 = vadd.f32 %v10644_v58, %v10573_v23 }
 0x8cf   :  { %v10646_v33 = vpop.f32.mrf.mxu0 }
 0x8d0   :  { %v10647_v11 = vadd.f32 %v10646_v33, %v10645_v30  ;;  %11540 = vmatmul.mubr.f32.vlgmr.msra.gmra.mxu1 %v6238_v32  ;;  %v18128_v32 = vpop.f32.mrf.mxu1  ;;  %v10585_v33 = vadd.f32 %v10584_v60, %v18093_v2  ;;  %v10588_v2 = vadd.f32 %v18106_v7, %v18101_v48  ;;  %v10591_v48 = vadd.f32 %v18116_v59, %v18111_v35 }
 0x8d1   :  { %10782 = vmatpush3.msra.mxu1 %v20308_v27  ;;  %v10648_v26 = vpop.f32.mrf.mxu0  ;;  %11542 = vmatprep.mubr.msk.f32.mxu1 %vm11838_vm9, %v20227_v5  ;;  %v10594_v35 = vadd.f32 %v18120_v15, %v18118_v9 }
 0x8d2   :  { %v6243_v6 = vadd.f32 %v10647_v11, %v10576_v40  ;;  %10783 = vmatprep.subr.mxu1 %v20309_v20  ;;  %v10596_v18 = vpop.f32.mrf.mxu1 }
 0x8d3   :  { %10784 = vmatpush3.msra.mxu1 %v20310_v29  ;;  %v10649_v53 = vpop.f32.mrf.mxu0 }
 0x8d4   :  { %v10650_v42 = vadd.f32 %v10649_v53, %v10648_v26  ;;  %10785 = vmatprep.subr.mxu1 %v20312_v1  ;;  %11543 = vmatmul.mubr.f32.gmra.mxu1 %v6243_v6  ;;  %v10598_v51 = vpop.f32.mrf.mxu1 }
 0x8d5   :  { %10786 = vmatpush3.msra.mxu1 %v20313_v43  ;;  %v10651_v30 = vpop.f32.mrf.mxu0  ;;  %11545 = vmatprep.mubr.msk.f32.mxu1 %vm11838_vm9, %v20227_v5 }
 0x8d6   :  { %v6248_v21 = vadd.f32 %v10650_v42, %v10579_v52  ;;  %10787 = vmatprep.subr.mxu1 %v20315_v54  ;;  %v10599_v6 = vpop.f32.mrf.mxu1 }
 0x8d7   :  { %10788 = vmatpush3.msra.mxu1 %v20319_v10  ;;  %v10652_v55 = vpop.f32.mrf.mxu0 }
 0x8d8   :  { %v10653_v44 = vadd.f32 %v10652_v55, %v10651_v30  ;;  %10789 = vmatprep.subr.mxu1 %v20322_v17  ;;  %11546 = vmatmul.mubr.f32.gmra.mxu1 %v6248_v21  ;;  %v10601_v30 = vpop.f32.mrf.mxu1 }
 0x8d9   :  { %10790 = vmatpush3.msra.mxu1 %v20323_v38  ;;  %v10654_v34 = vpop.f32.mrf.mxu0  ;;  %11548 = vmatprep.mubr.msk.f32.mxu1 %vm11838_vm9, %v20227_v5 }
 0x8da   :  { %v6253_v23 = vadd.f32 %v10653_v44, %v10582_v63  ;;  %10791 = vmatprep.subr.mxu1 %v20324_v37  ;;  %v10602_v44 = vpop.f32.mrf.mxu1 }
 0x8db   :  { %10792 = vmatpush3.msra.mxu1 %v20325_v22  ;;  %v10655_v58 = vpop.f32.mrf.mxu0 }
 0x8dc   :  { %v10656_v19 = vadd.f32 %v10655_v58, %v10654_v34  ;;  %10793 = vmatprep.subr.mxu1 %v20328_v16  ;;  %11549 = vmatmul.mubr.f32.gmra.mxu1 %v6253_v23  ;;  %v10604_v15 = vpop.f32.mrf.mxu1 }
 0x8dd   :  { %10794 = vmatpush3.msra.mxu1 %v20329_v3  ;;  %v10657_v40 = vpop.f32.mrf.mxu0  ;;  %11551 = vmatprep.mubr.msk.f32.mxu1 %vm11838_vm9, %v20227_v5 }
 0x8de   :  { %v6258_v11 = vadd.f32 %v10656_v19, %v10585_v33  ;;  %10795 = vmatprep.subr.mxu1 %v20330_v24  ;;  %v10597_v33 = vadd.f32 %v10596_v18, %v18128_v32  ;;  %v10605_v32 = vpop.f32.mrf.mxu1 }
 0x8df   :  { %10796 = vmatpush3.msra.mxu1 %v20331_v41  ;;  %v10658_v26 = vpop.f32.mrf.mxu0 }
 0x8e0   :  { %v10659_v60 = vadd.f32 %v10658_v26, %v10657_v40  ;;  %10797 = vmatprep.subr.mxu1 %v20332_v50  ;;  %11552 = vmatmul.mubr.f32.gmra.mxu1 %v6258_v11  ;;  %v10600_v26 = vadd.f32 %v10599_v6, %v10598_v51 }
 0x8e1   :  { %10798 = vmatpush3.msra.mxu1 %v20333_v45  ;;  %v10660_v53 = vpop.f32.mrf.mxu0  ;;  %11554 = vmatprep.mubr.msk.f32.mxu1 %vm11838_vm9, %v20227_v5 }
 0x8e2   :  { %v6263_v52 = vadd.f32 %v10659_v60, %v10588_v2  ;;  %10799 = vmatprep.subr.mxu1 %v20334_v49 }
 0x8e3   :  { %10800 = vmatpush3.msra.mxu1 %v20335_v14  ;;  %v10661_v42 = vpop.f32.mrf.mxu0 }
 0x8e4   :  { %v10662_v7 = vadd.f32 %v10661_v42, %v10660_v53  ;;  %10801 = vmatprep.subr.mxu1 %v20336_v36  ;;  %11555 = vmatmul.mubr.f32.gmra.mxu1 %v6263_v52  ;;  %v10603_v52 = vadd.f32 %v10602_v44, %v10601_v30 }
 0x8e5   :  { %10802 = vmatpush3.msra.mxu1 %v20337_v46  ;;  %v10663_v21 = vpop.f32.mrf.mxu0  ;;  %11557 = vmatprep.mubr.msk.f32.mxu1 %vm11838_vm9, %v20227_v5 }
 0x8e6   :  { %v6268_v55 = vadd.f32 %v10662_v7, %v10591_v48  ;;  %10803 = vmatprep.subr.mxu1 %v20338_v13  ;;  %v10607_v48 = vpop.f32.mrf.mxu1 }
 0x8e7   :  { %10804 = vmatpush3.msra.mxu1 %v20339_v61  ;;  %v10664_v63 = vpop.f32.mrf.mxu0 }
 0x8e8   :  { %v10665_v59 = vadd.f32 %v10664_v63, %v10663_v21  ;;  %10805 = vmatprep.subr.mxu1 %v20340_v39  ;;  %11558 = vmatmul.mubr.f32.gmra.mxu1 %v6268_v55  ;;  %v10606_v21 = vadd.f32 %v10605_v32, %v10604_v15  ;;  %v10608_v55 = vpop.f32.mrf.mxu1  ;;  %v20750_v15 = vld [vmem:[#allocation57_spill] sm:$0xff]  ;;  %v20757_v32 = vld [vmem:[#allocation68_spill] sm:$0xff] }
 0x8e9   :  { %10806 = vmatpush3.msra.mxu1 %v20341_v28  ;;  %v10666_v34 = vpop.f32.mrf.mxu0  ;;  %11560 = vmatprep.mubr.msk.f32.mxu1 %vm11838_vm9, %v20227_v5  ;;  %v10609_v30 = vadd.f32 %v10608_v55, %v10607_v48  ;;  %v20763_v48 = vld [vmem:[#allocation81_spill] sm:$0xff]  ;;  %v20769_v55 = vld [vmem:[#allocation106_spill] sm:$0xff] }
 0x8ea   :  { %v6273_v23 = vadd.f32 %v10665_v59, %v10594_v35  ;;  %10807 = vmatprep.subr.mxu1 %v20342_v47  ;;  %vm6532_vm6 = vcmp.eq.s32.totalorder %v20763_v48, %v20228_v4 }
 0x8eb   :  { %10808 = vmatpush3.msra.mxu1 %v20343_v56  ;;  %v10667_v58 = vpop.f32.mrf.mxu0 }
 0x8ec   :  { %v10668_v9 = vadd.f32 %v10667_v58, %v10666_v34  ;;  %10809 = vmatprep.subr.mxu1 %v20344_v25  ;;  %11561 = vmatmul.mubr.f32.gmra.mxu1 %v6273_v23  ;;  %v20746_v23 = vmov 1.0   ;;  %v20747_v58 = vld [vmem:[#allocation105_spill] sm:$0xff] }
 0x8ed   :  { %10810 = vmatpush3.msra.mxu1 %v20493_v8  ;;  %v10669_v19 = vpop.f32.mrf.mxu0  ;;  %11563 = vmatprep.mubr.msk.f32.mxu1 %vm11838_vm9, %v20227_v5  ;;  %vm6515_vm8 = vcmp.eq.s32.totalorder %v17896_v12, %v20747_v58  ;;  %v20753_v12 = vld [vmem:[#allocation76_spill] sm:$0xff]  ;;  %vm6531_vm10 = vcmp.eq.s32.totalorder %v20763_v48, %v20747_v58  ;;  %v18295_v48 = vpop.permute.xlu1 %7103 }
 0x8ee   :  { %v6278_v40 = vadd.f32 %v10668_v9, %v10597_v33  ;;  %10811 = vmatprep.subr.mxu1 %v20494_v62  ;;  %v20748_v33 = vld [vmem:[#allocation100_spill] sm:$0xff]  ;;  %vm6524_vm1 = vcmp.eq.s32.totalorder %v20753_v12, %v20228_v4  ;;  %vm6523_vm5 = vcmp.eq.s32.totalorder %v20753_v12, %v20747_v58  ;;  %v20781_v12 = vld [vmem:[#allocation53_spill] sm:$0xff] }
 0x8ef   :  { %10812 = vmatpush3.msra.mxu1 %v20495_v31  ;;  %v10670_v11 = vpop.f32.mrf.mxu0  ;;  %vm6520_vm11 = vcmp.eq.s32.totalorder %v20748_v33, %v20228_v4  ;;  %v20749_v9 = vld [vmem:[#allocation104_spill] sm:$0xff]  ;;  %vm6519_vm4 = vcmp.eq.s32.totalorder %v20748_v33, %v20747_v58  ;;  %v20776_v33 = vld [vmem:[#allocation94_spill] sm:$0xff] }
 0x8f0   :  { %v10671_v2 = vadd.f32 %v10670_v11, %v10669_v19  ;;  %10881 = vmatprep.subr.mxu1 %v20496_v0  ;;  %11564 = vmatmul.mubr.f32.gmra.mxu1 %v6278_v40  ;;  %v20751_v19 = vld [vmem:[#allocation60_spill] sm:$0xff]  ;;  %v20754_v11 = vld [vmem:[#allocation65_spill] sm:$0xff] }
 0x8f1   :  { %v10672_v18 = vpop.f32.mrf.mxu0  ;;  %11566 = vmatprep.mubr.msk.f32.mxu1 %vm11838_vm9, %v20227_v5  ;;  %v20752_v40 = vld [vmem:[#allocation64_spill] sm:$0xff] }
 0x8f2   :  { %v6283_v60 = vadd.f32 %v10671_v2, %v10600_v26  ;;  %v20755_v26 = vld [vmem:[#allocation16_spill] sm:$0xff]  ;;  %v20756_v2 = vld [vmem:[#allocation74_spill] sm:$0xff] }
 0x8f3   :  { %v10673_v53 = vpop.f32.mrf.mxu0 }
 0x8f4   :  { %v10674_v42 = vadd.f32 %v10673_v53, %v10672_v18  ;;  %11567 = vmatmul.mubr.f32.gmra.mxu1 %v6283_v60  ;;  %v20758_v18 = vld [vmem:[#allocation8_spill] sm:$0xff]  ;;  %v20759_v60 = vld [vmem:[#allocation13_spill] sm:$0xff]  ;;  %v20760_v53 = vld [vmem:[#allocation71_spill] sm:$0xff] }
 0x8f5   :  { %v10675_v7 = vpop.f32.mrf.mxu0  ;;  %11569 = vmatprep.mubr.msk.f32.mxu1 %vm11838_vm9, %v20227_v5  ;;  %vm6528_vm7 = vcmp.eq.s32.totalorder %v20758_v18, %v20228_v4  ;;  %vm6527_vm14 = vcmp.eq.s32.totalorder %v20758_v18, %v20747_v58  ;;  %v20786_v18 = vld [vmem:[#allocation109_spill] sm:$0xff] }
 0x8f6   :  { %v6288_v51 = vadd.f32 %v10674_v42, %v10603_v52  ;;  %v20761_v52 = vld [vmem:[#allocation75_spill] sm:$0xff]  ;;  %v20762_v42 = vld [vmem:[#allocation78_spill] sm:$0xff] }
 0x8f7   :  { %v10676_v6 = vpop.f32.mrf.mxu0 }
 0x8f8   :  { %v10677_v0 = vadd.f32 %v10676_v6, %v10675_v7  ;;  %11570 = vmatmul.mubr.f32.gmra.mxu1 %v6288_v51  ;;  %v20764_v7 = vld [vmem:[#allocation79_spill] sm:$0xff]  ;;  %v20766_v6 = vld [vmem:[#allocation82_spill] sm:$0xff] }
 0x8f9   :  { %v10678_v63 = vpop.f32.mrf.mxu0  ;;  %11572 = vmatprep.mubr.msk.f32.mxu1 %vm11838_vm9, %v20227_v5  ;;  %v20765_v51 = vld [vmem:[#allocation91_spill] sm:$0xff] }
 0x8fa   :  { %v6293_v35 = vadd.f32 %v10677_v0, %v10606_v21  ;;  %v20767_v21 = vld [vmem:[#allocation15_spill] sm:$0xff]  ;;  %v20768_v0 = vld [vmem:[#allocation69_spill] sm:$0xff] }
 0x8fb   :  { %v10679_v59 = vpop.f32.mrf.mxu0  ;;  %vm6536_vm13 = vcmp.eq.s32.totalorder %v20768_v0, %v20228_v4  ;;  %vm6535_vm15 = vcmp.eq.s32.totalorder %v20768_v0, %v20747_v58 }
 0x8fc   :  { %v10680_v44 = vadd.f32 %v10679_v59, %v10678_v63  ;;  %11573 = vmatmul.mubr.f32.gmra.mxu1 %v6293_v35  ;;  %v20770_v63 = vld [vmem:[#allocation10_spill] sm:$0xff]  ;;  %v20771_v35 = vld [vmem:[#allocation83_spill] sm:$0xff] }
 0x8fd   :  { %11575 = vmatprep.mubr.msk.f32.mxu1 %vm11838_vm9, %v20227_v5  ;;  %v20772_v59 = vld [vmem:[#allocation103_spill] sm:$0xff] }
 0x8fe   :  { %v6298_v34 = vadd.f32 %v10680_v44, %v10609_v30  ;;  %v20773_v30 = vld [vmem:[#allocation7_spill] sm:$0xff]  ;;  %v20774_v44 = vld [vmem:[#allocation5_spill] sm:$0xff] }
 0x8ff   :  { %vm6540_vm0 = vcmp.eq.s32.totalorder %v20773_v30, %v20228_v4  ;;  %vm6539_vm2 = vcmp.eq.s32.totalorder %v20773_v30, %v20747_v58 }
 0x900   :  { %11576 = vmatmul.mubr.f32.gmra.mxu1 %v6298_v34  ;;  %v20775_v34 = vld [vmem:[#allocation88_spill] sm:$0xff] }
 0x901   :  { %9163 = vmatprep.mubr.msk.f32.mxu1 %vm6516_vm12, %v20746_v23 }
 0x904   :  { %9164 = vmatmul.mubr.msk.f32.vlgmr.msra.gmra.mxu1 %vm6515_vm8, %v20746_v23 }
 0x905   :  { %10882 = vmatpush3.msra.mxu1 %v20749_v9  ;;  %9165 = vmatprep.mubr.msk.f32.mxu1 %vm6520_vm11, %v20746_v23  ;;  %v20777_v9 = vld [vmem:[#allocation87_spill] sm:$0xff] }
 0x906   :  { %10883 = vmatprep.subr.mxu1 %v20750_v15  ;;  %v20778_v15 = vld [vmem:[#allocation85_spill] sm:$0xff] }
 0x907   :  { %10884 = vmatpush3.msra.mxu1 %v20751_v19  ;;  %vm6544_vm3 = vcmp.eq.s32.totalorder %v20778_v15, %v20228_v4  ;;  %v20779_v19 = vld [vmem:[#allocation93_spill] sm:$0xff]  ;;  %vm6543_vm12 = vcmp.eq.s32.totalorder %v20778_v15, %v20747_v58  ;;  %v10742_v15 = vpop.f32.mrf.mxu0 }
 0x908   :  { %10885 = vmatprep.subr.mxu1 %v20752_v40  ;;  %9166 = vmatmul.mubr.msk.f32.gmra.mxu1 %vm6519_vm4, %v20746_v23  ;;  %v20780_v40 = vld [vmem:[#allocation86_spill] sm:$0xff] }
 0x909   :  { %10886 = vmatpush3.msra.mxu1 %v20754_v11  ;;  %9167 = vmatprep.mubr.msk.f32.mxu1 %vm6524_vm1, %v20746_v23  ;;  %v20782_v11 = vld [vmem:[#allocation99_spill] sm:$0xff] }
 0x90a   :  { %10887 = vmatprep.subr.mxu1 %v20755_v26  ;;  %v20783_v26 = vld [vmem:[#allocation110_spill] sm:$0xff] }
 0x90b   :  { %10888 = vmatpush3.msra.mxu1 %v20756_v2  ;;  %vm6548_vm8 = vcmp.eq.s32.totalorder %v20783_v26, %v20228_v4  ;;  %v20784_v2 = vld [vmem:[#allocation55_spill] sm:$0xff]  ;;  %vm6547_vm11 = vcmp.eq.s32.totalorder %v20783_v26, %v20747_v58  ;;  %v10743_v26 = vpop.f32.mrf.mxu0 }
 0x90c   :  { %10889 = vmatprep.subr.mxu1 %v20757_v32  ;;  %9168 = vmatmul.mubr.msk.f32.gmra.mxu1 %vm6523_vm5, %v20746_v23  ;;  %v20785_v32 = vld [vmem:[#allocation98_spill] sm:$0xff] }
 0x90d   :  { %10890 = vmatpush3.msra.mxu1 %v20759_v60  ;;  %9169 = vmatprep.mubr.msk.f32.mxu1 %vm6528_vm7, %v20746_v23  ;;  %v20787_v60 = vld [vmem:[#allocation52_spill] sm:$0xff] }
 0x90e   :  { %10891 = vmatprep.subr.mxu1 %v20760_v53  ;;  %vm6552_vm4 = vcmp.eq.s32.totalorder %v20787_v60, %v20228_v4  ;;  %vm6551_vm1 = vcmp.eq.s32.totalorder %v20787_v60, %v20747_v58  ;;  %v20788_v53 = vld [vmem:[#allocation49_spill] sm:$0xff] }
 0x90f   :  { %10892 = vmatpush3.msra.mxu1 %v20761_v52  ;;  %vm6556_vm5 = vcmp.eq.s32.totalorder %v20788_v53, %v20228_v4  ;;  %vm6555_vm7 = vcmp.eq.s32.totalorder %v20788_v53, %v20747_v58  ;;  %v20789_v52 = vld [vmem:[#allocation56_spill] sm:$0xff]  ;;  %v10745_v53 = vpop.f32.mrf.mxu0 }
 0x910   :  { %10893 = vmatprep.subr.mxu1 %v20762_v42  ;;  %9170 = vmatmul.mubr.msk.f32.gmra.mxu1 %vm6527_vm14, %v20746_v23  ;;  %vm6560_vm14 = vcmp.eq.s32.totalorder %v20789_v52, %v20228_v4  ;;  %v20790_v42 = vld [vmem:[#allocation51_spill] sm:$0xff] }
 0x911   :  { %10894 = vmatpush3.msra.mxu1 %v20764_v7  ;;  %9171 = vmatprep.mubr.msk.f32.mxu1 %vm6532_vm6, %v20746_v23  ;;  %vm6559_vm6 = vcmp.eq.s32.totalorder %v20789_v52, %v20747_v58  ;;  %v20791_v7 = vld [vmem:[#allocation35_spill] sm:$0xff] }
 0x912   :  { %10895 = vmatprep.subr.mxu1 %v20765_v51  ;;  %v18303_v51 = vpop.permute.xlu0 %7106 }
 0x913   :  { %10896 = vmatpush3.msra.mxu1 %v20766_v6  ;;  %20792 = vst [vmem:[#allocation45_spill] sm:$0xff] %v18303_v51  ;;  %v20793_v6 = vld [vmem:[#allocation32_spill] sm:$0xff] }
 0x914   :  { %10897 = vmatprep.subr.mxu1 %v20767_v21  ;;  %9172 = vmatmul.mubr.msk.f32.gmra.mxu1 %vm6531_vm10, %v20746_v23  ;;  %vm6564_vm10 = vcmp.eq.s32.totalorder %v20790_v42, %v20228_v4  ;;  %v18311_v21 = vpop.permute.xlu1 %7109 }
 0x915   :  { %10898 = vmatpush3.msra.mxu1 %v20769_v55  ;;  %9173 = vmatprep.mubr.msk.f32.mxu1 %vm6536_vm13, %v20746_v23  ;;  %vm6563_vm13 = vcmp.eq.s32.totalorder %v20790_v42, %v20747_v58  ;;  %20794 = vst [vmem:[#allocation50_spill] sm:$0xff] %v18311_v21  ;;  %v20809_v42 = vld [vmem:[#allocation11_spill] sm:$0xff] }
 0x916   :  { %10899 = vmatprep.subr.mxu1 %v20770_v63  ;;  %v18319_v0 = vpop.permute.xlu0 %7112 }
 0x917   :  { %10900 = vmatpush3.msra.mxu1 %v20771_v35  ;;  %20795 = vst [vmem:[#allocation47_spill] sm:$0xff] %v18319_v0 }
 0x918   :  { %10901 = vmatprep.subr.mxu1 %v20772_v59  ;;  %9174 = vmatmul.mubr.msk.f32.gmra.mxu1 %vm6535_vm15, %v20746_v23  ;;  %vm7142_vm15 = vcmp.eq.s32.totalorder %v18295_v48, %v20791_v7  ;;  %v18327_v55 = vpop.permute.xlu1 %7115 }
 0x919   :  { %10902 = vmatpush3.msra.mxu1 %v20774_v44  ;;  %9175 = vmatprep.mubr.msk.f32.mxu1 %vm6540_vm0, %v20746_v23  ;;  %vm7141_vm0 = vcmp.eq.s32.totalorder %v18295_v48, %v20793_v6  ;;  %20796 = vst [vmem:[#allocation63_spill] sm:$0xff] %v18327_v55 }
 0x91a   :  { %10903 = vmatprep.subr.mxu1 %v20775_v34  ;;  %v18335_v63 = vpop.permute.xlu0 %7118 }
 0x91b   :  { %10904 = vmatpush3.msra.mxu1 %v20776_v33  ;;  %20797 = vst [vmem:[#allocation67_spill] sm:$0xff] %v18335_v63 }
 0x91c   :  { %10905 = vmatprep.subr.mxu1 %v20777_v9  ;;  %9176 = vmatmul.mubr.msk.f32.gmra.mxu1 %vm6539_vm2, %v20746_v23  ;;  %vm7146_vm2 = vcmp.eq.s32.totalorder %v18303_v51, %v20791_v7  ;;  %v18343_v35 = vpop.permute.xlu1 %7121 }
 0x91d   :  { %10906 = vmatpush3.msra.mxu1 %v20779_v19  ;;  %9177 = vmatprep.mubr.msk.f32.mxu1 %vm6544_vm3, %v20746_v23  ;;  %vm7145_vm3 = vcmp.eq.s32.totalorder %v18303_v51, %v20793_v6  ;;  %20798 = vst [vmem:[#allocation21_spill] sm:$0xff] %v18343_v35 }
 0x91e   :  { %10907 = vmatprep.subr.mxu1 %v20780_v40  ;;  %v18351_v59 = vpop.permute.xlu0 %7124  ;;  %v20805_v40 = vld [vmem:[#allocation58_spill] sm:$0xff] }
 0x91f   :  { %10908 = vmatpush3.msra.mxu1 %v20781_v12  ;;  %20799 = vst [vmem:[#allocation22_spill] sm:$0xff] %v18351_v59 }
 0x920   :  { %10909 = vmatprep.subr.mxu1 %v20782_v11  ;;  %9178 = vmatmul.mubr.msk.f32.gmra.mxu1 %vm6543_vm12, %v20746_v23  ;;  %vm7150_vm12 = vcmp.eq.s32.totalorder %v18311_v21, %v20791_v7  ;;  %v18359_v30 = vpop.permute.xlu1 %7127 }
 0x921   :  { %10910 = vmatpush3.msra.mxu1 %v20784_v2  ;;  %9179 = vmatprep.mubr.msk.f32.mxu1 %vm6548_vm8, %v20746_v23  ;;  %vm7149_vm8 = vcmp.eq.s32.totalorder %v18311_v21, %v20793_v6  ;;  %20800 = vst [vmem:[#allocation28_spill] sm:$0xff] %v18359_v30  ;;  %v20827_v21 = vld [vmem:[#allocation48_spill] sm:$0xff] }
 0x922   :  { %10911 = vmatprep.subr.mxu1 %v20785_v32  ;;  %v18367_v44 = vpop.permute.xlu0 %7130  ;;  %v20807_v32 = vld [vmem:[#allocation54_spill] sm:$0xff] }
 0x923   :  { %10912 = vmatpush3.msra.mxu1 %v20786_v18  ;;  %20801 = vst [vmem:[#allocation18_spill] sm:$0xff] %v18367_v44 }
 0x924   :  { %9180 = vmatmul.mubr.msk.f32.gmra.mxu1 %vm6547_vm11, %v20746_v23  ;;  %11649 = vmatprep.subr.mxu1 %v20227_v5  ;;  %vm7154_vm11 = vcmp.eq.s32.totalorder %v18319_v0, %v20791_v7  ;;  %v18375_v34 = vpop.permute.xlu1 %7133 }
 0x925   :  { %9181 = vmatprep.mubr.msk.f32.mxu1 %vm6552_vm4, %v20746_v23  ;;  %vm7153_vm4 = vcmp.eq.s32.totalorder %v18319_v0, %v20793_v6  ;;  %20802 = vst [vmem:[#allocation42_spill] sm:$0xff] %v18375_v34 }
 0x926   :  { %v18383_v33 = vpop.permute.xlu0 %7136 }
 0x927   :  { %20803 = vst [vmem:[#allocation73_spill] sm:$0xff] %v18383_v33 }
 0x928   :  { %9182 = vmatmul.mubr.msk.f32.gmra.mxu1 %vm6551_vm1, %v20746_v23  ;;  %vm7158_vm1 = vcmp.eq.s32.totalorder %v18327_v55, %v20791_v7  ;;  %v18391_v9 = vpop.permute.xlu1 %7139 }
 0x929   :  { %9183 = vmatprep.mubr.msk.f32.mxu1 %vm6556_vm5, %v20746_v23  ;;  %vm7157_vm5 = vcmp.eq.s32.totalorder %v18327_v55, %v20793_v6  ;;  %20804 = vst [vmem:[#allocation39_spill] sm:$0xff] %v18391_v9 }
 0x92c   :  { %9184 = vmatmul.mubr.msk.f32.gmra.mxu1 %vm6555_vm7, %v20746_v23  ;;  %vm7162_vm7 = vcmp.eq.s32.totalorder %v18335_v63, %v20791_v7 }
 0x92d   :  { %9185 = vmatprep.mubr.msk.f32.mxu1 %vm6560_vm14, %v20746_v23  ;;  %vm7161_vm14 = vcmp.eq.s32.totalorder %v18335_v63, %v20793_v6 }
 0x930   :  { %9186 = vmatmul.mubr.msk.f32.gmra.mxu1 %vm6559_vm6, %v20746_v23  ;;  %vm7166_vm6 = vcmp.eq.s32.totalorder %v18343_v35, %v20791_v7 }
 0x931   :  { %9187 = vmatprep.mubr.msk.f32.mxu1 %vm6564_vm10, %v20746_v23  ;;  %vm7165_vm10 = vcmp.eq.s32.totalorder %v18343_v35, %v20793_v6 }
 0x934   :  { %9188 = vmatmul.mubr.msk.f32.gmra.mxu1 %vm6563_vm13, %v20746_v23  ;;  %vm7170_vm13 = vcmp.eq.s32.totalorder %v18351_v59, %v20791_v7 }
 0x935   :  { %9257 = vmatprep.mubr.msk.f32.mxu1 %vm7142_vm15, %v20746_v23  ;;  %vm7169_vm15 = vcmp.eq.s32.totalorder %v18351_v59, %v20793_v6 }
 0x938   :  { %9258 = vmatmul.mubr.msk.f32.vlgmr.msra.gmra.mxu1 %vm7141_vm0, %v20746_v23  ;;  %vm7174_vm0 = vcmp.eq.s32.totalorder %v18359_v30, %v20791_v7 }
 0x939   :  { %9259 = vmatprep.mubr.msk.f32.mxu1 %vm7146_vm2, %v20746_v23  ;;  %vm7173_vm2 = vcmp.eq.s32.totalorder %v18359_v30, %v20793_v6 }
 0x93c   :  { %9260 = vmatmul.mubr.msk.f32.gmra.mxu1 %vm7145_vm3, %v20746_v23  ;;  %vm7178_vm3 = vcmp.eq.s32.totalorder %v18367_v44, %v20791_v7 }
 0x93d   :  { %9261 = vmatprep.mubr.msk.f32.mxu1 %vm7150_vm12, %v20746_v23  ;;  %vm7177_vm12 = vcmp.eq.s32.totalorder %v18367_v44, %v20793_v6 }
 0x940   :  { %9262 = vmatmul.mubr.msk.f32.gmra.mxu1 %vm7149_vm8, %v20746_v23  ;;  %vm7182_vm8 = vcmp.eq.s32.totalorder %v18375_v34, %v20791_v7 }
 0x941   :  { %9263 = vmatprep.mubr.msk.f32.mxu1 %vm7154_vm11, %v20746_v23  ;;  %vm7181_vm11 = vcmp.eq.s32.totalorder %v18375_v34, %v20793_v6  ;;  %v20811_v34 = vld [vmem:[#allocation111_spill] sm:$0xff] }
 0x944   :  { %9264 = vmatmul.mubr.msk.f32.gmra.mxu1 %vm7153_vm4, %v20746_v23  ;;  %vm7186_vm4 = vcmp.eq.s32.totalorder %v18383_v33, %v20791_v7 }
 0x945   :  { %9265 = vmatprep.mubr.msk.f32.mxu1 %vm7158_vm1, %v20746_v23  ;;  %vm7185_vm1 = vcmp.eq.s32.totalorder %v18383_v33, %v20793_v6 }
 0x948   :  { %9266 = vmatmul.mubr.msk.f32.gmra.mxu1 %vm7157_vm5, %v20746_v23  ;;  %vm7190_vm5 = vcmp.eq.s32.totalorder %v18391_v9, %v20791_v7 }
 0x949   :  { %9267 = vmatprep.mubr.msk.f32.mxu1 %vm7162_vm7, %v20746_v23  ;;  %vm7189_vm7 = vcmp.eq.s32.totalorder %v18391_v9, %v20793_v6  ;;  %v10746_v9 = vpop.f32.mrf.mxu0 }
 0x94c   :  { %9268 = vmatmul.mubr.msk.f32.gmra.mxu1 %vm7161_vm14, %v20746_v23  ;;  %vm7144_vm14 = vcmp.eq.s32.totalorder %v18295_v48, %v20228_v4 }
 0x94d   :  { %9269 = vmatprep.mubr.msk.f32.mxu1 %vm7166_vm6, %v20746_v23 }
 0x950   :  { %9270 = vmatmul.mubr.msk.f32.gmra.mxu1 %vm7165_vm10, %v20746_v23 }
 0x951   :  { %9271 = vmatprep.mubr.msk.f32.mxu1 %vm7170_vm13, %v20746_v23 }
 0x954   :  { %9272 = vmatmul.mubr.msk.f32.gmra.mxu1 %vm7169_vm15, %v20746_v23 }
 0x955   :  { %9273 = vmatprep.mubr.msk.f32.mxu1 %vm7174_vm0, %v20746_v23 }
 0x958   :  { %9274 = vmatmul.mubr.msk.f32.gmra.mxu1 %vm7173_vm2, %v20746_v23 }
 0x959   :  { %9275 = vmatprep.mubr.msk.f32.mxu1 %vm7178_vm3, %v20746_v23 }
 0x95c   :  { %9276 = vmatmul.mubr.msk.f32.gmra.mxu1 %vm7177_vm12, %v20746_v23 }
 0x95d   :  { %9277 = vmatprep.mubr.msk.f32.mxu1 %vm7182_vm8, %v20746_v23 }
 0x960   :  { %9278 = vmatmul.mubr.msk.f32.gmra.mxu1 %vm7181_vm11, %v20746_v23 }
 0x961   :  { %9279 = vmatprep.mubr.msk.f32.mxu1 %vm7186_vm4, %v20746_v23 }
 0x964   :  { %9280 = vmatmul.mubr.msk.f32.gmra.mxu1 %vm7185_vm1, %v20746_v23 }
 0x965   :  { %9281 = vmatprep.mubr.msk.f32.mxu1 %vm7190_vm5, %v20746_v23 }
 0x968   :  { %9282 = vmatmul.mubr.msk.f32.gmra.mxu1 %vm7189_vm7, %v20746_v23 }
 0x969   :  { %11681 = vmatprep.mubr.msk.f32.mxu1 %vm11838_vm9, %v20227_v5 }
 0x990   :  { %v6384_v19 = vpop.f32.mrf.mxu1 }
 0x991   :  { %v18405_v12 = vadd.f32 %v6384_v19, %v20805_v40  ;;  %v10748_v40 = vpop.f32.mrf.mxu0 }
 0x992   :  { %v11541_v11 = vpop.f32.mrf.mxu1 }
 0x993   :  { %20806 = vst [vmem:[#allocation44_spill] sm:$0xff] %v18405_v12  ;;  %v20813_v12 = vld [vmem:[#allocation84_spill] sm:$0xff] }
 0x994   :  { %v6389_v2 = vpop.f32.mrf.mxu1 }
 0x995   :  { %v18408_v18 = vadd.f32 %v6389_v2, %v20807_v32  ;;  %v10749_v32 = vpop.f32.mrf.mxu0 }
 0x996   :  { %v11544_v60 = vpop.f32.mrf.mxu1 }
 0x997   :  { %20808 = vst [vmem:[#allocation77_spill] sm:$0xff] %v18408_v18  ;;  %v20815_v18 = vld [vmem:[#allocation34_spill] sm:$0xff] }
 0x998   :  { %v6394_v52 = vpop.f32.mrf.mxu1 }
 0x999   :  { %v18411_v7 = vadd.f32 %v6394_v52, %v20809_v42  ;;  %v10751_v42 = vpop.f32.mrf.mxu0 }
 0x99a   :  { %v11547_v6 = vpop.f32.mrf.mxu1 }
 0x99b   :  { %20810 = vst [vmem:[#allocation41_spill] sm:$0xff] %v18411_v7  ;;  %v20817_v7 = vld [vmem:[#allocation26_spill] sm:$0xff] }
 0x99c   :  { %v6399_v33 = vpop.f32.mrf.mxu1 }
 0x99d   :  { %v18414_v44 = vadd.f32 %v6399_v33, %v20811_v34  ;;  %v10752_v33 = vpop.f32.mrf.mxu0 }
 0x99e   :  { %v11550_v19 = vpop.f32.mrf.mxu1 }
 0x99f   :  { %20812 = vst [vmem:[#allocation23_spill] sm:$0xff] %v18414_v44  ;;  %v20819_v44 = vld [vmem:[#allocation40_spill] sm:$0xff] }
 0x9a0   :  { %v6404_v11 = vpop.f32.mrf.mxu1 }
 0x9a1   :  { %v18417_v30 = vadd.f32 %v6404_v11, %v20813_v12  ;;  %v18428_v11 = vpop.f32.mrf.mxu0 }
 0x9a2   :  { %v11553_v2 = vpop.f32.mrf.mxu1 }
 0x9a3   :  { %20814 = vst [vmem:[#allocation112_spill] sm:$0xff] %v18417_v30  ;;  %v20821_v30 = vld [vmem:[#allocation37_spill] sm:$0xff] }
 0x9a4   :  { %v6409_v60 = vpop.f32.mrf.mxu1 }
 0x9a5   :  { %v18420_v59 = vadd.f32 %v6409_v60, %v20815_v18  ;;  %v10755_v60 = vpop.f32.mrf.mxu0 }
 0x9a6   :  { %v11556_v52 = vpop.f32.mrf.mxu1 }
 0x9a7   :  { %20816 = vst [vmem:[#allocation19_spill] sm:$0xff] %v18420_v59  ;;  %v20823_v59 = vld [vmem:[#allocation46_spill] sm:$0xff] }
 0x9a8   :  { %v6414_v6 = vpop.f32.mrf.mxu1 }
 0x9a9   :  { %v18423_v35 = vadd.f32 %v6414_v6, %v20817_v7  ;;  %v18436_v6 = vpop.f32.mrf.mxu0 }
 0x9aa   :  { %v11559_v34 = vpop.f32.mrf.mxu1 }
 0x9ab   :  { %20818 = vst [vmem:[#allocation14_spill] sm:$0xff] %v18423_v35  ;;  %v20825_v35 = vld [vmem:[#allocation43_spill] sm:$0xff] }
 0x9ac   :  { %v6419_v19 = vpop.f32.mrf.mxu1 }
 0x9ad   :  { %v18426_v63 = vadd.f32 %v6419_v19, %v20819_v44 }
 0x9ae   :  { %v11562_v12 = vpop.f32.mrf.mxu1 }
 0x9af   :  { %20820 = vst [vmem:[#allocation72_spill] sm:$0xff] %v18426_v63  ;;  %v18441_v12 = vpop.f32.mrf.mxu0 }
 0x9b0   :  { %v6424_v2 = vpop.f32.mrf.mxu1 }
 0x9b1   :  { %v18431_v55 = vadd.f32 %v6424_v2, %v20821_v30 }
 0x9b2   :  { %v11565_v18 = vpop.f32.mrf.mxu1 }
 0x9b3   :  { %20822 = vst [vmem:[#allocation80_spill] sm:$0xff] %v18431_v55  ;;  %v18446_v18 = vpop.f32.mrf.mxu0 }
 0x9b4   :  { %v6429_v52 = vpop.f32.mrf.mxu1 }
 0x9b5   :  { %v18434_v0 = vadd.f32 %v6429_v52, %v20823_v59 }
 0x9b6   :  { %v11568_v7 = vpop.f32.mrf.mxu1 }
 0x9b7   :  { %20824 = vst [vmem:[#allocation24_spill] sm:$0xff] %v18434_v0  ;;  %v18451_v7 = vpop.f32.mrf.mxu0 }
 0x9b8   :  { %v6434_v34 = vpop.f32.mrf.mxu1 }
 0x9b9   :  { %v18439_v44 = vadd.f32 %v6434_v34, %v20825_v35  ;;  %v10744_v34 = vadd.f32 %v10743_v26, %v10742_v15  ;;  %v10750_v15 = vadd.f32 %v10749_v32, %v10748_v40 }
 0x9ba   :  { %v11571_v19 = vpop.f32.mrf.mxu1 }
 0x9bb   :  { %20826 = vst [vmem:[#allocation6_spill] sm:$0xff] %v18439_v44  ;;  %v18453_v44 = vpop.f32.mrf.mxu0 }
 0x9bc   :  { %v6439_v63 = vpop.f32.mrf.mxu1 }
 0x9bd   :  { %v18444_v30 = vadd.f32 %v6439_v63, %v20827_v21  ;;  %v10747_v63 = vadd.f32 %v10746_v9, %v10745_v53 }
 0x9be   :  { %v11574_v2 = vpop.f32.mrf.mxu1 }
 0x9bf   :  { %20828 = vst [vmem:[#allocation70_spill] sm:$0xff] %v18444_v30  ;;  %v18455_v30 = vpop.f32.mrf.mxu0 }
 0x9c0   :  { %v6444_v55 = vpop.f32.mrf.mxu1 }
 0x9c1   :  { %v18449_v59 = vadd.f32 %v6444_v55, %v18114_v57 }
 0x9c2   :  { %v11577_v52 = vpop.f32.mrf.mxu1 }
 0x9c4   :  { %v10813_v0 = vpop.f32.mrf.mxu1 }
 0x9c6   :  { %v10814_v35 = vpop.f32.mrf.mxu1 }
 0x9c7   :  { %v10815_v19 = vadd.f32 %v10814_v35, %v10813_v0 }
 0x9c8   :  { %v10816_v51 = vpop.f32.mrf.mxu1 }
 0x9c9   :  { %v6866_v58 = vadd.f32 %v10815_v19, %v10744_v34 }
 0x9ca   :  { %v10817_v21 = vpop.f32.mrf.mxu1 }
 0x9cb   :  { %v10818_v2 = vadd.f32 %v10817_v21, %v10816_v51  ;;  %11611 = vmatmul.mubr.f32.vlgmr.msra.gmra.mxu0 %v6866_v58  ;;  %v18463_v58 = vpop.f32.mrf.mxu0 }
 0x9cc   :  { %10953 = vmatpush3.msra.mxu0 %v20308_v27  ;;  %v10819_v57 = vpop.f32.mrf.mxu1  ;;  %11613 = vmatprep.mubr.msk.f32.mxu0 %vm11838_vm9, %v20227_v5 }
 0x9cd   :  { %v6871_v55 = vadd.f32 %v10818_v2, %v10747_v63  ;;  %10954 = vmatprep.subr.mxu0 %v20309_v20 }
 0x9ce   :  { %10955 = vmatpush3.msra.mxu0 %v20310_v29  ;;  %v10820_v0 = vpop.f32.mrf.mxu1  ;;  %v10753_v29 = vadd.f32 %v10752_v33, %v10751_v42 }
 0x9cf   :  { %v10821_v26 = vadd.f32 %v10820_v0, %v10819_v57  ;;  %10956 = vmatprep.subr.mxu0 %v20312_v1  ;;  %11614 = vmatmul.mubr.f32.gmra.mxu0 %v6871_v55  ;;  %v10767_v1 = vpop.f32.mrf.mxu0 }
 0x9d0   :  { %10957 = vmatpush3.msra.mxu0 %v20313_v43  ;;  %v10822_v27 = vpop.f32.mrf.mxu1  ;;  %11616 = vmatprep.mubr.msk.f32.mxu0 %vm11838_vm9, %v20227_v5 }
 0x9d1   :  { %v6876_v51 = vadd.f32 %v10821_v26, %v10750_v15  ;;  %10958 = vmatprep.subr.mxu0 %v20315_v54 }
 0x9d2   :  { %10959 = vmatpush3.msra.mxu0 %v20319_v10  ;;  %v10823_v20 = vpop.f32.mrf.mxu1  ;;  %v10756_v10 = vadd.f32 %v10755_v60, %v18428_v11 }
 0x9d3   :  { %v10824_v9 = vadd.f32 %v10823_v20, %v10822_v27  ;;  %10960 = vmatprep.subr.mxu0 %v20322_v17  ;;  %11617 = vmatmul.mubr.f32.gmra.mxu0 %v6876_v51  ;;  %v10769_v17 = vpop.f32.mrf.mxu0  ;;  %v18524_v27 = vld [vmem:[%s19232_s8] ss:$0 sm:$0xff]  ;;  %v20829_v20 = vld [vmem:[#allocation25_spill] sm:$0xff] }
 0x9d4   :  { %10961 = vmatpush3.msra.mxu0 %v20323_v38  ;;  %v10825_v53 = vpop.f32.mrf.mxu1  ;;  %11619 = vmatprep.mubr.msk.f32.mxu0 %vm11838_vm9, %v20227_v5 }
 0x9d5   :  { %v6881_v43 = vadd.f32 %v10824_v9, %v10753_v29  ;;  %10962 = vmatprep.subr.mxu0 %v20324_v37  ;;  %v2005_v29 = vmul.f32 %v18524_v27, %v20829_v20  ;;  %v18535_v9 = vld [vmem:[%s19233_s9] ss:$0 sm:$0xff]  ;;  %v9324_v20 = vld [vmem:[%s19231_s2 + $0x478] sm:$0xff] }
 0x9d6   :  { %10963 = vmatpush3.msra.mxu0 %v20325_v22  ;;  %v10826_v54 = vpop.f32.mrf.mxu1  ;;  %v10759_v22 = vadd.f32 %v18441_v12, %v18436_v6  ;;  %11650 = vmatpush3.msra.mxu1 %v9324_v20 }
 0x9d7   :  { %v10827_v40 = vadd.f32 %v10826_v54, %v10825_v53  ;;  %10964 = vmatprep.subr.mxu0 %v20328_v16  ;;  %11620 = vmatmul.mubr.f32.gmra.mxu0 %v6881_v43  ;;  %v10770_v16 = vpop.f32.mrf.mxu0  ;;  %v20831_v43 = vld [vmem:[#allocation105_spill] sm:$0xff]  ;;  %v18543_v54 = vadd.f32 %v18535_v9, %v2005_v29 }
 0x9d8   :  { %10965 = vmatpush3.msra.mxu0 %v20329_v3  ;;  %v10828_v38 = vpop.f32.mrf.mxu1  ;;  %11622 = vmatprep.mubr.msk.f32.mxu0 %vm11838_vm9, %v20227_v5  ;;  %vm7143_vm6 = vcmp.eq.s32.totalorder %v18295_v48, %v20831_v43  ;;  %v20856_v29 = vld [vmem:[#allocation73_spill] sm:$0xff] }
 0x9d9   :  { %v6886_v32 = vadd.f32 %v10827_v40, %v10756_v10  ;;  %10966 = vmatprep.subr.mxu0 %v20330_v24  ;;  %v20832_v10 = vld [vmem:[#allocation27_spill] sm:$0xff]  ;;  %11651 = vmatprep.subr.mxu1 %v20227_v5 }
 0x9da   :  { %10967 = vmatpush3.msra.mxu0 %v20331_v41  ;;  %v10829_v37 = vpop.f32.mrf.mxu1  ;;  %v10762_v41 = vadd.f32 %v18451_v7, %v18446_v18  ;;  %v2003_v40 = vmul.f32 %v18524_v27, %v20832_v10  ;;  %v9321_v10 = vld [vmem:[%s19231_s2 + $0x460] sm:$0xff] }
 0x9db   :  { %v10830_v42 = vadd.f32 %v10829_v37, %v10828_v38  ;;  %10968 = vmatprep.subr.mxu0 %v20332_v50  ;;  %11623 = vmatmul.mubr.f32.gmra.mxu0 %v6886_v32  ;;  %v10772_v50 = vpop.f32.mrf.mxu0  ;;  %v20834_v32 = vld [vmem:[#allocation33_spill] sm:$0xff] }
 0x9dc   :  { %10969 = vmatpush3.msra.mxu0 %v20333_v45  ;;  %v10831_v3 = vpop.f32.mrf.mxu1  ;;  %11625 = vmatprep.mubr.msk.f32.mxu0 %vm11838_vm9, %v20227_v5  ;;  %v2002_v48 = vmul.f32 %v18524_v27, %v20834_v32  ;;  %v18562_v37 = vadd.f32 %v18535_v9, %v2003_v40  ;;  %v9320_v40 = vld [vmem:[%s19231_s2 + $0x458] sm:$0xff]  ;;  %v20858_v32 = vld [vmem:[#allocation32_spill] sm:$0xff] }
 0x9dd   :  { %v6891_v33 = vadd.f32 %v10830_v42, %v10759_v22  ;;  %10970 = vmatprep.subr.mxu0 %v20334_v49  ;;  %v10765_v49 = vadd.f32 %v18455_v30, %v18453_v44  ;;  %v20835_v22 = vld [vmem:[#allocation29_spill] sm:$0xff] }
 0x9de   :  { %10971 = vmatpush3.msra.mxu0 %v20335_v14  ;;  %v10832_v24 = vpop.f32.mrf.mxu1  ;;  %v2001_v42 = vmul.f32 %v18524_v27, %v20835_v22  ;;  %v7856_v22 = vpop.permute.xlu1 %7855 }
 0x9df   :  { %v10833_v11 = vadd.f32 %v10832_v24, %v10831_v3  ;;  %10972 = vmatprep.subr.mxu0 %v20336_v36  ;;  %11626 = vmatmul.mubr.f32.gmra.mxu0 %v6891_v33  ;;  %v10773_v36 = vpop.f32.mrf.mxu0  ;;  %v18573_v3 = vadd.f32 %v18535_v9, %v2002_v48  ;;  %v20837_v33 = vld [vmem:[#allocation36_spill] sm:$0xff] }
 0x9e0   :  { %10973 = vmatpush3.msra.mxu0 %v20337_v46  ;;  %v10834_v45 = vpop.f32.mrf.mxu1  ;;  %11628 = vmatprep.mubr.msk.f32.mxu0 %vm11838_vm9, %v20227_v5  ;;  %v10774_v35 = vadd.f32 %v10773_v36, %v10772_v50  ;;  %v2000_v24 = vmul.f32 %v18524_v27, %v20837_v33  ;;  %v20841_v36 = vld [vmem:[#allocation92_spill] sm:$0xff] }
 0x9e1   :  { %v6896_v60 = vadd.f32 %v10833_v11, %v10762_v41  ;;  %10974 = vmatprep.subr.mxu0 %v20338_v13  ;;  %v10768_v13 = vadd.f32 %v10767_v1, %v18463_v58  ;;  %v20830_v1 = vld [vmem:[#allocation30_spill] sm:$0xff]  ;;  %v18582_v41 = vadd.f32 %v18535_v9, %v2001_v42  ;;  %v20838_v11 = vld [vmem:[#allocation31_spill] sm:$0xff] }
 0x9e2   :  { %10975 = vmatpush3.msra.mxu0 %v20339_v61  ;;  %v10835_v14 = vpop.f32.mrf.mxu1  ;;  %v2004_v53 = vmul.f32 %v18524_v27, %v20830_v1  ;;  %v1999_v50 = vmul.f32 %v18524_v27, %v20838_v11  ;;  %v9322_v1 = vld [vmem:[%s19231_s2 + $0x468] sm:$0xff]  ;;  %v9317_v48 = vld [vmem:[%s19231_s2 + $0x440] sm:$0xff]  ;;  %v9316_v42 = vld [vmem:[%s19231_s2 + $0x438] sm:$0xff]  ;;  %v7862_v11 = vpop.permute.xlu1 %7861 }
 0x9e3   :  { %v10836_v6 = vadd.f32 %v10835_v14, %v10834_v45  ;;  %10976 = vmatprep.subr.mxu0 %v20340_v39  ;;  %11629 = vmatmul.mubr.f32.gmra.mxu0 %v6896_v60  ;;  %v10775_v39 = vpop.f32.mrf.mxu0  ;;  %v20839_v45 = vld [vmem:[#allocation47_spill] sm:$0xff]  ;;  %v18593_v60 = vadd.f32 %v18535_v9, %v2000_v24  ;;  %v20840_v14 = vld [vmem:[#allocation38_spill] sm:$0xff]  ;;  %v9314_v24 = vld [vmem:[%s19231_s2 + $0x428] sm:$0xff] }
 0x9e4   :  { %10977 = vmatpush3.msra.mxu0 %v20341_v28  ;;  %v10837_v46 = vpop.f32.mrf.mxu1  ;;  %11631 = vmatprep.mubr.msk.f32.mxu0 %vm11838_vm9, %v20227_v5  ;;  %v18553_v38 = vadd.f32 %v18535_v9, %v2004_v53  ;;  %vm7156_vm2 = vcmp.eq.s32.totalorder %v20839_v45, %v20228_v4  ;;  %vm7155_vm3 = vcmp.eq.s32.totalorder %v20839_v45, %v20831_v43  ;;  %v20857_v53 = vld [vmem:[#allocation39_spill] sm:$0xff] }
 0x9e5   :  { %v6901_v12 = vadd.f32 %v10836_v6, %v10765_v49  ;;  %10978 = vmatprep.subr.mxu0 %v20342_v47  ;;  %v10771_v47 = vadd.f32 %v10770_v16, %v10769_v17  ;;  %v20833_v17 = vld [vmem:[#allocation45_spill] sm:$0xff]  ;;  %v20836_v16 = vld [vmem:[#allocation50_spill] sm:$0xff]  ;;  %v1998_v49 = vmul.f32 %v18524_v27, %v20840_v14  ;;  %v18602_v6 = vadd.f32 %v18535_v9, %v1999_v50  ;;  %v9313_v50 = vld [vmem:[%s19231_s2 + $0x420] sm:$0xff] }
 0x9e6   :  { %10979 = vmatpush3.msra.mxu0 %v20343_v56  ;;  %v10838_v61 = vpop.f32.mrf.mxu1  ;;  %vm7148_vm10 = vcmp.eq.s32.totalorder %v20833_v17, %v20228_v4  ;;  %vm7147_vm13 = vcmp.eq.s32.totalorder %v20833_v17, %v20831_v43  ;;  %vm7152_vm15 = vcmp.eq.s32.totalorder %v20836_v16, %v20228_v4  ;;  %vm7151_vm0 = vcmp.eq.s32.totalorder %v20836_v16, %v20831_v43  ;;  %v7853_v17 = vpop.permute.xlu0 %7852  ;;  %v9315_v16 = vld [vmem:[%s19231_s2 + $0x430] sm:$0xff]  ;;  %v9312_v45 = vld [vmem:[%s19231_s2 + $0x418] sm:$0xff] }
 0x9e7   :  { %v10839_v44 = vadd.f32 %v10838_v61, %v10837_v46  ;;  %10980 = vmatprep.subr.mxu0 %v20344_v25  ;;  %11632 = vmatmul.mubr.f32.gmra.mxu0 %v6901_v12  ;;  %v10776_v25 = vpop.f32.mrf.mxu0  ;;  %v1997_v46 = vmul.f32 %v18524_v27, %v20841_v36  ;;  %v20842_v12 = vld [vmem:[#allocation63_spill] sm:$0xff]  ;;  %v18613_v61 = vadd.f32 %v18535_v9, %v1998_v49  ;;  %v9311_v14 = vld [vmem:[%s19231_s2 + $0x410] sm:$0xff]  ;;  %v7868_v36 = vpop.permute.xlu1 %7867 }
 0x9e8   :  { %10981 = vmatpush3.msra.mxu0 %v20493_v8  ;;  %v10840_v28 = vpop.f32.mrf.mxu1  ;;  %11634 = vmatprep.mubr.msk.f32.mxu0 %vm11838_vm9, %v20227_v5  ;;  %v10777_v63 = vadd.f32 %v10776_v25, %v10775_v39  ;;  %vm7160_vm12 = vcmp.eq.s32.totalorder %v20842_v12, %v20228_v4  ;;  %vm7159_vm8 = vcmp.eq.s32.totalorder %v20842_v12, %v20831_v43  ;;  %v9309_v12 = vld [vmem:[%s19231_s2 + $0x400] sm:$0xff] }
 0x9e9   :  { %v6906_v30 = vadd.f32 %v10839_v44, %v10768_v13  ;;  %10982 = vmatprep.subr.mxu0 %v20494_v62  ;;  %v10778_v19 = vpop.f32.mrf.mxu0  ;;  %v20843_v13 = vld [vmem:[#allocation95_spill] sm:$0xff]  ;;  %v18622_v39 = vadd.f32 %v18535_v9, %v1997_v46  ;;  %v9310_v46 = vld [vmem:[%s19231_s2 + $0x408] sm:$0xff] }
 0x9ea   :  { %10983 = vmatpush3.msra.mxu0 %v20495_v31  ;;  %v10841_v56 = vpop.f32.mrf.mxu1  ;;  %v1996_v44 = vmul.f32 %v18524_v27, %v20843_v13  ;;  %v7859_v33 = vpop.permute.xlu0 %7858 }
 0x9eb   :  { %v10842_v18 = vadd.f32 %v10841_v56, %v10840_v28  ;;  %11635 = vmatmul.mubr.f32.gmra.mxu0 %v6906_v30  ;;  %11720 = vmatprep.subr.mxu0 %v20227_v5  ;;  %v10779_v57 = vpop.f32.mrf.mxu0  ;;  %v20844_v28 = vld [vmem:[#allocation12_spill] sm:$0xff]  ;;  %v20845_v56 = vld [vmem:[#allocation67_spill] sm:$0xff]  ;;  %v7874_v13 = vpop.permute.xlu1 %7873 }
 0x9ec   :  { %v10843_v52 = vpop.f32.mrf.mxu1  ;;  %11637 = vmatprep.mubr.msk.f32.mxu0 %vm11838_vm9, %v20227_v5  ;;  %v10780_v26 = vadd.f32 %v10779_v57, %v10778_v19  ;;  %v1995_v30 = vmul.f32 %v18524_v27, %v20844_v28  ;;  %vm7164_vm11 = vcmp.eq.s32.totalorder %v20845_v56, %v20228_v4  ;;  %vm7163_vm4 = vcmp.eq.s32.totalorder %v20845_v56, %v20831_v43  ;;  %v20849_v19 = vld [vmem:[#allocation9_spill] sm:$0xff] }
 0x9ed   :  { %v6911_v8 = vadd.f32 %v10842_v18, %v10771_v47  ;;  %v18633_v47 = vadd.f32 %v18535_v9, %v1996_v44  ;;  %v20846_v18 = vld [vmem:[#allocation96_spill] sm:$0xff] }
 0x9ee   :  { %v10844_v7 = vpop.f32.mrf.mxu1  ;;  %v1994_v25 = vmul.f32 %v18524_v27, %v20846_v18  ;;  %v7865_v49 = vpop.permute.xlu0 %7864 }
 0x9ef   :  { %v10845_v34 = vadd.f32 %v10844_v7, %v10843_v52  ;;  %11638 = vmatmul.mubr.f32.gmra.mxu0 %v6911_v8  ;;  %v18642_v52 = vadd.f32 %v18535_v9, %v1995_v30  ;;  %v20847_v8 = vld [vmem:[#allocation97_spill] sm:$0xff]  ;;  %v7877_v28 = vpop.permute.xlu1 %7876 }
 0x9f0   :  { %v10846_v62 = vpop.f32.mrf.mxu1  ;;  %11640 = vmatprep.mubr.msk.f32.mxu0 %vm11838_vm9, %v20227_v5  ;;  %v1993_v7 = vmul.f32 %v18524_v27, %v20847_v8 }
 0x9f1   :  { %v6916_v31 = vadd.f32 %v10845_v34, %v10774_v35  ;;  %v20848_v35 = vld [vmem:[#allocation21_spill] sm:$0xff]  ;;  %v18653_v34 = vadd.f32 %v18535_v9, %v1994_v25  ;;  %v20859_v25 = vld [vmem:[#allocation44_spill] sm:$0xff] }
 0x9f2   :  { %v10847_v21 = vpop.f32.mrf.mxu1  ;;  %vm7168_vm1 = vcmp.eq.s32.totalorder %v20848_v35, %v20228_v4  ;;  %vm7167_vm5 = vcmp.eq.s32.totalorder %v20848_v35, %v20831_v43  ;;  %v7871_v44 = vpop.permute.xlu0 %7870 }
 0x9f3   :  { %v10848_v2 = vadd.f32 %v10847_v21, %v10846_v62  ;;  %11641 = vmatmul.mubr.f32.gmra.mxu0 %v6916_v31  ;;  %v1992_v62 = vmul.f32 %v18524_v27, %v20849_v19  ;;  %v18662_v31 = vadd.f32 %v18535_v9, %v1993_v7  ;;  %v20850_v21 = vld [vmem:[#allocation61_spill] sm:$0xff]  ;;  %v7880_v30 = vpop.permute.xlu1 %7879 }
 0x9f4   :  { %v10849_v55 = vpop.f32.mrf.mxu1  ;;  %11643 = vmatprep.mubr.msk.f32.mxu0 %vm11838_vm9, %v20227_v5 }
 0x9f5   :  { %v6921_v0 = vadd.f32 %v10848_v2, %v10777_v63  ;;  %v1991_v63 = vmul.f32 %v18524_v27, %v20850_v21  ;;  %v20851_v2 = vld [vmem:[#allocation22_spill] sm:$0xff]  ;;  %v18673_v57 = vadd.f32 %v18535_v9, %v1992_v62  ;;  %v20860_v62 = vld [vmem:[#allocation77_spill] sm:$0xff] }
 0x9f6   :  { %v10850_v15 = vpop.f32.mrf.mxu1  ;;  %vm7172_vm7 = vcmp.eq.s32.totalorder %v20851_v2, %v20228_v4 }
 0x9f7   :  { %v10851_v58 = vadd.f32 %v10850_v15, %v10849_v55  ;;  %11644 = vmatmul.mubr.f32.gmra.mxu0 %v6921_v0  ;;  %v20852_v55 = vld [vmem:[#allocation66_spill] sm:$0xff]  ;;  %v18682_v15 = vadd.f32 %v18535_v9, %v1991_v63 }
 0x9f8   :  { %11646 = vmatprep.mubr.msk.f32.mxu0 %vm11838_vm9, %v20227_v5  ;;  %v1990_v0 = vmul.f32 %v18524_v27, %v20852_v55  ;;  %v20854_v27 = vld [vmem:[#allocation18_spill] sm:$0xff]  ;;  %v10913_v56 = vpop.f32.mrf.mxu1 }
 0x9f9   :  { %v6926_v51 = vadd.f32 %v10851_v58, %v10780_v26  ;;  %v20853_v26 = vld [vmem:[#allocation28_spill] sm:$0xff] }
 0x9fa   :  { %v18691_v58 = vadd.f32 %v18535_v9, %v1990_v0  ;;  %v9323_v9 = vld [vmem:[%s19231_s2 + $0x470] sm:$0xff]  ;;  %v10914_v35 = vpop.f32.mrf.mxu1 }
 0x9fb   :  { %11647 = vmatmul.mubr.f32.gmra.mxu0 %v6926_v51  ;;  %v20855_v51 = vld [vmem:[#allocation42_spill] sm:$0xff]  ;;  %11652 = vmatpush3.msra.mxu1 %v9323_v9  ;;  %v20861_v0 = vld [vmem:[#allocation41_spill] sm:$0xff] }
 0x9fc   :  { %9283 = vmatprep.mubr.msk.f32.mxu0 %vm7144_vm14, %v20746_v23  ;;  %vm7171_vm14 = vcmp.eq.s32.totalorder %v20851_v2, %v20831_v43  ;;  %11653 = vmatprep.subr.mxu1 %v20227_v5  ;;  %v10916_v2 = vpop.f32.mrf.mxu1 }
 0x9fd   :  { %11654 = vmatpush3.msra.mxu1 %v9322_v1 }
 0x9fe   :  { %11655 = vmatprep.subr.mxu1 %v20227_v5 }
 0x9ff   :  { %9284 = vmatmul.mubr.msk.f32.vlgmr.msra.gmra.mxu0 %vm7143_vm6, %v20746_v23  ;;  %vm7176_vm6 = vcmp.eq.s32.totalorder %v20853_v26, %v20228_v4  ;;  %11656 = vmatpush3.msra.mxu1 %v9321_v10 }
 0xa00   :  { %11721 = vmatpush3.msra.mxu0 %v18543_v54  ;;  %9285 = vmatprep.mubr.msk.f32.mxu0 %vm7148_vm10, %v20746_v23  ;;  %vm7175_vm10 = vcmp.eq.s32.totalorder %v20853_v26, %v20831_v43 }
 0xa01   :  { %11722 = vmatprep.subr.mxu0 %v20227_v5  ;;  %11657 = vmatprep.subr.mxu1 %v20227_v5 }
 0xa02   :  { %11723 = vmatpush3.msra.mxu0 %v18553_v38  ;;  %11658 = vmatpush3.msra.mxu1 %v9320_v40  ;;  %v20863_v40 = vld [vmem:[#allocation112_spill] sm:$0xff] }
 0xa03   :  { %11724 = vmatprep.subr.mxu0 %v20227_v5  ;;  %9286 = vmatmul.mubr.msk.f32.gmra.mxu0 %vm7147_vm13, %v20746_v23  ;;  %vm7180_vm13 = vcmp.eq.s32.totalorder %v20854_v27, %v20228_v4 }
 0xa04   :  { %11725 = vmatpush3.msra.mxu0 %v18562_v37  ;;  %9287 = vmatprep.mubr.msk.f32.mxu0 %vm7152_vm15, %v20746_v23  ;;  %vm7179_vm15 = vcmp.eq.s32.totalorder %v20854_v27, %v20831_v43 }
 0xa05   :  { %11726 = vmatprep.subr.mxu0 %v20227_v5  ;;  %11659 = vmatprep.subr.mxu1 %v20227_v5 }
 0xa06   :  { %11727 = vmatpush3.msra.mxu0 %v18573_v3 }
 0xa07   :  { %11728 = vmatprep.subr.mxu0 %v20227_v5  ;;  %9288 = vmatmul.mubr.msk.f32.gmra.mxu0 %vm7151_vm0, %v20746_v23  ;;  %vm7184_vm0 = vcmp.eq.s32.totalorder %v20855_v51, %v20228_v4 }
 0xa08   :  { %11729 = vmatpush3.msra.mxu0 %v18582_v41  ;;  %9289 = vmatprep.mubr.msk.f32.mxu0 %vm7156_vm2, %v20746_v23  ;;  %vm7183_vm2 = vcmp.eq.s32.totalorder %v20855_v51, %v20831_v43  ;;  %v10917_v51 = vpop.f32.mrf.mxu1 }
 0xa09   :  { %11730 = vmatprep.subr.mxu0 %v20227_v5 }
 0xa0a   :  { %11731 = vmatpush3.msra.mxu0 %v18593_v60 }
 0xa0b   :  { %11732 = vmatprep.subr.mxu0 %v20227_v5  ;;  %9290 = vmatmul.mubr.msk.f32.gmra.mxu0 %vm7155_vm3, %v20746_v23  ;;  %vm7188_vm3 = vcmp.eq.s32.totalorder %v20856_v29, %v20228_v4 }
 0xa0c   :  { %11733 = vmatpush3.msra.mxu0 %v18602_v6  ;;  %9291 = vmatprep.mubr.msk.f32.mxu0 %vm7160_vm12, %v20746_v23  ;;  %vm7187_vm12 = vcmp.eq.s32.totalorder %v20856_v29, %v20831_v43  ;;  %v20862_v29 = vld [vmem:[#allocation23_spill] sm:$0xff] }
 0xa0d   :  { %11734 = vmatprep.subr.mxu0 %v20227_v5 }
 0xa0e   :  { %11735 = vmatpush3.msra.mxu0 %v18613_v61 }
 0xa0f   :  { %11736 = vmatprep.subr.mxu0 %v20227_v5  ;;  %9292 = vmatmul.mubr.msk.f32.gmra.mxu0 %vm7159_vm8, %v20746_v23  ;;  %vm7192_vm8 = vcmp.eq.s32.totalorder %v20857_v53, %v20228_v4  ;;  %v9319_v4 = vld [vmem:[%s19231_s2 + $0x450] sm:$0xff] }
 0xa10   :  { %11737 = vmatpush3.msra.mxu0 %v18622_v39  ;;  %9293 = vmatprep.mubr.msk.f32.mxu0 %vm7164_vm11, %v20746_v23  ;;  %vm7191_vm11 = vcmp.eq.s32.totalorder %v20857_v53, %v20831_v43  ;;  %v9318_v43 = vld [vmem:[%s19231_s2 + $0x448] sm:$0xff]  ;;  %v10919_v53 = vpop.f32.mrf.mxu1 }
 0xa11   :  { %11738 = vmatprep.subr.mxu0 %v20227_v5  ;;  %11660 = vmatpush3.msra.mxu1 %v9319_v4 }
 0xa12   :  { %11739 = vmatpush3.msra.mxu0 %v18633_v47  ;;  %11661 = vmatprep.subr.mxu1 %v20227_v5 }
 0xa13   :  { %11740 = vmatprep.subr.mxu0 %v20227_v5  ;;  %9294 = vmatmul.mubr.msk.f32.gmra.mxu0 %vm7163_vm4, %v20746_v23  ;;  %vm7890_vm4 = vcmp.eq.s32.totalorder %v7853_v17, %v20858_v32 }
 0xa14   :  { %11741 = vmatpush3.msra.mxu0 %v18642_v52  ;;  %9295 = vmatprep.mubr.msk.f32.mxu0 %vm7168_vm1, %v20746_v23  ;;  %vm7891_vm1 = vcmp.eq.s32.totalorder %v7856_v22, %v20858_v32  ;;  %v20864_v22 = vld [vmem:[#allocation19_spill] sm:$0xff] }
 0xa15   :  { %11742 = vmatprep.subr.mxu0 %v20227_v5  ;;  %11662 = vmatpush3.msra.mxu1 %v9318_v43  ;;  %v10920_v43 = vpop.f32.mrf.mxu1 }
 0xa16   :  { %11743 = vmatpush3.msra.mxu0 %v18653_v34  ;;  %11663 = vmatprep.subr.mxu1 %v20227_v5 }
 0xa17   :  { %11744 = vmatprep.subr.mxu0 %v20227_v5  ;;  %9296 = vmatmul.mubr.msk.f32.gmra.mxu0 %vm7167_vm5, %v20746_v23  ;;  %vm7892_vm5 = vcmp.eq.s32.totalorder %v7859_v33, %v20858_v32  ;;  %v10922_v33 = vpop.f32.mrf.mxu1 }
 0xa18   :  { %11745 = vmatpush3.msra.mxu0 %v18662_v31  ;;  %9297 = vmatprep.mubr.msk.f32.mxu0 %vm7172_vm7, %v20746_v23  ;;  %vm7893_vm7 = vcmp.eq.s32.totalorder %v7862_v11, %v20858_v32  ;;  %v20865_v11 = vld [vmem:[#allocation14_spill] sm:$0xff] }
 0xa19   :  { %11746 = vmatprep.subr.mxu0 %v20227_v5  ;;  %11664 = vmatpush3.msra.mxu1 %v9317_v48 }
 0xa1a   :  { %11747 = vmatpush3.msra.mxu0 %v18673_v57  ;;  %11665 = vmatprep.subr.mxu1 %v20227_v5 }
 0xa1b   :  { %11748 = vmatprep.subr.mxu0 %v20227_v5  ;;  %9298 = vmatmul.mubr.msk.f32.gmra.mxu0 %vm7171_vm14, %v20746_v23  ;;  %vm7894_vm14 = vcmp.eq.s32.totalorder %v7865_v49, %v20858_v32 }
 0xa1c   :  { %11749 = vmatpush3.msra.mxu0 %v18682_v15  ;;  %9299 = vmatprep.mubr.msk.f32.mxu0 %vm7176_vm6, %v20746_v23  ;;  %vm7895_vm6 = vcmp.eq.s32.totalorder %v7868_v36, %v20858_v32  ;;  %v20866_v36 = vld [vmem:[#allocation72_spill] sm:$0xff] }
 0xa1d   :  { %11750 = vmatprep.subr.mxu0 %v20227_v5  ;;  %11666 = vmatpush3.msra.mxu1 %v9316_v42 }
 0xa1e   :  { %11751 = vmatpush3.msra.mxu0 %v18691_v58  ;;  %11667 = vmatprep.subr.mxu1 %v20227_v5 }
 0xa1f   :  { %9300 = vmatmul.mubr.msk.f32.gmra.mxu0 %vm7175_vm10, %v20746_v23  ;;  %11668 = vmatpush3.msra.mxu1 %v9315_v16  ;;  %vm7896_vm10 = vcmp.eq.s32.totalorder %v7871_v44, %v20858_v32 }
 0xa20   :  { %9301 = vmatprep.mubr.msk.f32.mxu0 %vm7180_vm13, %v20746_v23  ;;  %11669 = vmatprep.subr.mxu1 %v20227_v5  ;;  %vm7897_vm13 = vcmp.eq.s32.totalorder %v7874_v13, %v20858_v32 }
 0xa21   :  { %11670 = vmatpush3.msra.mxu1 %v9314_v24 }
 0xa22   :  { %11671 = vmatprep.subr.mxu1 %v20227_v5 }
 0xa23   :  { %9302 = vmatmul.mubr.msk.f32.gmra.mxu0 %vm7179_vm15, %v20746_v23  ;;  %11672 = vmatpush3.msra.mxu1 %v9313_v50  ;;  %vm7898_vm15 = vcmp.eq.s32.totalorder %v7877_v28, %v20858_v32  ;;  %v20867_v28 = vld [vmem:[#allocation80_spill] sm:$0xff] }
 0xa24   :  { %9303 = vmatprep.mubr.msk.f32.mxu0 %vm7184_vm0, %v20746_v23  ;;  %11673 = vmatprep.subr.mxu1 %v20227_v5  ;;  %vm7899_vm0 = vcmp.eq.s32.totalorder %v7880_v30, %v20858_v32 }
 0xa25   :  { %11674 = vmatpush3.msra.mxu1 %v9312_v45 }
 0xa26   :  { %11675 = vmatprep.subr.mxu1 %v20227_v5 }
 0xa27   :  { %9304 = vmatmul.mubr.msk.f32.gmra.mxu0 %vm7183_vm2, %v20746_v23  ;;  %11676 = vmatpush3.msra.mxu1 %v9311_v14  ;;  %v10923_v14 = vpop.f32.mrf.mxu1 }
 0xa28   :  { %9305 = vmatprep.mubr.msk.f32.mxu0 %vm7188_vm3, %v20746_v23  ;;  %11677 = vmatprep.subr.mxu1 %v20227_v5 }
 0xa29   :  { %11678 = vmatpush3.msra.mxu1 %v9310_v46  ;;  %v18850_v13 = vpop.f32.mrf.mxu1 }
 0xa2a   :  { %11679 = vmatprep.subr.mxu1 %v20227_v5 }
 0xa2b   :  { %9306 = vmatmul.mubr.msk.f32.gmra.mxu0 %vm7187_vm12, %v20746_v23  ;;  %11680 = vmatpush3.msra.mxu1 %v9309_v12 }
 0xa2c   :  { %9307 = vmatprep.mubr.msk.f32.mxu0 %vm7192_vm8, %v20746_v23  ;;  %11791 = vmatprep.subr.mxu1 %v20227_v5 }
 0xa2f   :  { %9308 = vmatmul.mubr.msk.f32.gmra.mxu0 %vm7191_vm11, %v20746_v23 }
 0xa30   :  { %11752 = vmatprep.mubr.msk.f32.mxu0 %vm11838_vm9, %v20227_v5 }
 0xa33   :  { %11753 = vmatmul.mubr.msk.f32.vlgmr.msra.gmra.mxu0 %vm7890_vm4, %v20746_v23 }
 0xa34   :  { %11755 = vmatprep.mubr.msk.f32.mxu0 %vm11838_vm9, %v20227_v5 }
 0xa37   :  { %11756 = vmatmul.mubr.msk.f32.gmra.mxu0 %vm7891_vm1, %v20746_v23 }
 0xa38   :  { %11758 = vmatprep.mubr.msk.f32.mxu0 %vm11838_vm9, %v20227_v5 }
 0xa3b   :  { %11759 = vmatmul.mubr.msk.f32.gmra.mxu0 %vm7892_vm5, %v20746_v23 }
 0xa3c   :  { %11761 = vmatprep.mubr.msk.f32.mxu0 %vm11838_vm9, %v20227_v5 }
 0xa3f   :  { %11762 = vmatmul.mubr.msk.f32.gmra.mxu0 %vm7893_vm7, %v20746_v23 }
 0xa40   :  { %11764 = vmatprep.mubr.msk.f32.mxu0 %vm11838_vm9, %v20227_v5 }
 0xa43   :  { %11765 = vmatmul.mubr.msk.f32.gmra.mxu0 %vm7894_vm14, %v20746_v23 }
 0xa44   :  { %11767 = vmatprep.mubr.msk.f32.mxu0 %vm11838_vm9, %v20227_v5 }
 0xa47   :  { %11768 = vmatmul.mubr.msk.f32.gmra.mxu0 %vm7895_vm6, %v20746_v23 }
 0xa48   :  { %11770 = vmatprep.mubr.msk.f32.mxu0 %vm11838_vm9, %v20227_v5 }
 0xa4b   :  { %11771 = vmatmul.mubr.msk.f32.gmra.mxu0 %vm7896_vm10, %v20746_v23 }
 0xa4c   :  { %11773 = vmatprep.mubr.msk.f32.mxu0 %vm11838_vm9, %v20227_v5 }
 0xa4f   :  { %11774 = vmatmul.mubr.msk.f32.gmra.mxu0 %vm7897_vm13, %v20746_v23 }
 0xa50   :  { %11776 = vmatprep.mubr.msk.f32.mxu0 %vm11838_vm9, %v20227_v5 }
 0xa53   :  { %11777 = vmatmul.mubr.msk.f32.gmra.mxu0 %vm7898_vm15, %v20746_v23 }
 0xa54   :  { %11779 = vmatprep.mubr.msk.f32.mxu0 %vm11838_vm9, %v20227_v5 }
 0xa57   :  { %11780 = vmatmul.mubr.msk.f32.gmra.mxu0 %vm7899_vm0, %v20746_v23 }
 0xa8b   :  { %v7012_v18 = vpop.f32.mrf.mxu0 }
 0xa8c   :  { %v18827_v8 = vadd.f32 %v7012_v18, %v20859_v25  ;;  %v10926_v25 = vpop.f32.mrf.mxu1 }
 0xa8d   :  { %v11612_v7 = vpop.f32.mrf.mxu0 }
 0xa8f   :  { %v7017_v19 = vpop.f32.mrf.mxu0 }
 0xa90   :  { %v18830_v21 = vadd.f32 %v7017_v19, %v20860_v62  ;;  %v20868_v19 = vld [vmem:[#allocation24_spill] sm:$0xff] }
 0xa91   :  { %v11615_v63 = vpop.f32.mrf.mxu0 }
 0xa93   :  { %v7022_v55 = vpop.f32.mrf.mxu0 }
 0xa94   :  { %v18833_v26 = vadd.f32 %v7022_v55, %v20861_v0  ;;  %v18858_v55 = vpop.f32.mrf.mxu1 }
 0xa95   :  { %v11618_v27 = vpop.f32.mrf.mxu0 }
 0xa96   :  { %v20869_v27 = vld [vmem:[#allocation6_spill] sm:$0xff] }
 0xa97   :  { %v7027_v20 = vpop.f32.mrf.mxu0 }
 0xa98   :  { %v18836_v9 = vadd.f32 %v7027_v20, %v20862_v29 }
 0xa99   :  { %v11621_v1 = vpop.f32.mrf.mxu0 }
 0xa9a   :  { %v18863_v1 = vpop.f32.mrf.mxu1 }
 0xa9b   :  { %v7032_v10 = vpop.f32.mrf.mxu0 }
 0xa9c   :  { %v18839_v4 = vadd.f32 %v7032_v10, %v20863_v40  ;;  %v20870_v40 = vld [vmem:[#allocation70_spill] sm:$0xff] }
 0xa9d   :  { %v11624_v17 = vpop.f32.mrf.mxu0 }
 0xa9f   :  { %v7037_v48 = vpop.f32.mrf.mxu0 }
 0xaa0   :  { %v18842_v42 = vadd.f32 %v7037_v48, %v20864_v22  ;;  %v18868_v22 = vpop.f32.mrf.mxu1 }
 0xaa1   :  { %v11627_v16 = vpop.f32.mrf.mxu0 }
 0xaa3   :  { %v7042_v24 = vpop.f32.mrf.mxu0 }
 0xaa4   :  { %v18845_v50 = vadd.f32 %v7042_v24, %v20865_v11 }
 0xaa5   :  { %v11630_v45 = vpop.f32.mrf.mxu0 }
 0xaa6   :  { %v18873_v45 = vpop.f32.mrf.mxu1 }
 0xaa7   :  { %v7047_v49 = vpop.f32.mrf.mxu0 }
 0xaa8   :  { %v18848_v46 = vadd.f32 %v7047_v49, %v20866_v36 }
 0xaa9   :  { %v11633_v12 = vpop.f32.mrf.mxu0 }
 0xaaa   :  { %v10915_v12 = vadd.f32 %v10914_v35, %v10913_v56  ;;  %v10921_v35 = vadd.f32 %v10920_v43, %v10919_v53 }
 0xaab   :  { %v7052_v44 = vpop.f32.mrf.mxu0 }
 0xaac   :  { %v18853_v30 = vadd.f32 %v7052_v44, %v20867_v28  ;;  %v18875_v28 = vpop.f32.mrf.mxu1 }
 0xaad   :  { %v11636_v18 = vpop.f32.mrf.mxu0 }
 0xaaf   :  { %v7057_v7 = vpop.f32.mrf.mxu0 }
 0xab0   :  { %v18856_v62 = vadd.f32 %v7057_v7, %v20868_v19 }
 0xab1   :  { %v11639_v63 = vpop.f32.mrf.mxu0 }
 0xab2   :  { %v10918_v63 = vadd.f32 %v10917_v51, %v10916_v2 }
 0xab3   :  { %v7062_v0 = vpop.f32.mrf.mxu0 }
 0xab4   :  { %v18861_v20 = vadd.f32 %v7062_v0, %v20869_v27  ;;  %v18877_v27 = vpop.f32.mrf.mxu1 }
 0xab5   :  { %v11642_v29 = vpop.f32.mrf.mxu0 }
 0xab6   :  { %v18885_v2 = vpop.f32.mrf.mxu1 }
 0xab7   :  { %v7067_v10 = vpop.f32.mrf.mxu0 }
 0xab8   :  { %v18866_v17 = vadd.f32 %v7067_v10, %v20870_v40  ;;  %v10924_v40 = vadd.f32 %v10923_v14, %v10922_v33  ;;  %v10938_v43 = vpop.f32.mrf.mxu1 }
 0xab9   :  { %v11645_v48 = vpop.f32.mrf.mxu0 }
 0xaba   :  { %v10940_v14 = vpop.f32.mrf.mxu1 }
 0xabb   :  { %v7072_v16 = vpop.f32.mrf.mxu0 }
 0xabc   :  { %v18871_v24 = vadd.f32 %v7072_v16, %v18449_v59 }
 0xabd   :  { %v11648_v11 = vpop.f32.mrf.mxu0 }
 0xabf   :  { %v10984_v49 = vpop.f32.mrf.mxu0 }
 0xac1   :  { %v10985_v36 = vpop.f32.mrf.mxu0 }
 0xac2   :  { %v10986_v44 = vadd.f32 %v10985_v36, %v10984_v49  ;;  %v10941_v49 = vpop.f32.mrf.mxu1 }
 0xac3   :  { %v10987_v18 = vpop.f32.mrf.mxu0 }
 0xac4   :  { %v7494_v7 = vadd.f32 %v10986_v44, %v10915_v12  ;;  %v10943_v12 = vpop.f32.mrf.mxu1 }
 0xac5   :  { %v10988_v19 = vpop.f32.mrf.mxu0 }
 0xac6   :  { %v10989_v0 = vadd.f32 %v10988_v19, %v10987_v18  ;;  %11682 = vmatmul.mubr.f32.vlgmr.msra.gmra.mxu1 %v7494_v7  ;;  %v10944_v18 = vpop.f32.mrf.mxu1  ;;  %v10939_v19 = vadd.f32 %v10938_v43, %v18885_v2 }
 0xac7   :  { %11807 = vmatpush3.msra.mxu1 %v18543_v54  ;;  %v10990_v59 = vpop.f32.mrf.mxu0  ;;  %11684 = vmatprep.mubr.msk.f32.mxu1 %vm11838_vm9, %v20227_v5 }
 0xac8   :  { %v7499_v29 = vadd.f32 %v10989_v0, %v10918_v63  ;;  %11792 = vmatprep.subr.mxu1 %v20227_v5  ;;  %v10946_v63 = vpop.f32.mrf.mxu1 }
 0xac9   :  { %11808 = vmatpush3.msra.mxu1 %v18553_v38  ;;  %v10991_v56 = vpop.f32.mrf.mxu0 }
 0xaca   :  { %v10992_v10 = vadd.f32 %v10991_v56, %v10990_v59  ;;  %11793 = vmatprep.subr.mxu1 %v20227_v5  ;;  %11685 = vmatmul.mubr.f32.gmra.mxu1 %v7499_v29  ;;  %v10947_v29 = vpop.f32.mrf.mxu1 }
 0xacb   :  { %11809 = vmatpush3.msra.mxu1 %v18562_v37  ;;  %v10993_v54 = vpop.f32.mrf.mxu0  ;;  %11687 = vmatprep.mubr.msk.f32.mxu1 %vm11838_vm9, %v20227_v5 }
 0xacc   :  { %v7504_v51 = vadd.f32 %v10992_v10, %v10921_v35  ;;  %11794 = vmatprep.subr.mxu1 %v20227_v5  ;;  %v10945_v10 = vadd.f32 %v10944_v18, %v10943_v12 }
 0xacd   :  { %11810 = vmatpush3.msra.mxu1 %v18573_v3  ;;  %v10994_v38 = vpop.f32.mrf.mxu0  ;;  %v10927_v3 = vadd.f32 %v10926_v25, %v18850_v13  ;;  %v10930_v13 = vadd.f32 %v18863_v1, %v18858_v55  ;;  %v10933_v55 = vadd.f32 %v18873_v45, %v18868_v22  ;;  %v10936_v22 = vadd.f32 %v18877_v27, %v18875_v28 }
 0xace   :  { %v10995_v53 = vadd.f32 %v10994_v38, %v10993_v54  ;;  %11795 = vmatprep.subr.mxu1 %v20227_v5  ;;  %11688 = vmatmul.mubr.f32.gmra.mxu1 %v7504_v51  ;;  %v10942_v27 = vadd.f32 %v10941_v49, %v10940_v14  ;;  %v10949_v54 = vpop.f32.mrf.mxu1 }
 0xacf   :  { %11811 = vmatpush3.msra.mxu1 %v18582_v41  ;;  %v10996_v48 = vpop.f32.mrf.mxu0  ;;  %11690 = vmatprep.mubr.msk.f32.mxu1 %vm11838_vm9, %v20227_v5 }
 0xad0   :  { %v7509_v37 = vadd.f32 %v10995_v53, %v10924_v40  ;;  %11796 = vmatprep.subr.mxu1 %v20227_v5  ;;  %v10948_v40 = vadd.f32 %v10947_v29, %v10946_v63  ;;  %v10950_v43 = vpop.f32.mrf.mxu1 }
 0xad1   :  { %11812 = vmatpush3.msra.mxu1 %v18593_v60  ;;  %v10997_v16 = vpop.f32.mrf.mxu0 }
 0xad2   :  { %v10998_v33 = vadd.f32 %v10997_v16, %v10996_v48  ;;  %11797 = vmatprep.subr.mxu1 %v20227_v5  ;;  %11691 = vmatmul.mubr.f32.gmra.mxu1 %v7509_v37 }
 0xad3   :  { %11813 = vmatpush3.msra.mxu1 %v18602_v6  ;;  %v10999_v41 = vpop.f32.mrf.mxu0  ;;  %11693 = vmatprep.mubr.msk.f32.mxu1 %vm11838_vm9, %v20227_v5 }
 0xad4   :  { %v7514_v11 = vadd.f32 %v10998_v33, %v10927_v3  ;;  %11798 = vmatprep.subr.mxu1 %v20227_v5  ;;  %v7883_v3 = vpop.permute.xlu0 %7882  ;;  %v10951_v33 = vadd.f32 %v10950_v43, %v10949_v54 }
 0xad5   :  { %11814 = vmatpush3.msra.mxu1 %v18613_v61  ;;  %v11000_v60 = vpop.f32.mrf.mxu0  ;;  %vm7900_vm2 = vcmp.eq.s32.totalorder %v7883_v3, %v20858_v32 }
 0xad6   :  { %v11001_v25 = vadd.f32 %v11000_v60, %v10999_v41  ;;  %11799 = vmatprep.subr.mxu1 %v20227_v5  ;;  %11694 = vmatmul.mubr.f32.gmra.mxu1 %v7514_v11 }
 0xad7   :  { %11815 = vmatpush3.msra.mxu1 %v18622_v39  ;;  %v11002_v6 = vpop.f32.mrf.mxu0  ;;  %11696 = vmatprep.mubr.msk.f32.mxu1 %vm11838_vm9, %v20227_v5 }
 0xad8   :  { %v7519_v36 = vadd.f32 %v11001_v25, %v10930_v13  ;;  %11800 = vmatprep.subr.mxu1 %v20227_v5  ;;  %v7886_v25 = vpop.permute.xlu0 %7885 }
 0xad9   :  { %11816 = vmatpush3.msra.mxu1 %v18633_v47  ;;  %v11003_v61 = vpop.f32.mrf.mxu0  ;;  %vm7901_vm3 = vcmp.eq.s32.totalorder %v7886_v25, %v20858_v32 }
 0xada   :  { %v11004_v1 = vadd.f32 %v11003_v61, %v11002_v6  ;;  %11801 = vmatprep.subr.mxu1 %v20227_v5  ;;  %11697 = vmatmul.mubr.f32.gmra.mxu1 %v7519_v36 }
 0xadb   :  { %11817 = vmatpush3.msra.mxu1 %v18642_v52  ;;  %v11005_v39 = vpop.f32.mrf.mxu0  ;;  %11699 = vmatprep.mubr.msk.f32.mxu1 %vm11838_vm9, %v20227_v5 }
 0xadc   :  { %v7524_v44 = vadd.f32 %v11004_v1, %v10933_v55  ;;  %11802 = vmatprep.subr.mxu1 %v20227_v5  ;;  %v7889_v61 = vpop.permute.xlu0 %7888 }
 0xadd   :  { %11818 = vmatpush3.msra.mxu1 %v18653_v34  ;;  %v11006_v47 = vpop.f32.mrf.mxu0  ;;  %vm7902_vm12 = vcmp.eq.s32.totalorder %v7889_v61, %v20858_v32 }
 0xade   :  { %v11007_v45 = vadd.f32 %v11006_v47, %v11005_v39  ;;  %11803 = vmatprep.subr.mxu1 %v20227_v5  ;;  %11700 = vmatmul.mubr.f32.gmra.mxu1 %v7524_v44 }
 0xadf   :  { %11819 = vmatpush3.msra.mxu1 %v18662_v31  ;;  %v11008_v52 = vpop.f32.mrf.mxu0  ;;  %11702 = vmatprep.mubr.msk.f32.mxu1 %vm11838_vm9, %v20227_v5 }
 0xae0   :  { %v7529_v7 = vadd.f32 %v11007_v45, %v10936_v22  ;;  %11804 = vmatprep.subr.mxu1 %v20227_v5 }
 0xae1   :  { %11820 = vmatpush3.msra.mxu1 %v18673_v57  ;;  %v11009_v34 = vpop.f32.mrf.mxu0 }
 0xae2   :  { %v11010_v28 = vadd.f32 %v11009_v34, %v11008_v52  ;;  %11805 = vmatprep.subr.mxu1 %v20227_v5  ;;  %11703 = vmatmul.mubr.f32.gmra.mxu1 %v7529_v7 }
 0xae3   :  { %11821 = vmatpush3.msra.mxu1 %v18682_v15  ;;  %v11011_v31 = vpop.f32.mrf.mxu0  ;;  %11705 = vmatprep.mubr.msk.f32.mxu1 %vm11838_vm9, %v20227_v5 }
 0xae4   :  { %v7534_v0 = vadd.f32 %v11010_v28, %v10939_v19  ;;  %11806 = vmatprep.subr.mxu1 %v20227_v5 }
 0xae5   :  { %11822 = vmatpush3.msra.mxu1 %v18691_v58  ;;  %v11012_v57 = vpop.f32.mrf.mxu0 }
 0xae6   :  { %v11013_v59 = vadd.f32 %v11012_v57, %v11011_v31  ;;  %11706 = vmatmul.mubr.f32.gmra.mxu1 %v7534_v0 }
 0xae7   :  { %v11014_v56 = vpop.f32.mrf.mxu0  ;;  %11708 = vmatprep.mubr.msk.f32.mxu1 %vm11838_vm9, %v20227_v5 }
 0xae8   :  { %v7539_v35 = vadd.f32 %v11013_v59, %v10942_v27 }
 0xae9   :  { %v11015_v15 = vpop.f32.mrf.mxu0 }
 0xaea   :  { %v11016_v2 = vadd.f32 %v11015_v15, %v11014_v56  ;;  %11709 = vmatmul.mubr.f32.gmra.mxu1 %v7539_v35 }
 0xaeb   :  { %v11017_v51 = vpop.f32.mrf.mxu0  ;;  %11711 = vmatprep.mubr.msk.f32.mxu1 %vm11838_vm9, %v20227_v5 }
 0xaec   :  { %v7544_v58 = vadd.f32 %v11016_v2, %v10945_v10 }
 0xaed   :  { %v11018_v38 = vpop.f32.mrf.mxu0 }
 0xaee   :  { %v11019_v53 = vadd.f32 %v11018_v38, %v11017_v51  ;;  %11712 = vmatmul.mubr.f32.gmra.mxu1 %v7544_v58 }
 0xaef   :  { %v11020_v48 = vpop.f32.mrf.mxu0  ;;  %11714 = vmatprep.mubr.msk.f32.mxu1 %vm11838_vm9, %v20227_v5 }
 0xaf0   :  { %v7549_v37 = vadd.f32 %v11019_v53, %v10948_v40 }
 0xaf1   :  { %v11021_v16 = vpop.f32.mrf.mxu0 }
 0xaf2   :  { %v11022_v14 = vadd.f32 %v11021_v16, %v11020_v48  ;;  %11715 = vmatmul.mubr.f32.gmra.mxu1 %v7549_v37 }
 0xaf3   :  { %v18942_v41 = vpop.f32.mrf.mxu0  ;;  %11717 = vmatprep.mubr.msk.f32.mxu1 %vm11838_vm9, %v20227_v5 }
 0xaf4   :  { %v7554_v11 = vadd.f32 %v11022_v14, %v10951_v33 }
 0xaf5   :  { %v11754_v60 = vpop.f32.mrf.mxu0 }
 0xaf6   :  { %11718 = vmatmul.mubr.f32.gmra.mxu1 %v7554_v11 }
 0xaf7   :  { %v18946_v13 = vpop.f32.mrf.mxu0  ;;  %11782 = vmatprep.mubr.msk.f32.mxu1 %vm11838_vm9, %v20227_v5 }
 0xaf9   :  { %v11757_v49 = vpop.f32.mrf.mxu0 }
 0xafa   :  { %11783 = vmatmul.mubr.msk.f32.vlgmr.msra.gmra.mxu1 %vm7900_vm2, %v20746_v23 }
 0xafb   :  { %v18952_v6 = vpop.f32.mrf.mxu0  ;;  %11785 = vmatprep.mubr.msk.f32.mxu1 %vm11838_vm9, %v20227_v5 }
 0xafd   :  { %v11760_v36 = vpop.f32.mrf.mxu0 }
 0xafe   :  { %11786 = vmatmul.mubr.msk.f32.gmra.mxu1 %vm7901_vm3, %v20746_v23 }
 0xaff   :  { %v18958_v55 = vpop.f32.mrf.mxu0  ;;  %11788 = vmatprep.mubr.msk.f32.mxu1 %vm11838_vm9, %v20227_v5 }
 0xb01   :  { %v11763_v1 = vpop.f32.mrf.mxu0 }
 0xb02   :  { %11789 = vmatmul.mubr.msk.f32.gmra.mxu1 %vm7902_vm12, %v20746_v23 }
 0xb03   :  { %v18964_v12 = vpop.f32.mrf.mxu0 }
 0xb05   :  { %v11766_v39 = vpop.f32.mrf.mxu0 }
 0xb07   :  { %v18966_v44 = vpop.f32.mrf.mxu0 }
 0xb09   :  { %v11769_v47 = vpop.f32.mrf.mxu0 }
 0xb0b   :  { %v18968_v22 = vpop.f32.mrf.mxu0 }
 0xb0d   :  { %v11772_v45 = vpop.f32.mrf.mxu0 }
 0xb0f   :  { %v18970_v18 = vpop.f32.mrf.mxu0 }
 0xb11   :  { %v11775_v52 = vpop.f32.mrf.mxu0 }
 0xb13   :  { %v18972_v7 = vpop.f32.mrf.mxu0 }
 0xb15   :  { %v11778_v5 = vpop.f32.mrf.mxu0 }
 0xb17   :  { %v18974_v34 = vpop.f32.mrf.mxu0 }
 0xb19   :  { %v11781_v32 = vpop.f32.mrf.mxu0 }
 0xb86   :  { %v7640_v19 = vpop.f32.mrf.mxu1 }
 0xb87   :  { %v18977_v28 = vadd.f32 %v7640_v19, %v18827_v8 }
 0xb88   :  { %v11683_v23 = vpop.f32.mrf.mxu1 }
 0xb89   :  { %v7737_v57 = vmul.f32 %v18977_v28, %v18977_v28 }
 0xb8a   :  { %v7645_v63 = vpop.f32.mrf.mxu1 }
 0xb8b   :  { %v18980_v31 = vadd.f32 %v7645_v63, %v18830_v21 }
 0xb8c   :  { %v11686_v0 = vpop.f32.mrf.mxu1 }
 0xb8d   :  { %v7719_v27 = vadd.f32 %v18980_v31, %v18977_v28  ;;  %v7738_v59 = vmul.f32 %v18980_v31, %v18980_v31 }
 0xb8e   :  { %v7650_v29 = vpop.f32.mrf.mxu1 }
 0xb8f   :  { %v7750_v56 = vadd.f32 %v7738_v59, %v7737_v57  ;;  %v18989_v35 = vadd.f32 %v7650_v29, %v18833_v26 }
 0xb90   :  { %v11689_v8 = vpop.f32.mrf.mxu1 }
 0xb91   :  { %v7720_v15 = vadd.f32 %v7719_v27, %v18989_v35  ;;  %v7739_v21 = vmul.f32 %v18989_v35, %v18989_v35 }
 0xb92   :  { %v7655_v10 = vpop.f32.mrf.mxu1 }
 0xb93   :  { %v7751_v2 = vadd.f32 %v7750_v56, %v7739_v21  ;;  %v18995_v54 = vadd.f32 %v7655_v10, %v18836_v9 }
 0xb94   :  { %v11692_v51 = vpop.f32.mrf.mxu1 }
 0xb95   :  { %v7721_v58 = vadd.f32 %v7720_v15, %v18995_v54  ;;  %v7740_v38 = vmul.f32 %v18995_v54, %v18995_v54 }
 0xb96   :  { %v7660_v40 = vpop.f32.mrf.mxu1 }
 0xb97   :  { %v7752_v26 = vadd.f32 %v7751_v2, %v7740_v38  ;;  %v19001_v53 = vadd.f32 %v7660_v40, %v18839_v4 }
 0xb98   :  { %v11695_v43 = vpop.f32.mrf.mxu1 }
 0xb99   :  { %v7722_v48 = vadd.f32 %v7721_v58, %v19001_v53  ;;  %v7741_v37 = vmul.f32 %v19001_v53, %v19001_v53 }
 0xb9a   :  { %v7665_v16 = vpop.f32.mrf.mxu1 }
 0xb9b   :  { %v7753_v9 = vadd.f32 %v7752_v26, %v7741_v37  ;;  %v19007_v3 = vadd.f32 %v7665_v16, %v18842_v42 }
 0xb9c   :  { %v11698_v33 = vpop.f32.mrf.mxu1 }
 0xb9d   :  { %v7723_v14 = vadd.f32 %v7722_v48, %v19007_v3  ;;  %v7742_v11 = vmul.f32 %v19007_v3, %v19007_v3 }
 0xb9e   :  { %v7670_v60 = vpop.f32.mrf.mxu1 }
 0xb9f   :  { %v7754_v4 = vadd.f32 %v7753_v9, %v7742_v11  ;;  %v19013_v25 = vadd.f32 %v7670_v60, %v18845_v50 }
 0xba0   :  { %v11701_v49 = vpop.f32.mrf.mxu1 }
 0xba1   :  { %v7724_v36 = vadd.f32 %v7723_v14, %v19013_v25  ;;  %v7743_v61 = vmul.f32 %v19013_v25, %v19013_v25 }
 0xba2   :  { %v7675_v1 = vpop.f32.mrf.mxu1 }
 0xba3   :  { %v7755_v42 = vadd.f32 %v7754_v4, %v7743_v61  ;;  %v19019_v39 = vadd.f32 %v7675_v1, %v18848_v46 }
 0xba4   :  { %v11704_v47 = vpop.f32.mrf.mxu1 }
 0xba5   :  { %v7725_v45 = vadd.f32 %v7724_v36, %v19019_v39  ;;  %v7744_v52 = vmul.f32 %v19019_v39, %v19019_v39 }
 0xba6   :  { %v7680_v5 = vpop.f32.mrf.mxu1 }
 0xba7   :  { %v7756_v50 = vadd.f32 %v7755_v42, %v7744_v52  ;;  %v19025_v32 = vadd.f32 %v7680_v5, %v18853_v30 }
 0xba8   :  { %v11707_v19 = vpop.f32.mrf.mxu1 }
 0xba9   :  { %v7726_v23 = vadd.f32 %v7725_v45, %v19025_v32  ;;  %v7745_v63 = vmul.f32 %v19025_v32, %v19025_v32 }
 0xbaa   :  { %v7685_v0 = vpop.f32.mrf.mxu1 }
 0xbab   :  { %v7757_v46 = vadd.f32 %v7756_v50, %v7745_v63  ;;  %v19031_v57 = vadd.f32 %v7685_v0, %v18856_v62 }
 0xbac   :  { %v11710_v27 = vpop.f32.mrf.mxu1 }
 0xbad   :  { %v7727_v59 = vadd.f32 %v7726_v23, %v19031_v57  ;;  %v7746_v29 = vmul.f32 %v19031_v57, %v19031_v57 }
 0xbae   :  { %v7690_v56 = vpop.f32.mrf.mxu1 }
 0xbaf   :  { %v7758_v30 = vadd.f32 %v7757_v46, %v7746_v29  ;;  %v19037_v8 = vadd.f32 %v7690_v56, %v18861_v20 }
 0xbb0   :  { %v11713_v15 = vpop.f32.mrf.mxu1 }
 0xbb1   :  { %v7728_v21 = vadd.f32 %v7727_v59, %v19037_v8  ;;  %v7747_v10 = vmul.f32 %v19037_v8, %v19037_v8 }
 0xbb2   :  { %v7695_v2 = vpop.f32.mrf.mxu1 }
 0xbb3   :  { %v7759_v62 = vadd.f32 %v7758_v30, %v7747_v10  ;;  %v19043_v51 = vadd.f32 %v7695_v2, %v18866_v17 }
 0xbb4   :  { %v11716_v58 = vpop.f32.mrf.mxu1 }
 0xbb5   :  { %v7729_v38 = vadd.f32 %v7728_v21, %v19043_v51  ;;  %v7748_v40 = vmul.f32 %v19043_v51, %v19043_v51 }
 0xbb6   :  { %v7700_v26 = vpop.f32.mrf.mxu1 }
 0xbb7   :  { %v7760_v20 = vadd.f32 %v7759_v62, %v7748_v40  ;;  %v19049_v43 = vadd.f32 %v7700_v26, %v18871_v24  ;;  %v19108_v26 = vld [vmem:[%s19235_s11] ss:$0 sm:$0xff] }
 0xbb8   :  { %v11719_v48 = vpop.f32.mrf.mxu1 }
 0xbb9   :  { %v7730_v37 = vadd.f32 %v7729_v38, %v19049_v43  ;;  %v7749_v16 = vmul.f32 %v19049_v43, %v19049_v43 }
 0xbba   :  { %v19054_v9 = vpop.f32.mrf.mxu1 }
 0xbbb   :  { %v7731_v17 = vrot.slane %v7730_v37, 4  ;;  %v7761_v33 = vadd.f32 %v7760_v20, %v7749_v16 }
 0xbbc   :  { %v11784_v14 = vpop.f32.mrf.mxu1 }
 0xbbd   :  { %v7732_v11 = vadd.f32 %v7731_v17, %v7730_v37  ;;  %v7762_v60 = vrot.slane %v7761_v33, 4 }
 0xbbe   :  { %v19056_v4 = vpop.f32.mrf.mxu1 }
 0xbbf   :  { %v7733_v49 = vrot.slane %v7732_v11, 2  ;;  %v7763_v36 = vadd.f32 %v7762_v60, %v7761_v33 }
 0xbc0   :  { %v11787_v61 = vpop.f32.mrf.mxu1 }
 0xbc1   :  { %v7734_v24 = vadd.f32 %v7733_v49, %v7732_v11  ;;  %v7764_v1 = vrot.slane %v7763_v36, 2 }
 0xbc2   :  { %v19058_v42 = vpop.f32.mrf.mxu1 }
 0xbc3   :  { %v7735_v47 = vrot.slane %v7734_v24, 1  ;;  %v7765_v45 = vadd.f32 %v7764_v1, %v7763_v36 }
 0xbc4   :  { %v11790_v52 = vpop.f32.mrf.mxu1 }
 0xbc5   :  { %v7736_v5 = vadd.f32 %v7735_v47, %v7734_v24  ;;  %v7766_v50 = vrot.slane %v7765_v45, 1 }
 0xbc7   :  { %v7767_v19 = vadd.f32 %v7766_v50, %v7765_v45  ;;  %v19060_v23 = vmul.f32 0.010204081, %v7736_v5 }
 0xbc9   :  { %v7769_v63 = vmul.f32 0.010204081, %v7767_v19  ;;  %v7770_v0 = vmul.f32 %v19060_v23, %v19060_v23  ;;  %v7784_v46 = vsub.f32 %v19049_v43, %v19060_v23  ;;  %v7772_v27 = vsub.f32 %v18977_v28, %v19060_v23 }
 0xbca   :  { %v7773_v59 = vsub.f32 %v18980_v31, %v19060_v23  ;;  %v7774_v29 = vsub.f32 %v18989_v35, %v19060_v23  ;;  %v7775_v56 = vsub.f32 %v18995_v54, %v19060_v23  ;;  %v7776_v30 = vsub.f32 %v19001_v53, %v19060_v23 }
 0xbcb   :  { %v7771_v15 = vsub.f32 %v7769_v63, %v7770_v0  ;;  %v7777_v21 = vsub.f32 %v19007_v3, %v19060_v23  ;;  %v7778_v10 = vsub.f32 %v19013_v25, %v19060_v23  ;;  %v7779_v28 = vsub.f32 %v19019_v39, %v19060_v23  ;;  %v19095_v25 = vld [vmem:[%s19234_s10] ss:$0 sm:$0xff] }
 0xbcc   :  { %v7780_v31 = vsub.f32 %v19025_v32, %v19060_v23  ;;  %v7781_v35 = vsub.f32 %v19031_v57, %v19060_v23  ;;  %v7782_v54 = vsub.f32 %v19037_v8, %v19060_v23  ;;  %v7783_v53 = vsub.f32 %v19043_v51, %v19060_v23 }
 0xbcd   :  { %v7785_v2 = vadd.f32 1e-05, %v7771_v15 }
 0xbcf   :  { %11833 = vrsqrt.f32 %v7785_v2 }
 0xbdc   :  { %v19090_v3 = vpop.eup %11833 }
 0xbdd   :  { %v7787_v39 = vmul.f32 %v19090_v3, %v7772_v27  ;;  %v7788_v32 = vmul.f32 %v19090_v3, %v7773_v59  ;;  %v7789_v57 = vmul.f32 %v19090_v3, %v7774_v29  ;;  %v7790_v8 = vmul.f32 %v19090_v3, %v7775_v56 }
 0xbde   :  { %v7791_v62 = vmul.f32 %v19090_v3, %v7776_v30  ;;  %v7792_v58 = vmul.f32 %v19090_v3, %v7777_v21  ;;  %v7793_v38 = vmul.f32 %v19090_v3, %v7778_v10  ;;  %v7794_v40 = vmul.f32 %v19090_v3, %v7779_v28 }
 0xbdf   :  { %v7795_v20 = vmul.f32 %v19090_v3, %v7780_v31  ;;  %v7796_v48 = vmul.f32 %v19090_v3, %v7781_v35  ;;  %v7797_v37 = vmul.f32 %v19090_v3, %v7782_v54  ;;  %v7806_v16 = vmul.f32 %v19095_v25, %v7787_v39 }
 0xbe0   :  { %v7807_v17 = vmul.f32 %v19095_v25, %v7788_v32  ;;  %v7808_v33 = vmul.f32 %v19095_v25, %v7789_v57  ;;  %v7809_v14 = vmul.f32 %v19095_v25, %v7790_v8  ;;  %v7810_v11 = vmul.f32 %v19095_v25, %v7791_v62 }
 0xbe1   :  { %v7811_v60 = vmul.f32 %v19095_v25, %v7792_v58  ;;  %v7812_v49 = vmul.f32 %v19095_v25, %v7793_v38  ;;  %v7813_v36 = vmul.f32 %v19095_v25, %v7794_v40  ;;  %v7814_v61 = vmul.f32 %v19095_v25, %v7795_v20 }
 0xbe2   :  { %v7815_v24 = vmul.f32 %v19095_v25, %v7796_v48  ;;  %v7816_v1 = vmul.f32 %v19095_v25, %v7797_v37  ;;  %v7825_v47 = vadd.f32 %v19108_v26, %v7806_v16  ;;  %v7826_v45 = vadd.f32 %v19108_v26, %v7807_v17 }
 0xbe3   :  { %v7827_v52 = vadd.f32 %v19108_v26, %v7808_v33  ;;  %v7828_v5 = vadd.f32 %v19108_v26, %v7809_v14  ;;  %v7829_v50 = vadd.f32 %v19108_v26, %v7810_v11  ;;  %v7830_v19 = vadd.f32 %v19108_v26, %v7811_v60 }
 0xbe4   :  { %v7831_v63 = vadd.f32 %v19108_v26, %v7812_v49  ;;  %v7832_v0 = vadd.f32 %v19108_v26, %v7813_v36  ;;  %v7833_v27 = vadd.f32 %v19108_v26, %v7814_v61  ;;  %v7834_v59 = vadd.f32 %v19108_v26, %v7815_v24 }
 0xbe5   :  { %v7835_v29 = vadd.f32 %v19108_v26, %v7816_v1  ;;  %v8059_v56 = vadd.f32 %v18942_v41, %v7825_v47  ;;  %v8060_v30 = vadd.f32 %v18946_v13, %v7826_v45  ;;  %v8061_v15 = vadd.f32 %v18952_v6, %v7827_v52  ;;  %v20871_v13 = vld [vmem:[#allocation17_spill] sm:$0xff] }
 0xbe6   :  { %v8062_v21 = vadd.f32 %v18958_v55, %v7828_v5  ;;  %v8063_v10 = vadd.f32 %v18964_v12, %v7829_v50  ;;  %v8064_v28 = vadd.f32 %v18966_v44, %v7830_v19  ;;  %v8065_v31 = vadd.f32 %v18968_v22, %v7831_v63 }
 0xbe7   :  { %v8066_v35 = vadd.f32 %v18970_v18, %v7832_v0  ;;  %v8067_v54 = vadd.f32 %v18972_v7, %v7833_v27  ;;  %v8068_v2 = vadd.f32 %v18974_v34, %v7834_v59  ;;  %v8069_v41 = vadd.f32 %v19054_v9, %v7835_v29 }
 0xbe8   :  { %vm8072_vm9 = vcmp.gt.f32.partialorder %v8059_v56, 0.0  ;;  %vm8073_vm8 = vcmp.gt.f32.partialorder %v8060_v30, 0.0  ;;  %vm8074_vm11 = vcmp.gt.f32.partialorder %v8061_v15, 0.0  ;;  %vm8075_vm4 = vcmp.gt.f32.partialorder %v8062_v21, 0.0 }
 0xbe9   :  { %vm8076_vm1 = vcmp.gt.f32.partialorder %v8063_v10, 0.0  ;;  %vm8077_vm5 = vcmp.gt.f32.partialorder %v8064_v28, 0.0  ;;  %vm8078_vm7 = vcmp.gt.f32.partialorder %v8065_v31, 0.0  ;;  %vm8079_vm14 = vcmp.gt.f32.partialorder %v8066_v35, 0.0 }
 0xbea   :  { %vm8080_vm6 = vcmp.gt.f32.partialorder %v8067_v54, 0.0  ;;  %vm8081_vm10 = vcmp.gt.f32.partialorder %v8068_v2, 0.0  ;;  %vm8082_vm13 = vcmp.gt.f32.partialorder %v8069_v41, 0.0  ;;  %v8085_v6 = vmul.f32 %v8059_v56, %v20871_v13 }
 0xbeb   :  { %v8086_v55 = vmul.f32 %v8060_v30, %v20871_v13  ;;  %v8087_v12 = vmul.f32 %v8061_v15, %v20871_v13  ;;  %v8088_v44 = vmul.f32 %v8062_v21, %v20871_v13  ;;  %v8089_v22 = vmul.f32 %v8063_v10, %v20871_v13 }
 0xbec   :  { %v8090_v18 = vmul.f32 %v8064_v28, %v20871_v13  ;;  %v8091_v7 = vmul.f32 %v8065_v31, %v20871_v13  ;;  %v8092_v34 = vmul.f32 %v8066_v35, %v20871_v13  ;;  %v8093_v9 = vmul.f32 %v8067_v54, %v20871_v13 }
 0xbed   :  { %v8094_v39 = vmul.f32 %v8068_v2, %v20871_v13  ;;  %v8095_v32 = vmul.f32 %v8069_v41, %v20871_v13  ;;  %v8098_v57 = vsel %vm8072_vm9, %v8059_v56, %v8085_v6  ;;  %v8099_v8 = vsel %vm8073_vm8, %v8060_v30, %v8086_v55 }
 0xbee   :  { %v8100_v62 = vsel %vm8074_vm11, %v8061_v15, %v8087_v12  ;;  %v8101_v58 = vsel %vm8075_vm4, %v8062_v21, %v8088_v44  ;;  %v8102_v38 = vsel %vm8076_vm1, %v8063_v10, %v8089_v22  ;;  %v8103_v40 = vsel %vm8077_vm5, %v8064_v28, %v8090_v18  ;;  %8111 = vst [vmem:[%s19236_s13] sm:$0xff] %v8098_v57 }
 0xbef   :  { %8112 = vst [vmem:[%s19236_s13 + $0x8] sm:$0xff] %v8099_v8  ;;  %v8104_v20 = vsel %vm8078_vm7, %v8065_v31, %v8091_v7  ;;  %v8105_v48 = vsel %vm8079_vm14, %v8066_v35, %v8092_v34  ;;  %v8106_v37 = vsel %vm8080_vm6, %v8067_v54, %v8093_v9  ;;  %v8107_v16 = vsel %vm8081_vm10, %v8068_v2, %v8094_v39 }
 0xbf0   :  { %8113 = vst [vmem:[%s19236_s13 + $0x10] sm:$0xff] %v8100_v62  ;;  %8114 = vst [vmem:[%s19236_s13 + $0x18] sm:$0xff] %v8101_v58  ;;  %v8108_v17 = vsel %vm8082_vm13, %v8069_v41, %v8095_v32  ;;  %v7798_v33 = vmul.f32 %v19090_v3, %v7783_v53  ;;  %v7799_v14 = vmul.f32 %v19090_v3, %v7784_v46 }
 0xbf1   :  { %8115 = vst [vmem:[%s19236_s13 + $0x20] sm:$0xff] %v8102_v38  ;;  %8116 = vst [vmem:[%s19236_s13 + $0x28] sm:$0xff] %v8103_v40 }
 0xbf2   :  { %8117 = vst [vmem:[%s19236_s13 + $0x30] sm:$0xff] %v8104_v20  ;;  %8118 = vst [vmem:[%s19236_s13 + $0x38] sm:$0xff] %v8105_v48  ;;  %v7817_v11 = vmul.f32 %v19095_v25, %v7798_v33  ;;  %v7818_v60 = vmul.f32 %v19095_v25, %v7799_v14 }
 0xbf3   :  { %8119 = vst [vmem:[%s19236_s13 + $0x40] sm:$0xff] %v8106_v37  ;;  %8120 = vst [vmem:[%s19236_s13 + $0x48] sm:$0xff] %v8107_v16 }
 0xbf4   :  { %8121 = vst [vmem:[%s19236_s13 + $0x50] sm:$0xff] %v8108_v17  ;;  %v7836_v49 = vadd.f32 %v19108_v26, %v7817_v11  ;;  %v7837_v36 = vadd.f32 %v19108_v26, %v7818_v60 }
 0xbf6   :  { %v8070_v51 = vadd.f32 %v19056_v4, %v7836_v49  ;;  %v8071_v53 = vadd.f32 %v19058_v42, %v7837_v36 }
 0xbf8   :  { %vm8083_vm15 = vcmp.gt.f32.partialorder %v8070_v51, 0.0  ;;  %v8096_v43 = vmul.f32 %v8070_v51, %v20871_v13  ;;  %vm8084_vm0 = vcmp.gt.f32.partialorder %v8071_v53, 0.0  ;;  %v8097_v23 = vmul.f32 %v8071_v53, %v20871_v13 }
 0xbfa   :  { %v8109_v46 = vsel %vm8083_vm15, %v8070_v51, %v8096_v43  ;;  %v8110_v3 = vsel %vm8084_vm0, %v8071_v53, %v8097_v23 }
 0xbfb   :  { %8122 = vst [vmem:[%s19236_s13 + $0x58] sm:$0xff] %v8109_v46  ;;  %8123 = vst [vmem:[%s19236_s13 + $0x60] sm:$0xff] %v8110_v3 }

</bundles_post_ra>
